<compile_context>
chip_gen: v5e
topology: v5e:2x2
jax: 0.10.0
libtpu: 0.0.40
codegen_flags: <defaults>
</compile_context>

<pallas_src>
import functools

import jax
import jax.numpy as jnp
from jax import lax
from jax.experimental import pallas as pl
from jax.experimental.pallas import tpu as pltpu

LN_EPS = 1e-5


# ----------------------------------------------------------------- small math helpers
def _bf(x):
    return x.astype(jnp.bfloat16)


def _mm(a, b):
    # bf16 x bf16 -> f32 accumulate (single-pass MXU).
    return jnp.dot(a, b, preferred_element_type=jnp.float32)


def _ln(x, g, b):
    mu = jnp.mean(x, axis=-1, keepdims=True)
    var = jnp.mean((x - mu) ** 2, axis=-1, keepdims=True)
    return (x - mu) * lax.rsqrt(var + LN_EPS) * g + b


def _gelu(x):
    # exact (erf) GELU == torch.nn.GELU() default
    return 0.5 * x * (1.0 + lax.erf(x * jnp.float32(0.7071067811865476)))


# -------------------------------------------------------------- parameter preprocessing
def _fold_qkv(p, heads, ffn):
    """Fold sigmoid(alpha) into the cur/pre QKV weights & biases (inference transform)."""
    a = jax.nn.sigmoid(p["alpha"]).reshape(1, 3 * heads * ffn)   # cols ordered (qkv, h, d)
    wc = p["w_cqkv"] * a
    wp = p["w_pqkv"] * (1.0 - a)
    bq = p["b_cqkv"] * a + p["b_pqkv"] * (1.0 - a)
    return wc, wp, bq


def _pack_params(cell_params, heads, ffn, project_flags):
    """Fold alpha + attention scale, fuse QKV weights, and pack everything into ONE bf16
    weight blob + ONE f32 vector blob with static (rows, col_off, width) maps."""
    F, H = ffn, heads
    scale = float(F) ** -0.5
    qcols = H * F

    w_items, v_items = [], []            # (layer, name, 2-D array)
    for l, p in enumerate(cell_params):
        wc, wp, bq = _fold_qkv(p, H, F)
        w_qkv = jnp.concatenate([wc, wp], axis=0)            # (2F, 3HF): [cur ; pre]
        w_qkv = w_qkv.at[:, :qcols].multiply(scale)          # fold attn scale into Q cols
        bq = bq.at[:, :qcols].multiply(scale)

        if project_flags[l]:
            w_items += [(l, "pro1", p["w_pro1"])]
            v_items += [(l, "b_pro1", p["b_pro1"]),
                        (l, "lnc_g", p["lnc_g"]), (l, "lnc_b", p["lnc_b"])]
        w_items += [(l, "pro2", p["w_pro2"]), (l, "qkv", w_qkv),
                    (l, "proj", p["w_proj"]), (l, "ffn", p["w_ffn"])]
        v_items += [(l, "b_pro2", p["b_pro2"]),
                    (l, "lnp_g", p["lnp_g"]), (l, "lnp_b", p["lnp_b"]),
                    (l, "bq", bq),
                    (l, "ln1_g", p["ln1_g"]), (l, "ln1_b", p["ln1_b"]),
                    (l, "b_proj", p["b_proj"]),
                    (l, "ln2_g", p["ln2_g"]), (l, "ln2_b", p["ln2_b"]),
                    (l, "lno_g", p["lno_g"]), (l, "lno_b", p["lno_b"]),
                    (l, "b_ffn", p["b_ffn"])]

    max_rows = max(a.shape[0] for _, _, a in w_items)
    max_rows = -(-max_rows // 16) * 16                        # bf16 sublane-pack granularity

    wmeta = [dict() for _ in cell_params]
    w_cols, off = [], 0
    for l, name, a in w_items:
        r, c = a.shape
        wmeta[l][name] = (r, off, c)
        w_cols.append(jnp.pad(a, ((0, max_rows - r), (0, 0))))
        off += c
    wblob = jnp.concatenate(w_cols, axis=1).astype(jnp.bfloat16)

    vmeta = [dict() for _ in cell_params]
    v_cols, voff = [], 0
    for l, name, a in v_items:
        c = a.shape[-1]
        vmeta[l][name] = (voff, c)
        v_cols.append(a.reshape(1, c).astype(jnp.float32))
        voff += c
    vblob = jnp.concatenate(v_cols, axis=1)

    return wblob, vblob, tuple(wmeta), tuple(vmeta)


# ----------------------------------------------------------------------- fused kernel
def _fused_kernel(depth, heads, ffn, project_flags, wmeta, vmeta, *refs):
    cur_ref = refs[0]
    hpre_refs = refs[1:1 + depth]
    w_ref = refs[1 + depth]
    v_ref = refs[2 + depth]
    out_ref = refs[3 + depth]

    F, H = ffn, heads
    G, S, Din0 = cur_ref.shape
    R = G * S

    def W(l, name):                      # bf16 weight slice (static offsets)
        r, off, c = wmeta[l][name]
        return w_ref[0:r, off:off + c]

    def V(l, name):                      # f32 (1, c) vector slice
        off, c = vmeta[l][name]
        return v_ref[:, off:off + c]

    x = cur_ref[...].reshape(R, Din0)                                     # f32

    for l in range(depth):
        h_prev = hpre_refs[l][...].reshape(R, hpre_refs[l].shape[-1])

        # ---- RTCell input projections + LayerNorms
        if project_flags[l]:
            cur = _ln(_mm(_bf(x), W(l, "pro1")) + V(l, "b_pro1"),
                      V(l, "lnc_g"), V(l, "lnc_b"))
        else:
            cur = x
        pre = _ln(_mm(_bf(h_prev), W(l, "pro2")) + V(l, "b_pro2"),
                  V(l, "lnp_g"), V(l, "lnp_b"))

        # ---- fused QKV: [cur | pre] @ [Wc ; Wp]; alpha blend + attn scale pre-folded
        cp = jnp.concatenate([_bf(cur), _bf(pre)], axis=-1)               # (R, 2F)
        qkv = _mm(cp, W(l, "qkv")) + V(l, "bq")                           # (R, 3HF) f32

        ln1_g, ln1_b = V(l, "ln1_g"), V(l, "ln1_b")
        head_out = []
        for j in range(H):
            def part(i, j=j):             # columns ordered (qkv, h, d)
                k = (i * H + j) * F
                return qkv[:, k:k + F].reshape(G, S, F)
            Q, K, Vh = part(0), part(1), part(2)

            s = jnp.einsum('gqd,gkd->gqk', _bf(Q), _bf(K),
                           preferred_element_type=jnp.float32)            # scale folded
            s = s - jnp.max(s, axis=-1, keepdims=True)
            e = jnp.exp(s)
            pattn = e * pl.reciprocal(jnp.sum(e, axis=-1, keepdims=True), approx=True)
            Aj = jnp.einsum('gqk,gkd->gqd', _bf(pattn), _bf(Vh),
                            preferred_element_type=jnp.float32)
            head_out.append(_bf(_ln(Aj, ln1_g, ln1_b)).reshape(R, F))     # bn1 per head

        # ---- fused head projection: lane concat + single (R,HF)x(HF,F) matmul
        Acat = jnp.concatenate(head_out, axis=-1)                         # (R, HF) bf16
        A = _ln(_mm(Acat, W(l, "proj")) + V(l, "b_proj"),
                V(l, "ln2_g"), V(l, "ln2_b"))                             # proj + bn2
        A = A + _gelu(cur)                                                # A += GELU(cur)
        O_hat = _ln(cur + A, V(l, "lno_g"), V(l, "lno_b"))                # layer_norm_o
        x = _mm(_bf(O_hat), W(l, "ffn")) + V(l, "b_ffn") + _gelu(O_hat)   # ffn + GELU

    out_ref[...] = x.reshape(G, S, F)


# --------------------------------------------------------------------------- wrapper
def _chip_params():
    """(row_cap, tensorcores_per_device) from the device kind, with safe fallbacks."""
    try:
        kind = jax.devices()[0].device_kind.lower().replace(" ", "")
    except Exception:
        kind = ""
    is_v5e = ("v5lite" in kind) or ("v5e" in kind)
    row_cap = 128 if is_v5e else 256          # 128-row MXU on v5e; 256-row on v6e/v7x
    two_tc = any(t in kind for t in ("v4", "v5p", "v7", "7x"))
    return row_cap, (2 if two_tc else 1)


def _pick_group(BT, S, row_cap, ncores):
    divs = [g for g in range(1, BT + 1) if BT % g == 0 and g * S <= row_cap] or [1]
    good = [g for g in divs if (BT // g) % ncores == 0]
    return max(good) if good else max(divs)


def recursive_transformer(sequence, H_pre, cell_params, *, dim, ffn, heads,
                          slabs_per_program=None):
    B, T, S, Din0 = sequence.shape
    BT = B * T
    depth = len(cell_params)

    row_cap, ncores = _chip_params()
    G = (slabs_per_program if slabs_per_program is not None
         else _pick_group(BT, S, row_cap, ncores))
    assert BT % G == 0

    seq2 = sequence.reshape(BT, S, Din0)
    hpre2 = []
    for h in H_pre:
        assert h.shape[-1] == dim, "H_pre feature dim must equal `dim` (pro2 input)"
        # TODO(synk): proj_ffn_dim_to_dim / pre_hidden=None branches are never taken here.
        hpre2.append(h.reshape(BT, S, h.shape[-1]))

    project_flags = []
    din = Din0
    for _ in range(depth):
        pc = (din == dim)
        project_flags.append(pc)
        if not pc:
            assert din == ffn, "RTCell without input projection requires Din == ffn_dim"
        din = ffn
    project_flags = tuple(project_flags)

    wblob, vblob, wmeta, vmeta = _pack_params(cell_params, heads, ffn, project_flags)

    kernel = functools.partial(_fused_kernel, depth, heads, ffn,
                               project_flags, wmeta, vmeta)

    def slab_spec(last):
        return pl.BlockSpec((G, S, last), lambda g: (g, 0, 0))

    def full_spec(a):
        return pl.BlockSpec(a.shape, lambda g, _n=a.ndim: (0,) * _n)

    in_specs = ([slab_spec(Din0)]
                + [slab_spec(h.shape[-1]) for h in hpre2]
                + [full_spec(wblob), full_spec(vblob)])
    out_spec = slab_spec(ffn)

    out = pl.pallas_call(
        kernel,
        out_shape=jax.ShapeDtypeStruct((BT, S, ffn), jnp.float32),
        grid=(BT // G,),
        in_specs=in_specs,
        out_specs=out_spec,
        compiler_params=pltpu.CompilerParams(
            dimension_semantics=("parallel",)),
    )(seq2, *hpre2, wblob, vblob)

    return out.reshape(B, T, S, ffn)


# ------------------------------------------------------- pure-JAX reference (same math,
# same numerics policy: folded alpha, bf16 matmul operands, f32 accumulate/elementwise;
# structured like the PyTorch module to independently check the kernel's weight layouts).
def _rtcell_ref(cur, pre, p, *, dim, ffn, heads):
    if cur.shape[-1] == dim:
        cur = _ln(jnp.einsum('bsd,df->bsf', _bf(cur), _bf(p["w_pro1"]),
                             preferred_element_type=jnp.float32) + p["b_pro1"],
                  p["lnc_g"], p["lnc_b"])
    pre = _ln(jnp.einsum('bsd,df->bsf', _bf(pre), _bf(p["w_pro2"]),
                         preferred_element_type=jnp.float32) + p["b_pro2"],
              p["lnp_g"], p["lnp_b"])

    wc, wp, bq = _fold_qkv(p, heads, ffn)
    qkv = (jnp.einsum('bsf,fk->bsk', _bf(cur), _bf(wc), preferred_element_type=jnp.float32)
           + jnp.einsum('bsf,fk->bsk', _bf(pre), _bf(wp), preferred_element_type=jnp.float32)
           + bq)
    B, S, _ = cur.shape
    qkv = jnp.transpose(qkv.reshape(B, S, 3, heads, ffn), (2, 0, 3, 1, 4))  # (3,B,h,S,d)
    Q, K, V = qkv[0], qkv[1], qkv[2]

    attn = jnp.einsum('bhqd,bhkd->bhqk', _bf(Q), _bf(K),
                      preferred_element_type=jnp.float32) * (float(ffn) ** -0.5)
    attn = jax.nn.softmax(attn, axis=-1)
    A = jnp.einsum('bhqk,bhkd->bhqd', _bf(attn), _bf(V),
                   preferred_element_type=jnp.float32)
    A = _ln(A, p["ln1_g"], p["ln1_b"])
    A = jnp.transpose(A, (0, 2, 1, 3)).reshape(B, S, heads * ffn)
    A = jnp.einsum('bsk,kf->bsf', _bf(A), _bf(p["w_proj"]),
                   preferred_element_type=jnp.float32) + p["b_proj"]
    A = _ln(A, p["ln2_g"], p["ln2_b"])
    A = A + _gelu(cur)
    O_hat = _ln(cur + A, p["lno_g"], p["lno_b"])
    return (jnp.einsum('bsf,fg->bsg', _bf(O_hat), _bf(p["w_ffn"]),
                       preferred_element_type=jnp.float32) + p["b_ffn"]
            + _gelu(O_hat))


def recursive_transformer_ref(sequence, H_pre, cell_params, *, dim, ffn, heads):
    B, T, S, _ = sequence.shape
    outs = []
    for t in range(T):
        O_t = sequence[:, t]
        for l, cp in enumerate(cell_params):
            O_t = _rtcell_ref(O_t, H_pre[l][:, t], cp, dim=dim, ffn=ffn, heads=heads)
        outs.append(O_t)
    return jnp.stack(outs, axis=1)


# ------------------------------------------------------------------------ param init
def init_cell_params(key, dim, ffn, heads):
    ks = jax.random.split(key, 13)
    w = lambda k, shape, s=0.05: (s * jax.random.normal(k, shape)).astype(jnp.float32)
    ones = lambda n: jnp.ones((1, n), jnp.float32)
    zeros = lambda n: jnp.zeros((1, n), jnp.float32)
    return dict(
        w_pro1=w(ks[0], (dim, ffn)), b_pro1=w(ks[1], (1, ffn)),
        lnc_g=ones(ffn), lnc_b=zeros(ffn),
        w_pro2=w(ks[2], (dim, ffn)), b_pro2=w(ks[3], (1, ffn)),
        lnp_g=ones(ffn), lnp_b=zeros(ffn),
        w_cqkv=w(ks[4], (ffn, 3 * heads * ffn)), b_cqkv=w(ks[5], (1, 3 * heads * ffn)),
        w_pqkv=w(ks[6], (ffn, 3 * heads * ffn)), b_pqkv=w(ks[7], (1, 3 * heads * ffn)),
        alpha=jax.random.uniform(ks[8], (3, heads * ffn), jnp.float32, 0.0, 1.0),
        w_proj=w(ks[9], (heads * ffn, ffn)), b_proj=w(ks[10], (1, ffn)),
        ln1_g=ones(ffn), ln1_b=zeros(ffn),
        ln2_g=ones(ffn), ln2_b=zeros(ffn),
        lno_g=ones(ffn), lno_b=zeros(ffn),
        w_ffn=w(ks[11], (ffn, ffn)), b_ffn=w(ks[12], (1, ffn)),
    )


# ------------------------------------------------------------------------------ main
if __name__ == "__main__":
    dim, ffn_dim, depth, heads = 16, 32, 2, 2
    B, T, S = 2, 3, 8

    key = jax.random.PRNGKey(0)
    k_seq, k_h, k_p = jax.random.split(key, 3)

    sequence = jax.random.normal(k_seq, (B, T, S, dim), jnp.float32)
    h_keys = jax.random.split(k_h, depth)
    # Deterministic stand-in for the randomly-initialized H_pre parameters.
    H_pre = [jax.random.normal(h_keys[l], (B, T, S, dim), jnp.float32)
             for l in range(depth)]
    p_keys = jax.random.split(k_p, depth)
    cell_params = [init_cell_params(p_keys[l], dim, ffn_dim, heads)
                   for l in range(depth)]

    fwd = jax.jit(functools.partial(recursive_transformer,
                                    dim=dim, ffn=ffn_dim, heads=heads))
    out = jax.block_until_ready(fwd(sequence, H_pre, cell_params))

    ref = jax.block_until_ready(
        recursive_transformer_ref(sequence, H_pre, cell_params,
                                  dim=dim, ffn=ffn_dim, heads=heads))

    assert out.shape == (B, T, S, ffn_dim), out.shape
    if not jnp.allclose(out, ref, atol=2e-2, rtol=2e-2):
        raise AssertionError("Pallas kernel output mismatch vs JAX reference")

    print("KERNEL_OK")
</pallas_src>

<mosaic_0001>
module attributes {stable_mosaic.version = 11 : i64} {
  func.func @_fused_kernel(%arg0: i32, %arg1: memref<6x8x16xf32, #tpu.memory_space<vmem>>, %arg2: memref<6x8x16xf32, #tpu.memory_space<vmem>>, %arg3: memref<6x8x16xf32, #tpu.memory_space<vmem>>, %arg4: memref<64x608xbf16, #tpu.memory_space<vmem>>, %arg5: memref<1x1184xf32, #tpu.memory_space<vmem>>, %arg6: memref<6x8x32xf32, #tpu.memory_space<vmem>>) attributes {dimension_semantics = [#tpu.dimension_semantics<parallel>], iteration_bounds = array<i64: 1>, scalar_prefetch = 0 : i64, scratch_operands = 0 : i64, tpu.core_type = #tpu.core_type<tc>, window_params = [{transform_indices = @transform_0, window_bounds = array<i64: 6, 8, 16>}, {transform_indices = @transform_1, window_bounds = array<i64: 6, 8, 16>}, {transform_indices = @transform_2, window_bounds = array<i64: 6, 8, 16>}, {pipeline_mode = #tpu.pipeline_mode<synchronous>, transform_indices = @transform_3, window_bounds = array<i64: 64, 608>}, {pipeline_mode = #tpu.pipeline_mode<synchronous>, transform_indices = @transform_4, window_bounds = array<i64: 1, 1184>}, {transform_indices = @transform_5, window_bounds = array<i64: 6, 8, 32>}]} {
    %c0 = arith.constant 0 : index
    %c0_0 = arith.constant 0 : index
    %c0_1 = arith.constant 0 : index
    %0 = vector.load %arg1[%c0, %c0_0, %c0_1] : memref<6x8x16xf32, #tpu.memory_space<vmem>>, vector<6x8x16xf32>
    %1 = vector.shape_cast %0 : vector<6x8x16xf32> to vector<48x16xf32>
    %c0_2 = arith.constant 0 : index
    %c0_3 = arith.constant 0 : index
    %c0_4 = arith.constant 0 : index
    %2 = vector.load %arg2[%c0_2, %c0_3, %c0_4] : memref<6x8x16xf32, #tpu.memory_space<vmem>>, vector<6x8x16xf32>
    %3 = vector.shape_cast %2 : vector<6x8x16xf32> to vector<48x16xf32>
    %4 = arith.truncf %1 : vector<48x16xf32> to vector<48x16xbf16>
    %c0_5 = arith.constant 0 : index
    %c0_6 = arith.constant 0 : index
    %5 = vector.load %arg4[%c0_5, %c0_6] : memref<64x608xbf16, #tpu.memory_space<vmem>>, vector<16x32xbf16>
    %cst = arith.constant dense<0.000000e+00> : vector<48x32xf32>
    %6 = tpu.matmul %4, %5, %cst {dimension_numbers = #tpu.dot_dimension_numbers<[1], [0], [0], [1], [0, 0, 1, 1], [], []>} : vector<48x16xbf16>, vector<16x32xbf16>, vector<48x32xf32> -> vector<48x32xf32>
    %c0_7 = arith.constant 0 : index
    %c0_8 = arith.constant 0 : index
    %7 = vector.load %arg5[%c0_7, %c0_8] : memref<1x1184xf32, #tpu.memory_space<vmem>>, vector<1x32xf32>
    %8 = vector.broadcast %7 : vector<1x32xf32> to vector<48x32xf32>
    %9 = arith.addf %6, %8 : vector<48x32xf32>
    %c0_9 = arith.constant 0 : index
    %c32 = arith.constant 32 : index
    %10 = vector.load %arg5[%c0_9, %c32] : memref<1x1184xf32, #tpu.memory_space<vmem>>, vector<1x32xf32>
    %c0_10 = arith.constant 0 : index
    %c64 = arith.constant 64 : index
    %11 = vector.load %arg5[%c0_10, %c64] : memref<1x1184xf32, #tpu.memory_space<vmem>>, vector<1x32xf32>
    %cst_11 = arith.constant dense<0.000000e+00> : vector<48xf32>
    %12 = vector.multi_reduction <add>, %9, %cst_11 [1] : vector<48x32xf32> to vector<48xf32>
    %13 = vector.shape_cast %12 : vector<48xf32> to vector<48x1xf32>
    %cst_12 = arith.constant 3.200000e+01 : f32
    %14 = vector.broadcast %cst_12 : f32 to vector<48x1xf32>
    %15 = arith.divf %13, %14 : vector<48x1xf32>
    %16 = vector.broadcast %15 : vector<48x1xf32> to vector<48x32xf32>
    %17 = arith.subf %9, %16 : vector<48x32xf32>
    %18 = arith.mulf %17, %17 : vector<48x32xf32>
    %cst_13 = arith.constant dense<0.000000e+00> : vector<48xf32>
    %19 = vector.multi_reduction <add>, %18, %cst_13 [1] : vector<48x32xf32> to vector<48xf32>
    %20 = vector.shape_cast %19 : vector<48xf32> to vector<48x1xf32>
    %cst_14 = arith.constant 3.200000e+01 : f32
    %21 = vector.broadcast %cst_14 : f32 to vector<48x1xf32>
    %22 = arith.divf %20, %21 : vector<48x1xf32>
    %23 = vector.broadcast %15 : vector<48x1xf32> to vector<48x32xf32>
    %24 = arith.subf %9, %23 : vector<48x32xf32>
    %cst_15 = arith.constant 9.99999974E-6 : f32
    %25 = vector.broadcast %cst_15 : f32 to vector<48x1xf32>
    %26 = arith.addf %22, %25 : vector<48x1xf32>
    %27 = math.rsqrt %26 : vector<48x1xf32>
    %28 = vector.broadcast %27 : vector<48x1xf32> to vector<48x32xf32>
    %29 = arith.mulf %24, %28 : vector<48x32xf32>
    %30 = vector.broadcast %10 : vector<1x32xf32> to vector<48x32xf32>
    %31 = arith.mulf %29, %30 : vector<48x32xf32>
    %32 = vector.broadcast %11 : vector<1x32xf32> to vector<48x32xf32>
    %33 = arith.addf %31, %32 : vector<48x32xf32>
    %34 = arith.truncf %3 : vector<48x16xf32> to vector<48x16xbf16>
    %c0_16 = arith.constant 0 : index
    %c32_17 = arith.constant 32 : index
    %35 = vector.load %arg4[%c0_16, %c32_17] : memref<64x608xbf16, #tpu.memory_space<vmem>>, vector<16x32xbf16>
    %cst_18 = arith.constant dense<0.000000e+00> : vector<48x32xf32>
    %36 = tpu.matmul %34, %35, %cst_18 {dimension_numbers = #tpu.dot_dimension_numbers<[1], [0], [0], [1], [0, 0, 1, 1], [], []>} : vector<48x16xbf16>, vector<16x32xbf16>, vector<48x32xf32> -> vector<48x32xf32>
    %c0_19 = arith.constant 0 : index
    %c96 = arith.constant 96 : index
    %37 = vector.load %arg5[%c0_19, %c96] : memref<1x1184xf32, #tpu.memory_space<vmem>>, vector<1x32xf32>
    %38 = vector.broadcast %37 : vector<1x32xf32> to vector<48x32xf32>
    %39 = arith.addf %36, %38 : vector<48x32xf32>
    %c0_20 = arith.constant 0 : index
    %c128 = arith.constant 128 : index
    %40 = vector.load %arg5[%c0_20, %c128] : memref<1x1184xf32, #tpu.memory_space<vmem>>, vector<1x32xf32>
    %c0_21 = arith.constant 0 : index
    %c160 = arith.constant 160 : index
    %41 = vector.load %arg5[%c0_21, %c160] : memref<1x1184xf32, #tpu.memory_space<vmem>>, vector<1x32xf32>
    %cst_22 = arith.constant dense<0.000000e+00> : vector<48xf32>
    %42 = vector.multi_reduction <add>, %39, %cst_22 [1] : vector<48x32xf32> to vector<48xf32>
    %43 = vector.shape_cast %42 : vector<48xf32> to vector<48x1xf32>
    %cst_23 = arith.constant 3.200000e+01 : f32
    %44 = vector.broadcast %cst_23 : f32 to vector<48x1xf32>
    %45 = arith.divf %43, %44 : vector<48x1xf32>
    %46 = vector.broadcast %45 : vector<48x1xf32> to vector<48x32xf32>
    %47 = arith.subf %39, %46 : vector<48x32xf32>
    %48 = arith.mulf %47, %47 : vector<48x32xf32>
    %cst_24 = arith.constant dense<0.000000e+00> : vector<48xf32>
    %49 = vector.multi_reduction <add>, %48, %cst_24 [1] : vector<48x32xf32> to vector<48xf32>
    %50 = vector.shape_cast %49 : vector<48xf32> to vector<48x1xf32>
    %cst_25 = arith.constant 3.200000e+01 : f32
    %51 = vector.broadcast %cst_25 : f32 to vector<48x1xf32>
    %52 = arith.divf %50, %51 : vector<48x1xf32>
    %53 = vector.broadcast %45 : vector<48x1xf32> to vector<48x32xf32>
    %54 = arith.subf %39, %53 : vector<48x32xf32>
    %cst_26 = arith.constant 9.99999974E-6 : f32
    %55 = vector.broadcast %cst_26 : f32 to vector<48x1xf32>
    %56 = arith.addf %52, %55 : vector<48x1xf32>
    %57 = math.rsqrt %56 : vector<48x1xf32>
    %58 = vector.broadcast %57 : vector<48x1xf32> to vector<48x32xf32>
    %59 = arith.mulf %54, %58 : vector<48x32xf32>
    %60 = vector.broadcast %40 : vector<1x32xf32> to vector<48x32xf32>
    %61 = arith.mulf %59, %60 : vector<48x32xf32>
    %62 = vector.broadcast %41 : vector<1x32xf32> to vector<48x32xf32>
    %63 = arith.addf %61, %62 : vector<48x32xf32>
    %64 = arith.truncf %33 : vector<48x32xf32> to vector<48x32xbf16>
    %65 = arith.truncf %63 : vector<48x32xf32> to vector<48x32xbf16>
    %66 = tpu.concatenate %64, %65 in 1 : vector<48x32xbf16>, vector<48x32xbf16> -> vector<48x64xbf16>
    %c0_27 = arith.constant 0 : index
    %c64_28 = arith.constant 64 : index
    %67 = vector.load %arg4[%c0_27, %c64_28] : memref<64x608xbf16, #tpu.memory_space<vmem>>, vector<64x192xbf16>
    %cst_29 = arith.constant dense<0.000000e+00> : vector<48x192xf32>
    %68 = tpu.matmul %66, %67, %cst_29 {dimension_numbers = #tpu.dot_dimension_numbers<[1], [0], [0], [1], [0, 0, 1, 1], [], []>} : vector<48x64xbf16>, vector<64x192xbf16>, vector<48x192xf32> -> vector<48x192xf32>
    %c0_30 = arith.constant 0 : index
    %c192 = arith.constant 192 : index
    %69 = vector.load %arg5[%c0_30, %c192] : memref<1x1184xf32, #tpu.memory_space<vmem>>, vector<1x192xf32>
    %70 = vector.broadcast %69 : vector<1x192xf32> to vector<48x192xf32>
    %71 = arith.addf %68, %70 : vector<48x192xf32>
    %c0_31 = arith.constant 0 : index
    %c384 = arith.constant 384 : index
    %72 = vector.load %arg5[%c0_31, %c384] : memref<1x1184xf32, #tpu.memory_space<vmem>>, vector<1x32xf32>
    %c0_32 = arith.constant 0 : index
    %c416 = arith.constant 416 : index
    %73 = vector.load %arg5[%c0_32, %c416] : memref<1x1184xf32, #tpu.memory_space<vmem>>, vector<1x32xf32>
    %74 = vector.extract_strided_slice %71 {offsets = [0, 0], sizes = [48, 32], strides = [1, 1]} : vector<48x192xf32> to vector<48x32xf32>
    %75 = vector.shape_cast %74 : vector<48x32xf32> to vector<6x8x32xf32>
    %76 = vector.extract_strided_slice %71 {offsets = [0, 64], sizes = [48, 32], strides = [1, 1]} : vector<48x192xf32> to vector<48x32xf32>
    %77 = vector.shape_cast %76 : vector<48x32xf32> to vector<6x8x32xf32>
    %78 = vector.extract_strided_slice %71 {offsets = [0, 128], sizes = [48, 32], strides = [1, 1]} : vector<48x192xf32> to vector<48x32xf32>
    %79 = vector.shape_cast %78 : vector<48x32xf32> to vector<6x8x32xf32>
    %80 = arith.truncf %75 : vector<6x8x32xf32> to vector<6x8x32xbf16>
    %81 = arith.truncf %77 : vector<6x8x32xf32> to vector<6x8x32xbf16>
    "tpu.trace_start"() <{level = 10 : i32, message = "gqd,gkd->gqk"}> : () -> ()
    %cst_33 = arith.constant dense<0.000000e+00> : vector<6x8x8xf32>
    %82 = tpu.matmul %80, %81, %cst_33 {dimension_numbers = #tpu.dot_dimension_numbers<[2], [2], [1], [1], [0, 0, 0, 1, 1, 1], [0], [0]>} : vector<6x8x32xbf16>, vector<6x8x32xbf16>, vector<6x8x8xf32> -> vector<6x8x8xf32>
    "tpu.trace_stop"() : () -> ()
    %cst_34 = arith.constant dense<0xFF800000> : vector<6x8xf32>
    %83 = vector.multi_reduction <maximumf>, %82, %cst_34 [2] : vector<6x8x8xf32> to vector<6x8xf32>
    %84 = vector.shape_cast %83 : vector<6x8xf32> to vector<6x8x1xf32>
    %85 = vector.broadcast %84 : vector<6x8x1xf32> to vector<6x8x8xf32>
    %86 = arith.subf %82, %85 : vector<6x8x8xf32>
    %87 = math.exp %86 : vector<6x8x8xf32>
    %cst_35 = arith.constant dense<0.000000e+00> : vector<6x8xf32>
    %88 = vector.multi_reduction <add>, %87, %cst_35 [2] : vector<6x8x8xf32> to vector<6x8xf32>
    %89 = vector.shape_cast %88 : vector<6x8xf32> to vector<6x8x1xf32>
    %90 = tpu.reciprocal %89 {approx = true} : vector<6x8x1xf32> -> vector<6x8x1xf32>
    %91 = vector.broadcast %90 : vector<6x8x1xf32> to vector<6x8x8xf32>
    %92 = arith.mulf %87, %91 : vector<6x8x8xf32>
    %93 = arith.truncf %92 : vector<6x8x8xf32> to vector<6x8x8xbf16>
    %94 = arith.truncf %79 : vector<6x8x32xf32> to vector<6x8x32xbf16>
    "tpu.trace_start"() <{level = 10 : i32, message = "gqk,gkd->gqd"}> : () -> ()
    %cst_36 = arith.constant dense<0.000000e+00> : vector<6x8x32xf32>
    %95 = tpu.matmul %93, %94, %cst_36 {dimension_numbers = #tpu.dot_dimension_numbers<[2], [1], [1], [2], [0, 0, 0, 1, 1, 2], [0], [0]>} : vector<6x8x8xbf16>, vector<6x8x32xbf16>, vector<6x8x32xf32> -> vector<6x8x32xf32>
    "tpu.trace_stop"() : () -> ()
    %cst_37 = arith.constant dense<0.000000e+00> : vector<6x8xf32>
    %96 = vector.multi_reduction <add>, %95, %cst_37 [2] : vector<6x8x32xf32> to vector<6x8xf32>
    %97 = vector.shape_cast %96 : vector<6x8xf32> to vector<6x8x1xf32>
    %cst_38 = arith.constant 3.200000e+01 : f32
    %98 = vector.broadcast %cst_38 : f32 to vector<6x8x1xf32>
    %99 = arith.divf %97, %98 : vector<6x8x1xf32>
    %100 = vector.broadcast %99 : vector<6x8x1xf32> to vector<6x8x32xf32>
    %101 = arith.subf %95, %100 : vector<6x8x32xf32>
    %102 = arith.mulf %101, %101 : vector<6x8x32xf32>
    %cst_39 = arith.constant dense<0.000000e+00> : vector<6x8xf32>
    %103 = vector.multi_reduction <add>, %102, %cst_39 [2] : vector<6x8x32xf32> to vector<6x8xf32>
    %104 = vector.shape_cast %103 : vector<6x8xf32> to vector<6x8x1xf32>
    %cst_40 = arith.constant 3.200000e+01 : f32
    %105 = vector.broadcast %cst_40 : f32 to vector<6x8x1xf32>
    %106 = arith.divf %104, %105 : vector<6x8x1xf32>
    %107 = vector.broadcast %99 : vector<6x8x1xf32> to vector<6x8x32xf32>
    %108 = arith.subf %95, %107 : vector<6x8x32xf32>
    %cst_41 = arith.constant 9.99999974E-6 : f32
    %109 = vector.broadcast %cst_41 : f32 to vector<6x8x1xf32>
    %110 = arith.addf %106, %109 : vector<6x8x1xf32>
    %111 = math.rsqrt %110 : vector<6x8x1xf32>
    %112 = vector.broadcast %111 : vector<6x8x1xf32> to vector<6x8x32xf32>
    %113 = arith.mulf %108, %112 : vector<6x8x32xf32>
    %114 = vector.shape_cast %72 : vector<1x32xf32> to vector<1x1x32xf32>
    %115 = vector.broadcast %114 : vector<1x1x32xf32> to vector<6x8x32xf32>
    %116 = arith.mulf %113, %115 : vector<6x8x32xf32>
    %117 = vector.shape_cast %73 : vector<1x32xf32> to vector<1x1x32xf32>
    %118 = vector.broadcast %117 : vector<1x1x32xf32> to vector<6x8x32xf32>
    %119 = arith.addf %116, %118 : vector<6x8x32xf32>
    %120 = arith.truncf %119 : vector<6x8x32xf32> to vector<6x8x32xbf16>
    %121 = vector.shape_cast %120 : vector<6x8x32xbf16> to vector<48x32xbf16>
    %122 = vector.extract_strided_slice %71 {offsets = [0, 32], sizes = [48, 32], strides = [1, 1]} : vector<48x192xf32> to vector<48x32xf32>
    %123 = vector.shape_cast %122 : vector<48x32xf32> to vector<6x8x32xf32>
    %124 = vector.extract_strided_slice %71 {offsets = [0, 96], sizes = [48, 32], strides = [1, 1]} : vector<48x192xf32> to vector<48x32xf32>
    %125 = vector.shape_cast %124 : vector<48x32xf32> to vector<6x8x32xf32>
    %126 = vector.extract_strided_slice %71 {offsets = [0, 160], sizes = [48, 32], strides = [1, 1]} : vector<48x192xf32> to vector<48x32xf32>
    %127 = vector.shape_cast %126 : vector<48x32xf32> to vector<6x8x32xf32>
    %128 = arith.truncf %123 : vector<6x8x32xf32> to vector<6x8x32xbf16>
    %129 = arith.truncf %125 : vector<6x8x32xf32> to vector<6x8x32xbf16>
    "tpu.trace_start"() <{level = 10 : i32, message = "gqd,gkd->gqk"}> : () -> ()
    %cst_42 = arith.constant dense<0.000000e+00> : vector<6x8x8xf32>
    %130 = tpu.matmul %128, %129, %cst_42 {dimension_numbers = #tpu.dot_dimension_numbers<[2], [2], [1], [1], [0, 0, 0, 1, 1, 1], [0], [0]>} : vector<6x8x32xbf16>, vector<6x8x32xbf16>, vector<6x8x8xf32> -> vector<6x8x8xf32>
    "tpu.trace_stop"() : () -> ()
    %cst_43 = arith.constant dense<0xFF800000> : vector<6x8xf32>
    %131 = vector.multi_reduction <maximumf>, %130, %cst_43 [2] : vector<6x8x8xf32> to vector<6x8xf32>
    %132 = vector.shape_cast %131 : vector<6x8xf32> to vector<6x8x1xf32>
    %133 = vector.broadcast %132 : vector<6x8x1xf32> to vector<6x8x8xf32>
    %134 = arith.subf %130, %133 : vector<6x8x8xf32>
    %135 = math.exp %134 : vector<6x8x8xf32>
    %cst_44 = arith.constant dense<0.000000e+00> : vector<6x8xf32>
    %136 = vector.multi_reduction <add>, %135, %cst_44 [2] : vector<6x8x8xf32> to vector<6x8xf32>
    %137 = vector.shape_cast %136 : vector<6x8xf32> to vector<6x8x1xf32>
    %138 = tpu.reciprocal %137 {approx = true} : vector<6x8x1xf32> -> vector<6x8x1xf32>
    %139 = vector.broadcast %138 : vector<6x8x1xf32> to vector<6x8x8xf32>
    %140 = arith.mulf %135, %139 : vector<6x8x8xf32>
    %141 = arith.truncf %140 : vector<6x8x8xf32> to vector<6x8x8xbf16>
    %142 = arith.truncf %127 : vector<6x8x32xf32> to vector<6x8x32xbf16>
    "tpu.trace_start"() <{level = 10 : i32, message = "gqk,gkd->gqd"}> : () -> ()
    %cst_45 = arith.constant dense<0.000000e+00> : vector<6x8x32xf32>
    %143 = tpu.matmul %141, %142, %cst_45 {dimension_numbers = #tpu.dot_dimension_numbers<[2], [1], [1], [2], [0, 0, 0, 1, 1, 2], [0], [0]>} : vector<6x8x8xbf16>, vector<6x8x32xbf16>, vector<6x8x32xf32> -> vector<6x8x32xf32>
    "tpu.trace_stop"() : () -> ()
    %cst_46 = arith.constant dense<0.000000e+00> : vector<6x8xf32>
    %144 = vector.multi_reduction <add>, %143, %cst_46 [2] : vector<6x8x32xf32> to vector<6x8xf32>
    %145 = vector.shape_cast %144 : vector<6x8xf32> to vector<6x8x1xf32>
    %cst_47 = arith.constant 3.200000e+01 : f32
    %146 = vector.broadcast %cst_47 : f32 to vector<6x8x1xf32>
    %147 = arith.divf %145, %146 : vector<6x8x1xf32>
    %148 = vector.broadcast %147 : vector<6x8x1xf32> to vector<6x8x32xf32>
    %149 = arith.subf %143, %148 : vector<6x8x32xf32>
    %150 = arith.mulf %149, %149 : vector<6x8x32xf32>
    %cst_48 = arith.constant dense<0.000000e+00> : vector<6x8xf32>
    %151 = vector.multi_reduction <add>, %150, %cst_48 [2] : vector<6x8x32xf32> to vector<6x8xf32>
    %152 = vector.shape_cast %151 : vector<6x8xf32> to vector<6x8x1xf32>
    %cst_49 = arith.constant 3.200000e+01 : f32
    %153 = vector.broadcast %cst_49 : f32 to vector<6x8x1xf32>
    %154 = arith.divf %152, %153 : vector<6x8x1xf32>
    %155 = vector.broadcast %147 : vector<6x8x1xf32> to vector<6x8x32xf32>
    %156 = arith.subf %143, %155 : vector<6x8x32xf32>
    %cst_50 = arith.constant 9.99999974E-6 : f32
    %157 = vector.broadcast %cst_50 : f32 to vector<6x8x1xf32>
    %158 = arith.addf %154, %157 : vector<6x8x1xf32>
    %159 = math.rsqrt %158 : vector<6x8x1xf32>
    %160 = vector.broadcast %159 : vector<6x8x1xf32> to vector<6x8x32xf32>
    %161 = arith.mulf %156, %160 : vector<6x8x32xf32>
    %162 = vector.shape_cast %72 : vector<1x32xf32> to vector<1x1x32xf32>
    %163 = vector.broadcast %162 : vector<1x1x32xf32> to vector<6x8x32xf32>
    %164 = arith.mulf %161, %163 : vector<6x8x32xf32>
    %165 = vector.shape_cast %73 : vector<1x32xf32> to vector<1x1x32xf32>
    %166 = vector.broadcast %165 : vector<1x1x32xf32> to vector<6x8x32xf32>
    %167 = arith.addf %164, %166 : vector<6x8x32xf32>
    %168 = arith.truncf %167 : vector<6x8x32xf32> to vector<6x8x32xbf16>
    %169 = vector.shape_cast %168 : vector<6x8x32xbf16> to vector<48x32xbf16>
    %170 = tpu.concatenate %121, %169 in 1 : vector<48x32xbf16>, vector<48x32xbf16> -> vector<48x64xbf16>
    %c0_51 = arith.constant 0 : index
    %c256 = arith.constant 256 : index
    %171 = vector.load %arg4[%c0_51, %c256] : memref<64x608xbf16, #tpu.memory_space<vmem>>, vector<64x32xbf16>
    %cst_52 = arith.constant dense<0.000000e+00> : vector<48x32xf32>
    %172 = tpu.matmul %170, %171, %cst_52 {dimension_numbers = #tpu.dot_dimension_numbers<[1], [0], [0], [1], [0, 0, 1, 1], [], []>} : vector<48x64xbf16>, vector<64x32xbf16>, vector<48x32xf32> -> vector<48x32xf32>
    %c0_53 = arith.constant 0 : index
    %c448 = arith.constant 448 : index
    %173 = vector.load %arg5[%c0_53, %c448] : memref<1x1184xf32, #tpu.memory_space<vmem>>, vector<1x32xf32>
    %174 = vector.broadcast %173 : vector<1x32xf32> to vector<48x32xf32>
    %175 = arith.addf %172, %174 : vector<48x32xf32>
    %c0_54 = arith.constant 0 : index
    %c480 = arith.constant 480 : index
    %176 = vector.load %arg5[%c0_54, %c480] : memref<1x1184xf32, #tpu.memory_space<vmem>>, vector<1x32xf32>
    %c0_55 = arith.constant 0 : index
    %c512 = arith.constant 512 : index
    %177 = vector.load %arg5[%c0_55, %c512] : memref<1x1184xf32, #tpu.memory_space<vmem>>, vector<1x32xf32>
    %cst_56 = arith.constant dense<0.000000e+00> : vector<48xf32>
    %178 = vector.multi_reduction <add>, %175, %cst_56 [1] : vector<48x32xf32> to vector<48xf32>
    %179 = vector.shape_cast %178 : vector<48xf32> to vector<48x1xf32>
    %cst_57 = arith.constant 3.200000e+01 : f32
    %180 = vector.broadcast %cst_57 : f32 to vector<48x1xf32>
    %181 = arith.divf %179, %180 : vector<48x1xf32>
    %182 = vector.broadcast %181 : vector<48x1xf32> to vector<48x32xf32>
    %183 = arith.subf %175, %182 : vector<48x32xf32>
    %184 = arith.mulf %183, %183 : vector<48x32xf32>
    %cst_58 = arith.constant dense<0.000000e+00> : vector<48xf32>
    %185 = vector.multi_reduction <add>, %184, %cst_58 [1] : vector<48x32xf32> to vector<48xf32>
    %186 = vector.shape_cast %185 : vector<48xf32> to vector<48x1xf32>
    %cst_59 = arith.constant 3.200000e+01 : f32
    %187 = vector.broadcast %cst_59 : f32 to vector<48x1xf32>
    %188 = arith.divf %186, %187 : vector<48x1xf32>
    %189 = vector.broadcast %181 : vector<48x1xf32> to vector<48x32xf32>
    %190 = arith.subf %175, %189 : vector<48x32xf32>
    %cst_60 = arith.constant 9.99999974E-6 : f32
    %191 = vector.broadcast %cst_60 : f32 to vector<48x1xf32>
    %192 = arith.addf %188, %191 : vector<48x1xf32>
    %193 = math.rsqrt %192 : vector<48x1xf32>
    %194 = vector.broadcast %193 : vector<48x1xf32> to vector<48x32xf32>
    %195 = arith.mulf %190, %194 : vector<48x32xf32>
    %196 = vector.broadcast %176 : vector<1x32xf32> to vector<48x32xf32>
    %197 = arith.mulf %195, %196 : vector<48x32xf32>
    %198 = vector.broadcast %177 : vector<1x32xf32> to vector<48x32xf32>
    %199 = arith.addf %197, %198 : vector<48x32xf32>
    %cst_61 = arith.constant 5.000000e-01 : f32
    %200 = vector.broadcast %cst_61 : f32 to vector<48x32xf32>
    %201 = arith.mulf %200, %33 : vector<48x32xf32>
    %cst_62 = arith.constant 0.707106769 : f32
    %202 = vector.broadcast %cst_62 : f32 to vector<48x32xf32>
    %203 = arith.mulf %33, %202 : vector<48x32xf32>
    %204 = math.erf %203 : vector<48x32xf32>
    %cst_63 = arith.constant 1.000000e+00 : f32
    %205 = vector.broadcast %cst_63 : f32 to vector<48x32xf32>
    %206 = arith.addf %205, %204 : vector<48x32xf32>
    %207 = arith.mulf %201, %206 : vector<48x32xf32>
    %208 = arith.addf %199, %207 : vector<48x32xf32>
    %209 = arith.addf %33, %208 : vector<48x32xf32>
    %c0_64 = arith.constant 0 : index
    %c544 = arith.constant 544 : index
    %210 = vector.load %arg5[%c0_64, %c544] : memref<1x1184xf32, #tpu.memory_space<vmem>>, vector<1x32xf32>
    %c0_65 = arith.constant 0 : index
    %c576 = arith.constant 576 : index
    %211 = vector.load %arg5[%c0_65, %c576] : memref<1x1184xf32, #tpu.memory_space<vmem>>, vector<1x32xf32>
    %cst_66 = arith.constant dense<0.000000e+00> : vector<48xf32>
    %212 = vector.multi_reduction <add>, %209, %cst_66 [1] : vector<48x32xf32> to vector<48xf32>
    %213 = vector.shape_cast %212 : vector<48xf32> to vector<48x1xf32>
    %cst_67 = arith.constant 3.200000e+01 : f32
    %214 = vector.broadcast %cst_67 : f32 to vector<48x1xf32>
    %215 = arith.divf %213, %214 : vector<48x1xf32>
    %216 = vector.broadcast %215 : vector<48x1xf32> to vector<48x32xf32>
    %217 = arith.subf %209, %216 : vector<48x32xf32>
    %218 = arith.mulf %217, %217 : vector<48x32xf32>
    %cst_68 = arith.constant dense<0.000000e+00> : vector<48xf32>
    %219 = vector.multi_reduction <add>, %218, %cst_68 [1] : vector<48x32xf32> to vector<48xf32>
    %220 = vector.shape_cast %219 : vector<48xf32> to vector<48x1xf32>
    %cst_69 = arith.constant 3.200000e+01 : f32
    %221 = vector.broadcast %cst_69 : f32 to vector<48x1xf32>
    %222 = arith.divf %220, %221 : vector<48x1xf32>
    %223 = vector.broadcast %215 : vector<48x1xf32> to vector<48x32xf32>
    %224 = arith.subf %209, %223 : vector<48x32xf32>
    %cst_70 = arith.constant 9.99999974E-6 : f32
    %225 = vector.broadcast %cst_70 : f32 to vector<48x1xf32>
    %226 = arith.addf %222, %225 : vector<48x1xf32>
    %227 = math.rsqrt %226 : vector<48x1xf32>
    %228 = vector.broadcast %227 : vector<48x1xf32> to vector<48x32xf32>
    %229 = arith.mulf %224, %228 : vector<48x32xf32>
    %230 = vector.broadcast %210 : vector<1x32xf32> to vector<48x32xf32>
    %231 = arith.mulf %229, %230 : vector<48x32xf32>
    %232 = vector.broadcast %211 : vector<1x32xf32> to vector<48x32xf32>
    %233 = arith.addf %231, %232 : vector<48x32xf32>
    %234 = arith.truncf %233 : vector<48x32xf32> to vector<48x32xbf16>
    %c0_71 = arith.constant 0 : index
    %c288 = arith.constant 288 : index
    %235 = vector.load %arg4[%c0_71, %c288] : memref<64x608xbf16, #tpu.memory_space<vmem>>, vector<32x32xbf16>
    %cst_72 = arith.constant dense<0.000000e+00> : vector<48x32xf32>
    %236 = tpu.matmul %234, %235, %cst_72 {dimension_numbers = #tpu.dot_dimension_numbers<[1], [0], [0], [1], [0, 0, 1, 1], [], []>} : vector<48x32xbf16>, vector<32x32xbf16>, vector<48x32xf32> -> vector<48x32xf32>
    %c0_73 = arith.constant 0 : index
    %c608 = arith.constant 608 : index
    %237 = vector.load %arg5[%c0_73, %c608] : memref<1x1184xf32, #tpu.memory_space<vmem>>, vector<1x32xf32>
    %238 = vector.broadcast %237 : vector<1x32xf32> to vector<48x32xf32>
    %239 = arith.addf %236, %238 : vector<48x32xf32>
    %cst_74 = arith.constant 5.000000e-01 : f32
    %240 = vector.broadcast %cst_74 : f32 to vector<48x32xf32>
    %241 = arith.mulf %240, %233 : vector<48x32xf32>
    %cst_75 = arith.constant 0.707106769 : f32
    %242 = vector.broadcast %cst_75 : f32 to vector<48x32xf32>
    %243 = arith.mulf %233, %242 : vector<48x32xf32>
    %244 = math.erf %243 : vector<48x32xf32>
    %cst_76 = arith.constant 1.000000e+00 : f32
    %245 = vector.broadcast %cst_76 : f32 to vector<48x32xf32>
    %246 = arith.addf %245, %244 : vector<48x32xf32>
    %247 = arith.mulf %241, %246 : vector<48x32xf32>
    %248 = arith.addf %239, %247 : vector<48x32xf32>
    %c0_77 = arith.constant 0 : index
    %c0_78 = arith.constant 0 : index
    %c0_79 = arith.constant 0 : index
    %249 = vector.load %arg3[%c0_77, %c0_78, %c0_79] : memref<6x8x16xf32, #tpu.memory_space<vmem>>, vector<6x8x16xf32>
    %250 = vector.shape_cast %249 : vector<6x8x16xf32> to vector<48x16xf32>
    %251 = arith.truncf %250 : vector<48x16xf32> to vector<48x16xbf16>
    %c0_80 = arith.constant 0 : index
    %c320 = arith.constant 320 : index
    %252 = vector.load %arg4[%c0_80, %c320] : memref<64x608xbf16, #tpu.memory_space<vmem>>, vector<16x32xbf16>
    %cst_81 = arith.constant dense<0.000000e+00> : vector<48x32xf32>
    %253 = tpu.matmul %251, %252, %cst_81 {dimension_numbers = #tpu.dot_dimension_numbers<[1], [0], [0], [1], [0, 0, 1, 1], [], []>} : vector<48x16xbf16>, vector<16x32xbf16>, vector<48x32xf32> -> vector<48x32xf32>
    %c0_82 = arith.constant 0 : index
    %c640 = arith.constant 640 : index
    %254 = vector.load %arg5[%c0_82, %c640] : memref<1x1184xf32, #tpu.memory_space<vmem>>, vector<1x32xf32>
    %255 = vector.broadcast %254 : vector<1x32xf32> to vector<48x32xf32>
    %256 = arith.addf %253, %255 : vector<48x32xf32>
    %c0_83 = arith.constant 0 : index
    %c672 = arith.constant 672 : index
    %257 = vector.load %arg5[%c0_83, %c672] : memref<1x1184xf32, #tpu.memory_space<vmem>>, vector<1x32xf32>
    %c0_84 = arith.constant 0 : index
    %c704 = arith.constant 704 : index
    %258 = vector.load %arg5[%c0_84, %c704] : memref<1x1184xf32, #tpu.memory_space<vmem>>, vector<1x32xf32>
    %cst_85 = arith.constant dense<0.000000e+00> : vector<48xf32>
    %259 = vector.multi_reduction <add>, %256, %cst_85 [1] : vector<48x32xf32> to vector<48xf32>
    %260 = vector.shape_cast %259 : vector<48xf32> to vector<48x1xf32>
    %cst_86 = arith.constant 3.200000e+01 : f32
    %261 = vector.broadcast %cst_86 : f32 to vector<48x1xf32>
    %262 = arith.divf %260, %261 : vector<48x1xf32>
    %263 = vector.broadcast %262 : vector<48x1xf32> to vector<48x32xf32>
    %264 = arith.subf %256, %263 : vector<48x32xf32>
    %265 = arith.mulf %264, %264 : vector<48x32xf32>
    %cst_87 = arith.constant dense<0.000000e+00> : vector<48xf32>
    %266 = vector.multi_reduction <add>, %265, %cst_87 [1] : vector<48x32xf32> to vector<48xf32>
    %267 = vector.shape_cast %266 : vector<48xf32> to vector<48x1xf32>
    %cst_88 = arith.constant 3.200000e+01 : f32
    %268 = vector.broadcast %cst_88 : f32 to vector<48x1xf32>
    %269 = arith.divf %267, %268 : vector<48x1xf32>
    %270 = vector.broadcast %262 : vector<48x1xf32> to vector<48x32xf32>
    %271 = arith.subf %256, %270 : vector<48x32xf32>
    %cst_89 = arith.constant 9.99999974E-6 : f32
    %272 = vector.broadcast %cst_89 : f32 to vector<48x1xf32>
    %273 = arith.addf %269, %272 : vector<48x1xf32>
    %274 = math.rsqrt %273 : vector<48x1xf32>
    %275 = vector.broadcast %274 : vector<48x1xf32> to vector<48x32xf32>
    %276 = arith.mulf %271, %275 : vector<48x32xf32>
    %277 = vector.broadcast %257 : vector<1x32xf32> to vector<48x32xf32>
    %278 = arith.mulf %276, %277 : vector<48x32xf32>
    %279 = vector.broadcast %258 : vector<1x32xf32> to vector<48x32xf32>
    %280 = arith.addf %278, %279 : vector<48x32xf32>
    %281 = arith.truncf %248 : vector<48x32xf32> to vector<48x32xbf16>
    %282 = arith.truncf %280 : vector<48x32xf32> to vector<48x32xbf16>
    %283 = tpu.concatenate %281, %282 in 1 : vector<48x32xbf16>, vector<48x32xbf16> -> vector<48x64xbf16>
    %c0_90 = arith.constant 0 : index
    %c352 = arith.constant 352 : index
    %284 = vector.load %arg4[%c0_90, %c352] : memref<64x608xbf16, #tpu.memory_space<vmem>>, vector<64x192xbf16>
    %cst_91 = arith.constant dense<0.000000e+00> : vector<48x192xf32>
    %285 = tpu.matmul %283, %284, %cst_91 {dimension_numbers = #tpu.dot_dimension_numbers<[1], [0], [0], [1], [0, 0, 1, 1], [], []>} : vector<48x64xbf16>, vector<64x192xbf16>, vector<48x192xf32> -> vector<48x192xf32>
    %c0_92 = arith.constant 0 : index
    %c736 = arith.constant 736 : index
    %286 = vector.load %arg5[%c0_92, %c736] : memref<1x1184xf32, #tpu.memory_space<vmem>>, vector<1x192xf32>
    %287 = vector.broadcast %286 : vector<1x192xf32> to vector<48x192xf32>
    %288 = arith.addf %285, %287 : vector<48x192xf32>
    %c0_93 = arith.constant 0 : index
    %c928 = arith.constant 928 : index
    %289 = vector.load %arg5[%c0_93, %c928] : memref<1x1184xf32, #tpu.memory_space<vmem>>, vector<1x32xf32>
    %c0_94 = arith.constant 0 : index
    %c960 = arith.constant 960 : index
    %290 = vector.load %arg5[%c0_94, %c960] : memref<1x1184xf32, #tpu.memory_space<vmem>>, vector<1x32xf32>
    %291 = vector.extract_strided_slice %288 {offsets = [0, 0], sizes = [48, 32], strides = [1, 1]} : vector<48x192xf32> to vector<48x32xf32>
    %292 = vector.shape_cast %291 : vector<48x32xf32> to vector<6x8x32xf32>
    %293 = vector.extract_strided_slice %288 {offsets = [0, 64], sizes = [48, 32], strides = [1, 1]} : vector<48x192xf32> to vector<48x32xf32>
    %294 = vector.shape_cast %293 : vector<48x32xf32> to vector<6x8x32xf32>
    %295 = vector.extract_strided_slice %288 {offsets = [0, 128], sizes = [48, 32], strides = [1, 1]} : vector<48x192xf32> to vector<48x32xf32>
    %296 = vector.shape_cast %295 : vector<48x32xf32> to vector<6x8x32xf32>
    %297 = arith.truncf %292 : vector<6x8x32xf32> to vector<6x8x32xbf16>
    %298 = arith.truncf %294 : vector<6x8x32xf32> to vector<6x8x32xbf16>
    "tpu.trace_start"() <{level = 10 : i32, message = "gqd,gkd->gqk"}> : () -> ()
    %cst_95 = arith.constant dense<0.000000e+00> : vector<6x8x8xf32>
    %299 = tpu.matmul %297, %298, %cst_95 {dimension_numbers = #tpu.dot_dimension_numbers<[2], [2], [1], [1], [0, 0, 0, 1, 1, 1], [0], [0]>} : vector<6x8x32xbf16>, vector<6x8x32xbf16>, vector<6x8x8xf32> -> vector<6x8x8xf32>
    "tpu.trace_stop"() : () -> ()
    %cst_96 = arith.constant dense<0xFF800000> : vector<6x8xf32>
    %300 = vector.multi_reduction <maximumf>, %299, %cst_96 [2] : vector<6x8x8xf32> to vector<6x8xf32>
    %301 = vector.shape_cast %300 : vector<6x8xf32> to vector<6x8x1xf32>
    %302 = vector.broadcast %301 : vector<6x8x1xf32> to vector<6x8x8xf32>
    %303 = arith.subf %299, %302 : vector<6x8x8xf32>
    %304 = math.exp %303 : vector<6x8x8xf32>
    %cst_97 = arith.constant dense<0.000000e+00> : vector<6x8xf32>
    %305 = vector.multi_reduction <add>, %304, %cst_97 [2] : vector<6x8x8xf32> to vector<6x8xf32>
    %306 = vector.shape_cast %305 : vector<6x8xf32> to vector<6x8x1xf32>
    %307 = tpu.reciprocal %306 {approx = true} : vector<6x8x1xf32> -> vector<6x8x1xf32>
    %308 = vector.broadcast %307 : vector<6x8x1xf32> to vector<6x8x8xf32>
    %309 = arith.mulf %304, %308 : vector<6x8x8xf32>
    %310 = arith.truncf %309 : vector<6x8x8xf32> to vector<6x8x8xbf16>
    %311 = arith.truncf %296 : vector<6x8x32xf32> to vector<6x8x32xbf16>
    "tpu.trace_start"() <{level = 10 : i32, message = "gqk,gkd->gqd"}> : () -> ()
    %cst_98 = arith.constant dense<0.000000e+00> : vector<6x8x32xf32>
    %312 = tpu.matmul %310, %311, %cst_98 {dimension_numbers = #tpu.dot_dimension_numbers<[2], [1], [1], [2], [0, 0, 0, 1, 1, 2], [0], [0]>} : vector<6x8x8xbf16>, vector<6x8x32xbf16>, vector<6x8x32xf32> -> vector<6x8x32xf32>
    "tpu.trace_stop"() : () -> ()
    %cst_99 = arith.constant dense<0.000000e+00> : vector<6x8xf32>
    %313 = vector.multi_reduction <add>, %312, %cst_99 [2] : vector<6x8x32xf32> to vector<6x8xf32>
    %314 = vector.shape_cast %313 : vector<6x8xf32> to vector<6x8x1xf32>
    %cst_100 = arith.constant 3.200000e+01 : f32
    %315 = vector.broadcast %cst_100 : f32 to vector<6x8x1xf32>
    %316 = arith.divf %314, %315 : vector<6x8x1xf32>
    %317 = vector.broadcast %316 : vector<6x8x1xf32> to vector<6x8x32xf32>
    %318 = arith.subf %312, %317 : vector<6x8x32xf32>
    %319 = arith.mulf %318, %318 : vector<6x8x32xf32>
    %cst_101 = arith.constant dense<0.000000e+00> : vector<6x8xf32>
    %320 = vector.multi_reduction <add>, %319, %cst_101 [2] : vector<6x8x32xf32> to vector<6x8xf32>
    %321 = vector.shape_cast %320 : vector<6x8xf32> to vector<6x8x1xf32>
    %cst_102 = arith.constant 3.200000e+01 : f32
    %322 = vector.broadcast %cst_102 : f32 to vector<6x8x1xf32>
    %323 = arith.divf %321, %322 : vector<6x8x1xf32>
    %324 = vector.broadcast %316 : vector<6x8x1xf32> to vector<6x8x32xf32>
    %325 = arith.subf %312, %324 : vector<6x8x32xf32>
    %cst_103 = arith.constant 9.99999974E-6 : f32
    %326 = vector.broadcast %cst_103 : f32 to vector<6x8x1xf32>
    %327 = arith.addf %323, %326 : vector<6x8x1xf32>
    %328 = math.rsqrt %327 : vector<6x8x1xf32>
    %329 = vector.broadcast %328 : vector<6x8x1xf32> to vector<6x8x32xf32>
    %330 = arith.mulf %325, %329 : vector<6x8x32xf32>
    %331 = vector.shape_cast %289 : vector<1x32xf32> to vector<1x1x32xf32>
    %332 = vector.broadcast %331 : vector<1x1x32xf32> to vector<6x8x32xf32>
    %333 = arith.mulf %330, %332 : vector<6x8x32xf32>
    %334 = vector.shape_cast %290 : vector<1x32xf32> to vector<1x1x32xf32>
    %335 = vector.broadcast %334 : vector<1x1x32xf32> to vector<6x8x32xf32>
    %336 = arith.addf %333, %335 : vector<6x8x32xf32>
    %337 = arith.truncf %336 : vector<6x8x32xf32> to vector<6x8x32xbf16>
    %338 = vector.shape_cast %337 : vector<6x8x32xbf16> to vector<48x32xbf16>
    %339 = vector.extract_strided_slice %288 {offsets = [0, 32], sizes = [48, 32], strides = [1, 1]} : vector<48x192xf32> to vector<48x32xf32>
    %340 = vector.shape_cast %339 : vector<48x32xf32> to vector<6x8x32xf32>
    %341 = vector.extract_strided_slice %288 {offsets = [0, 96], sizes = [48, 32], strides = [1, 1]} : vector<48x192xf32> to vector<48x32xf32>
    %342 = vector.shape_cast %341 : vector<48x32xf32> to vector<6x8x32xf32>
    %343 = vector.extract_strided_slice %288 {offsets = [0, 160], sizes = [48, 32], strides = [1, 1]} : vector<48x192xf32> to vector<48x32xf32>
    %344 = vector.shape_cast %343 : vector<48x32xf32> to vector<6x8x32xf32>
    %345 = arith.truncf %340 : vector<6x8x32xf32> to vector<6x8x32xbf16>
    %346 = arith.truncf %342 : vector<6x8x32xf32> to vector<6x8x32xbf16>
    "tpu.trace_start"() <{level = 10 : i32, message = "gqd,gkd->gqk"}> : () -> ()
    %cst_104 = arith.constant dense<0.000000e+00> : vector<6x8x8xf32>
    %347 = tpu.matmul %345, %346, %cst_104 {dimension_numbers = #tpu.dot_dimension_numbers<[2], [2], [1], [1], [0, 0, 0, 1, 1, 1], [0], [0]>} : vector<6x8x32xbf16>, vector<6x8x32xbf16>, vector<6x8x8xf32> -> vector<6x8x8xf32>
    "tpu.trace_stop"() : () -> ()
    %cst_105 = arith.constant dense<0xFF800000> : vector<6x8xf32>
    %348 = vector.multi_reduction <maximumf>, %347, %cst_105 [2] : vector<6x8x8xf32> to vector<6x8xf32>
    %349 = vector.shape_cast %348 : vector<6x8xf32> to vector<6x8x1xf32>
    %350 = vector.broadcast %349 : vector<6x8x1xf32> to vector<6x8x8xf32>
    %351 = arith.subf %347, %350 : vector<6x8x8xf32>
    %352 = math.exp %351 : vector<6x8x8xf32>
    %cst_106 = arith.constant dense<0.000000e+00> : vector<6x8xf32>
    %353 = vector.multi_reduction <add>, %352, %cst_106 [2] : vector<6x8x8xf32> to vector<6x8xf32>
    %354 = vector.shape_cast %353 : vector<6x8xf32> to vector<6x8x1xf32>
    %355 = tpu.reciprocal %354 {approx = true} : vector<6x8x1xf32> -> vector<6x8x1xf32>
    %356 = vector.broadcast %355 : vector<6x8x1xf32> to vector<6x8x8xf32>
    %357 = arith.mulf %352, %356 : vector<6x8x8xf32>
    %358 = arith.truncf %357 : vector<6x8x8xf32> to vector<6x8x8xbf16>
    %359 = arith.truncf %344 : vector<6x8x32xf32> to vector<6x8x32xbf16>
    "tpu.trace_start"() <{level = 10 : i32, message = "gqk,gkd->gqd"}> : () -> ()
    %cst_107 = arith.constant dense<0.000000e+00> : vector<6x8x32xf32>
    %360 = tpu.matmul %358, %359, %cst_107 {dimension_numbers = #tpu.dot_dimension_numbers<[2], [1], [1], [2], [0, 0, 0, 1, 1, 2], [0], [0]>} : vector<6x8x8xbf16>, vector<6x8x32xbf16>, vector<6x8x32xf32> -> vector<6x8x32xf32>
    "tpu.trace_stop"() : () -> ()
    %cst_108 = arith.constant dense<0.000000e+00> : vector<6x8xf32>
    %361 = vector.multi_reduction <add>, %360, %cst_108 [2] : vector<6x8x32xf32> to vector<6x8xf32>
    %362 = vector.shape_cast %361 : vector<6x8xf32> to vector<6x8x1xf32>
    %cst_109 = arith.constant 3.200000e+01 : f32
    %363 = vector.broadcast %cst_109 : f32 to vector<6x8x1xf32>
    %364 = arith.divf %362, %363 : vector<6x8x1xf32>
    %365 = vector.broadcast %364 : vector<6x8x1xf32> to vector<6x8x32xf32>
    %366 = arith.subf %360, %365 : vector<6x8x32xf32>
    %367 = arith.mulf %366, %366 : vector<6x8x32xf32>
    %cst_110 = arith.constant dense<0.000000e+00> : vector<6x8xf32>
    %368 = vector.multi_reduction <add>, %367, %cst_110 [2] : vector<6x8x32xf32> to vector<6x8xf32>
    %369 = vector.shape_cast %368 : vector<6x8xf32> to vector<6x8x1xf32>
    %cst_111 = arith.constant 3.200000e+01 : f32
    %370 = vector.broadcast %cst_111 : f32 to vector<6x8x1xf32>
    %371 = arith.divf %369, %370 : vector<6x8x1xf32>
    %372 = vector.broadcast %364 : vector<6x8x1xf32> to vector<6x8x32xf32>
    %373 = arith.subf %360, %372 : vector<6x8x32xf32>
    %cst_112 = arith.constant 9.99999974E-6 : f32
    %374 = vector.broadcast %cst_112 : f32 to vector<6x8x1xf32>
    %375 = arith.addf %371, %374 : vector<6x8x1xf32>
    %376 = math.rsqrt %375 : vector<6x8x1xf32>
    %377 = vector.broadcast %376 : vector<6x8x1xf32> to vector<6x8x32xf32>
    %378 = arith.mulf %373, %377 : vector<6x8x32xf32>
    %379 = vector.shape_cast %289 : vector<1x32xf32> to vector<1x1x32xf32>
    %380 = vector.broadcast %379 : vector<1x1x32xf32> to vector<6x8x32xf32>
    %381 = arith.mulf %378, %380 : vector<6x8x32xf32>
    %382 = vector.shape_cast %290 : vector<1x32xf32> to vector<1x1x32xf32>
    %383 = vector.broadcast %382 : vector<1x1x32xf32> to vector<6x8x32xf32>
    %384 = arith.addf %381, %383 : vector<6x8x32xf32>
    %385 = arith.truncf %384 : vector<6x8x32xf32> to vector<6x8x32xbf16>
    %386 = vector.shape_cast %385 : vector<6x8x32xbf16> to vector<48x32xbf16>
    %387 = tpu.concatenate %338, %386 in 1 : vector<48x32xbf16>, vector<48x32xbf16> -> vector<48x64xbf16>
    %c0_113 = arith.constant 0 : index
    %c544_114 = arith.constant 544 : index
    %388 = vector.load %arg4[%c0_113, %c544_114] : memref<64x608xbf16, #tpu.memory_space<vmem>>, vector<64x32xbf16>
    %cst_115 = arith.constant dense<0.000000e+00> : vector<48x32xf32>
    %389 = tpu.matmul %387, %388, %cst_115 {dimension_numbers = #tpu.dot_dimension_numbers<[1], [0], [0], [1], [0, 0, 1, 1], [], []>} : vector<48x64xbf16>, vector<64x32xbf16>, vector<48x32xf32> -> vector<48x32xf32>
    %c0_116 = arith.constant 0 : index
    %c992 = arith.constant 992 : index
    %390 = vector.load %arg5[%c0_116, %c992] : memref<1x1184xf32, #tpu.memory_space<vmem>>, vector<1x32xf32>
    %391 = vector.broadcast %390 : vector<1x32xf32> to vector<48x32xf32>
    %392 = arith.addf %389, %391 : vector<48x32xf32>
    %c0_117 = arith.constant 0 : index
    %c1024 = arith.constant 1024 : index
    %393 = vector.load %arg5[%c0_117, %c1024] : memref<1x1184xf32, #tpu.memory_space<vmem>>, vector<1x32xf32>
    %c0_118 = arith.constant 0 : index
    %c1056 = arith.constant 1056 : index
    %394 = vector.load %arg5[%c0_118, %c1056] : memref<1x1184xf32, #tpu.memory_space<vmem>>, vector<1x32xf32>
    %cst_119 = arith.constant dense<0.000000e+00> : vector<48xf32>
    %395 = vector.multi_reduction <add>, %392, %cst_119 [1] : vector<48x32xf32> to vector<48xf32>
    %396 = vector.shape_cast %395 : vector<48xf32> to vector<48x1xf32>
    %cst_120 = arith.constant 3.200000e+01 : f32
    %397 = vector.broadcast %cst_120 : f32 to vector<48x1xf32>
    %398 = arith.divf %396, %397 : vector<48x1xf32>
    %399 = vector.broadcast %398 : vector<48x1xf32> to vector<48x32xf32>
    %400 = arith.subf %392, %399 : vector<48x32xf32>
    %401 = arith.mulf %400, %400 : vector<48x32xf32>
    %cst_121 = arith.constant dense<0.000000e+00> : vector<48xf32>
    %402 = vector.multi_reduction <add>, %401, %cst_121 [1] : vector<48x32xf32> to vector<48xf32>
    %403 = vector.shape_cast %402 : vector<48xf32> to vector<48x1xf32>
    %cst_122 = arith.constant 3.200000e+01 : f32
    %404 = vector.broadcast %cst_122 : f32 to vector<48x1xf32>
    %405 = arith.divf %403, %404 : vector<48x1xf32>
    %406 = vector.broadcast %398 : vector<48x1xf32> to vector<48x32xf32>
    %407 = arith.subf %392, %406 : vector<48x32xf32>
    %cst_123 = arith.constant 9.99999974E-6 : f32
    %408 = vector.broadcast %cst_123 : f32 to vector<48x1xf32>
    %409 = arith.addf %405, %408 : vector<48x1xf32>
    %410 = math.rsqrt %409 : vector<48x1xf32>
    %411 = vector.broadcast %410 : vector<48x1xf32> to vector<48x32xf32>
    %412 = arith.mulf %407, %411 : vector<48x32xf32>
    %413 = vector.broadcast %393 : vector<1x32xf32> to vector<48x32xf32>
    %414 = arith.mulf %412, %413 : vector<48x32xf32>
    %415 = vector.broadcast %394 : vector<1x32xf32> to vector<48x32xf32>
    %416 = arith.addf %414, %415 : vector<48x32xf32>
    %cst_124 = arith.constant 5.000000e-01 : f32
    %417 = vector.broadcast %cst_124 : f32 to vector<48x32xf32>
    %418 = arith.mulf %417, %248 : vector<48x32xf32>
    %cst_125 = arith.constant 0.707106769 : f32
    %419 = vector.broadcast %cst_125 : f32 to vector<48x32xf32>
    %420 = arith.mulf %248, %419 : vector<48x32xf32>
    %421 = math.erf %420 : vector<48x32xf32>
    %cst_126 = arith.constant 1.000000e+00 : f32
    %422 = vector.broadcast %cst_126 : f32 to vector<48x32xf32>
    %423 = arith.addf %422, %421 : vector<48x32xf32>
    %424 = arith.mulf %418, %423 : vector<48x32xf32>
    %425 = arith.addf %416, %424 : vector<48x32xf32>
    %426 = arith.addf %248, %425 : vector<48x32xf32>
    %c0_127 = arith.constant 0 : index
    %c1088 = arith.constant 1088 : index
    %427 = vector.load %arg5[%c0_127, %c1088] : memref<1x1184xf32, #tpu.memory_space<vmem>>, vector<1x32xf32>
    %c0_128 = arith.constant 0 : index
    %c1120 = arith.constant 1120 : index
    %428 = vector.load %arg5[%c0_128, %c1120] : memref<1x1184xf32, #tpu.memory_space<vmem>>, vector<1x32xf32>
    %cst_129 = arith.constant dense<0.000000e+00> : vector<48xf32>
    %429 = vector.multi_reduction <add>, %426, %cst_129 [1] : vector<48x32xf32> to vector<48xf32>
    %430 = vector.shape_cast %429 : vector<48xf32> to vector<48x1xf32>
    %cst_130 = arith.constant 3.200000e+01 : f32
    %431 = vector.broadcast %cst_130 : f32 to vector<48x1xf32>
    %432 = arith.divf %430, %431 : vector<48x1xf32>
    %433 = vector.broadcast %432 : vector<48x1xf32> to vector<48x32xf32>
    %434 = arith.subf %426, %433 : vector<48x32xf32>
    %435 = arith.mulf %434, %434 : vector<48x32xf32>
    %cst_131 = arith.constant dense<0.000000e+00> : vector<48xf32>
    %436 = vector.multi_reduction <add>, %435, %cst_131 [1] : vector<48x32xf32> to vector<48xf32>
    %437 = vector.shape_cast %436 : vector<48xf32> to vector<48x1xf32>
    %cst_132 = arith.constant 3.200000e+01 : f32
    %438 = vector.broadcast %cst_132 : f32 to vector<48x1xf32>
    %439 = arith.divf %437, %438 : vector<48x1xf32>
    %440 = vector.broadcast %432 : vector<48x1xf32> to vector<48x32xf32>
    %441 = arith.subf %426, %440 : vector<48x32xf32>
    %cst_133 = arith.constant 9.99999974E-6 : f32
    %442 = vector.broadcast %cst_133 : f32 to vector<48x1xf32>
    %443 = arith.addf %439, %442 : vector<48x1xf32>
    %444 = math.rsqrt %443 : vector<48x1xf32>
    %445 = vector.broadcast %444 : vector<48x1xf32> to vector<48x32xf32>
    %446 = arith.mulf %441, %445 : vector<48x32xf32>
    %447 = vector.broadcast %427 : vector<1x32xf32> to vector<48x32xf32>
    %448 = arith.mulf %446, %447 : vector<48x32xf32>
    %449 = vector.broadcast %428 : vector<1x32xf32> to vector<48x32xf32>
    %450 = arith.addf %448, %449 : vector<48x32xf32>
    %451 = arith.truncf %450 : vector<48x32xf32> to vector<48x32xbf16>
    %c0_134 = arith.constant 0 : index
    %c576_135 = arith.constant 576 : index
    %452 = vector.load %arg4[%c0_134, %c576_135] : memref<64x608xbf16, #tpu.memory_space<vmem>>, vector<32x32xbf16>
    %cst_136 = arith.constant dense<0.000000e+00> : vector<48x32xf32>
    %453 = tpu.matmul %451, %452, %cst_136 {dimension_numbers = #tpu.dot_dimension_numbers<[1], [0], [0], [1], [0, 0, 1, 1], [], []>} : vector<48x32xbf16>, vector<32x32xbf16>, vector<48x32xf32> -> vector<48x32xf32>
    %c0_137 = arith.constant 0 : index
    %c1152 = arith.constant 1152 : index
    %454 = vector.load %arg5[%c0_137, %c1152] : memref<1x1184xf32, #tpu.memory_space<vmem>>, vector<1x32xf32>
    %455 = vector.broadcast %454 : vector<1x32xf32> to vector<48x32xf32>
    %456 = arith.addf %453, %455 : vector<48x32xf32>
    %cst_138 = arith.constant 5.000000e-01 : f32
    %457 = vector.broadcast %cst_138 : f32 to vector<48x32xf32>
    %458 = arith.mulf %457, %450 : vector<48x32xf32>
    %cst_139 = arith.constant 0.707106769 : f32
    %459 = vector.broadcast %cst_139 : f32 to vector<48x32xf32>
    %460 = arith.mulf %450, %459 : vector<48x32xf32>
    %461 = math.erf %460 : vector<48x32xf32>
    %cst_140 = arith.constant 1.000000e+00 : f32
    %462 = vector.broadcast %cst_140 : f32 to vector<48x32xf32>
    %463 = arith.addf %462, %461 : vector<48x32xf32>
    %464 = arith.mulf %458, %463 : vector<48x32xf32>
    %465 = arith.addf %456, %464 : vector<48x32xf32>
    %466 = vector.shape_cast %465 : vector<48x32xf32> to vector<6x8x32xf32>
    %c0_141 = arith.constant 0 : index
    %c0_142 = arith.constant 0 : index
    %c0_143 = arith.constant 0 : index
    %467 = vector.load %arg6[%c0_141, %c0_142, %c0_143] : memref<6x8x32xf32, #tpu.memory_space<vmem>>, vector<6x8x32xf32>
    tpu.vector_store %arg6[%c0_141, %c0_142, %c0_143], %466 {strides = array<i32>} : memref<6x8x32xf32, #tpu.memory_space<vmem>>, vector<6x8x32xf32>,
    return
  }
  func.func @transform_0(%arg0: i32) -> (i32, i32, i32) {
    %c0_i32 = arith.constant 0 : i32
    %c0_i32_0 = arith.constant 0 : i32
    %c0_i32_1 = arith.constant 0 : i32
    return %arg0, %c0_i32, %c0_i32_0 : i32, i32, i32
  }
  func.func @transform_1(%arg0: i32) -> (i32, i32, i32) {
    %c0_i32 = arith.constant 0 : i32
    %c0_i32_0 = arith.constant 0 : i32
    %c0_i32_1 = arith.constant 0 : i32
    return %arg0, %c0_i32, %c0_i32_0 : i32, i32, i32
  }
  func.func @transform_2(%arg0: i32) -> (i32, i32, i32) {
    %c0_i32 = arith.constant 0 : i32
    %c0_i32_0 = arith.constant 0 : i32
    %c0_i32_1 = arith.constant 0 : i32
    return %arg0, %c0_i32, %c0_i32_0 : i32, i32, i32
  }
  func.func @transform_3(%arg0: i32) -> (i32, i32) {
    %c0_i32 = arith.constant 0 : i32
    %c0_i32_0 = arith.constant 0 : i32
    %c0_i32_1 = arith.constant 0 : i32
    return %c0_i32, %c0_i32_0 : i32, i32
  }
  func.func @transform_4(%arg0: i32) -> (i32, i32) {
    %c0_i32 = arith.constant 0 : i32
    %c0_i32_0 = arith.constant 0 : i32
    %c0_i32_1 = arith.constant 0 : i32
    return %c0_i32, %c0_i32_0 : i32, i32
  }
  func.func @transform_5(%arg0: i32) -> (i32, i32, i32) {
    %c0_i32 = arith.constant 0 : i32
    %c0_i32_0 = arith.constant 0 : i32
    %c0_i32_1 = arith.constant 0 : i32
    return %arg0, %c0_i32, %c0_i32_0 : i32, i32, i32
  }
}

</mosaic_0001>

<bundles_post_ra>
// kernel: mul.39
= control target key start
LH: loop header
LB: loop body
LE: loop exit
PB: predicated region body
PF: predicated region fallthrough
CT: control target
= control target key end

     0   :  { %vm8_vm0 = vcmask 523264   ;;  %s23_s8 = smov 64   ;;  %vm14_vm1 = vcmask 1048064   ;;  %s40_s0 = inlined_call_operand.vmem [shape: f32[3,64], index: 0, kind: input, shape index: {}]   ;;  %s41_s1 = inlined_call_operand.vmem [shape: f32[192], index: 1, kind: output, shape index: {}]  }
   0x1   :  { %v4_v0 = vld [vmem:[%s40_s0] sm:$0xf]  ;;  %s6_s0 = smov 3 }
   0x2   :  { %5 = vst [vmem:[#allocation1] sm:$0xf] %v4_v0 }
   0x9   :  { %v11_v1 = vld [vmem:[#allocation1 + $0x1] sm:$0x1]   ;;  %v7_v2 = vld [vmem:[#allocation1] ss:$2 sm:%s6_s0]  }
   0xa   :  { %12 = vrot.lane.b32.xlu0 %v11_v1, %s23_s8  ;;  %9 = vst.msk [vmem:[#allocation0] sm:$0x3] %vm8_vm0, %v7_v2  }
  0x7c   :  { %v13_v3 = vpop.permute.xlu0 %12  }
  0x7d   :  { %15 = vst.msk [vmem:[#allocation0] sm:$0x1] %vm14_vm1, %v13_v3  }
  0x84   :  { %v18_v4 = vld [vmem:[#allocation0] sm:$0x3] }
  0x85   :  { %21 = vst [vmem:[%s41_s1] sm:$0x3] %v18_v4 }

// kernel: recursive_transformer.1
= control target key start
LH: loop header
LB: loop body
LE: loop exit
PB: predicated region body
PF: predicated region fallthrough
CT: control target
= control target key end

     0   :  { %s5749_s30 = smov 96   ;;  %vm49_vm0 = vcmask 130048   ;;  %s8578_s0 = inlined_call_operand.vmem [shape: f32[6,8,16], index: 0, kind: input, shape index: {}]   ;;  %s8579_s1 = inlined_call_operand.vmem [shape: f32[6,8,16], index: 1, kind: input, shape index: {}]   ;;  %s8580_s2 = inlined_call_operand.vmem [shape: f32[6,8,16], index: 2, kind: input, shape index: {}]   ;;  %s8581_s3 = inlined_call_operand.vmem [shape: bf16[64,608], index: 3, kind: input, shape index: {}]   ;;  %s8582_s4 = inlined_call_operand.vmem [shape: f32[1,1184], index: 4, kind: input, shape index: {}]   ;;  %s8583_s5 = inlined_call_operand.hbm [shape: f32[6,8,32], index: 5, kind: output, shape index: {}]  }
   0x1   :  { %v5150_v0 = vld [vmem:[%s8581_s3] sm:$0xf]  ;;  %v5389_v1 = vld [vmem:[%s8581_s3 + $0x10] sm:$0xf0]  ;;  %v23_v4 = vld [vmem:[%s8578_s0 + $0x8] sm:$0xff] }
   0x2   :  { %v22_v2 = vld [vmem:[%s8578_s0] sm:$0xff]  ;;  %v5151_v3 = vor.u32 %v5389_v1, %v5150_v0  ;;  %v24_v5 = vld [vmem:[%s8578_s0 + $0x10] sm:$0xff]  ;;  %v25_v6 = vld [vmem:[%s8578_s0 + $0x18] sm:$0xff] }
   0x3   :  { %v34_v7 = vpack.c.bf16 %v23_v4, %v22_v2  ;;  %v35_v8 = vpack.c.bf16 %v25_v6, %v24_v5 }
   0x4   :  { %244 = vrot.lane.b32.xlu0 %v5151_v3, %s5749_s30  ;;  %66 = vmatpush.bf16.msra.mxu0 %v5151_v3 }
   0x5   :  { %5423 = vmatpush.bf16.msra.mxu1 %v5151_v3 }
   0x7   :  { %5152 = vmatmul.msk.bf16.vlgmr.msra.gmra.mxu0 %vm49_vm0, %v34_v7 }
   0x8   :  { %10 = vsyncpa [#allocation3], 0  ;;  %5153 = vmatmul.msk.bf16.vlgmr.msra.gmra.mxu1 %vm49_vm0, %v35_v8  ;;  %v5810_v9 = vld [vmem:[%s8582_s4] ss:$0 sm:$0xff]  ;;  %s5750_s8 = smov 32   ;;  %v27_v11 = vld [vmem:[%s8578_s0 + $0x28] sm:$0xff] }
   0x9   :  { %v26_v10 = vld [vmem:[%s8578_s0 + $0x20] sm:$0xff]  ;;  %v29_v14 = vld [vmem:[%s8579_s1 + $0x8] sm:$0xff]  ;;  %v30_v17 = vld [vmem:[%s8579_s1 + $0x10] sm:$0xff]  ;;  %vm83_vm1 = vcmask 261120   ;;  %v5751_v39 = vmov 32.0   ;;  %s5752_s29 = smov 64  }
   0xa   :  { %v36_v12 = vpack.c.bf16 %v27_v11, %v26_v10  ;;  %v28_v13 = vld [vmem:[%s8579_s1] sm:$0xff]  ;;  %v31_v18 = vld [vmem:[%s8579_s1 + $0x18] sm:$0xff]  ;;  %v33_v32 = vld [vmem:[%s8579_s1 + $0x28] sm:$0xff]  ;;  %5445 = vrcp.f32 %v5751_v39  ;;  %vm551_vm3 = vcmask 523264   ;;  %s5136_s18 = sshll.u32 %s8583_s5, 4  ;;  %s5754_s0 = smov 128   ;;  %s5137_s18 = int_to_ptr.hbm [resolvable:$true] %s5136_s18 }
   0xb   :  { %v241_v16 = vpack.c.bf16 %v29_v14, %v28_v13  ;;  %v242_v22 = vpack.c.bf16 %v31_v18, %v30_v17  ;;  %v32_v31 = vld [vmem:[%s8579_s1 + $0x20] sm:$0xff]  ;;  %v5391_v39 = vld [vmem:[%s8581_s3 + $0x10] sm:$0xf0]  ;;  %s5755_s19 = smov 8  }
   0xc   :  { %247 = vrot.lane.b32.xlu0 %v5810_v9, %s5750_s8  ;;  %v243_v35 = vpack.c.bf16 %v33_v32, %v32_v31  ;;  %v5394_v31 = vld [vmem:[%s8581_s3 + $0x54] sm:$0xf]  ;;  %v5178_v32 = vld [vmem:[%s8581_s3 + $0x64] sm:$0xf0] }
  0x10   :  { %v5446_v40 = vpop.eup %5445 }
  0x11   :  { %v103_v41 = vmul.f32 32.0, %v5446_v40  ;;  %vm107_vm2 = vweird.f32 %v5446_v40 }
  0x13   :  { %v104_v44 = vsub.f32 1.0, %v103_v41 }
  0x15   :  { %v105_v47 = vmul.f32 %v5446_v40, %v104_v44 }
  0x17   :  { %v106_v48 = vadd.f32 %v5446_v40, %v105_v47 }
  0x18   :  { %5154 = vmatmul.msk.bf16.gmra.mxu1 %vm49_vm0, %v36_v12 }
  0x19   :  { %v5866_v52 = vsel %vm107_vm2, %v5446_v40, %v106_v48 }
  0x76   :  { %v245_v15 = vpop.permute.xlu0 %244 }
  0x77   :  { %266 = vmatpush.bf16.msrb.mxu1 %v245_v15 }
  0x7a   :  { %5155 = vmatmul.msk.bf16.vlgmr.msrb.gmra.mxu1 %vm49_vm0, %v241_v16 }
  0x7e   :  { %v248_v42 = vpop.permute.xlu0 %247 }
  0x84   :  { %v68_v19 = vpop.f32.mrf.mxu0 }
  0x85   :  { %v69_v20 = vadd.f32 %v5810_v9, %v68_v19  ;;  %v73_v21 = vpop.f32.mrf.mxu1 }
  0x86   :  { %v74_v24 = vadd.f32 %v5810_v9, %v73_v21  ;;  %v5184_v21 = vld [vmem:[%s8581_s3 + $0x78] sm:$0xf] }
  0x87   :  { %v84_v23 = vsel %vm83_vm1, %v69_v20, 0.0 }
  0x88   :  { %85 = vadd.xlane.f32.xlu2 %v84_v23  ;;  %v90_v28 = vsel %vm83_vm1, %v74_v24, 0.0 }
  0x8a   :  { %5156 = vmatmul.msk.bf16.gmra.mxu1 %vm49_vm0, %v242_v22  ;;  %v5397_v22 = vld [vmem:[%s8581_s3 + $0x88] sm:$0xf0] }
  0x8b   :  { %v5185_v23 = vor.u32 %v5397_v22, %v5184_v21 }
  0x8c   :  { %v70_v25 = vpop.f32.mrf.mxu0 }
  0x8d   :  { %v75_v26 = vpop.f32.mrf.mxu1  ;;  %v5839_v27 = vadd.f32 %v5810_v9, %v70_v25  ;;  %v5395_v25 = vld [vmem:[%s8581_s3 + $0x60] sm:$0xf0] }
  0x8e   :  { %v76_v30 = vadd.f32 %v5810_v9, %v75_v26 }
  0x8f   :  { %v87_v29 = vsel %vm83_vm1, %v5839_v27, 0.0 }
  0x90   :  { %88 = vadd.xlane.f32.xlu1 %v87_v29  ;;  %91 = vadd.xlane.f32.xlu2 %v90_v28  ;;  %v93_v34 = vsel %vm83_vm1, %v76_v30, 0.0  ;;  %v5396_v28 = vld [vmem:[%s8581_s3 + $0x7c] sm:$0xf]  ;;  %v5186_v29 = vld [vmem:[%s8581_s3 + $0x8c] sm:$0xf0] }
  0x95   :  { %v78_v33 = vpop.f32.mrf.mxu1 }
  0x96   :  { %v5869_v54 = vadd.f32 %v5810_v9, %v78_v33  ;;  %v5181_v33 = vor.u32 %v5394_v31, %v5178_v32 }
  0x98   :  { %94 = vadd.xlane.f32.xlu1 %v93_v34  ;;  %v96_v59 = vsel %vm83_vm1, %v5869_v54, 0.0  ;;  %v5168_v34 = vld [vmem:[%s8581_s3 + $0x28] sm:$0xf] }
  0x9a   :  { %5157 = vmatmul.msk.bf16.gmra.mxu1 %vm49_vm0, %v243_v35  ;;  %v5393_v35 = vld [vmem:[%s8581_s3 + $0x38] sm:$0xf0] }
  0x9d   :  { %v80_v36 = vpop.f32.mrf.mxu1 }
  0x9e   :  { %v5854_v37 = vadd.f32 %v5810_v9, %v80_v36  ;;  %v5169_v36 = vor.u32 %v5393_v35, %v5168_v34  ;;  %v5162_v34 = vld [vmem:[%s8581_s3 + $0x14] sm:$0xf0] }
  0xa0   :  { %v99_v38 = vsel %vm83_vm1, %v5854_v37, 0.0 }
  0xa1   :  { %100 = vadd.xlane.f32.xlu0 %v99_v38  ;;  %v5160_v38 = vld [vmem:[%s8581_s3] sm:$0xf] }
  0xa2   :  { %v5161_v40 = vor.u32 %v5391_v39, %v5160_v38 }
  0xf7   :  { %v268_v43 = vpop.f32.mrf.mxu1 }
  0xf8   :  { %v5858_v45 = vadd.f32 %v268_v43, %v248_v42 }
  0xfa   :  { %v284_v46 = vsel %vm83_vm1, %v5858_v45, 0.0 }
  0xfb   :  { %285 = vadd.xlane.f32.xlu1 %v284_v46  ;;  %v86_v53 = vpop.xlane.xlu2 %85 }
  0xfc   :  { %v109_v55 = vmul.f32 %v5866_v52, %v86_v53 }
  0xfe   :  { %v5874_v58 = vsub.f32 %v69_v20, %v109_v55  ;;  %v5910_v20 = vld [vmem:[%s8582_s4 + $0x1] ss:$0 sm:$0xff] }
  0xff   :  { %v270_v49 = vpop.f32.mrf.mxu1 }
 0x100   :  { %v5862_v50 = vadd.f32 %v270_v49, %v248_v42  ;;  %v121_v61 = vmul.f32 %v5874_v58, %v5874_v58 }
 0x102   :  { %v287_v51 = vsel %vm83_vm1, %v5862_v50, 0.0  ;;  %v127_v2 = vsel %vm83_vm1, %v121_v61, 0.0 }
 0x103   :  { %288 = vadd.xlane.f32.xlu1 %v287_v51  ;;  %v89_v0 = vpop.xlane.xlu1 %88  ;;  %v92_v3 = vpop.xlane.xlu2 %91 }
 0x104   :  { %v111_v4 = vmul.f32 %v5866_v52, %v92_v3  ;;  %v110_v43 = vmul.f32 %v5866_v52, %v89_v0  ;;  %v5170_v3 = vld [vmem:[%s8581_s3 + $0x3c] sm:$0xf0] }
 0x106   :  { %v5890_v7 = vsub.f32 %v74_v24, %v111_v4  ;;  %v5176_v24 = vld [vmem:[%s8581_s3 + $0x50] sm:$0xf]  ;;  %v5966_v47 = vsub.f32 %v5839_v27, %v110_v43 }
 0x107   :  { %v273_v56 = vpop.f32.mrf.mxu1  ;;  %v5177_v26 = vor.u32 %v5395_v25, %v5176_v24 }
 0x108   :  { %v5872_v57 = vadd.f32 %v273_v56, %v248_v42  ;;  %v123_v12 = vmul.f32 %v5890_v7, %v5890_v7  ;;  %v122_v55 = vmul.f32 %v5966_v47, %v5966_v47 }
 0x10a   :  { %v290_v60 = vsel %vm83_vm1, %v5872_v57, 0.0  ;;  %v133_v17 = vsel %vm83_vm1, %v123_v12, 0.0  ;;  %v130_v56 = vsel %vm83_vm1, %v122_v55, 0.0 }
 0x10b   :  { %97 = vadd.xlane.f32.xlu1 %v96_v59  ;;  %291 = vadd.xlane.f32.xlu2 %v290_v60  ;;  %v95_v10 = vpop.xlane.xlu1 %94 }
 0x10c   :  { %v112_v11 = vmul.f32 %v5866_v52, %v95_v10 }
 0x10e   :  { %v5899_v15 = vsub.f32 %v76_v30, %v112_v11  ;;  %v5189_v30 = vor.u32 %v5396_v28, %v5186_v29 }
 0x10f   :  { %v275_v62 = vpop.f32.mrf.mxu1 }
 0x110   :  { %v5882_v63 = vadd.f32 %v275_v62, %v248_v42  ;;  %v124_v18 = vmul.f32 %v5899_v15, %v5899_v15 }
 0x112   :  { %v293_v1 = vsel %vm83_vm1, %v5882_v63, 0.0  ;;  %v136_v19 = vsel %vm83_vm1, %v124_v18, 0.0 }
 0x113   :  { %294 = vadd.xlane.f32.xlu2 %v293_v1  ;;  %128 = vadd.xlane.f32.xlu1 %v127_v2  ;;  %v5392_v2 = vld [vmem:[%s8581_s3 + $0x2c] sm:$0xf] }
 0x114   :  { %v101_v10 = vpop.xlane.xlu0 %100 }
 0x117   :  { %v278_v5 = vpop.f32.mrf.mxu1 }
 0x118   :  { %v5888_v6 = vadd.f32 %v278_v5, %v248_v42 }
 0x11a   :  { %v296_v8 = vsel %vm83_vm1, %v5888_v6, 0.0 }
 0x11b   :  { %297 = vadd.xlane.f32.xlu0 %v296_v8 }
 0x11f   :  { %v280_v13 = vpop.f32.mrf.mxu1 }
 0x120   :  { %v5897_v14 = vadd.f32 %v280_v13, %v248_v42 }
 0x122   :  { %v299_v16 = vsel %vm83_vm1, %v5897_v14, 0.0 }
 0x123   :  { %300 = vadd.xlane.f32.xlu1 %v299_v16  ;;  %134 = vadd.xlane.f32.xlu0 %v133_v17 }
 0x12b   :  { %137 = vadd.xlane.f32.xlu1 %v136_v19  ;;  %425 = vrot.lane.b32.xlu2 %v5910_v20, %s5749_s30 }
 0x137   :  { %547 = vrot.lane.b32.xlu0 %v5185_v23, %s5752_s29 }
 0x13f   :  { %543 = vrot.lane.b32.xlu0 %v5177_v26, %s5752_s29 }
 0x144   :  { %549 = vrot.lane.b32.xlu1 %v5189_v30, %s5752_s29 }
 0x147   :  { %545 = vrot.lane.b32.xlu0 %v5181_v33, %s5752_s29 }
 0x14c   :  { %223 = vrot.lane.b32.xlu1 %v5810_v9, %s5749_s30 }
 0x14f   :  { %539 = vrot.lane.b32.xlu0 %v5169_v36, %s5752_s29 }
 0x157   :  { %535 = vrot.lane.b32.xlu0 %v5161_v40, %s5752_s29 }
 0x16e   :  { %v286_v41 = vpop.xlane.xlu1 %285 }
 0x16f   :  { %v302_v42 = vmul.f32 %v286_v41, %v5866_v52 }
 0x171   :  { %v5961_v44 = vsub.f32 %v5858_v45, %v302_v42 }
 0x173   :  { %v314_v46 = vmul.f32 %v5961_v44, %v5961_v44 }
 0x175   :  { %v320_v48 = vsel %vm83_vm1, %v314_v46, 0.0 }
 0x176   :  { %v289_v49 = vpop.xlane.xlu1 %288  ;;  %321 = vadd.xlane.f32.xlu2 %v320_v48 }
 0x177   :  { %v303_v51 = vmul.f32 %v289_v49, %v5866_v52 }
 0x179   :  { %v5971_v53 = vsub.f32 %v5862_v50, %v303_v51 }
 0x17b   :  { %v315_v45 = vmul.f32 %v5971_v53, %v5971_v53 }
 0x17d   :  { %v323_v27 = vsel %vm83_vm1, %v315_v45, 0.0 }
 0x17e   :  { %131 = vadd.xlane.f32.xlu2 %v130_v56  ;;  %324 = vadd.xlane.f32.xlu1 %v323_v27  ;;  %v292_v59 = vpop.xlane.xlu2 %291  ;;  %v5985_v62 = vpop.xlane.xlu1 %97 }
 0x17f   :  { %v304_v60 = vmul.f32 %v292_v59, %v5866_v52 }
 0x181   :  { %v5981_v61 = vsub.f32 %v5872_v57, %v304_v60  ;;  %v5173_v57 = vor.u32 %v5392_v2, %v5170_v3 }
 0x183   :  { %v316_v50 = vmul.f32 %v5981_v61, %v5981_v61 }
 0x185   :  { %v326_v0 = vsel %vm83_vm1, %v316_v50, 0.0  ;;  %v113_v50 = vmul.f32 %v5866_v52, %v5985_v62 }
 0x186   :  { %327 = vadd.xlane.f32.xlu2 %v326_v0  ;;  %v5988_v1 = vpop.xlane.xlu1 %128  ;;  %v295_v18 = vpop.xlane.xlu2 %294 }
 0x187   :  { %v305_v19 = vmul.f32 %v295_v18, %v5866_v52 }
 0x189   :  { %v6017_v23 = vsub.f32 %v5882_v63, %v305_v19 }
 0x18b   :  { %v317_v25 = vmul.f32 %v6017_v23, %v6017_v23 }
 0x18d   :  { %v329_v29 = vsel %vm83_vm1, %v317_v25, 0.0 }
 0x18e   :  { %v298_v13 = vpop.xlane.xlu0 %297  ;;  %v6045_v36 = vpop.permute.xlu2 %425 }
 0x18f   :  { %v306_v24 = vmul.f32 %v298_v13, %v5866_v52 }
 0x191   :  { %v6027_v28 = vsub.f32 %v5888_v6, %v306_v24  ;;  %v5390_v6 = vld [vmem:[%s8581_s3 + $0x4] sm:$0xf] }
 0x192   :  { %v5165_v35 = vor.u32 %v5390_v6, %v5162_v34 }
 0x193   :  { %v318_v30 = vmul.f32 %v6027_v28, %v6027_v28 }
 0x195   :  { %v332_v32 = vsel %vm83_vm1, %v318_v30, 0.0 }
 0x196   :  { %v301_v4 = vpop.xlane.xlu1 %300  ;;  %v6006_v16 = vpop.xlane.xlu0 %134 }
 0x197   :  { %v307_v5 = vmul.f32 %v301_v4, %v5866_v52  ;;  %541 = vrot.lane.b32.xlu1 %v5173_v57, %s5752_s29  ;;  %v6058_v4 = vsub.f32 %v5869_v54, %v113_v50 }
 0x199   :  { %v5999_v8 = vsub.f32 %v5897_v14, %v307_v5  ;;  %v125_v13 = vmul.f32 %v6058_v4, %v6058_v4 }
 0x19b   :  { %v319_v11 = vmul.f32 %v5999_v8, %v5999_v8 }
 0x19d   :  { %v335_v12 = vsel %vm83_vm1, %v319_v11, 0.0 }
 0x19e   :  { %336 = vadd.xlane.f32.xlu0 %v335_v12  ;;  %232 = vrot.lane.b32.xlu2 %v5810_v9, %s5752_s29  ;;  %v6008_v17 = vpop.xlane.xlu1 %137  ;;  %v114_v9 = vmul.f32 %v5866_v52, %v101_v10 }
 0x1a0   :  { %v6024_v26 = vsub.f32 %v5854_v37, %v114_v9 }
 0x1a2   :  { %v126_v63 = vmul.f32 %v6024_v26, %v6024_v26 }
 0x1a4   :  { %v142_v31 = vsel %vm83_vm1, %v126_v63, 0.0 }
 0x1a9   :  { %v548_v14 = vpop.permute.xlu0 %547 }
 0x1b1   :  { %v544_v37 = vpop.permute.xlu0 %543 }
 0x1b6   :  { %v6011_v21 = vpop.permute.xlu1 %549 }
 0x1b7   :  { %5424 = vmatpush.bf16.msra.mxu3 %v6011_v21  ;;  %v555_v22 = vsel %vm551_vm3, %v548_v14, %v6011_v21 }
 0x1b8   :  { %582 = vmatpush.bf16.msra.mxu2 %v555_v22  ;;  %v139_v22 = vsel %vm83_vm1, %v125_v13, 0.0 }
 0x1b9   :  { %v6036_v33 = vpop.permute.xlu0 %545 }
 0x1ba   :  { %v554_v38 = vsel %vm551_vm3, %v544_v37, %v6036_v33 }
 0x1bb   :  { %5425 = vmatpush.bf16.msra.mxu3 %v6036_v33 }
 0x1bc   :  { %583 = vmatpush.bf16.msra.mxu2 %v554_v38 }
 0x1be   :  { %v6050_v39 = vpop.permute.xlu1 %223 }
 0x1c1   :  { %330 = vadd.xlane.f32.xlu1 %v329_v29 }
 0x1c7   :  { %143 = vadd.xlane.f32.xlu2 %v142_v31 }
 0x1c9   :  { %333 = vadd.xlane.f32.xlu1 %v332_v32 }
 0x1e2   :  { %537 = vrot.lane.b32.xlu1 %v5165_v35, %s5752_s29 }
 0x1e9   :  { %v322_v40 = vpop.xlane.xlu2 %321 }
 0x1ea   :  { %v338_v41 = vmul.f32 %v322_v40, %v5866_v52 }
 0x1ec   :  { %v344_v42 = vadd.f32 1e-05, %v338_v41 }
 0x1ee   :  { %5447 = vrsqrt.f32 %v344_v42  ;;  %vm356_vm5 = vweird.f32 %v344_v42 }
 0x1f1   :  { %v325_v43 = vpop.xlane.xlu1 %324 }
 0x1f2   :  { %v339_v46 = vmul.f32 %v325_v43, %v5866_v52 }
 0x1f4   :  { %v5448_v48 = vpop.eup %5447  ;;  %v345_v49 = vadd.f32 1e-05, %v339_v46 }
 0x1f5   :  { %v351_v51 = vmul.f32 %v5448_v48, %v344_v42  ;;  %vm357_vm4 = vweird.f32 %v5448_v48 }
 0x1f6   :  { %5449 = vrsqrt.f32 %v345_v49  ;;  %vm358_vm6 = vmor %vm356_vm5, %vm357_vm4  ;;  %vm366_vm8 = vweird.f32 %v345_v49 }
 0x1f7   :  { %v352_v55 = vmul.f32 %v5448_v48, %v351_v51 }
 0x1f9   :  { %v353_v45 = vmul.f32 0.5, %v352_v55 }
 0x1fb   :  { %v354_v56 = vsub.f32 1.5, %v353_v45 }
 0x1fc   :  { %v5450_v27 = vpop.eup %5449 }
 0x1fd   :  { %v355_v59 = vmul.f32 %v5448_v48, %v354_v56  ;;  %v361_v60 = vmul.f32 %v5450_v27, %v345_v49  ;;  %vm367_vm7 = vweird.f32 %v5450_v27 }
 0x1fe   :  { %vm368_vm9 = vmor %vm366_vm8, %vm367_vm7 }
 0x1ff   :  { %v359_v0 = vsel %vm358_vm6, %v5448_v48, %v355_v59  ;;  %v362_v2 = vmul.f32 %v5450_v27, %v361_v60 }
 0x200   :  { %v410_v3 = vmul.f32 %v359_v0, %v5961_v44  ;;  %v540_v44 = vpop.permute.xlu0 %539 }
 0x201   :  { %v363_v57 = vmul.f32 0.5, %v362_v2 }
 0x202   :  { %v419_v10 = vmul.f32 %v5910_v20, %v410_v3 }
 0x203   :  { %v364_v5 = vsub.f32 1.5, %v363_v57 }
 0x204   :  { %v428_v18 = vadd.f32 %v6045_v36, %v419_v10 }
 0x205   :  { %v365_v11 = vmul.f32 %v5450_v27, %v364_v5 }
 0x206   :  { %v440_v24 = vpack.c.bf16 %v428_v18, %v428_v18 }
 0x207   :  { %v369_v12 = vsel %vm368_vm9, %v5450_v27, %v365_v11 }
 0x208   :  { %v411_v62 = vmul.f32 %v369_v12, %v5971_v53  ;;  %v132_v53 = vpop.xlane.xlu2 %131  ;;  %v467_v29 = vunpack.c.l.b16 %v440_v24  ;;  %v6074_v31 = vpop.permute.xlu0 %535 }
 0x209   :  { %v6065_v19 = vpop.permute.xlu1 %541 }
 0x20a   :  { %5426 = vmatpush.bf16.msra.mxu3 %v6065_v19  ;;  %v553_v54 = vsel %vm551_vm3, %v540_v44, %v6065_v19  ;;  %v420_v14 = vmul.f32 %v5910_v20, %v411_v62 }
 0x20b   :  { %584 = vmatpush.bf16.msra.mxu2 %v553_v54 }
 0x20c   :  { %140 = vadd.xlane.f32.xlu1 %v139_v22  ;;  %v429_v9 = vadd.f32 %v6045_v36, %v420_v14 }
 0x20e   :  { %v441_v25 = vpack.c.bf16 %v429_v9, %v429_v9  ;;  %v146_v9 = vmul.f32 %v132_v53, %v5866_v52 }
 0x210   :  { %v468_v63 = vunpack.c.l.b16 %v441_v25  ;;  %v328_v32 = vpop.xlane.xlu2 %327 }
 0x211   :  { %v340_v37 = vmul.f32 %v328_v32, %v5866_v52  ;;  %v337_v34 = vpop.xlane.xlu0 %336  ;;  %v152_v32 = vadd.f32 1e-05, %v146_v9 }
 0x212   :  { %v473_v30 = vpack.c.b16 %v468_v63, %v467_v29  ;;  %v343_v35 = vmul.f32 %v337_v34, %v5866_v52 }
 0x213   :  { %v346_v6 = vadd.f32 1e-05, %v340_v37 }
 0x214   :  { %476 = vrot.lane.b32.xlu0 %v473_v30, %s5750_s8  ;;  %v349_v38 = vadd.f32 1e-05, %v343_v35 }
 0x215   :  { %5451 = vrsqrt.f32 %v346_v6  ;;  %vm376_vm11 = vweird.f32 %v346_v6 }
 0x216   :  { %5453 = vrsqrt.f32 %v349_v38  ;;  %vm406_vm14 = vweird.f32 %v349_v38 }
 0x21b   :  { %v5452_v40 = vpop.eup %5451 }
 0x21c   :  { %v371_v41 = vmul.f32 %v5452_v40, %v346_v6  ;;  %v5454_v43 = vpop.eup %5453  ;;  %vm377_vm10 = vweird.f32 %v5452_v40  ;;  %v145_v6 = vmul.f32 %v5988_v1, %v5866_v52 }
 0x21d   :  { %v401_v48 = vmul.f32 %v5454_v43, %v349_v38  ;;  %vm378_vm12 = vmor %vm376_vm11, %vm377_vm10  ;;  %vm407_vm13 = vweird.f32 %v5454_v43  ;;  %vm173_vm10 = vweird.f32 %v152_v32 }
 0x21e   :  { %v372_v42 = vmul.f32 %v5452_v40, %v371_v41  ;;  %vm408_vm2 = vmor %vm406_vm14, %vm407_vm13 }
 0x21f   :  { %v402_v56 = vmul.f32 %v5454_v43, %v401_v48 }
 0x220   :  { %v373_v46 = vmul.f32 0.5, %v372_v42 }
 0x221   :  { %v403_v59 = vmul.f32 0.5, %v402_v56 }
 0x222   :  { %v374_v45 = vsub.f32 1.5, %v373_v46 }
 0x223   :  { %v404_v57 = vsub.f32 1.5, %v403_v59 }
 0x224   :  { %v375_v27 = vmul.f32 %v5452_v40, %v374_v45 }
 0x225   :  { %v405_v12 = vmul.f32 %v5454_v43, %v404_v57 }
 0x226   :  { %v379_v3 = vsel %vm378_vm12, %v5452_v40, %v375_v27 }
 0x227   :  { %v412_v11 = vmul.f32 %v379_v3, %v5981_v61  ;;  %v409_v54 = vsel %vm408_vm2, %v5454_v43, %v405_v12 }
 0x228   :  { %v415_v63 = vmul.f32 %v409_v54, %v5999_v8  ;;  %v151_v8 = vadd.f32 1e-05, %v145_v6 }
 0x229   :  { %v421_v44 = vmul.f32 %v5910_v20, %v412_v11  ;;  %v499_v11 = vld [vmem:[%s8582_s4 + $0x1] sm:$0x3] }
 0x22a   :  { %v424_v38 = vmul.f32 %v5910_v20, %v415_v63  ;;  %v501_v12 = vperm.slane %v499_v11, 0  ;;  %vm163_vm13 = vweird.f32 %v151_v8  ;;  %v502_v54 = vperm.slane %v499_v11, 1 }
 0x22b   :  { %v430_v29 = vadd.f32 %v6045_v36, %v421_v44 }
 0x22c   :  { %v433_v1 = vadd.f32 %v6045_v36, %v424_v38 }
 0x22d   :  { %v442_v35 = vpack.c.bf16 %v430_v29, %v430_v29 }
 0x22f   :  { %v469_v42 = vunpack.c.l.b16 %v442_v35 }
 0x234   :  { %v331_v49 = vpop.xlane.xlu1 %330 }
 0x235   :  { %v341_v51 = vmul.f32 %v331_v49, %v5866_v52 }
 0x237   :  { %v347_v55 = vadd.f32 1e-05, %v341_v51 }
 0x239   :  { %5455 = vrsqrt.f32 %v347_v55  ;;  %vm386_vm4 = vweird.f32 %v347_v55 }
 0x23c   :  { %v334_v60 = vpop.xlane.xlu1 %333 }
 0x23d   :  { %v342_v50 = vmul.f32 %v334_v60, %v5866_v52 }
 0x23f   :  { %v5456_v0 = vpop.eup %5455  ;;  %v348_v2 = vadd.f32 1e-05, %v342_v50 }
 0x240   :  { %v381_v5 = vmul.f32 %v5456_v0, %v347_v55  ;;  %vm387_vm15 = vweird.f32 %v5456_v0 }
 0x241   :  { %5457 = vrsqrt.f32 %v348_v2  ;;  %vm388_vm5 = vmor %vm386_vm4, %vm387_vm15  ;;  %vm396_vm7 = vweird.f32 %v348_v2 }
 0x242   :  { %v382_v10 = vmul.f32 %v5456_v0, %v381_v5  ;;  %5459 = vrsqrt.f32 %v152_v32 }
 0x243   :  { %5461 = vrsqrt.f32 %v151_v8 }
 0x244   :  { %v383_v13 = vmul.f32 0.5, %v382_v10 }
 0x246   :  { %v384_v62 = vsub.f32 1.5, %v383_v13 }
 0x247   :  { %v5458_v18 = vpop.eup %5457 }
 0x248   :  { %v385_v14 = vmul.f32 %v5456_v0, %v384_v62  ;;  %v391_v22 = vmul.f32 %v5458_v18, %v348_v2  ;;  %vm397_vm6 = vweird.f32 %v5458_v18  ;;  %v5460_v45 = vpop.eup %5459 }
 0x249   :  { %vm398_vm8 = vmor %vm396_vm7, %vm397_vm6  ;;  %v168_v59 = vmul.f32 %v5460_v45, %v152_v32  ;;  %v5462_v50 = vpop.eup %5461  ;;  %vm174_vm9 = vweird.f32 %v5460_v45  ;;  %v147_v32 = vmul.f32 %v6006_v16, %v5866_v52 }
 0x24a   :  { %v389_v24 = vsel %vm388_vm5, %v5456_v0, %v385_v14  ;;  %v392_v25 = vmul.f32 %v5458_v18, %v391_v22  ;;  %v158_v2 = vmul.f32 %v5462_v50, %v151_v8  ;;  %vm175_vm11 = vmor %vm173_vm10, %vm174_vm9  ;;  %vm164_vm12 = vweird.f32 %v5462_v50  ;;  %v6109_v14 = vpop.permute.xlu2 %232 }
 0x24b   :  { %v413_v61 = vmul.f32 %v389_v24, %v6017_v23  ;;  %vm165_vm14 = vmor %vm163_vm13, %vm164_vm12  ;;  %v153_v6 = vadd.f32 1e-05, %v147_v32 }
 0x24c   :  { %v393_v30 = vmul.f32 0.5, %v392_v25  ;;  %v159_v3 = vmul.f32 %v5462_v50, %v158_v2 }
 0x24d   :  { %v422_v37 = vmul.f32 %v5910_v20, %v413_v61  ;;  %5463 = vrsqrt.f32 %v153_v6  ;;  %vm183_vm4 = vweird.f32 %v153_v6 }
 0x24e   :  { %v394_v34 = vsub.f32 1.5, %v393_v30 }
 0x24f   :  { %v431_v53 = vadd.f32 %v6045_v36, %v422_v37  ;;  %v148_v37 = vmul.f32 %v6008_v17, %v5866_v52 }
 0x250   :  { %v395_v40 = vmul.f32 %v5458_v18, %v394_v34 }
 0x251   :  { %v443_v23 = vpack.c.bf16 %v431_v53, %v431_v53  ;;  %v154_v34 = vadd.f32 1e-05, %v148_v37 }
 0x252   :  { %v399_v41 = vsel %vm398_vm8, %v5458_v18, %v395_v40  ;;  %v144_v35 = vpop.xlane.xlu2 %143 }
 0x253   :  { %v470_v43 = vunpack.c.l.b16 %v443_v23  ;;  %v414_v46 = vmul.f32 %v399_v41, %v6027_v28  ;;  %v445_v28 = vpack.c.bf16 %v433_v1, %v433_v1  ;;  %5465 = vrsqrt.f32 %v154_v34  ;;  %v5464_v40 = vpop.eup %5463 }
 0x254   :  { %v538_v48 = vpop.permute.xlu1 %537  ;;  %v150_v8 = vmul.f32 %v144_v35, %v5866_v52  ;;  %vm184_vm15 = vweird.f32 %v5464_v40  ;;  %vm193_vm6 = vweird.f32 %v154_v34 }
 0x255   :  { %v552_v49 = vsel %vm551_vm3, %v6074_v31, %v538_v48  ;;  %v474_v51 = vpack.c.b16 %v470_v43, %v469_v42  ;;  %v423_v55 = vmul.f32 %v5910_v20, %v414_v46  ;;  %5427 = vmatpush.bf16.msra.mxu3 %v538_v48  ;;  %v472_v31 = vunpack.c.l.b16 %v445_v28  ;;  %vm185_vm5 = vmor %vm183_vm4, %vm184_vm15 }
 0x256   :  { %585 = vmatpush.bf16.msra.mxu2 %v552_v49  ;;  %v169_v20 = vmul.f32 %v5460_v45, %v168_v59  ;;  %v178_v42 = vmul.f32 %v5464_v40, %v153_v6  ;;  %v156_v46 = vadd.f32 1e-05, %v150_v8  ;;  %vm777_vm15 = vcmask 64512  }
 0x257   :  { %478 = vrot.lane.b32.xlu0 %v474_v51, %s5750_s8  ;;  %v432_v56 = vadd.f32 %v6045_v36, %v423_v55  ;;  %v160_v36 = vmul.f32 0.5, %v159_v3 }
 0x258   :  { %v179_v16 = vmul.f32 %v5464_v40, %v178_v42  ;;  %vm213_vm12 = vweird.f32 %v156_v46 }
 0x259   :  { %v444_v27 = vpack.c.bf16 %v432_v56, %v432_v56  ;;  %v161_v10 = vsub.f32 1.5, %v160_v36  ;;  %v5466_v23 = vpop.eup %5465 }
 0x25a   :  { %606 = vmatpush.bf16.msrb.mxu2 %v6011_v21  ;;  %v170_v21 = vmul.f32 0.5, %v169_v20  ;;  %v188_v43 = vmul.f32 %v5466_v23, %v154_v34  ;;  %v180_v17 = vmul.f32 0.5, %v179_v16  ;;  %vm194_vm2 = vweird.f32 %v5466_v23 }
 0x25b   :  { %v471_v60 = vunpack.c.l.b16 %v444_v27  ;;  %vm195_vm7 = vmor %vm193_vm6, %vm194_vm2 }
 0x25c   :  { %v171_v57 = vsub.f32 1.5, %v170_v21  ;;  %v189_v1 = vmul.f32 %v5466_v23, %v188_v43  ;;  %v181_v55 = vsub.f32 1.5, %v180_v17 }
 0x25d   :  { %v475_v0 = vpack.c.b16 %v472_v31, %v471_v60 }
 0x25e   :  { %607 = vmatpush.bf16.msrb.mxu2 %v6036_v33  ;;  %v172_v5 = vmul.f32 %v5460_v45, %v171_v57  ;;  %v182_v27 = vmul.f32 %v5464_v40, %v181_v55 }
 0x25f   :  { %480 = vrot.lane.b32.xlu0 %v475_v0, %s5750_s8 }
 0x260   :  { %v176_v33 = vsel %vm175_vm11, %v5460_v45, %v172_v5 }
 0x261   :  { %v218_v13 = vmul.f32 %v176_v33, %v5966_v47 }
 0x262   :  { %608 = vmatpush.bf16.msrb.mxu2 %v6065_v19  ;;  %v162_v19 = vmul.f32 %v5462_v50, %v161_v10 }
 0x263   :  { %v227_v18 = vmul.f32 %v6050_v39, %v218_v13 }
 0x264   :  { %v166_v62 = vsel %vm165_vm14, %v5462_v50, %v162_v19  ;;  %v186_v50 = vsel %vm185_vm5, %v5464_v40, %v182_v27  ;;  %vm859_vm14 = vcmask 1043456  }
 0x265   :  { %v217_v44 = vmul.f32 %v166_v62, %v5874_v58  ;;  %v6113_v9 = vadd.f32 %v6109_v14, %v227_v18  ;;  %v219_v21 = vmul.f32 %v186_v50, %v5890_v7 }
 0x266   :  { %609 = vmatpush.bf16.msrb.mxu2 %v538_v48  ;;  %v190_v48 = vmul.f32 0.5, %v189_v1 }
 0x267   :  { %564 = vrot.lane.b32.xlu0 %v501_v12, %s5752_s29  ;;  %v226_v22 = vmul.f32 %v6050_v39, %v217_v44  ;;  %v435_v24 = vpack.c.bf16 %v6113_v9, %v6113_v9  ;;  %v228_v36 = vmul.f32 %v6050_v39, %v219_v21 }
 0x268   :  { %v191_v45 = vsub.f32 1.5, %v190_v48 }
 0x269   :  { %v6117_v47 = vadd.f32 %v6109_v14, %v226_v22  ;;  %v453_v58 = vunpack.c.l.b16 %v435_v24  ;;  %v6139_v33 = vadd.f32 %v6109_v14, %v228_v36 }
 0x26a   :  { %v192_v59 = vmul.f32 %v5466_v23, %v191_v45 }
 0x26b   :  { %v434_v25 = vpack.c.bf16 %v6117_v47, %v6117_v47  ;;  %v436_v7 = vpack.c.bf16 %v6139_v33, %v6139_v33 }
 0x26c   :  { %v196_v0 = vsel %vm195_vm7, %v5466_v23, %v192_v59 }
 0x26d   :  { %v452_v61 = vunpack.c.l.b16 %v434_v25  ;;  %v220_v3 = vmul.f32 %v196_v0, %v5899_v15  ;;  %v454_v44 = vunpack.c.l.b16 %v436_v7 }
 0x26f   :  { %566 = vrot.lane.b32.xlu0 %v502_v54, %s5752_s29  ;;  %v458_v29 = vpack.c.b16 %v453_v58, %v452_v61  ;;  %v229_v5 = vmul.f32 %v6050_v39, %v220_v3 }
 0x271   :  { %v6142_v11 = vadd.f32 %v6109_v14, %v229_v5 }
 0x273   :  { %v437_v15 = vpack.c.bf16 %v6142_v11, %v6142_v11 }
 0x275   :  { %v455_v54 = vunpack.c.l.b16 %v437_v15 }
 0x277   :  { %v459_v25 = vpack.c.b16 %v455_v54, %v454_v44 }
 0x27f   :  { %v141_v53 = vpop.xlane.xlu1 %140 }
 0x280   :  { %v149_v38 = vmul.f32 %v141_v53, %v5866_v52 }
 0x282   :  { %v155_v41 = vadd.f32 1e-05, %v149_v38 }
 0x284   :  { %5467 = vrsqrt.f32 %v155_v41  ;;  %vm203_vm10 = vweird.f32 %v155_v41 }
 0x285   :  { %5469 = vrsqrt.f32 %v156_v46 }
 0x286   :  { %v477_v63 = vpop.permute.xlu0 %476 }
 0x287   :  { %v6124_v30 = vsel %vm83_vm1, %v458_v29, %v477_v63 }
 0x288   :  { %5190 = vmatmul.msk.bf16.vlgmr.msra.gmra.mxu2 %vm551_vm3, %v6124_v30 }
 0x28a   :  { %v5468_v49 = vpop.eup %5467 }
 0x28b   :  { %v5470_v51 = vpop.eup %5469  ;;  %v198_v56 = vmul.f32 %v5468_v49, %v155_v41  ;;  %vm204_vm8 = vweird.f32 %v5468_v49 }
 0x28c   :  { %v208_v28 = vmul.f32 %v5470_v51, %v156_v46  ;;  %vm214_vm9 = vweird.f32 %v5470_v51  ;;  %vm205_vm11 = vmor %vm203_vm10, %vm204_vm8 }
 0x28d   :  { %v199_v60 = vmul.f32 %v5468_v49, %v198_v56  ;;  %vm215_vm13 = vmor %vm213_vm12, %vm214_vm9 }
 0x28e   :  { %v209_v31 = vmul.f32 %v5470_v51, %v208_v28 }
 0x28f   :  { %v200_v20 = vmul.f32 0.5, %v199_v60 }
 0x290   :  { %v210_v2 = vmul.f32 0.5, %v209_v31 }
 0x291   :  { %v201_v57 = vsub.f32 1.5, %v200_v20 }
 0x292   :  { %v211_v10 = vsub.f32 1.5, %v210_v2 }
 0x293   :  { %v202_v12 = vmul.f32 %v5468_v49, %v201_v57 }
 0x294   :  { %v212_v19 = vmul.f32 %v5470_v51, %v211_v10 }
 0x295   :  { %v206_v13 = vsel %vm205_vm11, %v5468_v49, %v202_v12 }
 0x296   :  { %v216_v62 = vsel %vm215_vm13, %v5470_v51, %v212_v19  ;;  %v221_v18 = vmul.f32 %v206_v13, %v6058_v4 }
 0x297   :  { %v222_v22 = vmul.f32 %v216_v62, %v6024_v26 }
 0x298   :  { %v230_v24 = vmul.f32 %v6050_v39, %v221_v18 }
 0x299   :  { %v231_v61 = vmul.f32 %v6050_v39, %v222_v22 }
 0x29a   :  { %v6156_v63 = vadd.f32 %v6109_v14, %v230_v24 }
 0x29b   :  { %v6159_v4 = vadd.f32 %v6109_v14, %v231_v61 }
 0x29c   :  { %v438_v26 = vpack.c.bf16 %v6156_v63, %v6156_v63 }
 0x29d   :  { %v439_v32 = vpack.c.bf16 %v6159_v4, %v6159_v4 }
 0x29e   :  { %v456_v37 = vunpack.c.l.b16 %v438_v26 }
 0x29f   :  { %v457_v39 = vunpack.c.l.b16 %v439_v32 }
 0x2a1   :  { %v460_v34 = vpack.c.b16 %v457_v39, %v456_v37 }
 0x2c9   :  { %v479_v58 = vpop.permute.xlu0 %478 }
 0x2ca   :  { %v487_v29 = vsel %vm83_vm1, %v459_v25, %v479_v58 }
 0x2cb   :  { %5191 = vmatmul.msk.bf16.gmra.mxu2 %vm551_vm3, %v487_v29  ;;  %5194 = vmatmul.msk.bf16.vlgmr.msra.gmra.mxu3 %vm551_vm3, %v487_v29 }
 0x2d1   :  { %v481_v6 = vpop.permute.xlu0 %480 }
 0x2d2   :  { %v490_v53 = vsel %vm83_vm1, %v460_v34, %v481_v6 }
 0x2d9   :  { %v565_v14 = vpop.permute.xlu0 %564 }
 0x2db   :  { %5192 = vmatmul.msk.bf16.gmra.mxu2 %vm551_vm3, %v490_v53  ;;  %5195 = vmatmul.msk.bf16.gmra.mxu3 %vm551_vm3, %v490_v53 }
 0x2e1   :  { %v6170_v35 = vpop.permute.xlu0 %566 }
 0x2e2   :  { %v569_v38 = vsel %vm551_vm3, %v565_v14, %v6170_v35 }
 0x2eb   :  { %5193 = vmatmul.msk.bf16.vlgmr.msrb.gmra.mxu2 %vm551_vm3, %v6124_v30 }
 0x30b   :  { %v587_v40 = vpop.f32.mrf.mxu2 }
 0x30c   :  { %v588_v23 = vadd.f32 %v587_v40, %v569_v38 }
 0x30e   :  { %v627_v8 = vpack.c.bf16 %v588_v23, %v588_v23 }
 0x310   :  { %v634_v41 = vunpack.c.l.b16 %v627_v8 }
 0x312   :  { %v6174_v42 = vpack.c.b16 %v634_v41, %v634_v41 }
 0x313   :  { %v589_v43 = vpop.f32.mrf.mxu2 }
 0x314   :  { %636 = vrot.lane.b32.xlu1 %v6174_v42, %s5752_s29  ;;  %v590_v1 = vadd.f32 %v589_v43, %v569_v38 }
 0x316   :  { %v6178_v48 = vpack.c.bf16 %v590_v1, %v590_v1 }
 0x318   :  { %v658_v45 = vunpack.c.l.b16 %v6178_v48 }
 0x31a   :  { %v6187_v59 = vpack.c.b16 %v658_v45, %v658_v45 }
 0x34e   :  { %v592_v46 = vpop.f32.mrf.mxu2  ;;  %v616_v12 = vpop.f32.mrf.mxu3 }
 0x34f   :  { %v593_v16 = vadd.f32 %v592_v46, %v569_v38  ;;  %v617_v40 = vadd.f32 %v616_v12, %v6170_v35 }
 0x351   :  { %v629_v30 = vpack.c.bf16 %v593_v16, %v593_v16  ;;  %v6229_v23 = vpack.c.bf16 %v617_v40, %v617_v40 }
 0x353   :  { %v682_v17 = vunpack.c.l.b16 %v629_v30  ;;  %v899_v43 = vsel %vm859_vm14, %v6229_v23, 0 }
 0x355   :  { %v6180_v49 = vpack.c.b16 %v682_v17, %v682_v17 }
 0x356   :  { %v594_v51 = vpop.f32.mrf.mxu2  ;;  %v618_v19 = vpop.f32.mrf.mxu3 }
 0x357   :  { %v595_v55 = vadd.f32 %v594_v51, %v569_v38  ;;  %684 = vrot.lane.b32.xlu0 %v6180_v49, %s5752_s29  ;;  %v619_v46 = vadd.f32 %v618_v19, %v6170_v35 }
 0x359   :  { %v630_v56 = vpack.c.bf16 %v595_v55, %v595_v55  ;;  %v6237_v16 = vpack.c.bf16 %v619_v46, %v619_v46 }
 0x35b   :  { %v706_v28 = vunpack.c.l.b16 %v630_v56  ;;  %v918_v17 = vsel %vm859_vm14, %v6237_v16, 0 }
 0x35d   :  { %v6185_v27 = vpack.c.b16 %v706_v28, %v706_v28 }
 0x35e   :  { %v597_v60 = vpop.f32.mrf.mxu2  ;;  %v621_v15 = vpop.f32.mrf.mxu3 }
 0x35f   :  { %v598_v31 = vadd.f32 %v597_v60, %v569_v38  ;;  %708 = vrot.lane.b32.xlu2 %v6185_v27, %s5752_s29  ;;  %660 = vrot.lane.b32.xlu0 %v6187_v59, %s5752_s29  ;;  %v622_v37 = vadd.f32 %v621_v15, %v6170_v35 }
 0x361   :  { %v631_v50 = vpack.c.bf16 %v598_v31, %v598_v31  ;;  %v6222_v34 = vpack.c.bf16 %v622_v37, %v622_v37 }
 0x363   :  { %v730_v0 = vunpack.c.l.b16 %v631_v50  ;;  %v937_v14 = vsel %vm859_vm14, %v6222_v34, 0 }
 0x365   :  { %v6193_v20 = vpack.c.b16 %v730_v0, %v730_v0 }
 0x366   :  { %v599_v2 = vpop.f32.mrf.mxu2  ;;  %v623_v18 = vpop.f32.mrf.mxu3 }
 0x367   :  { %v600_v21 = vadd.f32 %v599_v2, %v569_v38  ;;  %732 = vrot.lane.b32.xlu0 %v6193_v20, %s5752_s29  ;;  %v624_v22 = vadd.f32 %v623_v18, %v6170_v35 }
 0x369   :  { %v632_v3 = vpack.c.bf16 %v600_v21, %v600_v21  ;;  %v6210_v58 = vpack.c.bf16 %v624_v22, %v624_v22 }
 0x36b   :  { %v754_v57 = vunpack.c.l.b16 %v632_v3  ;;  %v956_v61 = vsel %vm859_vm14, %v6210_v58, 0 }
 0x36d   :  { %v6197_v36 = vpack.c.b16 %v754_v57, %v754_v57 }
 0x36e   :  { %v611_v7 = vpop.f32.mrf.mxu2 }
 0x36f   :  { %756 = vrot.lane.b32.xlu0 %v6197_v36, %s5752_s29  ;;  %v612_v29 = vadd.f32 %v611_v7, %v6170_v35 }
 0x371   :  { %v6216_v26 = vpack.c.bf16 %v612_v29, %v612_v29 }
 0x373   :  { %v861_v6 = vsel %vm859_vm14, %v6216_v26, 0 }
 0x376   :  { %v613_v13 = vpop.f32.mrf.mxu2 }
 0x377   :  { %v614_v62 = vadd.f32 %v613_v13, %v6170_v35 }
 0x379   :  { %v6204_v44 = vpack.c.bf16 %v614_v62, %v614_v62 }
 0x37b   :  { %v880_v25 = vsel %vm859_vm14, %v6204_v44, 0 }
 0x386   :  { %v637_v5 = vpop.permute.xlu1 %636 }
 0x387   :  { %v642_v10 = vsel %vm83_vm1, %v637_v5, 0 }
 0x388   :  { %651 = vmatpush.bf16.xpose.msrb.mxu0 %v642_v10 }
 0x38f   :  { %5196 = vmatmul.msk.bf16.vlgmr.msrb.gmra.mxu0 %vm83_vm1, %v627_v8 }
 0x3b9   :  { %v709_v54 = vpop.permute.xlu2 %708 }
 0x3ba   :  { %v714_v24 = vsel %vm83_vm1, %v709_v54, 0 }
 0x3bb   :  { %723 = vmatpush.bf16.xpose.msrb.mxu3 %v714_v24 }
 0x3c2   :  { %5199 = vmatmul.msk.bf16.vlgmr.msrb.gmra.mxu3 %vm83_vm1, %v630_v56 }
 0x3c3   :  { %889 = vmatpush.bf16.msra.mxu3 %v880_v25 }
 0x3c7   :  { %965 = vmatpush.bf16.msrb.mxu3 %v956_v61 }
 0x3c9   :  { %v685_v32 = vpop.permute.xlu0 %684 }
 0x3ca   :  { %v690_v39 = vsel %vm83_vm1, %v685_v32, 0 }
 0x3cb   :  { %699 = vmatpush.bf16.xpose.msra.mxu2 %v690_v39 }
 0x3d1   :  { %v661_v53 = vpop.permute.xlu0 %660 }
 0x3d2   :  { %v666_v38 = vsel %vm83_vm1, %v661_v53, 0  ;;  %5198 = vmatmul.msk.bf16.vlgmr.msra.gmra.mxu2 %vm83_vm1, %v629_v30 }
 0x3d3   :  { %870 = vmatpush.bf16.msrb.mxu2 %v861_v6  ;;  %675 = vmatpush.bf16.xpose.msra.mxu1 %v666_v38 }
 0x3d7   :  { %946 = vmatpush.bf16.msra.mxu2 %v937_v14 }
 0x3d9   :  { %v733_v8 = vpop.permute.xlu0 %732 }
 0x3da   :  { %v738_v41 = vsel %vm83_vm1, %v733_v8, 0  ;;  %5197 = vmatmul.msk.bf16.vlgmr.msra.gmra.mxu1 %vm83_vm1, %v6178_v48 }
 0x3db   :  { %747 = vmatpush.bf16.xpose.msra.mxu0 %v738_v41 }
 0x3e1   :  { %v757_v1 = vpop.permute.xlu0 %756 }
 0x3e2   :  { %v762_v30 = vsel %vm83_vm1, %v757_v1, 0  ;;  %5200 = vmatmul.msk.bf16.vlgmr.msra.gmra.mxu0 %vm83_vm1, %v631_v50 }
 0x3e3   :  { %908 = vmatpush.bf16.msrb.mxu0 %v899_v43  ;;  %771 = vmatpush.bf16.xpose.msrb.mxu1 %v762_v30 }
 0x3ea   :  { %5201 = vmatmul.msk.bf16.vlgmr.msrb.gmra.mxu1 %vm83_vm1, %v632_v3 }
 0x3eb   :  { %927 = vmatpush.bf16.msra.mxu1 %v918_v17 }
 0x40c   :  { %v653_v48 = vpop.f32.mrf.mxu0 }
 0x40d   :  { %v778_v35 = vsel %vm777_vm15, %v653_v48, -inf }
 0x40e   :  { %779 = vmax.xlane.f32.xlu2 %v778_v35 }
 0x414   :  { %v655_v51 = vpop.f32.mrf.mxu0 }
 0x445   :  { %v725_v55 = vpop.f32.mrf.mxu3 }
 0x446   :  { %v787_v45 = vsel %vm777_vm15, %v725_v55, -inf }
 0x447   :  { %788 = vmax.xlane.f32.xlu2 %v787_v45 }
 0x44d   :  { %v727_v56 = vpop.f32.mrf.mxu3 }
 0x455   :  { %v701_v28 = vpop.f32.mrf.mxu2 }
 0x456   :  { %v784_v60 = vsel %vm777_vm15, %v701_v28, -inf }
 0x457   :  { %v677_v31 = vpop.f32.mrf.mxu1  ;;  %785 = vmax.xlane.f32.xlu0 %v784_v60 }
 0x458   :  { %v781_v50 = vsel %vm777_vm15, %v677_v31, -inf }
 0x459   :  { %782 = vmax.xlane.f32.xlu1 %v781_v50 }
 0x45d   :  { %v703_v0 = vpop.f32.mrf.mxu2 }
 0x45e   :  { %v1338_v0 = vunpack.c.l.b16 %v6216_v26 }
 0x45f   :  { %v679_v2 = vpop.f32.mrf.mxu1  ;;  %v6248_v21 = vpop.f32.mrf.mxu0  ;;  %1129 = vrot.lane.b32.xlu2 %v6174_v42, %s5750_s8 }
 0x460   :  { %v790_v62 = vsel %vm777_vm15, %v6248_v21, -inf }
 0x467   :  { %v751_v3 = vpop.f32.mrf.mxu0  ;;  %v773_v57 = vpop.f32.mrf.mxu1 }
 0x468   :  { %v793_v13 = vsel %vm777_vm15, %v773_v57, -inf }
 0x46b   :  { %1127 = vrot.lane.b32.xlu0 %v6174_v42, %s5749_s30 }
 0x46f   :  { %v775_v5 = vpop.f32.mrf.mxu1 }
 0x472   :  { %1152 = vrot.lane.b32.xlu1 %v6187_v59, %s5750_s8 }
 0x481   :  { %v780_v10 = vpop.xlane.xlu2 %779 }
 0x482   :  { %v796_v12 = vsub.f32 %v653_v48, %v780_v10 }
 0x484   :  { %v802_v19 = vmul.f32 1.442695, %v796_v12 }
 0x486   :  { %5471 = vpow2.f32 %v802_v19 }
 0x48c   :  { %v5472_v7 = vpop.eup %5471 }
 0x48d   :  { %v814_v15 = vsel %vm777_vm15, %v5472_v7, 0.0 }
 0x48e   :  { %815 = vadd.xlane.f32.xlu2 %v814_v15 }
 0x495   :  { %794 = vmax.xlane.f32.xlu0 %v793_v13 }
 0x49c   :  { %791 = vmax.xlane.f32.xlu1 %v790_v62 }
 0x4ba   :  { %v789_v42 = vpop.xlane.xlu2 %788 }
 0x4bb   :  { %v799_v18 = vsub.f32 %v725_v55, %v789_v42 }
 0x4bd   :  { %v808_v54 = vmul.f32 1.442695, %v799_v18 }
 0x4bf   :  { %5473 = vpow2.f32 %v808_v54 }
 0x4c2   :  { %v1130_v22 = vpop.permute.xlu2 %1129 }
 0x4c3   :  { %v1135_v24 = vsel %vm83_vm1, %v1130_v22, 0 }
 0x4c4   :  { %1144 = vmatpush.bf16.xpose.msra.mxu0 %v1135_v24 }
 0x4c5   :  { %v5474_v25 = vpop.eup %5473 }
 0x4c6   :  { %v823_v61 = vsel %vm777_vm15, %v5474_v25, 0.0 }
 0x4c7   :  { %824 = vadd.xlane.f32.xlu2 %v823_v61 }
 0x4ca   :  { %v786_v29 = vpop.xlane.xlu0 %785 }
 0x4cb   :  { %v798_v32 = vsub.f32 %v701_v28, %v786_v29 }
 0x4cc   :  { %v783_v37 = vpop.xlane.xlu1 %782 }
 0x4cd   :  { %v806_v39 = vmul.f32 1.442695, %v798_v32  ;;  %v797_v6 = vsub.f32 %v677_v31, %v783_v37 }
 0x4cf   :  { %5475 = vpow2.f32 %v806_v39  ;;  %v804_v53 = vmul.f32 1.442695, %v797_v6 }
 0x4d1   :  { %5477 = vpow2.f32 %v804_v53 }
 0x4d5   :  { %v5476_v14 = vpop.eup %5475 }
 0x4d6   :  { %v820_v38 = vsel %vm777_vm15, %v5476_v14, 0.0 }
 0x4d7   :  { %v5478_v40 = vpop.eup %5477  ;;  %821 = vadd.xlane.f32.xlu0 %v820_v38 }
 0x4d8   :  { %v817_v8 = vsel %vm777_vm15, %v5478_v40, 0.0 }
 0x4d9   :  { %818 = vadd.xlane.f32.xlu1 %v817_v8 }
 0x4dd   :  { %v1128_v46 = vpop.permute.xlu0 %1127 }
 0x4df   :  { %1150 = vrot.lane.b32.xlu2 %v6187_v59, %s5749_s30 }
 0x4e4   :  { %v1153_v41 = vpop.permute.xlu1 %1152 }
 0x4e5   :  { %v1158_v43 = vsel %vm83_vm1, %v1153_v41, 0 }
 0x4e6   :  { %1167 = vmatpush.bf16.xpose.msrb.mxu1 %v1158_v43 }
 0x4e7   :  { %1173 = vrot.lane.b32.xlu2 %v6180_v49, %s5749_s30 }
 0x4eb   :  { %1175 = vrot.lane.b32.xlu0 %v6180_v49, %s5750_s8 }
 0x4ef   :  { %1244 = vrot.lane.b32.xlu2 %v6197_v36, %s5750_s8 }
 0x4f2   :  { %1198 = vrot.lane.b32.xlu1 %v6185_v27, %s5750_s8 }
 0x501   :  { %v816_v1 = vpop.xlane.xlu2 %815 }
 0x502   :  { %5479 = vrcp.f32 %v816_v1 }
 0x508   :  { %v5480_v59 = vpop.eup %5479  ;;  %v795_v30 = vpop.xlane.xlu0 %794 }
 0x509   :  { %v838_v17 = vmul.f32 %v5480_v59, %v5472_v7  ;;  %v801_v48 = vsub.f32 %v773_v57, %v795_v30  ;;  %v1339_v57 = vpack.c.b16 %v1338_v0, %v1338_v0 }
 0x50b   :  { %v844_v35 = vpack.c.bf16 %v838_v17, %v838_v17  ;;  %v812_v51 = vmul.f32 1.442695, %v801_v48 }
 0x50d   :  { %5481 = vpow2.f32 %v812_v51  ;;  %5202 = vmatmul.msk.bf16.vlgmr.msrb.gmra.mxu2 %vm777_vm15, %v844_v35 }
 0x50f   :  { %v792_v55 = vpop.xlane.xlu1 %791 }
 0x510   :  { %v800_v49 = vsub.f32 %v6248_v21, %v792_v55 }
 0x512   :  { %v810_v45 = vmul.f32 1.442695, %v800_v49 }
 0x513   :  { %v5482_v56 = vpop.eup %5481 }
 0x514   :  { %5483 = vpow2.f32 %v810_v45  ;;  %v829_v28 = vsel %vm777_vm15, %v5482_v56, 0.0 }
 0x515   :  { %830 = vadd.xlane.f32.xlu0 %v829_v28 }
 0x51a   :  { %v5484_v60 = vpop.eup %5483 }
 0x51b   :  { %v826_v31 = vsel %vm777_vm15, %v5484_v60, 0.0 }
 0x51c   :  { %827 = vadd.xlane.f32.xlu1 %v826_v31 }
 0x529   :  { %1196 = vrot.lane.b32.xlu0 %v6185_v27, %s5749_s30 }
 0x531   :  { %1219 = vrot.lane.b32.xlu0 %v6193_v20, %s5749_s30 }
 0x535   :  { %1221 = vrot.lane.b32.xlu1 %v6193_v20, %s5750_s8 }
 0x53a   :  { %v825_v50 = vpop.xlane.xlu2 %824 }
 0x53b   :  { %5485 = vrcp.f32 %v825_v50 }
 0x53d   :  { %1242 = vrot.lane.b32.xlu1 %v6197_v36, %s5749_s30 }
 0x541   :  { %v5486_v2 = vpop.eup %5485 }
 0x542   :  { %v841_v21 = vmul.f32 %v5486_v2, %v5474_v25  ;;  %v1151_v3 = vpop.permute.xlu2 %1150 }
 0x544   :  { %v847_v5 = vpack.c.bf16 %v841_v21, %v841_v21 }
 0x545   :  { %1340 = vrot.lane.b32.xlu1 %v1339_v57, %s5749_s30 }
 0x546   :  { %5205 = vmatmul.msk.bf16.vlgmr.msra.gmra.mxu1 %vm777_vm15, %v847_v5 }
 0x54a   :  { %v822_v27 = vpop.xlane.xlu0 %821  ;;  %v1174_v10 = vpop.permute.xlu2 %1173 }
 0x54b   :  { %5487 = vrcp.f32 %v822_v27 }
 0x54c   :  { %v819_v20 = vpop.xlane.xlu1 %818 }
 0x54d   :  { %5489 = vrcp.f32 %v819_v20 }
 0x551   :  { %v5488_v12 = vpop.eup %5487 }
 0x552   :  { %v840_v19 = vmul.f32 %v5488_v12, %v5476_v14  ;;  %v1245_v7 = vpop.permute.xlu2 %1244 }
 0x553   :  { %v5490_v36 = vpop.eup %5489  ;;  %v1250_v26 = vsel %vm83_vm1, %v1245_v7, 0 }
 0x554   :  { %v846_v15 = vpack.c.bf16 %v840_v19, %v840_v19  ;;  %v839_v13 = vmul.f32 %v5490_v36, %v5478_v40  ;;  %1259 = vmatpush.bf16.xpose.msra.mxu1 %v1250_v26 }
 0x556   :  { %v845_v62 = vpack.c.bf16 %v839_v13, %v839_v13  ;;  %5204 = vmatmul.msk.bf16.vlgmr.msrb.gmra.mxu0 %vm777_vm15, %v846_v15  ;;  %5209 = vmatmul.msk.bf16.vlgmr.msrb.gmra.mxu1 %vm83_vm1, %v1151_v3  ;;  %v1386_v15 = vunpack.c.l.b16 %v6229_v23 }
 0x558   :  { %5203 = vmatmul.msk.bf16.vlgmr.msra.gmra.mxu3 %vm777_vm15, %v845_v62  ;;  %v1387_v13 = vpack.c.b16 %v1386_v15, %v1386_v15  ;;  %v1410_v62 = vunpack.c.l.b16 %v6237_v16  ;;  %v1362_v16 = vunpack.c.l.b16 %v6204_v44 }
 0x55d   :  { %v1176_v42 = vpop.permute.xlu0 %1175 }
 0x55e   :  { %v1181_v18 = vsel %vm83_vm1, %v1176_v42, 0  ;;  %v1411_v42 = vpack.c.b16 %v1410_v62, %v1410_v62 }
 0x55f   :  { %1190 = vmatpush.bf16.xpose.msrb.mxu2 %v1181_v18 }
 0x564   :  { %v1199_v54 = vpop.permute.xlu1 %1198 }
 0x565   :  { %v1204_v22 = vsel %vm83_vm1, %v1199_v54, 0 }
 0x566   :  { %5208 = vmatmul.msk.bf16.vlgmr.msra.gmra.mxu0 %vm83_vm1, %v1128_v46  ;;  %1213 = vmatpush.bf16.xpose.msra.mxu3 %v1204_v22 }
 0x588   :  { %v831_v24 = vpop.xlane.xlu0 %830 }
 0x589   :  { %5491 = vrcp.f32 %v831_v24 }
 0x58f   :  { %v5492_v25 = vpop.eup %5491  ;;  %v828_v61 = vpop.xlane.xlu1 %827 }
 0x590   :  { %v843_v29 = vmul.f32 %v5492_v25, %v5482_v56  ;;  %5493 = vrcp.f32 %v828_v61  ;;  %v6297_v32 = vpop.f32.mrf.mxu2 }
 0x592   :  { %v849_v37 = vpack.c.bf16 %v843_v29, %v843_v29 }
 0x594   :  { %5207 = vmatmul.msk.bf16.vlgmr.msrb.gmra.mxu3 %vm777_vm15, %v849_v37 }
 0x596   :  { %v5494_v39 = vpop.eup %5493 }
 0x597   :  { %v842_v6 = vmul.f32 %v5494_v39, %v5484_v60 }
 0x598   :  { %v874_v53 = vpop.f32.mrf.mxu2 }
 0x599   :  { %v848_v14 = vpack.c.bf16 %v842_v6, %v842_v6  ;;  %v1363_v6 = vpack.c.b16 %v1362_v16, %v1362_v16 }
 0x59b   :  { %5206 = vmatmul.msk.bf16.vlgmr.msra.gmra.mxu2 %vm777_vm15, %v848_v14  ;;  %v1197_v38 = vpop.permute.xlu0 %1196 }
 0x5a3   :  { %v1220_v41 = vpop.permute.xlu0 %1219 }
 0x5a4   :  { %5211 = vmatmul.msk.bf16.vlgmr.msra.gmra.mxu3 %vm83_vm1, %v1197_v38 }
 0x5a7   :  { %v1222_v40 = vpop.permute.xlu1 %1221 }
 0x5a8   :  { %v1227_v8 = vsel %vm83_vm1, %v1222_v40, 0 }
 0x5a9   :  { %1236 = vmatpush.bf16.xpose.msrb.mxu0 %v1227_v8 }
 0x5ab   :  { %5210 = vmatmul.msk.bf16.vlgmr.msrb.gmra.mxu2 %vm83_vm1, %v1174_v10 }
 0x5af   :  { %v1243_v43 = vpop.permute.xlu1 %1242 }
 0x5b0   :  { %5212 = vmatmul.msk.bf16.vlgmr.msrb.gmra.mxu0 %vm83_vm1, %v1220_v41  ;;  %5213 = vmatmul.msk.bf16.vlgmr.msra.gmra.mxu1 %vm83_vm1, %v1243_v43 }
 0x5b7   :  { %v1341_v46 = vpop.permute.xlu1 %1340 }
 0x5b8   :  { %v1346_v1 = vsel %vm859_vm14, %v1341_v46, 0 }
 0x5b9   :  { %1355 = vmatpush.bf16.msra.mxu2 %v1346_v1 }
 0x5c3   :  { %v6307_v59 = vpop.f32.mrf.mxu1 }
 0x5cb   :  { %v931_v30 = vpop.f32.mrf.mxu1 }
 0x5d3   :  { %v6309_v17 = vpop.f32.mrf.mxu0  ;;  %v1169_v48 = vpop.f32.mrf.mxu1 }
 0x5d4   :  { %v1268_v35 = vsel %vm777_vm15, %v1169_v48, -inf }
 0x5d5   :  { %1269 = vmax.xlane.f32.xlu0 %v1268_v35 }
 0x5db   :  { %v6312_v51 = vpop.f32.mrf.mxu3  ;;  %v912_v55 = vpop.f32.mrf.mxu0 }
 0x5dc   :  { %v1171_v49 = vpop.f32.mrf.mxu1 }
 0x5e3   :  { %v893_v45 = vpop.f32.mrf.mxu3  ;;  %v1146_v56 = vpop.f32.mrf.mxu0 }
 0x5e4   :  { %v1265_v28 = vsel %vm777_vm15, %v1146_v56, -inf }
 0x5e5   :  { %1266 = vmax.xlane.f32.xlu2 %v1265_v28 }
 0x5eb   :  { %v1148_v60 = vpop.f32.mrf.mxu0 }
 0x617   :  { %v6315_v31 = vpop.f32.mrf.mxu3 }
 0x61e   :  { %v6317_v50 = vpop.f32.mrf.mxu2 }
 0x61f   :  { %v969_v0 = vpop.f32.mrf.mxu3 }
 0x626   :  { %v950_v2 = vpop.f32.mrf.mxu2 }
 0x627   :  { %v1215_v21 = vpop.f32.mrf.mxu3 }
 0x628   :  { %v1274_v3 = vsel %vm777_vm15, %v1215_v21, -inf }
 0x629   :  { %1275 = vmax.xlane.f32.xlu2 %v1274_v3 }
 0x62d   :  { %v1238_v57 = vpop.f32.mrf.mxu0  ;;  %v1261_v5 = vpop.f32.mrf.mxu1 }
 0x62e   :  { %v1192_v27 = vpop.f32.mrf.mxu2  ;;  %v1277_v10 = vsel %vm777_vm15, %v1238_v57, -inf  ;;  %v1280_v26 = vsel %vm777_vm15, %v1261_v5, -inf }
 0x62f   :  { %v1217_v20 = vpop.f32.mrf.mxu3  ;;  %1278 = vmax.xlane.f32.xlu0 %v1277_v10  ;;  %v1271_v12 = vsel %vm777_vm15, %v1192_v27, -inf  ;;  %v1458_v10 = vunpack.c.l.b16 %v6210_v58 }
 0x630   :  { %1272 = vmax.xlane.f32.xlu1 %v1271_v12 }
 0x631   :  { %v1459_v20 = vpack.c.b16 %v1458_v10, %v1458_v10 }
 0x635   :  { %v1240_v19 = vpop.f32.mrf.mxu0  ;;  %v1263_v7 = vpop.f32.mrf.mxu1 }
 0x636   :  { %v1194_v36 = vpop.f32.mrf.mxu2 }
 0x638   :  { %1281 = vmax.xlane.f32.xlu1 %v1280_v26 }
 0x643   :  { %1388 = vrot.lane.b32.xlu0 %v1387_v13, %s5749_s30 }
 0x648   :  { %v1270_v18 = vpop.xlane.xlu0 %1269 }
 0x649   :  { %v1284_v24 = vsub.f32 %v1169_v48, %v1270_v18 }
 0x64b   :  { %v1291_v61 = vmul.f32 1.442695, %v1284_v24 }
 0x651   :  { %1412 = vrot.lane.b32.xlu1 %v1411_v42, %s5749_s30 }
 0x658   :  { %v1267_v54 = vpop.xlane.xlu2 %1266 }
 0x659   :  { %v1283_v22 = vsub.f32 %v1146_v56, %v1267_v54 }
 0x65b   :  { %v1289_v25 = vmul.f32 1.442695, %v1283_v22 }
 0x65d   :  { %5495 = vpow2.f32 %v1289_v25 }
 0x65e   :  { %5497 = vpow2.f32 %v1291_v61 }
 0x663   :  { %v5496_v29 = vpop.eup %5495 }
 0x664   :  { %v1301_v37 = vsel %vm777_vm15, %v5496_v29, 0.0  ;;  %v5498_v23 = vpop.eup %5497 }
 0x665   :  { %1302 = vadd.xlane.f32.xlu2 %v1301_v37  ;;  %v1304_v39 = vsel %vm777_vm15, %v5498_v23, 0.0 }
 0x66d   :  { %1305 = vadd.xlane.f32.xlu0 %v1304_v39 }
 0x67d   :  { %1364 = vrot.lane.b32.xlu2 %v1363_v6, %s5749_s30 }
 0x69c   :  { %v1276_v14 = vpop.xlane.xlu2 %1275 }
 0x69d   :  { %v1286_v43 = vsub.f32 %v1215_v21, %v1276_v14 }
 0x69f   :  { %v1295_v1 = vmul.f32 1.442695, %v1286_v43 }
 0x6a2   :  { %v1279_v53 = vpop.xlane.xlu0 %1278 }
 0x6a3   :  { %v1287_v38 = vsub.f32 %v1238_v57, %v1279_v53  ;;  %v1273_v40 = vpop.xlane.xlu1 %1272 }
 0x6a4   :  { %v1285_v8 = vsub.f32 %v1192_v27, %v1273_v40 }
 0x6a5   :  { %v1297_v41 = vmul.f32 1.442695, %v1287_v38 }
 0x6a6   :  { %v1293_v46 = vmul.f32 1.442695, %v1285_v8 }
 0x6a7   :  { %5499 = vpow2.f32 %v1297_v41 }
 0x6a8   :  { %5501 = vpow2.f32 %v1293_v46 }
 0x6a9   :  { %5503 = vpow2.f32 %v1295_v1 }
 0x6ab   :  { %v1282_v30 = vpop.xlane.xlu1 %1281 }
 0x6ac   :  { %v1288_v48 = vsub.f32 %v1261_v5, %v1282_v30  ;;  %v1434_v5 = vunpack.c.l.b16 %v6222_v34 }
 0x6ad   :  { %v5500_v35 = vpop.eup %5499 }
 0x6ae   :  { %v5502_v55 = vpop.eup %5501  ;;  %v1299_v44 = vmul.f32 1.442695, %v1288_v48  ;;  %v1313_v49 = vsel %vm777_vm15, %v5500_v35, 0.0  ;;  %v1435_v27 = vpack.c.b16 %v1434_v5, %v1434_v5 }
 0x6af   :  { %1314 = vadd.xlane.f32.xlu2 %v1313_v49  ;;  %v1307_v45 = vsel %vm777_vm15, %v5502_v55, 0.0  ;;  %v5504_v56 = vpop.eup %5503 }
 0x6b0   :  { %5505 = vpow2.f32 %v1299_v44  ;;  %1308 = vadd.xlane.f32.xlu0 %v1307_v45  ;;  %v1310_v21 = vsel %vm777_vm15, %v5504_v56, 0.0  ;;  %v974_v44 = vsel %vm83_vm1, %v6312_v51, 0.0 }
 0x6b5   :  { %v1389_v28 = vpop.permute.xlu0 %1388 }
 0x6b6   :  { %v5506_v60 = vpop.eup %5505  ;;  %v1394_v0 = vsel %vm859_vm14, %v1389_v28, 0 }
 0x6b7   :  { %1403 = vmatpush.bf16.msra.mxu0 %v1394_v0  ;;  %v1316_v2 = vsel %vm777_vm15, %v5506_v60, 0.0 }
 0x6b8   :  { %1317 = vadd.xlane.f32.xlu1 %v1316_v2  ;;  %1311 = vadd.xlane.f32.xlu0 %v1310_v21  ;;  %v977_v21 = vsel %vm83_vm1, %v6309_v17, 0.0 }
 0x6c3   :  { %v1413_v3 = vpop.permute.xlu1 %1412 }
 0x6c4   :  { %v1418_v57 = vsel %vm859_vm14, %v1413_v3, 0 }
 0x6c5   :  { %1427 = vmatpush.bf16.msrb.mxu1 %v1418_v57 }
 0x6cc   :  { %1436 = vrot.lane.b32.xlu0 %v1435_v27, %s5749_s30 }
 0x6d4   :  { %1460 = vrot.lane.b32.xlu0 %v1459_v20, %s5749_s30  ;;  %v986_v20 = vsel %vm83_vm1, %v6315_v31, 0.0 }
 0x6d8   :  { %v1303_v12 = vpop.xlane.xlu2 %1302 }
 0x6d9   :  { %5507 = vrcp.f32 %v1303_v12 }
 0x6df   :  { %v5508_v19 = vpop.eup %5507 }
 0x6e0   :  { %v1325_v7 = vmul.f32 %v5508_v19, %v5496_v29  ;;  %v1306_v36 = vpop.xlane.xlu0 %1305  ;;  %v1365_v26 = vpop.permute.xlu2 %1364 }
 0x6e1   :  { %5509 = vrcp.f32 %v1306_v36  ;;  %v1370_v15 = vsel %vm859_vm14, %v1365_v26, 0 }
 0x6e2   :  { %v1331_v13 = vpack.c.bf16 %v1325_v7, %v1325_v7  ;;  %1379 = vmatpush.bf16.msrb.mxu3 %v1370_v15 }
 0x6e4   :  { %5214 = vmatmul.msk.bf16.vlgmr.msra.gmra.mxu2 %vm777_vm15, %v1331_v13 }
 0x6e7   :  { %v5510_v34 = vpop.eup %5509 }
 0x6e8   :  { %v1326_v62 = vmul.f32 %v5510_v34, %v5498_v23 }
 0x6ea   :  { %v1332_v42 = vpack.c.bf16 %v1326_v62, %v1326_v62 }
 0x6ec   :  { %5215 = vmatmul.msk.bf16.vlgmr.msrb.gmra.mxu3 %vm777_vm15, %v1332_v42 }
 0x722   :  { %v1315_v25 = vpop.xlane.xlu2 %1314 }
 0x723   :  { %v1309_v58 = vpop.xlane.xlu0 %1308 }
 0x724   :  { %5511 = vrcp.f32 %v1309_v58  ;;  %v980_v58 = vsel %vm83_vm1, %v6307_v59, 0.0 }
 0x72a   :  { %v5512_v18 = vpop.eup %5511 }
 0x72b   :  { %v1327_v54 = vmul.f32 %v5512_v18, %v5502_v55  ;;  %v1312_v22 = vpop.xlane.xlu0 %1311  ;;  %v1318_v23 = vpop.xlane.xlu1 %1317 }
 0x72c   :  { %5513 = vrcp.f32 %v1312_v22 }
 0x72d   :  { %v1333_v24 = vpack.c.bf16 %v1327_v54, %v1327_v54  ;;  %5515 = vrcp.f32 %v1315_v25  ;;  %v983_v54 = vsel %vm83_vm1, %v6317_v50, 0.0 }
 0x72e   :  { %5517 = vrcp.f32 %v1318_v23 }
 0x72f   :  { %5216 = vmatmul.msk.bf16.vlgmr.msra.gmra.mxu0 %vm777_vm15, %v1333_v24 }
 0x732   :  { %v5514_v61 = vpop.eup %5513 }
 0x733   :  { %v1328_v29 = vmul.f32 %v5514_v61, %v5504_v56  ;;  %v5516_v39 = vpop.eup %5515 }
 0x734   :  { %v1329_v16 = vmul.f32 %v5516_v39, %v5500_v35  ;;  %v5518_v38 = vpop.eup %5517 }
 0x735   :  { %v1334_v37 = vpack.c.bf16 %v1328_v29, %v1328_v29  ;;  %v1330_v40 = vmul.f32 %v5518_v38, %v5506_v60  ;;  %v971_v60 = vsel %vm83_vm1, %v6297_v32, 0.0 }
 0x736   :  { %v1335_v14 = vpack.c.bf16 %v1329_v16, %v1329_v16 }
 0x737   :  { %5217 = vmatmul.msk.bf16.vlgmr.msrb.gmra.mxu1 %vm777_vm15, %v1334_v37  ;;  %v1336_v43 = vpack.c.bf16 %v1330_v40, %v1330_v40 }
 0x73e   :  { %v1437_v6 = vpop.permute.xlu0 %1436 }
 0x73f   :  { %v1442_v53 = vsel %vm859_vm14, %v1437_v6, 0 }
 0x740   :  { %1451 = vmatpush.bf16.msrb.mxu2 %v1442_v53 }
 0x743   :  { %5218 = vmatmul.msk.bf16.vlgmr.msrb.gmra.mxu2 %vm777_vm15, %v1335_v14 }
 0x746   :  { %v1461_v8 = vpop.permute.xlu0 %1460 }
 0x747   :  { %v1466_v41 = vsel %vm859_vm14, %v1461_v8, 0 }
 0x748   :  { %1475 = vmatpush.bf16.msra.mxu3 %v1466_v41 }
 0x74b   :  { %5219 = vmatmul.msk.bf16.vlgmr.msra.gmra.mxu3 %vm777_vm15, %v1336_v43 }
 0x767   :  { %v1357_v46 = vpop.f32.mrf.mxu2 }
 0x768   :  { %v1481_v1 = vsel %vm83_vm1, %v1357_v46, 0.0 }
 0x769   :  { %1482 = vadd.xlane.f32.xlu0 %v1481_v1 }
 0x76f   :  { %v1359_v30 = vpop.f32.mrf.mxu2  ;;  %v1381_v48 = vpop.f32.mrf.mxu3 }
 0x770   :  { %v1484_v35 = vsel %vm83_vm1, %v1381_v48, 0.0 }
 0x771   :  { %1485 = vadd.xlane.f32.xlu2 %v1484_v35 }
 0x777   :  { %v1383_v55 = vpop.f32.mrf.mxu3 }
 0x779   :  { %975 = vadd.xlane.f32.xlu2 %v974_v44 }
 0x7ac   :  { %v1405_v49 = vpop.f32.mrf.mxu0 }
 0x7ad   :  { %v1487_v45 = vsel %vm83_vm1, %v1405_v49, 0.0 }
 0x7ae   :  { %1488 = vadd.xlane.f32.xlu1 %v1487_v45 }
 0x7b4   :  { %v1407_v56 = vpop.f32.mrf.mxu0  ;;  %v1429_v28 = vpop.f32.mrf.mxu1 }
 0x7b5   :  { %v1490_v0 = vsel %vm83_vm1, %v1429_v28, 0.0 }
 0x7b6   :  { %972 = vadd.xlane.f32.xlu1 %v971_v60  ;;  %1491 = vadd.xlane.f32.xlu2 %v1490_v0 }
 0x7bc   :  { %v1431_v2 = vpop.f32.mrf.mxu1 }
 0x7be   :  { %978 = vadd.xlane.f32.xlu2 %v977_v21 }
 0x7c6   :  { %v1453_v3 = vpop.f32.mrf.mxu2 }
 0x7c7   :  { %v1493_v57 = vsel %vm83_vm1, %v1453_v3, 0.0 }
 0x7c8   :  { %1494 = vadd.xlane.f32.xlu1 %v1493_v57 }
 0x7ce   :  { %v1455_v5 = vpop.f32.mrf.mxu2  ;;  %v6361_v27 = vpop.f32.mrf.mxu3 }
 0x7cf   :  { %v1496_v10 = vsel %vm83_vm1, %v6361_v27, 0.0 }
 0x7d0   :  { %1497 = vadd.xlane.f32.xlu2 %v1496_v10  ;;  %987 = vadd.xlane.f32.xlu1 %v986_v20 }
 0x7d6   :  { %v1479_v12 = vpop.f32.mrf.mxu3 }
 0x7dc   :  { %v1483_v19 = vpop.xlane.xlu0 %1482 }
 0x7dd   :  { %v1499_v7 = vmul.f32 %v1483_v19, %v5866_v52 }
 0x7df   :  { %v6368_v36 = vsub.f32 %v1357_v46, %v1499_v7 }
 0x7e1   :  { %v1511_v26 = vmul.f32 %v6368_v36, %v6368_v36 }
 0x7e3   :  { %v1517_v15 = vsel %vm83_vm1, %v1511_v26, 0.0 }
 0x7e4   :  { %1518 = vadd.xlane.f32.xlu0 %v1517_v15  ;;  %v1486_v13 = vpop.xlane.xlu2 %1485 }
 0x7e5   :  { %v1500_v34 = vmul.f32 %v1486_v13, %v5866_v52 }
 0x7e7   :  { %v6374_v62 = vsub.f32 %v1381_v48, %v1500_v34 }
 0x7e9   :  { %v1512_v42 = vmul.f32 %v6374_v62, %v6374_v62 }
 0x7eb   :  { %v1520_v18 = vsel %vm83_vm1, %v1512_v42, 0.0 }
 0x7ec   :  { %981 = vadd.xlane.f32.xlu0 %v980_v58  ;;  %1521 = vadd.xlane.f32.xlu1 %v1520_v18  ;;  %v976_v22 = vpop.xlane.xlu2 %975 }
 0x7ed   :  { %v990_v61 = vmul.f32 %v976_v22, %v5866_v52 }
 0x7ef   :  { %v6390_v23 = vsub.f32 %v6312_v51, %v990_v61 }
 0x7f1   :  { %v1002_v53 = vmul.f32 %v6390_v23, %v6390_v23 }
 0x7f3   :  { %v1010_v40 = vsel %vm83_vm1, %v1002_v53, 0.0 }
 0x7f4   :  { %984 = vadd.xlane.f32.xlu0 %v983_v54 }
 0x821   :  { %v1489_v24 = vpop.xlane.xlu1 %1488 }
 0x822   :  { %v1501_v25 = vmul.f32 %v1489_v24, %v5866_v52 }
 0x824   :  { %v6385_v29 = vsub.f32 %v1405_v49, %v1501_v25  ;;  %v6416_v49 = vld [vmem:[%s8582_s4 + $0x3] ss:$0 sm:$0xff] }
 0x826   :  { %v1513_v37 = vmul.f32 %v6385_v29, %v6385_v29 }
 0x828   :  { %v1523_v39 = vsel %vm83_vm1, %v1513_v37, 0.0 }
 0x829   :  { %1524 = vadd.xlane.f32.xlu1 %v1523_v39  ;;  %v1492_v16 = vpop.xlane.xlu2 %1491  ;;  %v973_v8 = vpop.xlane.xlu1 %972 }
 0x82a   :  { %v1502_v6 = vmul.f32 %v1492_v16, %v5866_v52  ;;  %v989_v46 = vmul.f32 %v973_v8, %v5866_v52 }
 0x82c   :  { %v6396_v14 = vsub.f32 %v1429_v28, %v1502_v6  ;;  %v6409_v48 = vsub.f32 %v6297_v32, %v989_v46 }
 0x82e   :  { %v1514_v38 = vmul.f32 %v6396_v14, %v6396_v14  ;;  %v1001_v45 = vmul.f32 %v6409_v48, %v6409_v48 }
 0x830   :  { %v1526_v51 = vsel %vm83_vm1, %v1514_v38, 0.0  ;;  %v1007_v32 = vsel %vm83_vm1, %v1001_v45, 0.0 }
 0x831   :  { %1011 = vadd.xlane.f32.xlu1 %v1010_v40  ;;  %1527 = vadd.xlane.f32.xlu2 %v1526_v51  ;;  %v979_v55 = vpop.xlane.xlu2 %978 }
 0x832   :  { %v991_v44 = vmul.f32 %v979_v55, %v5866_v52 }
 0x834   :  { %v6421_v56 = vsub.f32 %v6309_v17, %v991_v44 }
 0x836   :  { %v1003_v0 = vmul.f32 %v6421_v56, %v6421_v56 }
 0x838   :  { %v1013_v21 = vsel %vm83_vm1, %v1003_v0, 0.0 }
 0x83b   :  { %v1495_v41 = vpop.xlane.xlu1 %1494 }
 0x83c   :  { %v1503_v43 = vmul.f32 %v1495_v41, %v5866_v52 }
 0x83e   :  { %v6404_v1 = vsub.f32 %v1453_v3, %v1503_v43 }
 0x840   :  { %v1515_v30 = vmul.f32 %v6404_v1, %v6404_v1 }
 0x842   :  { %v1529_v35 = vsel %vm83_vm1, %v1515_v30, 0.0 }
 0x843   :  { %1530 = vadd.xlane.f32.xlu0 %v1529_v35  ;;  %v988_v28 = vpop.xlane.xlu1 %987  ;;  %v1498_v5 = vpop.xlane.xlu2 %1497 }
 0x844   :  { %v994_v60 = vmul.f32 %v988_v28, %v5866_v52  ;;  %v1504_v12 = vmul.f32 %v1498_v5, %v5866_v52 }
 0x846   :  { %v6430_v2 = vsub.f32 %v6315_v31, %v994_v60  ;;  %v6444_v7 = vsub.f32 %v6361_v27, %v1504_v12 }
 0x848   :  { %v1006_v17 = vmul.f32 %v6430_v2, %v6430_v2  ;;  %v1516_v42 = vmul.f32 %v6444_v7, %v6444_v7 }
 0x849   :  { %1112 = vrot.lane.b32.xlu2 %v6416_v49, %s5749_s30 }
 0x84a   :  { %v1022_v57 = vsel %vm83_vm1, %v1006_v17, 0.0 }
 0x84b   :  { %1008 = vadd.xlane.f32.xlu0 %v1007_v32 }
 0x853   :  { %1014 = vadd.xlane.f32.xlu0 %v1013_v21 }
 0x857   :  { %v1519_v3 = vpop.xlane.xlu0 %1518 }
 0x858   :  { %v1535_v54 = vmul.f32 %v1519_v3, %v5866_v52 }
 0x85a   :  { %v1541_v24 = vadd.f32 1e-05, %v1535_v54 }
 0x85b   :  { %1023 = vadd.xlane.f32.xlu0 %v1022_v57 }
 0x85c   :  { %5519 = vrsqrt.f32 %v1541_v24  ;;  %vm1553_vm5 = vweird.f32 %v1541_v24 }
 0x85f   :  { %v982_v10 = vpop.xlane.xlu0 %981  ;;  %v1522_v18 = vpop.xlane.xlu1 %1521 }
 0x860   :  { %v992_v20 = vmul.f32 %v982_v10, %v5866_v52  ;;  %v1536_v22 = vmul.f32 %v1522_v18, %v5866_v52 }
 0x862   :  { %v6439_v19 = vsub.f32 %v6307_v59, %v992_v20  ;;  %v1532_v59 = vsel %vm83_vm1, %v1516_v42, 0.0  ;;  %v5520_v25 = vpop.eup %5519 }
 0x863   :  { %v1548_v37 = vmul.f32 %v5520_v25, %v1541_v24  ;;  %vm1554_vm2 = vweird.f32 %v5520_v25 }
 0x864   :  { %v1004_v31 = vmul.f32 %v6439_v19, %v6439_v19  ;;  %vm1555_vm6 = vmor %vm1553_vm5, %vm1554_vm2 }
 0x865   :  { %v1549_v16 = vmul.f32 %v5520_v25, %v1548_v37 }
 0x866   :  { %v1016_v26 = vsel %vm83_vm1, %v1004_v31, 0.0 }
 0x867   :  { %v985_v15 = vpop.xlane.xlu0 %984  ;;  %1017 = vadd.xlane.f32.xlu1 %v1016_v26  ;;  %v1550_v53 = vmul.f32 0.5, %v1549_v16 }
 0x868   :  { %v993_v13 = vmul.f32 %v985_v15, %v5866_v52 }
 0x869   :  { %v1551_v51 = vsub.f32 1.5, %v1550_v53 }
 0x86a   :  { %v6449_v34 = vsub.f32 %v6317_v50, %v993_v13  ;;  %v1542_v50 = vadd.f32 1e-05, %v1536_v22 }
 0x86b   :  { %v1552_v46 = vmul.f32 %v5520_v25, %v1551_v51 }
 0x86c   :  { %v1005_v58 = vmul.f32 %v6449_v34, %v6449_v34  ;;  %5521 = vrsqrt.f32 %v1542_v50  ;;  %vm1563_vm7 = vweird.f32 %v1542_v50 }
 0x86d   :  { %v1556_v35 = vsel %vm1555_vm6, %v5520_v25, %v1552_v46 }
 0x86e   :  { %v1019_v27 = vsel %vm83_vm1, %v1005_v58, 0.0  ;;  %v1607_v0 = vmul.f32 %v1556_v35, %v6368_v36 }
 0x86f   :  { %1533 = vadd.xlane.f32.xlu1 %v1532_v59 }
 0x870   :  { %v1613_v57 = vmul.f32 %v6416_v49, %v1607_v0  ;;  %v5401_v0 = vld [vmem:[%s8581_s3 + $0x90] sm:$0xf0] }
 0x872   :  { %1020 = vadd.xlane.f32.xlu2 %v1019_v27  ;;  %v5522_v61 = vpop.eup %5521 }
 0x873   :  { %v1558_v39 = vmul.f32 %v5522_v61, %v1542_v50  ;;  %vm1564_vm4 = vweird.f32 %v5522_v61 }
 0x874   :  { %vm1565_vm8 = vmor %vm1563_vm7, %vm1564_vm4 }
 0x875   :  { %v1559_v6 = vmul.f32 %v5522_v61, %v1558_v39 }
 0x877   :  { %v1560_v38 = vmul.f32 0.5, %v1559_v6 }
 0x879   :  { %v1561_v8 = vsub.f32 1.5, %v1560_v38 }
 0x87b   :  { %v1562_v30 = vmul.f32 %v5522_v61, %v1561_v8 }
 0x87d   :  { %v1566_v55 = vsel %vm1565_vm8, %v5522_v61, %v1562_v30 }
 0x87e   :  { %v1608_v21 = vmul.f32 %v1566_v55, %v6374_v62 }
 0x880   :  { %v1614_v5 = vmul.f32 %v6416_v49, %v1608_v21 }
 0x89c   :  { %v1525_v40 = vpop.xlane.xlu1 %1524 }
 0x89d   :  { %v1537_v41 = vmul.f32 %v1525_v40, %v5866_v52 }
 0x89f   :  { %v1543_v43 = vadd.f32 1e-05, %v1537_v41 }
 0x8a1   :  { %5523 = vrsqrt.f32 %v1543_v43  ;;  %vm1573_vm10 = vweird.f32 %v1543_v43 }
 0x8a4   :  { %v1528_v44 = vpop.xlane.xlu2 %1527  ;;  %v1012_v46 = vpop.xlane.xlu1 %1011 }
 0x8a5   :  { %v1538_v45 = vmul.f32 %v1528_v44, %v5866_v52 }
 0x8a7   :  { %v5524_v32 = vpop.eup %5523  ;;  %v1544_v60 = vadd.f32 1e-05, %v1538_v45 }
 0x8a8   :  { %v1568_v28 = vmul.f32 %v5524_v32, %v1543_v43  ;;  %vm1574_vm9 = vweird.f32 %v5524_v32 }
 0x8a9   :  { %5525 = vrsqrt.f32 %v1544_v60  ;;  %vm1575_vm11 = vmor %vm1573_vm10, %vm1574_vm9  ;;  %vm1583_vm13 = vweird.f32 %v1544_v60 }
 0x8aa   :  { %v1569_v17 = vmul.f32 %v5524_v32, %v1568_v28 }
 0x8ac   :  { %v1570_v3 = vmul.f32 0.5, %v1569_v17  ;;  %v6465_v10 = vpop.permute.xlu2 %1112 }
 0x8ad   :  { %v1619_v12 = vadd.f32 %v1613_v57, %v6465_v10  ;;  %v1620_v31 = vadd.f32 %v1614_v5, %v6465_v10  ;;  %v5400_v57 = vld [vmem:[%s8581_s3 + $0x68] sm:$0xf0] }
 0x8ae   :  { %v1571_v20 = vsub.f32 1.5, %v1570_v3  ;;  %v5230_v3 = vld [vmem:[%s8581_s3 + $0x58] sm:$0xf] }
 0x8af   :  { %v5526_v26 = vpop.eup %5525  ;;  %v1625_v36 = vpack.c.bf16 %v1619_v12, %v1619_v12  ;;  %v1626_v13 = vpack.c.bf16 %v1620_v31, %v1620_v31  ;;  %v5231_v5 = vor.u32 %v5400_v57, %v5230_v3  ;;  %v5226_v12 = vld [vmem:[%s8581_s3 + $0x30] sm:$0xf]  ;;  %v5399_v31 = vld [vmem:[%s8581_s3 + $0x40] sm:$0xf0]  ;;  %v6517_v57 = vld [vmem:[%s8582_s4 + $0x3] ss:$0 sm:$0xff] }
 0x8b0   :  { %v1572_v15 = vmul.f32 %v5524_v32, %v1571_v20  ;;  %v1578_v62 = vmul.f32 %v5526_v26, %v1544_v60  ;;  %vm1584_vm12 = vweird.f32 %v5526_v26  ;;  %v5234_v60 = vld [vmem:[%s8581_s3 + $0x80] sm:$0xf] }
 0x8b1   :  { %v1652_v59 = vunpack.c.l.b16 %v1625_v36  ;;  %v1653_v27 = vunpack.c.l.b16 %v1626_v13  ;;  %vm1585_vm2 = vmor %vm1583_vm13, %vm1584_vm12  ;;  %v5235_v17 = vor.u32 %v5401_v0, %v5234_v60  ;;  %v5227_v36 = vor.u32 %v5399_v31, %v5226_v12  ;;  %v5222_v13 = vld [vmem:[%s8581_s3 + $0x8] sm:$0xf] }
 0x8b2   :  { %v1576_v42 = vsel %vm1575_vm11, %v5524_v32, %v1572_v15  ;;  %v1579_v58 = vmul.f32 %v5526_v26, %v1578_v62 }
 0x8b3   :  { %v1609_v18 = vmul.f32 %v1576_v42, %v6385_v29  ;;  %v1658_v22 = vpack.c.b16 %v1653_v27, %v1652_v59  ;;  %1724 = vmatpush.bf16.msrb.mxu0 %v5235_v17  ;;  %v5398_v42 = vld [vmem:[%s8581_s3 + $0x18] sm:$0xf0]  ;;  %v1026_v59 = vmul.f32 %v1012_v46, %v5866_v52 }
 0x8b4   :  { %v1580_v54 = vmul.f32 0.5, %v1579_v58 }
 0x8b5   :  { %1661 = vrot.lane.b32.xlu1 %v1658_v22, %s5750_s8  ;;  %v1615_v50 = vmul.f32 %v6416_v49, %v1609_v18  ;;  %v5223_v22 = vor.u32 %v5398_v42, %v5222_v13 }
 0x8b6   :  { %v1581_v24 = vsub.f32 1.5, %v1580_v54  ;;  %v1531_v51 = vpop.xlane.xlu0 %1530 }
 0x8b7   :  { %v1621_v39 = vadd.f32 %v1615_v50, %v6465_v10  ;;  %v1539_v41 = vmul.f32 %v1531_v51, %v5866_v52  ;;  %1725 = vmatpush.bf16.msrb.mxu0 %v5231_v5  ;;  %v1032_v50 = vadd.f32 1e-05, %v1026_v59 }
 0x8b8   :  { %v1582_v25 = vmul.f32 %v5526_v26, %v1581_v24 }
 0x8b9   :  { %v1627_v6 = vpack.c.bf16 %v1621_v39, %v1621_v39  ;;  %v1545_v43 = vadd.f32 1e-05, %v1539_v41 }
 0x8ba   :  { %v1586_v61 = vsel %vm1585_vm2, %v5526_v26, %v1582_v25  ;;  %vm1053_vm2 = vweird.f32 %v1032_v50 }
 0x8bb   :  { %v1610_v37 = vmul.f32 %v1586_v61, %v6396_v14  ;;  %v1654_v38 = vunpack.c.l.b16 %v1627_v6  ;;  %5527 = vrsqrt.f32 %v1545_v43  ;;  %vm1593_vm5 = vweird.f32 %v1545_v43  ;;  %1726 = vmatpush.bf16.msrb.mxu0 %v5227_v36 }
 0x8bd   :  { %v1616_v16 = vmul.f32 %v6416_v49, %v1610_v37 }
 0x8be   :  { %v1009_v20 = vpop.xlane.xlu0 %1008 }
 0x8bf   :  { %v1622_v29 = vadd.f32 %v1616_v16, %v6465_v10  ;;  %v1025_v15 = vmul.f32 %v1009_v20, %v5866_v52  ;;  %1727 = vmatpush.bf16.msrb.mxu0 %v5223_v22 }
 0x8c1   :  { %v1628_v53 = vpack.c.bf16 %v1622_v29, %v1622_v29  ;;  %v5528_v14 = vpop.eup %5527  ;;  %v1031_v18 = vadd.f32 1e-05, %v1025_v15 }
 0x8c2   :  { %v1588_v30 = vmul.f32 %v5528_v14, %v1545_v43  ;;  %vm1594_vm4 = vweird.f32 %v5528_v14 }
 0x8c3   :  { %v1655_v40 = vunpack.c.l.b16 %v1628_v53  ;;  %vm1595_vm6 = vmor %vm1593_vm5, %vm1594_vm4  ;;  %vm1043_vm12 = vweird.f32 %v1031_v18 }
 0x8c4   :  { %v1589_v55 = vmul.f32 %v5528_v14, %v1588_v30 }
 0x8c5   :  { %v1659_v8 = vpack.c.b16 %v1655_v40, %v1654_v38 }
 0x8c6   :  { %v1590_v44 = vmul.f32 0.5, %v1589_v55  ;;  %v1015_v40 = vpop.xlane.xlu0 %1014 }
 0x8c7   :  { %1663 = vrot.lane.b32.xlu0 %v1659_v8, %s5750_s8 }
 0x8c8   :  { %v1591_v21 = vsub.f32 1.5, %v1590_v44 }
 0x8ca   :  { %v1592_v26 = vmul.f32 %v5528_v14, %v1591_v21 }
 0x8cc   :  { %v1596_v58 = vsel %vm1595_vm6, %v5528_v14, %v1592_v26  ;;  %v1027_v14 = vmul.f32 %v1015_v40, %v5866_v52 }
 0x8cd   :  { %v1611_v24 = vmul.f32 %v1596_v58, %v6404_v1 }
 0x8cf   :  { %v1617_v37 = vmul.f32 %v6416_v49, %v1611_v24  ;;  %1711 = vrot.lane.b32.xlu0 %v6517_v57, %s5752_s29 }
 0x8d1   :  { %v1623_v6 = vadd.f32 %v1617_v37, %v6465_v10 }
 0x8d3   :  { %v1629_v43 = vpack.c.bf16 %v1623_v6, %v1623_v6 }
 0x8da   :  { %v1018_v35 = vpop.xlane.xlu1 %1017 }
 0x8db   :  { %v1028_v8 = vmul.f32 %v1018_v35, %v5866_v52 }
 0x8dd   :  { %v1034_v44 = vadd.f32 1e-05, %v1028_v8 }
 0x8e2   :  { %v1534_v45 = vpop.xlane.xlu1 %1533 }
 0x8e3   :  { %v1540_v32 = vmul.f32 %v1534_v45, %v5866_v52 }
 0x8e5   :  { %v1546_v28 = vadd.f32 1e-05, %v1540_v32 }
 0x8e7   :  { %5529 = vrsqrt.f32 %v1546_v28  ;;  %vm1603_vm8 = vweird.f32 %v1546_v28 }
 0x8e8   :  { %5531 = vrsqrt.f32 %v1031_v18 }
 0x8e9   :  { %5533 = vrsqrt.f32 %v1032_v50 }
 0x8ea   :  { %5535 = vrsqrt.f32 %v1034_v44 }
 0x8ed   :  { %v5530_v62 = vpop.eup %5529 }
 0x8ee   :  { %v1598_v27 = vmul.f32 %v5530_v62, %v1546_v28  ;;  %vm1604_vm7 = vweird.f32 %v5530_v62  ;;  %v5532_v53 = vpop.eup %5531  ;;  %v1033_v28 = vadd.f32 1e-05, %v1027_v14 }
 0x8ef   :  { %vm1605_vm9 = vmor %vm1603_vm8, %vm1604_vm7  ;;  %v5534_v38 = vpop.eup %5533  ;;  %v1038_v51 = vmul.f32 %v5532_v53, %v1031_v18  ;;  %vm1044_vm10 = vweird.f32 %v5532_v53  ;;  %vm1073_vm7 = vweird.f32 %v1034_v44 }
 0x8f0   :  { %v1599_v54 = vmul.f32 %v5530_v62, %v1598_v27  ;;  %v1048_v46 = vmul.f32 %v5534_v38, %v1032_v50  ;;  %5537 = vrsqrt.f32 %v1033_v28  ;;  %v5536_v17 = vpop.eup %5535  ;;  %vm1054_vm11 = vweird.f32 %v5534_v38  ;;  %vm1045_vm13 = vmor %vm1043_vm12, %vm1044_vm10 }
 0x8f1   :  { %v1039_v55 = vmul.f32 %v5532_v53, %v1038_v51  ;;  %v1068_v12 = vmul.f32 %v5536_v17, %v1034_v44  ;;  %vm1055_vm4 = vmor %vm1053_vm2, %vm1054_vm11  ;;  %vm1074_vm5 = vweird.f32 %v5536_v17  ;;  %v1021_v44 = vpop.xlane.xlu2 %1020 }
 0x8f2   :  { %v1600_v25 = vmul.f32 0.5, %v1599_v54  ;;  %v1049_v32 = vmul.f32 %v5534_v38, %v1048_v46  ;;  %vm1075_vm8 = vmor %vm1073_vm7, %vm1074_vm5 }
 0x8f3   :  { %v1040_v0 = vmul.f32 0.5, %v1039_v55  ;;  %v1069_v36 = vmul.f32 %v5536_v17, %v1068_v12 }
 0x8f4   :  { %v1601_v61 = vsub.f32 1.5, %v1600_v25  ;;  %v1050_v21 = vmul.f32 0.5, %v1049_v32 }
 0x8f5   :  { %v1041_v35 = vsub.f32 1.5, %v1040_v0  ;;  %v1070_v58 = vmul.f32 0.5, %v1069_v36 }
 0x8f6   :  { %v1602_v39 = vmul.f32 %v5530_v62, %v1601_v61  ;;  %v1051_v3 = vsub.f32 1.5, %v1050_v21  ;;  %v5538_v5 = vpop.eup %5537 }
 0x8f7   :  { %v1042_v20 = vmul.f32 %v5532_v53, %v1041_v35  ;;  %v1058_v26 = vmul.f32 %v5538_v5, %v1033_v28  ;;  %v1071_v22 = vsub.f32 1.5, %v1070_v58  ;;  %vm1064_vm6 = vweird.f32 %v5538_v5 }
 0x8f8   :  { %v1606_v16 = vsel %vm1605_vm9, %v5530_v62, %v1602_v39  ;;  %v1052_v31 = vmul.f32 %v5534_v38, %v1051_v3  ;;  %vm1063_vm9 = vweird.f32 %v1033_v28 }
 0x8f9   :  { %v1612_v29 = vmul.f32 %v1606_v16, %v6444_v7  ;;  %v1656_v7 = vunpack.c.l.b16 %v1629_v43  ;;  %v1046_v15 = vsel %vm1045_vm13, %v5532_v53, %v1042_v20  ;;  %v1059_v42 = vmul.f32 %v5538_v5, %v1058_v26  ;;  %vm1065_vm10 = vmor %vm1063_vm9, %vm1064_vm6 }
 0x8fa   :  { %v1056_v62 = vsel %vm1055_vm4, %v5534_v38, %v1052_v31  ;;  %v1097_v13 = vmul.f32 %v1046_v15, %v6409_v48  ;;  %v1072_v50 = vmul.f32 %v5536_v17, %v1071_v22 }
 0x8fb   :  { %v1618_v1 = vmul.f32 %v6416_v49, %v1612_v29  ;;  %v1098_v59 = vmul.f32 %v1056_v62, %v6390_v23  ;;  %v1060_v27 = vmul.f32 0.5, %v1059_v42 }
 0x8fc   :  { %v1106_v54 = vmul.f32 %v6416_v49, %v1097_v13  ;;  %v1076_v23 = vsel %vm1075_vm8, %v5536_v17, %v1072_v50 }
 0x8fd   :  { %v1624_v41 = vadd.f32 %v1618_v1, %v6465_v10  ;;  %v1107_v24 = vmul.f32 %v6416_v49, %v1098_v59  ;;  %v1061_v18 = vsub.f32 1.5, %v1060_v27  ;;  %v1100_v6 = vmul.f32 %v1076_v23, %v6439_v19 }
 0x8fe   :  { %v1115_v25 = vadd.f32 %v6465_v10, %v1106_v54 }
 0x8ff   :  { %v1630_v30 = vpack.c.bf16 %v1624_v41, %v1624_v41  ;;  %v1116_v61 = vadd.f32 %v6465_v10, %v1107_v24  ;;  %v1062_v37 = vmul.f32 %v5538_v5, %v1061_v18  ;;  %v1109_v51 = vmul.f32 %v6416_v49, %v1100_v6 }
 0x900   :  { %v1121_v48 = vpack.c.bf16 %v1115_v25, %v1115_v25 }
 0x901   :  { %v1657_v45 = vunpack.c.l.b16 %v1630_v30  ;;  %v1122_v39 = vpack.c.bf16 %v1116_v61, %v1116_v61  ;;  %v1066_v16 = vsel %vm1065_vm10, %v5538_v5, %v1062_v37  ;;  %v1118_v43 = vadd.f32 %v6465_v10, %v1109_v51  ;;  %v1024_v30 = vpop.xlane.xlu0 %1023  ;;  %v5404_v51 = vld [vmem:[%s8581_s3 + $0x18] sm:$0xf0] }
 0x902   :  { %v1637_v29 = vunpack.c.l.b16 %v1121_v48  ;;  %v1099_v1 = vmul.f32 %v1066_v16, %v6421_v56 }
 0x903   :  { %v1660_v60 = vpack.c.b16 %v1657_v45, %v1656_v7  ;;  %v1638_v53 = vunpack.c.l.b16 %v1122_v39  ;;  %v1124_v14 = vpack.c.bf16 %v1118_v43, %v1118_v43  ;;  %v1029_v45 = vmul.f32 %v1021_v44, %v5866_v52 }
 0x904   :  { %v1108_v41 = vmul.f32 %v6416_v49, %v1099_v1 }
 0x905   :  { %1665 = vrot.lane.b32.xlu1 %v1660_v60, %s5750_s8  ;;  %v1643_v38 = vpack.c.b16 %v1638_v53, %v1637_v29  ;;  %v1640_v55 = vunpack.c.l.b16 %v1124_v14  ;;  %v1030_v60 = vmul.f32 %v1024_v30, %v5866_v52  ;;  %v1035_v0 = vadd.f32 1e-05, %v1029_v45 }
 0x906   :  { %v1117_v46 = vadd.f32 %v6465_v10, %v1108_v41 }
 0x907   :  { %v1036_v21 = vadd.f32 1e-05, %v1030_v60  ;;  %5539 = vrsqrt.f32 %v1035_v0  ;;  %vm1083_vm13 = vweird.f32 %v1035_v0 }
 0x908   :  { %v1123_v19 = vpack.c.bf16 %v1117_v46, %v1117_v46 }
 0x909   :  { %5541 = vrsqrt.f32 %v1036_v21  ;;  %vm1093_vm4 = vweird.f32 %v1036_v21 }
 0x90a   :  { %v1639_v56 = vunpack.c.l.b16 %v1123_v19 }
 0x90c   :  { %v1644_v7 = vpack.c.b16 %v1640_v55, %v1639_v56 }
 0x90d   :  { %v5540_v35 = vpop.eup %5539 }
 0x90e   :  { %v1078_v3 = vmul.f32 %v5540_v35, %v1035_v0  ;;  %vm1084_vm11 = vweird.f32 %v5540_v35 }
 0x90f   :  { %v5542_v17 = vpop.eup %5541  ;;  %vm1085_vm2 = vmor %vm1083_vm13, %vm1084_vm11 }
 0x910   :  { %v1088_v5 = vmul.f32 %v5542_v17, %v1036_v21  ;;  %v1079_v20 = vmul.f32 %v5540_v35, %v1078_v3  ;;  %vm1094_vm12 = vweird.f32 %v5542_v17 }
 0x911   :  { %vm1095_vm5 = vmor %vm1093_vm4, %vm1094_vm12 }
 0x912   :  { %v1089_v12 = vmul.f32 %v5542_v17, %v1088_v5  ;;  %v1080_v31 = vmul.f32 0.5, %v1079_v20 }
 0x914   :  { %v1090_v26 = vmul.f32 0.5, %v1089_v12  ;;  %v1081_v15 = vsub.f32 1.5, %v1080_v31 }
 0x916   :  { %v1091_v36 = vsub.f32 1.5, %v1090_v26  ;;  %v1082_v62 = vmul.f32 %v5540_v35, %v1081_v15  ;;  %v6581_v15 = vmul.f32 0.70710677, %v6117_v47 }
 0x918   :  { %v1092_v13 = vmul.f32 %v5542_v17, %v1091_v36  ;;  %v1086_v42 = vsel %vm1085_vm2, %v5540_v35, %v1082_v62  ;;  %v1907_v36 = vmul.f32 %v6581_v15, %v6581_v15  ;;  %v6586_v62 = vmul.f32 0.70710677, %v6113_v9 }
 0x919   :  { %v1101_v58 = vmul.f32 %v1086_v42, %v6449_v34 }
 0x91a   :  { %v1096_v59 = vsel %vm1095_vm5, %v5542_v17, %v1092_v13  ;;  %v6588_v13 = vmin.f32 %v1907_v36, 16.0  ;;  %v1947_v42 = vmul.f32 %v6586_v62, %v6586_v62 }
 0x91b   :  { %v1102_v27 = vmul.f32 %v1096_v59, %v6430_v2  ;;  %v1110_v54 = vmul.f32 %v6416_v49, %v1101_v58 }
 0x91c   :  { %v1920_v59 = vmul.f32 3.8918573e-05, %v6588_v13  ;;  %v6593_v58 = vmin.f32 %v1947_v42, 16.0 }
 0x91d   :  { %v1111_v22 = vmul.f32 %v6416_v49, %v1102_v27  ;;  %v1119_v24 = vadd.f32 %v6465_v10, %v1110_v54  ;;  %v6596_v54 = vmul.f32 0.70710677, %v6139_v33 }
 0x91e   :  { %v1921_v27 = vadd.f32 0.001143296, %v1920_v59 }
 0x91f   :  { %v1120_v18 = vadd.f32 %v6465_v10, %v1111_v22  ;;  %v1125_v25 = vpack.c.bf16 %v1119_v24, %v1119_v24 }
 0x921   :  { %v1126_v50 = vpack.c.bf16 %v1120_v18, %v1120_v18  ;;  %v1641_v61 = vunpack.c.l.b16 %v1125_v25  ;;  %v1960_v18 = vmul.f32 3.8918573e-05, %v6593_v58  ;;  %v1922_v25 = vmul.f32 %v1921_v27, %v6588_v13 }
 0x923   :  { %v1642_v37 = vunpack.c.l.b16 %v1126_v50 }
 0x925   :  { %v1645_v48 = vpack.c.b16 %v1642_v37, %v1641_v61  ;;  %v1987_v61 = vmul.f32 %v6596_v54, %v6596_v54 }
 0x927   :  { %v1662_v40 = vpop.permute.xlu1 %1661 }
 0x928   :  { %v1669_v8 = vsel %vm83_vm1, %v1643_v38, %v1662_v40  ;;  %v5264_v40 = vld [vmem:[%s8581_s3 + $0x8] sm:$0xf] }
 0x929   :  { %5236 = vmatmul.msk.bf16.vlgmr.msrb.gmra.mxu0 %vm551_vm3, %v1669_v8  ;;  %v5265_v8 = vor.u32 %v5404_v51, %v5264_v40 }
 0x939   :  { %v1664_v32 = vpop.permute.xlu0 %1663 }
 0x93a   :  { %v1672_v28 = vsel %vm83_vm1, %v1644_v7, %v1664_v32 }
 0x93b   :  { %5237 = vmatmul.msk.bf16.gmra.mxu0 %vm551_vm3, %v1672_v28 }
 0x941   :  { %v1712_v34 = vpop.permute.xlu0 %1711 }
 0x977   :  { %v1666_v23 = vpop.permute.xlu1 %1665 }
 0x978   :  { %v1675_v39 = vsel %vm83_vm1, %v1645_v48, %v1666_v23  ;;  %v1961_v48 = vadd.f32 0.001143296, %v1960_v18  ;;  %v1923_v23 = vadd.f32 0.014752088, %v1922_v25 }
 0x979   :  { %5238 = vmatmul.msk.bf16.gmra.mxu0 %vm551_vm3, %v1675_v39 }
 0x9a6   :  { %v1729_v2 = vpop.f32.mrf.mxu0 }
 0x9a7   :  { %v1730_v16 = vadd.f32 %v1729_v2, %v1712_v34 }
 0x9a9   :  { %v1745_v29 = vsel %vm83_vm1, %v1730_v16, 0.0 }
 0x9aa   :  { %1746 = vadd.xlane.f32.xlu1 %v1745_v29  ;;  %v1962_v29 = vmul.f32 %v1961_v48, %v6593_v58 }
 0x9ae   :  { %v1731_v49 = vpop.f32.mrf.mxu0 }
 0x9af   :  { %v1732_v6 = vadd.f32 %v1731_v49, %v1712_v34  ;;  %v1924_v49 = vmul.f32 %v1923_v23, %v6588_v13 }
 0x9b1   :  { %v1748_v10 = vsel %vm83_vm1, %v1732_v6, 0.0 }
 0x9b2   :  { %1749 = vadd.xlane.f32.xlu2 %v1748_v10 }
 0x9b8   :  { %v1734_v53 = vpop.f32.mrf.mxu0 }
 0x9b9   :  { %v1735_v1 = vadd.f32 %v1734_v53, %v1712_v34 }
 0x9bb   :  { %v1751_v38 = vsel %vm83_vm1, %v1735_v1, 0.0 }
 0x9bc   :  { %1752 = vadd.xlane.f32.xlu0 %v1751_v38  ;;  %v1925_v38 = vadd.f32 0.112945676, %v1924_v49 }
 0x9c0   :  { %v1736_v41 = vpop.f32.mrf.mxu0 }
 0x9c1   :  { %v1737_v43 = vadd.f32 %v1736_v41, %v1712_v34 }
 0x9c3   :  { %v1754_v46 = vsel %vm83_vm1, %v1737_v43, 0.0 }
 0x9ca   :  { %2670 = vrot.lane.b32.xlu2 %v5265_v8, %s5752_s29 }
 0x9f3   :  { %1755 = vadd.xlane.f32.xlu2 %v1754_v46  ;;  %v1926_v46 = vmul.f32 %v1925_v38, %v6588_v13 }
 0x9f6   :  { %v1739_v14 = vpop.f32.mrf.mxu0 }
 0x9f7   :  { %v1740_v30 = vadd.f32 %v1739_v14, %v1712_v34 }
 0x9f9   :  { %v1757_v19 = vsel %vm83_vm1, %v1740_v30, 0.0 }
 0x9fb   :  { %1758 = vadd.xlane.f32.xlu2 %v1757_v19 }
 0x9fe   :  { %v1741_v55 = vpop.f32.mrf.mxu0 }
 0x9ff   :  { %v1742_v44 = vadd.f32 %v1741_v55, %v1712_v34  ;;  %v6608_v34 = vmin.f32 %v1987_v61, 16.0  ;;  %v1909_v55 = vmul.f32 2.1237322e-06, %v6588_v13 }
 0xa01   :  { %v1760_v56 = vsel %vm83_vm1, %v1742_v44, 0.0  ;;  %v2000_v10 = vmul.f32 3.8918573e-05, %v6608_v34 }
 0xa03   :  { %1761 = vadd.xlane.f32.xlu2 %v1760_v56  ;;  %v2001_v51 = vadd.f32 0.001143296, %v2000_v10 }
 0xa1b   :  { %1877 = vrot.lane.b32.xlu2 %v6517_v57, %s5750_s8 }
 0xa1d   :  { %v1747_v7 = vpop.xlane.xlu1 %1746 }
 0xa1e   :  { %v1763_v45 = vmul.f32 %v1747_v7, %v5866_v52  ;;  %v1927_v7 = vadd.f32 0.4994258, %v1926_v46 }
 0xa20   :  { %v6563_v32 = vsub.f32 %v1730_v16, %v1763_v45 }
 0xa22   :  { %v1775_v28 = vmul.f32 %v6563_v32, %v6563_v32 }
 0xa24   :  { %v1781_v60 = vsel %vm83_vm1, %v1775_v28, 0.0 }
 0xa25   :  { %1782 = vadd.xlane.f32.xlu1 %v1781_v60  ;;  %v1750_v0 = vpop.xlane.xlu2 %1749  ;;  %v1910_v60 = vadd.f32 0.00028619796, %v1909_v55 }
 0xa26   :  { %v1764_v21 = vmul.f32 %v1750_v0, %v5866_v52 }
 0xa28   :  { %v6569_v35 = vsub.f32 %v1732_v6, %v1764_v21  ;;  %v1928_v21 = vmul.f32 %v1927_v7, %v6588_v13 }
 0xa2a   :  { %v1776_v17 = vmul.f32 %v6569_v35, %v6569_v35 }
 0xa2c   :  { %v1784_v57 = vsel %vm83_vm1, %v1776_v17, 0.0  ;;  %v1911_v17 = vmul.f32 %v1910_v60, %v6588_v13 }
 0xa2d   :  { %1785 = vadd.xlane.f32.xlu0 %v1784_v57  ;;  %v2671_v3 = vpop.permute.xlu2 %2670  ;;  %v1949_v57 = vmul.f32 2.1237322e-06, %v6593_v58 }
 0xa2e   :  { %2689 = vmatpush.bf16.msra.mxu2 %v2671_v3 }
 0xa2f   :  { %v1753_v5 = vpop.xlane.xlu0 %1752  ;;  %v1950_v36 = vadd.f32 0.00028619796, %v1949_v57 }
 0xa30   :  { %v1765_v20 = vmul.f32 %v1753_v5, %v5866_v52  ;;  %v6634_v5 = vadd.f32 1.0, %v1928_v21 }
 0xa31   :  { %v1951_v25 = vmul.f32 %v1950_v36, %v6593_v58 }
 0xa32   :  { %v6575_v12 = vsub.f32 %v1735_v1, %v1765_v20  ;;  %v1963_v1 = vadd.f32 0.014752088, %v1962_v29  ;;  %5543 = vrcp.f32 %v6634_v5  ;;  %vm1935_vm7 = vweird.f32 %v6634_v5 }
 0xa34   :  { %v1777_v31 = vmul.f32 %v6575_v12, %v6575_v12 }
 0xa36   :  { %v1787_v26 = vsel %vm83_vm1, %v1777_v31, 0.0  ;;  %v1989_v31 = vmul.f32 2.1237322e-06, %v6608_v34 }
 0xa37   :  { %1788 = vadd.xlane.f32.xlu1 %v1787_v26  ;;  %v1912_v26 = vadd.f32 0.0036580483, %v1911_v17  ;;  %v1941_v17 = vand.u32 2147483648, %v6634_v5 }
 0xa38   :  { %v1990_v27 = vadd.f32 0.00028619796, %v1989_v31  ;;  %v5544_v48 = vpop.eup %5543 }
 0xa39   :  { %v1913_v18 = vmul.f32 %v1912_v26, %v6588_v13  ;;  %v1931_v29 = vmul.f32 %v5544_v48, %v6634_v5  ;;  %vm1936_vm6 = vweird.f32 %v5544_v48 }
 0xa3a   :  { %vm1937_vm8 = vmor %vm1935_vm7, %vm1936_vm6 }
 0xa66   :  { %v1756_v22 = vpop.xlane.xlu2 %1755 }
 0xa67   :  { %v1766_v24 = vmul.f32 %v1756_v22, %v5866_v52  ;;  %v5251_v22 = vld [vmem:[%s8581_s3 + $0x30] sm:$0xf] }
 0xa69   :  { %v6601_v50 = vsub.f32 %v1737_v43, %v1766_v24  ;;  %v1964_v43 = vmul.f32 %v1963_v1, %v6593_v58  ;;  %v5403_v24 = vld [vmem:[%s8581_s3 + $0x40] sm:$0xf0] }
 0xa6a   :  { %v5252_v23 = vor.u32 %v5403_v24, %v5251_v22  ;;  %v1942_v22 = vor.u32 1.1754944e-38, %v1941_v17 }
 0xa6b   :  { %v1778_v37 = vmul.f32 %v6601_v50, %v6601_v50  ;;  %v1965_v56 = vadd.f32 0.112945676, %v1964_v43 }
 0xa6d   :  { %v1790_v39 = vsel %vm83_vm1, %v1778_v37, 0.0  ;;  %v1966_v0 = vmul.f32 %v1965_v56, %v6593_v58 }
 0xa6e   :  { %1791 = vadd.xlane.f32.xlu0 %v1790_v39  ;;  %v1759_v2 = vpop.xlane.xlu2 %1758  ;;  %v1991_v39 = vmul.f32 %v1990_v27, %v6608_v34 }
 0xa6f   :  { %v1767_v16 = vmul.f32 %v1759_v2, %v5866_v52  ;;  %v1967_v3 = vadd.f32 0.4994258, %v1966_v0  ;;  %v1914_v2 = vadd.f32 0.05243302, %v1913_v18 }
 0xa70   :  { %v1992_v10 = vadd.f32 0.0036580483, %v1991_v39 }
 0xa71   :  { %v6613_v6 = vsub.f32 %v1740_v30, %v1767_v16  ;;  %v2002_v30 = vmul.f32 %v2001_v51, %v6608_v34  ;;  %v1968_v42 = vmul.f32 %v1967_v3, %v6593_v58  ;;  %v1952_v16 = vadd.f32 0.0036580483, %v1951_v25 }
 0xa73   :  { %v1779_v53 = vmul.f32 %v6613_v6, %v6613_v6  ;;  %v2003_v28 = vadd.f32 0.014752088, %v2002_v30  ;;  %v6648_v61 = vadd.f32 1.0, %v1968_v42  ;;  %v1953_v1 = vmul.f32 %v1952_v16, %v6593_v58 }
 0xa75   :  { %v1793_v40 = vsel %vm83_vm1, %v1779_v53, 0.0  ;;  %5545 = vrcp.f32 %v6648_v61  ;;  %v1915_v53 = vmul.f32 %v1914_v2, %v6588_v13  ;;  %v1954_v46 = vadd.f32 0.05243302, %v1953_v1 }
 0xa76   :  { %1794 = vadd.xlane.f32.xlu1 %v1793_v40  ;;  %v1762_v8 = vpop.xlane.xlu2 %1761  ;;  %v1932_v40 = vsub.f32 1.0, %v1931_v29  ;;  %v1979_v29 = vand.u32 2147483647, %v6648_v61  ;;  %vm1975_vm11 = vweird.f32 %v6648_v61 }
 0xa77   :  { %v1768_v41 = vmul.f32 %v1762_v8, %v5866_v52  ;;  %v1993_v8 = vmul.f32 %v1992_v10, %v6608_v34  ;;  %v1916_v43 = vadd.f32 0.18741608, %v1915_v53  ;;  %v1955_v0 = vmul.f32 %v1954_v46, %v6593_v58 }
 0xa78   :  { %v1933_v56 = vmul.f32 %v5544_v48, %v1932_v40  ;;  %v6700_v10 = vmul.f32 0.70710677, %v6156_v63  ;;  %vm1980_vm13 = vcmp.eq.f32.partialorder %v1979_v29, 8.507059e+37 }
 0xa79   :  { %v6622_v14 = vsub.f32 %v1742_v44, %v1768_v41  ;;  %v2004_v44 = vmul.f32 %v2003_v28, %v6608_v34  ;;  %v6663_v41 = vmul.f32 0.70710677, %v6142_v11  ;;  %v1994_v7 = vadd.f32 0.05243302, %v1993_v8 }
 0xa7a   :  { %v1917_v60 = vmul.f32 %v1916_v43, %v6588_v13  ;;  %v1939_v13 = vand.u32 2147483647, %v6634_v5  ;;  %v1956_v26 = vadd.f32 0.18741608, %v1955_v0 }
 0xa7b   :  { %v1780_v19 = vmul.f32 %v6622_v14, %v6622_v14  ;;  %v2005_v20 = vadd.f32 0.112945676, %v2004_v44  ;;  %v6657_v38 = vpop.eup %5545  ;;  %v1934_v44 = vadd.f32 %v5544_v48, %v1933_v56  ;;  %v1995_v57 = vmul.f32 %v1994_v7, %v6608_v34 }
 0xa7c   :  { %v1918_v31 = vadd.f32 1.1283791, %v1917_v60  ;;  %vm1940_vm9 = vcmp.eq.f32.partialorder %v1939_v13, 8.507059e+37  ;;  %v1957_v39 = vmul.f32 %v1956_v26, %v6593_v58  ;;  %vm1976_vm10 = vweird.f32 %v6657_v38 }
 0xa7d   :  { %v1796_v45 = vsel %vm83_vm1, %v1780_v19, 0.0  ;;  %v2006_v59 = vmul.f32 %v2005_v20, %v6608_v34  ;;  %v1971_v19 = vmul.f32 %v6657_v38, %v6648_v61  ;;  %v1938_v27 = vsel %vm1937_vm8, %v5544_v48, %v1934_v44  ;;  %vm6703_vm12 = vmor %vm1975_vm11, %vm1976_vm10 }
 0xa7e   :  { %1797 = vadd.xlane.f32.xlu0 %v1796_v45  ;;  %v2027_v45 = vmul.f32 %v6663_v41, %v6663_v41  ;;  %v1996_v24 = vadd.f32 0.18741608, %v1995_v57  ;;  %v1919_v5 = vmul.f32 %v1918_v31, %v6581_v15  ;;  %v1943_v16 = vsel %vm1940_vm9, %v1942_v22, %v1938_v27 }
 0xa7f   :  { %v2007_v37 = vadd.f32 0.4994258, %v2006_v59  ;;  %v1972_v21 = vsub.f32 1.0, %v1971_v19  ;;  %v1958_v19 = vadd.f32 1.1283791, %v1957_v39 }
 0xa80   :  { %v6678_v3 = vmin.f32 %v2027_v45, 16.0  ;;  %v1944_v53 = vmul.f32 %v1943_v16, %v1919_v5  ;;  %v1997_v46 = vmul.f32 %v1996_v24, %v6608_v34 }
 0xa81   :  { %v2008_v49 = vmul.f32 %v2007_v37, %v6608_v34  ;;  %v1973_v42 = vmul.f32 %v6657_v38, %v1972_v21  ;;  %v6717_v34 = vmul.f32 0.70710677, %v6159_v4  ;;  %v1959_v31 = vmul.f32 %v1958_v19, %v6586_v62  ;;  %v6736_v62 = vld [vmem:[%s8582_s4 + $0x4] ss:$0 sm:$0xff] }
 0xa82   :  { %v2040_v25 = vmul.f32 3.8918573e-05, %v6678_v3  ;;  %v5239_v0 = vclamps-f32 %v1944_v53, 1.0 }
 0xa83   :  { %v6659_v51 = vadd.f32 1.0, %v2008_v49  ;;  %v1974_v48 = vadd.f32 %v6657_v38, %v1973_v42  ;;  %v1981_v49 = vand.u32 2147483648, %v6648_v61  ;;  %v2067_v61 = vmul.f32 %v6700_v10, %v6700_v10 }
 0xa84   :  { %v2041_v40 = vadd.f32 0.001143296, %v2040_v25  ;;  %v2147_v22 = vadd.f32 1.0, %v5239_v0  ;;  %v2107_v5 = vmul.f32 %v6717_v34, %v6717_v34  ;;  %v1896_v0 = vmul.f32 0.5, %v6113_v9 }
 0xa85   :  { %5547 = vrcp.f32 %v6659_v51  ;;  %v1978_v43 = vsel %vm6703_vm12, %v6657_v38, %v1974_v48  ;;  %v2019_v13 = vand.u32 2147483647, %v6659_v51  ;;  %v6726_v26 = vmin.f32 %v2067_v61, 16.0 }
 0xa86   :  { %v2042_v38 = vmul.f32 %v2041_v40, %v6678_v3  ;;  %vm2015_vm7 = vweird.f32 %v6659_v51 }
 0xa87   :  { %v2080_v48 = vmul.f32 3.8918573e-05, %v6726_v26  ;;  %vm2020_vm10 = vcmp.eq.f32.partialorder %v2019_v13, 8.507059e+37 }
 0xa8b   :  { %v6680_v20 = vpop.eup %5547 }
 0xa8c   :  { %v2011_v18 = vmul.f32 %v6680_v20, %v6659_v51  ;;  %vm2016_vm6 = vweird.f32 %v6680_v20 }
 0xa8d   :  { %vm6746_vm8 = vmor %vm2015_vm7, %vm2016_vm6 }
 0xa8e   :  { %v2012_v58 = vsub.f32 1.0, %v2011_v18  ;;  %v2021_v18 = vand.u32 2147483648, %v6659_v51 }
 0xa90   :  { %v2013_v45 = vmul.f32 %v6680_v20, %v2012_v58  ;;  %v2022_v53 = vor.u32 1.1754944e-38, %v2021_v18 }
 0xa92   :  { %2340 = vrot.lane.b32.xlu0 %v5252_v23, %s5749_s30 }
 0xa98   :  { %v1783_v30 = vpop.xlane.xlu1 %1782 }
 0xa99   :  { %v1799_v55 = vmul.f32 %v1783_v30, %v5866_v52 }
 0xa9b   :  { %v6671_v28 = vadd.f32 1e-05, %v1799_v55  ;;  %v1982_v55 = vor.u32 1.1754944e-38, %v1981_v49 }
 0xa9d   :  { %5549 = vrsqrt.f32 %v6671_v28  ;;  %v1983_v21 = vsel %vm1980_vm13, %v1982_v55, %v1978_v43  ;;  %vm1817_vm4 = vweird.f32 %v6671_v28  ;;  %v6757_v43 = vmin.f32 %v2107_v5, 16.0 }
 0xa9e   :  { %v1984_v24 = vmul.f32 %v1983_v21, %v1959_v31 }
 0xaa0   :  { %v1786_v36 = vpop.xlane.xlu0 %1785  ;;  %v5240_v58 = vclamps-f32 %v1984_v24, 1.0 }
 0xaa1   :  { %v1800_v59 = vmul.f32 %v1786_v36, %v5866_v52 }
 0xaa3   :  { %v5550_v37 = vpop.eup %5549  ;;  %v6689_v23 = vadd.f32 1e-05, %v1800_v59  ;;  %v6729_v59 = vpop.permute.xlu2 %1877 }
 0xaa4   :  { %v1812_v2 = vmul.f32 %v5550_v37, %v6671_v28  ;;  %vm1818_vm2 = vweird.f32 %v5550_v37  ;;  %v2014_v28 = vadd.f32 %v6680_v20, %v2013_v45 }
 0xaa5   :  { %5551 = vrsqrt.f32 %v6689_v23  ;;  %vm1819_vm5 = vmor %vm1817_vm4, %vm1818_vm2  ;;  %vm1827_vm11 = vweird.f32 %v6689_v23 }
 0xaa6   :  { %v1813_v15 = vmul.f32 %v5550_v37, %v1812_v2  ;;  %v1998_v2 = vadd.f32 1.1283791, %v1997_v46  ;;  %v2018_v51 = vsel %vm6746_vm8, %v6680_v20, %v2014_v28  ;;  %v2081_v20 = vadd.f32 0.001143296, %v2080_v48 }
 0xaa7   :  { %v2023_v19 = vsel %vm2020_vm10, %v2022_v53, %v2018_v51 }
 0xaa8   :  { %v1814_v8 = vmul.f32 0.5, %v1813_v15  ;;  %v1999_v61 = vmul.f32 %v1998_v2, %v6596_v54  ;;  %v2082_v54 = vmul.f32 %v2081_v20, %v6726_v26  ;;  %v2029_v2 = vmul.f32 2.1237322e-06, %v6678_v3 }
 0xaaa   :  { %v1789_v30 = vpop.xlane.xlu1 %1788  ;;  %v1815_v56 = vsub.f32 1.5, %v1814_v8  ;;  %v2024_v21 = vmul.f32 %v2023_v19, %v1999_v61  ;;  %v2083_v24 = vadd.f32 0.014752088, %v2082_v54 }
 0xaab   :  { %v1801_v7 = vmul.f32 %v1789_v30, %v5866_v52  ;;  %v5552_v60 = vpop.eup %5551 }
 0xaac   :  { %v1816_v44 = vmul.f32 %v5550_v37, %v1815_v56  ;;  %v1822_v17 = vmul.f32 %v5552_v60, %v6689_v23  ;;  %vm1828_vm9 = vweird.f32 %v5552_v60  ;;  %v2148_v23 = vadd.f32 1.0, %v5240_v58 }
 0xaad   :  { %v6721_v57 = vadd.f32 1e-05, %v1801_v7  ;;  %vm1829_vm12 = vmor %vm1827_vm11, %vm1828_vm9 }
 0xaae   :  { %v1820_v36 = vsel %vm1819_vm5, %v5550_v37, %v1816_v44  ;;  %v1823_v42 = vmul.f32 %v5552_v60, %v1822_v17  ;;  %v2043_v37 = vadd.f32 0.014752088, %v2042_v38  ;;  %v2120_v44 = vmul.f32 3.8918573e-05, %v6757_v43 }
 0xaaf   :  { %5553 = vrsqrt.f32 %v6721_v57  ;;  %v1871_v27 = vmul.f32 %v1820_v36, %v6563_v32  ;;  %v1895_v32 = vmul.f32 0.5, %v6117_v47  ;;  %v2154_v13 = vmul.f32 %v2148_v23, %v1896_v0 }
 0xab0   :  { %v1824_v25 = vmul.f32 0.5, %v1823_v42  ;;  %v2044_v8 = vmul.f32 %v2043_v37, %v6678_v3  ;;  %v5241_v36 = vclamps-f32 %v2024_v21, 1.0  ;;  %v2121_v28 = vadd.f32 0.001143296, %v2120_v44 }
 0xab1   :  { %v1880_v39 = vmul.f32 %v6729_v59, %v1871_v27  ;;  %v2153_v15 = vmul.f32 %v2147_v22, %v1895_v32  ;;  %vm1837_vm2 = vweird.f32 %v6721_v57 }
 0xab2   :  { %v1825_v29 = vsub.f32 1.5, %v1824_v25  ;;  %v2045_v38 = vadd.f32 0.112945676, %v2044_v8  ;;  %v2149_v5 = vadd.f32 1.0, %v5241_v36 }
 0xab3   :  { %v1889_v49 = vadd.f32 %v6736_v62, %v1880_v39  ;;  %v2122_v39 = vmul.f32 %v2121_v28, %v6757_v43 }
 0xab4   :  { %v1826_v40 = vmul.f32 %v5552_v60, %v1825_v29  ;;  %v2046_v42 = vmul.f32 %v2045_v38, %v6678_v3  ;;  %v1897_v29 = vmul.f32 0.5, %v6139_v33  ;;  %v2109_v38 = vmul.f32 2.1237322e-06, %v6757_v43 }
 0xab5   :  { %v5554_v1 = vpop.eup %5553  ;;  %v2159_v30 = vadd.f32 %v2153_v15, %v1889_v49  ;;  %v2030_v49 = vadd.f32 0.00028619796, %v2029_v2 }
 0xab6   :  { %v1832_v46 = vmul.f32 %v5554_v1, %v6721_v57  ;;  %v1830_v55 = vsel %vm1829_vm12, %v5552_v60, %v1826_v40  ;;  %vm1838_vm13 = vweird.f32 %v5554_v1  ;;  %v2047_v16 = vadd.f32 0.4994258, %v2046_v42 }
 0xab7   :  { %v6762_v7 = vadd.f32 %v2159_v30, %v6117_v47  ;;  %v1872_v45 = vmul.f32 %v1830_v55, %v6569_v35  ;;  %vm1839_vm4 = vmor %vm1837_vm2, %vm1838_vm13  ;;  %v2084_v57 = vmul.f32 %v2083_v24, %v6726_v26  ;;  %v2155_v51 = vmul.f32 %v2149_v5, %v1897_v29 }
 0xab8   :  { %v1833_v56 = vmul.f32 %v5554_v1, %v1832_v46  ;;  %v2048_v15 = vmul.f32 %v2047_v16, %v6678_v3  ;;  %v2031_v8 = vmul.f32 %v2030_v49, %v6678_v3 }
 0xab9   :  { %v2171_v31 = vsel %vm83_vm1, %v6762_v7, 0.0  ;;  %v1881_v60 = vmul.f32 %v6729_v59, %v1872_v45  ;;  %v2085_v58 = vadd.f32 0.112945676, %v2084_v57 }
 0xaba   :  { %v1834_v17 = vmul.f32 0.5, %v1833_v56  ;;  %2172 = vadd.xlane.f32.xlu2 %v2171_v31  ;;  %v2049_v46 = vadd.f32 1.0, %v2048_v15  ;;  %v2032_v55 = vadd.f32 0.0036580483, %v2031_v8  ;;  %v2069_v56 = vmul.f32 2.1237322e-06, %v6726_v26 }
 0xabb   :  { %v1890_v35 = vadd.f32 %v6736_v62, %v1881_v60  ;;  %v2086_v30 = vmul.f32 %v2085_v58, %v6726_v26 }
 0xabc   :  { %v1835_v47 = vsub.f32 1.5, %v1834_v17  ;;  %5555 = vrcp.f32 %v2049_v46  ;;  %v2033_v45 = vmul.f32 %v2032_v55, %v6678_v3  ;;  %v2070_v0 = vadd.f32 0.00028619796, %v2069_v56 }
 0xabd   :  { %v2160_v22 = vadd.f32 %v2154_v13, %v1890_v35  ;;  %v2087_v61 = vadd.f32 0.4994258, %v2086_v30  ;;  %v2651_v35 = vld [vmem:[%s8580_s2 + $0x8] sm:$0xff]  ;;  %v2110_v13 = vadd.f32 0.00028619796, %v2109_v38  ;;  %vm2055_vm6 = vweird.f32 %v2049_v46 }
 0xabe   :  { %v1836_v27 = vmul.f32 %v5554_v1, %v1835_v47  ;;  %v2034_v17 = vadd.f32 0.05243302, %v2033_v45  ;;  %v2071_v54 = vmul.f32 %v2070_v0, %v6726_v26  ;;  %v2650_v47 = vld [vmem:[%s8580_s2] sm:$0xff]  ;;  %v2059_v15 = vand.u32 2147483647, %v2049_v46 }
 0xabf   :  { %v6775_v25 = vadd.f32 %v2160_v22, %v6113_v9  ;;  %v2088_v23 = vmul.f32 %v2087_v61, %v6726_v26  ;;  %v2656_v42 = vpack.c.bf16 %v2651_v35, %v2650_v47  ;;  %v2111_v24 = vmul.f32 %v2110_v13, %v6757_v43 }
 0xac0   :  { %v1840_v18 = vsel %vm1839_vm4, %v5554_v1, %v1836_v27  ;;  %v2035_v28 = vmul.f32 %v2034_v17, %v6678_v3  ;;  %v2072_v22 = vadd.f32 0.0036580483, %v2071_v54  ;;  %vm2060_vm8 = vcmp.eq.f32.partialorder %v2059_v15, 8.507059e+37 }
 0xac1   :  { %v1873_v37 = vmul.f32 %v1840_v18, %v6575_v12  ;;  %v2174_v32 = vsel %vm83_vm1, %v6775_v25, 0.0  ;;  %v2123_v12 = vadd.f32 0.014752088, %v2122_v39  ;;  %v6802_v31 = vadd.f32 1.0, %v2088_v23  ;;  %5266 = vmatmul.msk.bf16.vlgmr.msra.gmra.mxu2 %vm49_vm0, %v2656_v42 }
 0xac2   :  { %2175 = vadd.xlane.f32.xlu1 %v2174_v32  ;;  %v5556_v21 = vpop.eup %5555  ;;  %v2073_v39 = vmul.f32 %v2072_v22, %v6726_v26  ;;  %v2112_v2 = vadd.f32 0.0036580483, %v2111_v24 }
 0xac3   :  { %v1882_v48 = vmul.f32 %v6729_v59, %v1873_v37  ;;  %v2124_v40 = vmul.f32 %v2123_v12, %v6757_v43  ;;  %v2051_v60 = vmul.f32 %v5556_v21, %v2049_v46  ;;  %5557 = vrcp.f32 %v6802_v31 }
 0xac4   :  { %v2036_v37 = vadd.f32 0.18741608, %v2035_v28  ;;  %vm2056_vm5 = vweird.f32 %v5556_v21  ;;  %v2061_v12 = vand.u32 2147483648, %v2049_v46  ;;  %v2113_v58 = vmul.f32 %v2112_v2, %v6757_v43  ;;  %v2653_v46 = vld [vmem:[%s8580_s2 + $0x18] sm:$0xff] }
 0xac5   :  { %v1891_v9 = vadd.f32 %v6736_v62, %v1882_v48  ;;  %v2125_v20 = vadd.f32 0.112945676, %v2124_v40  ;;  %v2052_v27 = vsub.f32 1.0, %v2051_v60  ;;  %vm2057_vm7 = vmor %vm2055_vm6, %vm2056_vm5  ;;  %v2101_v42 = vand.u32 2147483648, %v6802_v31 }
 0xac6   :  { %v2037_v57 = vmul.f32 %v2036_v37, %v6678_v3  ;;  %v2114_v61 = vadd.f32 0.05243302, %v2113_v58  ;;  %vm2095_vm10 = vweird.f32 %v6802_v31 }
 0xac7   :  { %v2161_v53 = vadd.f32 %v2155_v51, %v1891_v9  ;;  %v2053_v5 = vmul.f32 %v5556_v21, %v2052_v27  ;;  %v2074_v9 = vadd.f32 0.05243302, %v2073_v39  ;;  %v2099_v27 = vand.u32 2147483647, %v6802_v31 }
 0xac8   :  { %v2115_v54 = vmul.f32 %v2114_v61, %v6757_v43 }
 0xac9   :  { %v6788_v1 = vadd.f32 %v2161_v53, %v6139_v33  ;;  %v2126_v33 = vmul.f32 %v2125_v20, %v6757_v43  ;;  %v6819_v32 = vpop.eup %5557  ;;  %v2054_v29 = vadd.f32 %v5556_v21, %v2053_v5  ;;  %v2038_v53 = vadd.f32 1.1283791, %v2037_v57  ;;  %v2652_v20 = vld [vmem:[%s8580_s2 + $0x10] sm:$0xff] }
 0xaca   :  { %v2091_v51 = vmul.f32 %v6819_v32, %v6802_v31  ;;  %v2075_v8 = vmul.f32 %v2074_v9, %v6726_v26  ;;  %v2657_v55 = vpack.c.bf16 %v2653_v46, %v2652_v20  ;;  %vm2096_vm9 = vweird.f32 %v6819_v32 }
 0xacb   :  { %v2177_v19 = vsel %vm83_vm1, %v6788_v1, 0.0  ;;  %v2127_v44 = vadd.f32 0.4994258, %v2126_v33  ;;  %v2058_v3 = vsel %vm2057_vm7, %v5556_v21, %v2054_v29  ;;  %v2039_v0 = vmul.f32 %v2038_v53, %v6663_v41  ;;  %vm6856_vm11 = vmor %vm2095_vm10, %vm2096_vm9 }
 0xacc   :  { %2178 = vadd.xlane.f32.xlu0 %v2177_v19  ;;  %v2092_v30 = vsub.f32 1.0, %v2091_v51  ;;  %v2062_v19 = vor.u32 1.1754944e-38, %v2061_v12  ;;  %v2076_v21 = vadd.f32 0.18741608, %v2075_v8  ;;  %v2116_v22 = vadd.f32 0.18741608, %v2115_v54 }
 0xacd   :  { %v2128_v36 = vmul.f32 %v2127_v44, %v6757_v43  ;;  %vm2100_vm13 = vcmp.eq.f32.partialorder %v2099_v27, 8.507059e+37  ;;  %v2654_v12 = vld [vmem:[%s8580_s2 + $0x20] sm:$0xff] }
 0xace   :  { %v2063_v33 = vsel %vm2060_vm8, %v2062_v19, %v2058_v3  ;;  %v2093_v38 = vmul.f32 %v6819_v32, %v2092_v30  ;;  %v2077_v13 = vmul.f32 %v2076_v21, %v6726_v26  ;;  %v2117_v51 = vmul.f32 %v2116_v22, %v6757_v43 }
 0xacf   :  { %v6816_v18 = vadd.f32 1.0, %v2128_v36  ;;  %v2064_v60 = vmul.f32 %v2063_v33, %v2039_v0  ;;  %v1898_v33 = vmul.f32 0.5, %v6142_v11 }
 0xad0   :  { %v2094_v41 = vadd.f32 %v6819_v32, %v2093_v38  ;;  %v2078_v39 = vadd.f32 1.1283791, %v2077_v13 }
 0xad1   :  { %5559 = vrcp.f32 %v6816_v18  ;;  %5267 = vmatmul.msk.bf16.gmra.mxu2 %vm49_vm0, %v2657_v55  ;;  %v5242_v28 = vclamps-f32 %v2064_v60, 1.0  ;;  %v2141_v19 = vand.u32 2147483648, %v6816_v18  ;;  %vm2135_vm6 = vweird.f32 %v6816_v18 }
 0xad2   :  { %2312 = vrot.lane.b32.xlu2 %v6736_v62, %s5752_s29  ;;  %v2098_v2 = vsel %vm6856_vm11, %v6819_v32, %v2094_v41  ;;  %v2655_v32 = vld [vmem:[%s8580_s2 + $0x28] sm:$0xff]  ;;  %v2079_v3 = vmul.f32 %v2078_v39, %v6700_v10  ;;  %v2139_v55 = vand.u32 2147483647, %v6816_v18 }
 0xad3   :  { %v2150_v9 = vadd.f32 1.0, %v5242_v28  ;;  %v2658_v20 = vpack.c.bf16 %v2655_v32, %v2654_v12  ;;  %v2142_v0 = vor.u32 1.1754944e-38, %v2141_v19 }
 0xad4   :  { %vm2140_vm9 = vcmp.eq.f32.partialorder %v2139_v55, 8.507059e+37 }
 0xad5   :  { %v2156_v38 = vmul.f32 %v2150_v9, %v1898_v33 }
 0xad7   :  { %v6829_v40 = vpop.eup %5559 }
 0xad8   :  { %v2131_v45 = vmul.f32 %v6829_v40, %v6816_v18  ;;  %vm2136_vm5 = vweird.f32 %v6829_v40 }
 0xad9   :  { %vm6884_vm7 = vmor %vm2135_vm6, %vm2136_vm5 }
 0xada   :  { %v2132_v35 = vsub.f32 1.0, %v2131_v45  ;;  %v2118_v45 = vadd.f32 1.1283791, %v2117_v51  ;;  %v1900_v51 = vmul.f32 0.5, %v6159_v4 }
 0xae1   :  { %v1792_v16 = vpop.xlane.xlu0 %1791  ;;  %5268 = vmatmul.msk.bf16.gmra.mxu2 %vm49_vm0, %v2658_v20 }
 0xae2   :  { %v1802_v48 = vmul.f32 %v1792_v16, %v5866_v52  ;;  %v2133_v16 = vmul.f32 %v6829_v40, %v2132_v35 }
 0xae4   :  { %v6826_v49 = vadd.f32 1e-05, %v1802_v48  ;;  %v2102_v48 = vor.u32 1.1754944e-38, %v2101_v42  ;;  %v2134_v43 = vadd.f32 %v6829_v40, %v2133_v16 }
 0xae6   :  { %5561 = vrsqrt.f32 %v6826_v49  ;;  %vm1847_vm2 = vweird.f32 %v6826_v49  ;;  %v2103_v53 = vsel %vm2100_vm13, %v2102_v48, %v2098_v2 }
 0xae9   :  { %v1795_v56 = vpop.xlane.xlu1 %1794 }
 0xaea   :  { %v1803_v23 = vmul.f32 %v1795_v56, %v5866_v52  ;;  %v5402_v56 = vld [vmem:[%s8581_s3 + $0x18] sm:$0xf0] }
 0xaec   :  { %v5562_v44 = vpop.eup %5561  ;;  %v6845_v17 = vadd.f32 1e-05, %v1803_v23  ;;  %v2138_v23 = vsel %vm6884_vm7, %v6829_v40, %v2134_v43  ;;  %v2119_v40 = vmul.f32 %v2118_v45, %v6717_v34 }
 0xaed   :  { %v1842_v47 = vmul.f32 %v5562_v44, %v6826_v49  ;;  %vm1848_vm12 = vweird.f32 %v5562_v44  ;;  %v2104_v49 = vmul.f32 %v2103_v53, %v2079_v3 }
 0xaee   :  { %5563 = vrsqrt.f32 %v6845_v17  ;;  %vm1849_vm4 = vmor %vm1847_vm2, %vm1848_vm12  ;;  %vm1857_vm10 = vweird.f32 %v6845_v17 }
 0xaef   :  { %v1843_v36 = vmul.f32 %v5562_v44, %v1842_v47  ;;  %v2143_v47 = vsel %vm2140_vm9, %v2142_v0, %v2138_v23 }
 0xaf0   :  { %v2144_v27 = vmul.f32 %v2143_v47, %v2119_v40  ;;  %v6953_v47 = vld [vmem:[%s8582_s4 + $0x5] ss:$0 sm:$0xff] }
 0xaf1   :  { %v1844_v24 = vmul.f32 0.5, %v1843_v36  ;;  %v1798_v37 = vpop.xlane.xlu0 %1797 }
 0xaf2   :  { %v1804_v26 = vmul.f32 %v1798_v37, %v5866_v52  ;;  %v1899_v37 = vmul.f32 0.5, %v6156_v63  ;;  %v5244_v39 = vclamps-f32 %v2144_v27, 1.0 }
 0xaf3   :  { %v1845_v57 = vsub.f32 1.5, %v1844_v24 }
 0xaf4   :  { %v5564_v31 = vpop.eup %5563  ;;  %v6865_v29 = vadd.f32 1e-05, %v1804_v26  ;;  %v2152_v48 = vadd.f32 1.0, %v5244_v39 }
 0xaf5   :  { %v1846_v15 = vmul.f32 %v5562_v44, %v1845_v57  ;;  %v1852_v58 = vmul.f32 %v5564_v31, %v6845_v17  ;;  %vm1858_vm8 = vweird.f32 %v5564_v31 }
 0xaf6   :  { %5565 = vrsqrt.f32 %v6865_v29  ;;  %vm1859_vm11 = vmor %vm1857_vm10, %vm1858_vm8  ;;  %vm1867_vm12 = vweird.f32 %v6865_v29  ;;  %v2158_v32 = vmul.f32 %v2152_v48, %v1900_v51 }
 0xaf7   :  { %v1850_v8 = vsel %vm1849_vm4, %v5562_v44, %v1846_v15  ;;  %v1853_v30 = vmul.f32 %v5564_v31, %v1852_v58  ;;  %v5243_v44 = vclamps-f32 %v2104_v49, 1.0 }
 0xaf8   :  { %v1874_v46 = vmul.f32 %v1850_v8, %v6601_v50 }
 0xaf9   :  { %v1854_v61 = vmul.f32 0.5, %v1853_v30  ;;  %v2151_v28 = vadd.f32 1.0, %v5243_v44 }
 0xafa   :  { %v1883_v10 = vmul.f32 %v6729_v59, %v1874_v46 }
 0xafb   :  { %v1855_v50 = vsub.f32 1.5, %v1854_v61  ;;  %v2157_v26 = vmul.f32 %v2151_v28, %v1899_v37 }
 0xafc   :  { %v5566_v18 = vpop.eup %5565  ;;  %v1892_v21 = vadd.f32 %v6736_v62, %v1883_v10 }
 0xafd   :  { %v1856_v60 = vmul.f32 %v5564_v31, %v1855_v50  ;;  %v1862_v54 = vmul.f32 %v5566_v18, %v6865_v29  ;;  %vm1868_vm0 = vweird.f32 %v5566_v18 }
 0xafe   :  { %v2162_v35 = vadd.f32 %v2156_v38, %v1892_v21  ;;  %vm1869_vm13 = vmor %vm1867_vm12, %vm1868_vm0 }
 0xaff   :  { %v1860_v13 = vsel %vm1859_vm11, %v5564_v31, %v1856_v60  ;;  %v1863_v41 = vmul.f32 %v5566_v18, %v1862_v54 }
 0xb00   :  { %v1875_v36 = vmul.f32 %v1860_v13, %v6613_v6  ;;  %v2168_v42 = vadd.f32 %v2162_v35, %v6142_v11 }
 0xb01   :  { %v1864_v22 = vmul.f32 0.5, %v1863_v41 }
 0xb02   :  { %v2180_v24 = vsel %vm83_vm1, %v2168_v42, 0.0  ;;  %v1884_v17 = vmul.f32 %v6729_v59, %v1875_v36 }
 0xb03   :  { %v1865_v5 = vsub.f32 1.5, %v1864_v22  ;;  %2181 = vadd.xlane.f32.xlu1 %v2180_v24 }
 0xb04   :  { %v1893_v34 = vadd.f32 %v6736_v62, %v1884_v17 }
 0xb05   :  { %v1866_v2 = vmul.f32 %v5566_v18, %v1865_v5 }
 0xb06   :  { %v2163_v11 = vadd.f32 %v2157_v26, %v1893_v34 }
 0xb07   :  { %v1870_v6 = vsel %vm1869_vm13, %v5566_v18, %v1866_v2 }
 0xb08   :  { %v2169_v16 = vadd.f32 %v2163_v11, %v6156_v63  ;;  %v1876_v57 = vmul.f32 %v1870_v6, %v6622_v14  ;;  %v2341_v63 = vpop.permute.xlu0 %2340 }
 0xb09   :  { %2362 = vmatpush.bf16.msra.mxu1 %v2341_v63 }
 0xb0a   :  { %v2183_v31 = vsel %vm83_vm1, %v2169_v16, 0.0  ;;  %v1885_v9 = vmul.f32 %v6729_v59, %v1876_v57 }
 0xb0b   :  { %2184 = vadd.xlane.f32.xlu0 %v2183_v31 }
 0xb0c   :  { %v1894_v12 = vadd.f32 %v6736_v62, %v1885_v9 }
 0xb0e   :  { %v2164_v15 = vadd.f32 %v2158_v32, %v1894_v12 }
 0xb10   :  { %v2170_v29 = vadd.f32 %v2164_v15, %v6159_v4 }
 0xb12   :  { %v2186_v58 = vsel %vm83_vm1, %v2170_v29, 0.0 }
 0xb13   :  { %2187 = vadd.xlane.f32.xlu1 %v2186_v58 }
 0xb2d   :  { %v2173_v14 = vpop.xlane.xlu2 %2172 }
 0xb2e   :  { %v2189_v53 = vmul.f32 %v2173_v14, %v5866_v52 }
 0xb30   :  { %v6915_v3 = vsub.f32 %v6762_v7, %v2189_v53 }
 0xb32   :  { %v2201_v59 = vmul.f32 %v6915_v3, %v6915_v3 }
 0xb34   :  { %v2207_v43 = vsel %vm83_vm1, %v2201_v59, 0.0 }
 0xb35   :  { %v2176_v8 = vpop.xlane.xlu1 %2175  ;;  %2208 = vadd.xlane.f32.xlu0 %v2207_v43 }
 0xb36   :  { %v2190_v4 = vmul.f32 %v2176_v8, %v5866_v52 }
 0xb38   :  { %v6922_v30 = vsub.f32 %v6775_v25, %v2190_v4  ;;  %v5247_v25 = vld [vmem:[%s8581_s3 + $0x8] sm:$0xf] }
 0xb39   :  { %v5248_v10 = vor.u32 %v5402_v56, %v5247_v25  ;;  %v7005_v25 = vpop.permute.xlu2 %2312 }
 0xb3a   :  { %v2202_v19 = vmul.f32 %v6922_v30, %v6922_v30 }
 0xb3c   :  { %v2210_v20 = vsel %vm83_vm1, %v2202_v19, 0.0 }
 0xb3d   :  { %2211 = vadd.xlane.f32.xlu1 %v2210_v20 }
 0xb3f   :  { %v2179_v7 = vpop.xlane.xlu0 %2178 }
 0xb40   :  { %v2191_v46 = vmul.f32 %v2179_v7, %v5866_v52 }
 0xb42   :  { %v6929_v49 = vsub.f32 %v6788_v1, %v2191_v46 }
 0xb44   :  { %v2203_v55 = vmul.f32 %v6929_v49, %v6929_v49  ;;  %v2691_v33 = vpop.f32.mrf.mxu2 }
 0xb45   :  { %v6987_v11 = vadd.f32 %v6953_v47, %v2691_v33 }
 0xb46   :  { %v2213_v61 = vsel %vm83_vm1, %v2203_v55, 0.0 }
 0xb47   :  { %2214 = vadd.xlane.f32.xlu0 %v2213_v61  ;;  %v2706_v6 = vsel %vm83_vm1, %v6987_v11, 0.0 }
 0xb4c   :  { %v2693_v1 = vpop.f32.mrf.mxu2 }
 0xb4d   :  { %v6959_v41 = vadd.f32 %v6953_v47, %v2693_v1 }
 0xb4f   :  { %v2709_v22 = vsel %vm83_vm1, %v6959_v41, 0.0 }
 0xb54   :  { %v2696_v23 = vpop.f32.mrf.mxu2 }
 0xb55   :  { %v6970_v17 = vadd.f32 %v6953_v47, %v2696_v23 }
 0xb57   :  { %v2712_v5 = vsel %vm83_vm1, %v6970_v17, 0.0 }
 0xb5b   :  { %2338 = vrot.lane.b32.xlu0 %v5248_v10, %s5749_s30 }
 0xb5c   :  { %v2698_v60 = vpop.f32.mrf.mxu2 }
 0xb64   :  { %v2701_v28 = vpop.f32.mrf.mxu2 }
 0xb65   :  { %v6973_v37 = vadd.f32 %v6953_v47, %v2701_v28 }
 0xb67   :  { %v2718_v34 = vsel %vm83_vm1, %v6973_v37, 0.0 }
 0xb6c   :  { %v2703_v26 = vpop.f32.mrf.mxu2 }
 0xb6d   :  { %v6982_v39 = vadd.f32 %v6953_v47, %v2703_v26 }
 0xb6f   :  { %v2721_v2 = vsel %vm83_vm1, %v6982_v39, 0.0 }
 0xb76   :  { %v2182_v45 = vpop.xlane.xlu1 %2181 }
 0xb77   :  { %v2192_v50 = vmul.f32 %v2182_v45, %v5866_v52 }
 0xb79   :  { %v6942_v0 = vsub.f32 %v2168_v42, %v2192_v50 }
 0xb7b   :  { %v2204_v18 = vmul.f32 %v6942_v0, %v6942_v0 }
 0xb7d   :  { %v2216_v21 = vsel %vm83_vm1, %v2204_v18, 0.0 }
 0xb7e   :  { %v2185_v38 = vpop.xlane.xlu0 %2184  ;;  %2217 = vadd.xlane.f32.xlu1 %v2216_v21 }
 0xb7f   :  { %v2193_v44 = vmul.f32 %v2185_v38, %v5866_v52 }
 0xb81   :  { %v6948_v54 = vsub.f32 %v2169_v16, %v2193_v44  ;;  %v6992_v16 = vadd.f32 %v6953_v47, %v2698_v60 }
 0xb83   :  { %v2205_v35 = vmul.f32 %v6948_v54, %v6948_v54  ;;  %v2715_v57 = vsel %vm83_vm1, %v6992_v16, 0.0 }
 0xb85   :  { %v2219_v40 = vsel %vm83_vm1, %v2205_v35, 0.0 }
 0xb86   :  { %v2188_v13 = vpop.xlane.xlu1 %2187  ;;  %2220 = vadd.xlane.f32.xlu0 %v2219_v40 }
 0xb87   :  { %v2194_v36 = vmul.f32 %v2188_v13, %v5866_v52 }
 0xb89   :  { %v6962_v42 = vsub.f32 %v2170_v29, %v2194_v36 }
 0xb8b   :  { %v2206_v27 = vmul.f32 %v6962_v42, %v6962_v42 }
 0xb8d   :  { %v2222_v24 = vsel %vm83_vm1, %v2206_v27, 0.0 }
 0xb8e   :  { %2223 = vadd.xlane.f32.xlu2 %v2222_v24  ;;  %2710 = vadd.xlane.f32.xlu0 %v2709_v22 }
 0xb96   :  { %2713 = vadd.xlane.f32.xlu2 %v2712_v5  ;;  %2719 = vadd.xlane.f32.xlu0 %v2718_v34 }
 0xb97   :  { %2303 = vrot.lane.b32.xlu1 %v6736_v62, %s5749_s30 }
 0xb9e   :  { %2722 = vadd.xlane.f32.xlu2 %v2721_v2 }
 0xba8   :  { %v2209_v48 = vpop.xlane.xlu0 %2208 }
 0xba9   :  { %v2225_v9 = vmul.f32 %v2209_v48, %v5866_v52 }
 0xbab   :  { %v2231_v32 = vadd.f32 1e-05, %v2225_v9 }
 0xbad   :  { %5567 = vrsqrt.f32 %v2231_v32  ;;  %vm2243_vm5 = vweird.f32 %v2231_v32 }
 0xbb0   :  { %v2212_v31 = vpop.xlane.xlu1 %2211 }
 0xbb1   :  { %v2226_v51 = vmul.f32 %v2212_v31, %v5866_v52 }
 0xbb3   :  { %v2232_v15 = vadd.f32 1e-05, %v2226_v51  ;;  %v5568_v63 = vpop.eup %5567 }
 0xbb4   :  { %v2238_v59 = vmul.f32 %v5568_v63, %v2231_v32  ;;  %vm2244_vm2 = vweird.f32 %v5568_v63 }
 0xbb5   :  { %5569 = vrsqrt.f32 %v2232_v15  ;;  %vm2245_vm6 = vmor %vm2243_vm5, %vm2244_vm2  ;;  %vm2253_vm7 = vweird.f32 %v2232_v15 }
 0xbb6   :  { %v2239_v20 = vmul.f32 %v5568_v63, %v2238_v59 }
 0xbb8   :  { %v2240_v55 = vmul.f32 0.5, %v2239_v20 }
 0xbba   :  { %v2215_v12 = vpop.xlane.xlu0 %2214  ;;  %v2241_v45 = vsub.f32 1.5, %v2240_v55 }
 0xbbb   :  { %v2227_v58 = vmul.f32 %v2215_v12, %v5866_v52  ;;  %v5570_v14 = vpop.eup %5569 }
 0xbbc   :  { %v2248_v43 = vmul.f32 %v5570_v14, %v2232_v15  ;;  %v2242_v44 = vmul.f32 %v5568_v63, %v2241_v45  ;;  %vm2254_vm4 = vweird.f32 %v5570_v14 }
 0xbbd   :  { %v6999_v53 = vadd.f32 1e-05, %v2227_v58  ;;  %vm2255_vm8 = vmor %vm2253_vm7, %vm2254_vm4 }
 0xbbe   :  { %v2249_v7 = vmul.f32 %v5570_v14, %v2248_v43  ;;  %v2246_v5 = vsel %vm2245_vm6, %v5568_v63, %v2242_v44 }
 0xbbf   :  { %5571 = vrsqrt.f32 %v6999_v53  ;;  %vm2263_vm12 = vweird.f32 %v6999_v53 }
 0xbc0   :  { %v2250_v61 = vmul.f32 0.5, %v2249_v7 }
 0xbc1   :  { %2707 = vadd.xlane.f32.xlu1 %v2706_v6  ;;  %v2297_v6 = vmul.f32 %v2246_v5, %v6915_v3 }
 0xbc2   :  { %v2251_v23 = vsub.f32 1.5, %v2250_v61 }
 0xbc4   :  { %v2252_v60 = vmul.f32 %v5570_v14, %v2251_v23 }
 0xbc5   :  { %v7003_v46 = vpop.eup %5571 }
 0xbc6   :  { %v2258_v33 = vmul.f32 %v7003_v46, %v6999_v53  ;;  %v2256_v34 = vsel %vm2255_vm8, %v5570_v14, %v2252_v60  ;;  %vm2264_vm10 = vweird.f32 %v7003_v46 }
 0xbc7   :  { %vm2265_vm13 = vmor %vm2263_vm12, %vm2264_vm10 }
 0xbc8   :  { %v2259_v21 = vmul.f32 %v7003_v46, %v2258_v33 }
 0xbc9   :  { %2716 = vadd.xlane.f32.xlu1 %v2715_v57  ;;  %v2298_v57 = vmul.f32 %v2256_v34, %v6922_v30 }
 0xbca   :  { %v2260_v27 = vmul.f32 0.5, %v2259_v21 }
 0xbcc   :  { %v2261_v48 = vsub.f32 1.5, %v2260_v27 }
 0xbcd   :  { %v2339_v29 = vpop.permute.xlu0 %2338 }
 0xbce   :  { %2363 = vmatpush.bf16.msra.mxu1 %v2339_v29  ;;  %v2262_v3 = vmul.f32 %v7003_v46, %v2261_v48 }
 0xbf1   :  { %v2218_v8 = vpop.xlane.xlu1 %2217 }
 0xbf2   :  { %v2228_v4 = vmul.f32 %v2218_v8, %v5866_v52 }
 0xbf4   :  { %v2234_v19 = vadd.f32 1e-05, %v2228_v4 }
 0xbf6   :  { %5573 = vrsqrt.f32 %v2234_v19  ;;  %vm2273_vm11 = vweird.f32 %v2234_v19 }
 0xbf9   :  { %v2221_v56 = vpop.xlane.xlu0 %2220 }
 0xbfa   :  { %v2229_v1 = vmul.f32 %v2221_v56, %v5866_v52 }
 0xbfc   :  { %v7007_v10 = vpop.eup %5573  ;;  %v7015_v38 = vadd.f32 1e-05, %v2229_v1 }
 0xbfd   :  { %v2268_v50 = vmul.f32 %v7007_v10, %v2234_v19  ;;  %vm2274_vm9 = vweird.f32 %v7007_v10  ;;  %v2266_v19 = vsel %vm2265_vm13, %v7003_v46, %v2262_v3 }
 0xbfe   :  { %5575 = vrsqrt.f32 %v7015_v38  ;;  %vm2275_vm0 = vmor %vm2273_vm11, %vm2274_vm9  ;;  %v2299_v53 = vmul.f32 %v2266_v19, %v6929_v49  ;;  %vm2283_vm7 = vweird.f32 %v7015_v38 }
 0xbff   :  { %v2269_v18 = vmul.f32 %v7007_v10, %v2268_v50 }
 0xc01   :  { %v2711_v35 = vpop.xlane.xlu0 %2710  ;;  %v2224_v40 = vpop.xlane.xlu2 %2223  ;;  %v2270_v28 = vmul.f32 0.5, %v2269_v18 }
 0xc02   :  { %v2725_v13 = vmul.f32 %v2711_v35, %v5866_v52  ;;  %v2230_v36 = vmul.f32 %v2224_v40, %v5866_v52 }
 0xc03   :  { %v2271_v2 = vsub.f32 1.5, %v2270_v28  ;;  %v5412_v28 = vld [vmem:[%s8581_s3 + $0x68] sm:$0xf0] }
 0xc04   :  { %v7021_v22 = vsub.f32 %v6959_v41, %v2725_v13  ;;  %v2236_v24 = vadd.f32 1e-05, %v2230_v36  ;;  %v5576_v41 = vpop.eup %5575 }
 0xc05   :  { %v2272_v15 = vmul.f32 %v7007_v10, %v2271_v2  ;;  %v2278_v14 = vmul.f32 %v5576_v41, %v7015_v38  ;;  %vm2284_vm4 = vweird.f32 %v5576_v41  ;;  %v5295_v38 = vld [vmem:[%s8581_s3 + $0x58] sm:$0xf] }
 0xc06   :  { %5577 = vrsqrt.f32 %v2236_v24  ;;  %v2737_v26 = vmul.f32 %v7021_v22, %v7021_v22  ;;  %vm2293_vm5 = vweird.f32 %v2236_v24  ;;  %vm2285_vm8 = vmor %vm2283_vm7, %vm2284_vm4  ;;  %v5296_v27 = vor.u32 %v5412_v28, %v5295_v38  ;;  %v5271_v38 = vld [vmem:[%s8581_s3 + $0x8] sm:$0xf] }
 0xc07   :  { %v2276_v4 = vsel %vm2275_vm0, %v7007_v10, %v2272_v15  ;;  %v2279_v55 = vmul.f32 %v5576_v41, %v2278_v14 }
 0xc08   :  { %v2745_v31 = vsel %vm83_vm1, %v2737_v26, 0.0  ;;  %v2300_v61 = vmul.f32 %v2276_v4, %v6942_v0  ;;  %v5411_v4 = vld [vmem:[%s8581_s3 + $0x5c] sm:$0xf] }
 0xc09   :  { %v2304_v9 = vpop.permute.xlu1 %2303  ;;  %2746 = vadd.xlane.f32.xlu0 %v2745_v31  ;;  %v2714_v51 = vpop.xlane.xlu2 %2713  ;;  %v2280_v33 = vmul.f32 0.5, %v2279_v55  ;;  %v5307_v55 = vld [vmem:[%s8581_s3 + $0x80] sm:$0xf] }
 0xc0a   :  { %v2306_v12 = vmul.f32 %v2304_v9, %v2297_v6  ;;  %v2307_v32 = vmul.f32 %v2304_v9, %v2298_v57  ;;  %v2726_v29 = vmul.f32 %v2714_v51, %v5866_v52  ;;  %v2308_v10 = vmul.f32 %v2304_v9, %v2299_v53  ;;  %v2720_v26 = vpop.xlane.xlu0 %2719 }
 0xc0b   :  { %v2309_v1 = vmul.f32 %v2304_v9, %v2300_v61  ;;  %v2281_v23 = vsub.f32 1.5, %v2280_v33  ;;  %v2728_v57 = vmul.f32 %v2720_v26, %v5866_v52 }
 0xc0c   :  { %v5578_v58 = vpop.eup %5577  ;;  %v7034_v30 = vadd.f32 %v7005_v25, %v2306_v12  ;;  %v7037_v63 = vadd.f32 %v7005_v25, %v2307_v32  ;;  %v7041_v43 = vsub.f32 %v6970_v17, %v2726_v29  ;;  %v7055_v50 = vadd.f32 %v7005_v25, %v2308_v10  ;;  %v5283_v10 = vld [vmem:[%s8581_s3 + $0x30] sm:$0xf] }
 0xc0d   :  { %v2288_v59 = vmul.f32 %v5578_v58, %v2236_v24  ;;  %v7058_v18 = vadd.f32 %v7005_v25, %v2309_v1  ;;  %vm2294_vm2 = vweird.f32 %v5578_v58  ;;  %v2282_v21 = vmul.f32 %v5576_v41, %v2281_v23  ;;  %v5409_v1 = vld [vmem:[%s8581_s3 + $0x40] sm:$0xf0] }
 0xc0e   :  { %v2321_v8 = vpack.c.bf16 %v7037_v63, %v7034_v30  ;;  %v2738_v7 = vmul.f32 %v7041_v43, %v7041_v43  ;;  %vm2295_vm6 = vmor %vm2293_vm5, %vm2294_vm2  ;;  %v7103_v31 = vsub.f32 %v6973_v37, %v2728_v57  ;;  %v5284_v23 = vor.u32 %v5409_v1, %v5283_v10 }
 0xc0f   :  { %v2289_v20 = vmul.f32 %v5578_v58, %v2288_v59  ;;  %v2322_v49 = vpack.c.bf16 %v7058_v18, %v7055_v50  ;;  %v2286_v44 = vsel %vm2285_vm8, %v5576_v41, %v2282_v21 }
 0xc10   :  { %5253 = vmatmul.msk.bf16.vlgmr.msra.gmra.mxu1 %vm83_vm1, %v2321_v8  ;;  %v2748_v17 = vsel %vm83_vm1, %v2738_v7, 0.0  ;;  %v2301_v35 = vmul.f32 %v2286_v44, %v6948_v54  ;;  %v2740_v41 = vmul.f32 %v7103_v31, %v7103_v31 }
 0xc11   :  { %2749 = vadd.xlane.f32.xlu2 %v2748_v17  ;;  %v2290_v56 = vmul.f32 0.5, %v2289_v20  ;;  %v5297_v20 = vld [vmem:[%s8581_s3 + $0x6c] sm:$0xf0]  ;;  %v5415_v17 = vld [vmem:[%s8581_s3 + $0x90] sm:$0xf0] }
 0xc12   :  { %v2310_v13 = vmul.f32 %v2304_v9, %v2301_v35  ;;  %v5300_v7 = vor.u32 %v5411_v4, %v5297_v20 }
 0xc13   :  { %v2291_v45 = vsub.f32 1.5, %v2290_v56  ;;  %v5308_v56 = vor.u32 %v5415_v17, %v5307_v55 }
 0xc15   :  { %v2292_v46 = vmul.f32 %v5578_v58, %v2291_v45 }
 0xc17   :  { %v2296_v0 = vsel %vm2295_vm6, %v5578_v58, %v2292_v46  ;;  %v5414_v58 = vld [vmem:[%s8581_s3 + $0x84] sm:$0xf] }
 0xc18   :  { %v2302_v60 = vmul.f32 %v2296_v0, %v6962_v42  ;;  %v7080_v42 = vadd.f32 %v7005_v25, %v2310_v13  ;;  %v5273_v13 = vld [vmem:[%s8581_s3 + $0x1c] sm:$0xf0] }
 0xc1a   :  { %v2311_v40 = vmul.f32 %v2304_v9, %v2302_v60  ;;  %v2723_v9 = vpop.xlane.xlu2 %2722 }
 0xc1b   :  { %v2729_v51 = vmul.f32 %v2723_v9, %v5866_v52 }
 0xc1c   :  { %v7069_v36 = vadd.f32 %v7005_v25, %v2311_v40  ;;  %v5405_v40 = vld [vmem:[%s8581_s3 + $0xc] sm:$0xf] }
 0xc1d   :  { %2838 = vrot.lane.b32.xlu0 %v6953_v47, %s5749_s30  ;;  %v7110_v12 = vsub.f32 %v6982_v39, %v2729_v51  ;;  %v5309_v39 = vld [vmem:[%s8581_s3 + $0x94] sm:$0xf0]  ;;  %v7174_v51 = vmul.f32 0.70710677, %v7037_v63 }
 0xc1e   :  { %v2323_v54 = vpack.c.bf16 %v7069_v36, %v7080_v42  ;;  %v5312_v3 = vor.u32 %v5414_v58, %v5309_v39  ;;  %v5408_v39 = vld [vmem:[%s8581_s3 + $0x34] sm:$0xf] }
 0xc1f   :  { %v2741_v32 = vmul.f32 %v7110_v12, %v7110_v12 }
 0xc20   :  { %5254 = vmatmul.msk.bf16.gmra.mxu1 %vm83_vm1, %v2322_v49 }
 0xc21   :  { %v2757_v37 = vsel %vm83_vm1, %v2741_v32, 0.0 }
 0xc25   :  { %3006 = vrot.lane.b32.xlu0 %v5312_v3, %s5750_s8 }
 0xc29   :  { %2847 = vrot.lane.b32.xlu2 %v6953_v47, %s5752_s29 }
 0xc2d   :  { %3000 = vrot.lane.b32.xlu0 %v5300_v7, %s5750_s8 }
 0xc30   :  { %5255 = vmatmul.msk.bf16.gmra.mxu1 %vm83_vm1, %v2323_v54  ;;  %v5276_v54 = vor.u32 %v5405_v40, %v5273_v13 }
 0xc31   :  { %2998 = vrot.lane.b32.xlu2 %v5296_v27, %s5750_s8  ;;  %v5406_v27 = vld [vmem:[%s8581_s3 + $0x18] sm:$0xf0] }
 0xc34   :  { %v2708_v47 = vpop.xlane.xlu1 %2707 }
 0xc35   :  { %v2724_v24 = vmul.f32 %v2708_v47, %v5866_v52  ;;  %2992 = vrot.lane.b32.xlu0 %v5284_v23, %s5750_s8 }
 0xc37   :  { %v7088_v5 = vsub.f32 %v6987_v11, %v2724_v24 }
 0xc39   :  { %v2736_v34 = vmul.f32 %v7088_v5, %v7088_v5  ;;  %2344 = vrot.lane.b32.xlu2 %v6736_v62, %s5750_s8 }
 0xc3b   :  { %v2742_v25 = vsel %vm83_vm1, %v2736_v34, 0.0 }
 0xc3c   :  { %2743 = vadd.xlane.f32.xlu1 %v2742_v25  ;;  %v2717_v2 = vpop.xlane.xlu1 %2716  ;;  %v5272_v25 = vor.u32 %v5406_v27, %v5271_v38 }
 0xc3d   :  { %v2727_v6 = vmul.f32 %v2717_v2, %v5866_v52  ;;  %2988 = vrot.lane.b32.xlu0 %v5276_v54, %s5750_s8 }
 0xc3f   :  { %v7098_v48 = vsub.f32 %v6992_v16, %v2727_v6  ;;  %v2754_v16 = vsel %vm83_vm1, %v2740_v41, 0.0 }
 0xc41   :  { %v2739_v11 = vmul.f32 %v7098_v48, %v7098_v48 }
 0xc43   :  { %v2751_v62 = vsel %vm83_vm1, %v2739_v11, 0.0 }
 0xc44   :  { %2752 = vadd.xlane.f32.xlu1 %v2751_v62  ;;  %v7171_v62 = vmul.f32 0.70710677, %v7034_v30 }
 0xc46   :  { %v2392_v58 = vmul.f32 %v7171_v62, %v7171_v62 }
 0xc4c   :  { %2755 = vadd.xlane.f32.xlu1 %v2754_v16 }
 0xc54   :  { %2758 = vadd.xlane.f32.xlu1 %v2757_v37 }
 0xc6d   :  { %3004 = vrot.lane.b32.xlu1 %v5308_v56, %s5750_s8 }
 0xc75   :  { %2986 = vrot.lane.b32.xlu1 %v5272_v25, %s5750_s8 }
 0xc7c   :  { %v2747_v15 = vpop.xlane.xlu0 %2746 }
 0xc7d   :  { %v2761_v29 = vmul.f32 %v2747_v15, %v5866_v52 }
 0xc7f   :  { %v2767_v14 = vadd.f32 1e-05, %v2761_v29 }
 0xc81   :  { %5579 = vrsqrt.f32 %v2767_v14  ;;  %vm2788_vm10 = vweird.f32 %v2767_v14 }
 0xc84   :  { %v2750_v59 = vpop.xlane.xlu2 %2749 }
 0xc85   :  { %v2762_v8 = vmul.f32 %v2750_v59, %v5866_v52 }
 0xc87   :  { %v7131_v19 = vadd.f32 1e-05, %v2762_v8  ;;  %v5580_v61 = vpop.eup %5579  ;;  %v2432_v8 = vmul.f32 %v7174_v51, %v7174_v51 }
 0xc88   :  { %v2783_v53 = vmul.f32 %v5580_v61, %v2767_v14  ;;  %vm2789_vm9 = vweird.f32 %v5580_v61 }
 0xc89   :  { %5581 = vrsqrt.f32 %v7131_v19  ;;  %vm2790_vm11 = vmor %vm2788_vm10, %vm2789_vm9  ;;  %vm2798_vm12 = vweird.f32 %v7131_v19  ;;  %v7203_v23 = vmin.f32 %v2432_v8, 16.0 }
 0xc8a   :  { %v2784_v33 = vmul.f32 %v5580_v61, %v2783_v53 }
 0xc8b   :  { %v2445_v13 = vmul.f32 3.8918573e-05, %v7203_v23 }
 0xc8c   :  { %v2785_v21 = vmul.f32 0.5, %v2784_v33 }
 0xc8e   :  { %v2786_v60 = vsub.f32 1.5, %v2785_v21 }
 0xc8f   :  { %v7148_v45 = vpop.eup %5581  ;;  %v7179_v37 = vpop.permute.xlu0 %2838 }
 0xc90   :  { %v2793_v49 = vmul.f32 %v7148_v45, %v7131_v19  ;;  %v2787_v47 = vmul.f32 %v5580_v61, %v2786_v60  ;;  %vm2799_vm0 = vweird.f32 %v7148_v45  ;;  %v7196_v19 = vmin.f32 %v2392_v58, 16.0 }
 0xc91   :  { %vm2800_vm2 = vmor %vm2798_vm12, %vm2799_vm0 }
 0xc92   :  { %v2794_v35 = vmul.f32 %v7148_v45, %v2793_v49  ;;  %v2791_v6 = vsel %vm2790_vm11, %v5580_v61, %v2787_v47  ;;  %v7198_v61 = vpop.permute.xlu2 %2847 }
 0xc93   :  { %v2833_v41 = vmul.f32 %v2791_v6, %v7021_v22  ;;  %v5285_v22 = vld [vmem:[%s8581_s3 + $0x44] sm:$0xf0] }
 0xc94   :  { %v2795_v24 = vmul.f32 0.5, %v2794_v35  ;;  %v5288_v14 = vor.u32 %v5408_v39, %v5285_v22 }
 0xc95   :  { %v2842_v20 = vmul.f32 %v7179_v37, %v2833_v41 }
 0xc96   :  { %v2796_v57 = vsub.f32 1.5, %v2795_v24  ;;  %2994 = vrot.lane.b32.xlu2 %v5288_v14, %s5750_s8 }
 0xc98   :  { %v2797_v32 = vmul.f32 %v7148_v45, %v2796_v57  ;;  %v2446_v57 = vadd.f32 0.001143296, %v2445_v13 }
 0xc9a   :  { %v2801_v7 = vsel %vm2800_vm2, %v7148_v45, %v2797_v32  ;;  %v2851_v45 = vadd.f32 %v7198_v61, %v2842_v20 }
 0xc9b   :  { %v2834_v33 = vmul.f32 %v2801_v7, %v7041_v43 }
 0xc9c   :  { %v2863_v40 = vpack.c.bf16 %v2851_v45, %v2851_v45 }
 0xc9d   :  { %v2843_v43 = vmul.f32 %v7179_v37, %v2834_v33 }
 0xc9f   :  { %v2852_v6 = vadd.f32 %v7198_v61, %v2843_v43 }
 0xcaf   :  { %v2744_v46 = vpop.xlane.xlu1 %2743 }
 0xcb0   :  { %v2760_v0 = vmul.f32 %v2744_v46, %v5866_v52 }
 0xcb2   :  { %v2766_v44 = vadd.f32 1e-05, %v2760_v0  ;;  %v2405_v0 = vmul.f32 3.8918573e-05, %v7196_v19 }
 0xcb4   :  { %5583 = vrsqrt.f32 %v2766_v44  ;;  %vm2778_vm4 = vweird.f32 %v2766_v44  ;;  %v2406_v27 = vadd.f32 0.001143296, %v2405_v0 }
 0xcb6   :  { %v2407_v32 = vmul.f32 %v2406_v27, %v7196_v19  ;;  %v2394_v27 = vmul.f32 2.1237322e-06, %v7196_v19 }
 0xcb7   :  { %v2753_v28 = vpop.xlane.xlu1 %2752 }
 0xcb8   :  { %v2763_v34 = vmul.f32 %v2753_v28, %v5866_v52 }
 0xcba   :  { %v5584_v26 = vpop.eup %5583  ;;  %v2769_v2 = vadd.f32 1e-05, %v2763_v34 }
 0xcbb   :  { %v2773_v11 = vmul.f32 %v5584_v26, %v2766_v44  ;;  %vm2779_vm13 = vweird.f32 %v5584_v26 }
 0xcbc   :  { %5585 = vrsqrt.f32 %v2769_v2  ;;  %vm2780_vm5 = vmor %vm2778_vm4, %vm2779_vm13  ;;  %vm2808_vm7 = vweird.f32 %v2769_v2 }
 0xcbd   :  { %v2774_v9 = vmul.f32 %v5584_v26, %v2773_v11 }
 0xcbf   :  { %v2756_v16 = vpop.xlane.xlu1 %2755  ;;  %v2775_v15 = vmul.f32 0.5, %v2774_v9 }
 0xcc0   :  { %v2764_v29 = vmul.f32 %v2756_v16, %v5866_v52 }
 0xcc1   :  { %v2776_v3 = vsub.f32 1.5, %v2775_v15 }
 0xcc2   :  { %v5586_v59 = vpop.eup %5585  ;;  %v2770_v4 = vadd.f32 1e-05, %v2764_v29  ;;  %v2864_v29 = vpack.c.bf16 %v2852_v6, %v2852_v6 }
 0xcc3   :  { %v2777_v55 = vmul.f32 %v5584_v26, %v2776_v3  ;;  %v2803_v17 = vmul.f32 %v5586_v59, %v2769_v2  ;;  %vm2809_vm6 = vweird.f32 %v5586_v59 }
 0xcc4   :  { %5587 = vrsqrt.f32 %v2770_v4  ;;  %vm2810_vm8 = vmor %vm2808_vm7, %vm2809_vm6  ;;  %vm2818_vm10 = vweird.f32 %v2770_v4  ;;  %v2891_v20 = vunpack.c.l.b16 %v2864_v29 }
 0xcc5   :  { %v2781_v56 = vsel %vm2780_vm5, %v5584_v26, %v2777_v55  ;;  %v2804_v53 = vmul.f32 %v5586_v59, %v2803_v17  ;;  %v2890_v26 = vunpack.c.l.b16 %v2863_v40 }
 0xcc6   :  { %v2832_v10 = vmul.f32 %v2781_v56, %v7088_v5 }
 0xcc7   :  { %v2759_v1 = vpop.xlane.xlu1 %2758  ;;  %v2805_v46 = vmul.f32 0.5, %v2804_v53 }
 0xcc8   :  { %v2765_v21 = vmul.f32 %v2759_v1, %v5866_v52  ;;  %v2841_v49 = vmul.f32 %v7179_v37, %v2832_v10  ;;  %v7224_v1 = vmul.f32 0.70710677, %v7055_v50 }
 0xcc9   :  { %v2806_v44 = vsub.f32 1.5, %v2805_v46 }
 0xcca   :  { %v2771_v60 = vadd.f32 1e-05, %v2765_v21  ;;  %v5588_v35 = vpop.eup %5587  ;;  %v2850_v5 = vadd.f32 %v7198_v61, %v2841_v49 }
 0xccb   :  { %v2807_v38 = vmul.f32 %v5586_v59, %v2806_v44  ;;  %v2813_v28 = vmul.f32 %v5588_v35, %v2770_v4  ;;  %vm2819_vm9 = vweird.f32 %v5588_v35 }
 0xccc   :  { %5589 = vrsqrt.f32 %v2771_v60  ;;  %v2862_v54 = vpack.c.bf16 %v2850_v5, %v2850_v5  ;;  %vm2820_vm11 = vmor %vm2818_vm10, %vm2819_vm9  ;;  %vm2828_vm12 = vweird.f32 %v2771_v60 }
 0xccd   :  { %v2811_v47 = vsel %vm2810_vm8, %v5586_v59, %v2807_v38  ;;  %v2814_v24 = vmul.f32 %v5588_v35, %v2813_v28  ;;  %v2408_v59 = vadd.f32 0.014752088, %v2407_v32 }
 0xcce   :  { %v2835_v34 = vmul.f32 %v2811_v47, %v7098_v48  ;;  %v2889_v25 = vunpack.c.l.b16 %v2862_v54  ;;  %v2447_v48 = vmul.f32 %v2446_v57, %v7203_v23 }
 0xccf   :  { %v2815_v11 = vmul.f32 0.5, %v2814_v24  ;;  %v2409_v33 = vmul.f32 %v2408_v59, %v7196_v19 }
 0xcd0   :  { %v2844_v9 = vmul.f32 %v7179_v37, %v2835_v34  ;;  %v2895_v41 = vpack.c.b16 %v2890_v26, %v2889_v25  ;;  %v2448_v55 = vadd.f32 0.014752088, %v2447_v48  ;;  %v2434_v34 = vmul.f32 2.1237322e-06, %v7203_v23 }
 0xcd1   :  { %v2816_v16 = vsub.f32 1.5, %v2815_v11  ;;  %v2410_v21 = vadd.f32 0.112945676, %v2409_v33  ;;  %v2395_v11 = vadd.f32 0.00028619796, %v2394_v27 }
 0xcd2   :  { %v5590_v2 = vpop.eup %5589  ;;  %2898 = vrot.lane.b32.xlu2 %v2895_v41, %s5750_s8  ;;  %v2853_v15 = vadd.f32 %v7198_v61, %v2844_v9  ;;  %v2449_v4 = vmul.f32 %v2448_v55, %v7203_v23  ;;  %v2435_v9 = vadd.f32 0.00028619796, %v2434_v34 }
 0xcd3   :  { %v2817_v58 = vmul.f32 %v5588_v35, %v2816_v16  ;;  %v2823_v39 = vmul.f32 %v5590_v2, %v2771_v60  ;;  %vm2829_vm0 = vweird.f32 %v5590_v2  ;;  %v2411_v60 = vmul.f32 %v2410_v21, %v7196_v19 }
 0xcd4   :  { %v2865_v22 = vpack.c.bf16 %v2853_v15, %v2853_v15  ;;  %vm2830_vm13 = vmor %vm2828_vm12, %vm2829_vm0  ;;  %v2450_v44 = vadd.f32 0.112945676, %v2449_v4  ;;  %v7253_v15 = vmul.f32 0.70710677, %v7069_v36  ;;  %v2396_v29 = vmul.f32 %v2395_v11, %v7196_v19 }
 0xcd5   :  { %v2821_v3 = vsel %vm2820_vm11, %v5588_v35, %v2817_v58  ;;  %v2824_v14 = vmul.f32 %v5590_v2, %v2823_v39  ;;  %v2472_v35 = vmul.f32 %v7224_v1, %v7224_v1  ;;  %v2412_v47 = vadd.f32 0.4994258, %v2411_v60 }
 0xcd6   :  { %v2836_v8 = vmul.f32 %v2821_v3, %v7103_v31  ;;  %v2892_v7 = vunpack.c.l.b16 %v2865_v22  ;;  %v7227_v31 = vmul.f32 0.70710677, %v7058_v18  ;;  %v2451_v38 = vmul.f32 %v2450_v44, %v7203_v23 }
 0xcd7   :  { %v2825_v17 = vmul.f32 0.5, %v2824_v14  ;;  %v7239_v28 = vmin.f32 %v2472_v35, 16.0  ;;  %v2413_v57 = vmul.f32 %v2412_v47, %v7196_v19  ;;  %v2436_v48 = vmul.f32 %v2435_v9, %v7203_v23 }
 0xcd8   :  { %v2896_v56 = vpack.c.b16 %v2892_v7, %v2891_v20  ;;  %v2845_v10 = vmul.f32 %v7179_v37, %v2836_v8  ;;  %v2512_v5 = vmul.f32 %v7227_v31, %v7227_v31  ;;  %v2452_v25 = vadd.f32 0.4994258, %v2451_v38 }
 0xcd9   :  { %v2826_v53 = vsub.f32 1.5, %v2825_v17  ;;  %v2485_v26 = vmul.f32 3.8918573e-05, %v7239_v28  ;;  %v7250_v32 = vadd.f32 1.0, %v2413_v57  ;;  %v7261_v22 = vmul.f32 0.70710677, %v7080_v42 }
 0xcda   :  { %2900 = vrot.lane.b32.xlu1 %v2896_v56, %s5750_s8  ;;  %v2854_v0 = vadd.f32 %v7198_v61, %v2845_v10  ;;  %v7241_v54 = vmin.f32 %v2512_v5, 16.0  ;;  %v2453_v41 = vmul.f32 %v2452_v25, %v7203_v23  ;;  %v2592_v14 = vmul.f32 %v7253_v15, %v7253_v15 }
 0xcdb   :  { %v2827_v45 = vmul.f32 %v5590_v2, %v2826_v53  ;;  %v2486_v16 = vadd.f32 0.001143296, %v2485_v26  ;;  %5591 = vrcp.f32 %v7250_v32  ;;  %v2397_v59 = vadd.f32 0.0036580483, %v2396_v29 }
 0xcdc   :  { %v2866_v13 = vpack.c.bf16 %v2854_v0, %v2854_v0  ;;  %v7257_v58 = vadd.f32 1.0, %v2453_v41  ;;  %v2437_v8 = vadd.f32 0.0036580483, %v2436_v48  ;;  %v2552_v7 = vmul.f32 %v7261_v22, %v7261_v22 }
 0xcdd   :  { %v2831_v46 = vsel %vm2830_vm13, %v5590_v2, %v2827_v45  ;;  %v2487_v39 = vmul.f32 %v2486_v16, %v7239_v28  ;;  %v7270_v17 = vmin.f32 %v2592_v14, 16.0  ;;  %v2398_v56 = vmul.f32 %v2397_v59, %v7196_v19 }
 0xcde   :  { %v2837_v49 = vmul.f32 %v2831_v46, %v7110_v12  ;;  %v2893_v24 = vunpack.c.l.b16 %v2866_v13  ;;  %5593 = vrcp.f32 %v7257_v58  ;;  %v2438_v53 = vmul.f32 %v2437_v8, %v7203_v23 }
 0xcdf   :  { %v2488_v20 = vadd.f32 0.014752088, %v2487_v39  ;;  %v7277_v4 = vmin.f32 %v2552_v7, 16.0  ;;  %v2605_v21 = vmul.f32 3.8918573e-05, %v7270_v17  ;;  %vm2420_vm5 = vweird.f32 %v7250_v32 }
 0xce0   :  { %v2846_v43 = vmul.f32 %v7179_v37, %v2837_v49  ;;  %v2399_v49 = vadd.f32 0.05243302, %v2398_v56  ;;  %v2439_v0 = vadd.f32 0.05243302, %v2438_v53  ;;  %v2474_v34 = vmul.f32 2.1237322e-06, %v7239_v28 }
 0xce1   :  { %v2489_v33 = vmul.f32 %v2488_v20, %v7239_v28  ;;  %v7275_v10 = vpop.eup %5591  ;;  %v2565_v5 = vmul.f32 3.8918573e-05, %v7277_v4  ;;  %v2514_v25 = vmul.f32 2.1237322e-06, %v7241_v54  ;;  %v2426_v7 = vand.u32 2147483648, %v7250_v32 }
 0xce2   :  { %v2855_v40 = vadd.f32 %v7198_v61, %v2846_v43  ;;  %v2525_v61 = vmul.f32 3.8918573e-05, %v7241_v54  ;;  %v2416_v35 = vmul.f32 %v7275_v10, %v7250_v32  ;;  %v2400_v13 = vmul.f32 %v2399_v49, %v7196_v19 }
 0xce3   :  { %v2490_v44 = vadd.f32 0.112945676, %v2489_v33  ;;  %v2440_v38 = vmul.f32 %v2439_v0, %v7203_v23  ;;  %v2515_v29 = vadd.f32 0.00028619796, %v2514_v25  ;;  %vm2421_vm2 = vweird.f32 %v7275_v10 }
 0xce4   :  { %v2867_v12 = vpack.c.bf16 %v2855_v40, %v2855_v40  ;;  %v2526_v2 = vadd.f32 0.001143296, %v2525_v61  ;;  %v7279_v45 = vpop.eup %5593  ;;  %v2606_v40 = vadd.f32 0.001143296, %v2605_v21  ;;  %v2417_v27 = vsub.f32 1.0, %v2416_v35  ;;  %vm7309_vm6 = vmor %vm2420_vm5, %vm2421_vm2 }
 0xce5   :  { %v2456_v43 = vmul.f32 %v7279_v45, %v7257_v58  ;;  %v2441_v61 = vadd.f32 0.18741608, %v2440_v38  ;;  %vm2461_vm4 = vweird.f32 %v7279_v45  ;;  %v2424_v56 = vand.u32 2147483647, %v7250_v32 }
 0xce6   :  { %v2894_v37 = vunpack.c.l.b16 %v2867_v12  ;;  %v2527_v3 = vmul.f32 %v2526_v2, %v7241_v54  ;;  %v2491_v12 = vmul.f32 %v2490_v44, %v7239_v28  ;;  %v2607_v26 = vmul.f32 %v2606_v40, %v7270_v17  ;;  %v2999_v44 = vpop.permute.xlu2 %2998 }
 0xce7   :  { %v2457_v47 = vsub.f32 1.0, %v2456_v43  ;;  %v2418_v11 = vmul.f32 %v7275_v10, %v2417_v27  ;;  %v2475_v2 = vadd.f32 0.00028619796, %v2474_v34  ;;  %vm2460_vm7 = vweird.f32 %v7257_v58 }
 0xce8   :  { %v2897_v6 = vpack.c.b16 %v2894_v37, %v2893_v24  ;;  %v2528_v55 = vadd.f32 0.014752088, %v2527_v3  ;;  %v2566_v24 = vadd.f32 0.001143296, %v2565_v5  ;;  %v2492_v57 = vadd.f32 0.4994258, %v2491_v12  ;;  %vm7317_vm8 = vmor %vm2460_vm7, %vm2461_vm4  ;;  %v7331_v5 = vpop.permute.xlu0 %3006 }
 0xce9   :  { %v2458_v9 = vmul.f32 %v7279_v45, %v2457_v47  ;;  %v2608_v48 = vadd.f32 0.014752088, %v2607_v26  ;;  %v2442_v3 = vmul.f32 %v2441_v61, %v7203_v23  ;;  %v2419_v59 = vadd.f32 %v7275_v10, %v2418_v11  ;;  %v7343_v26 = vld [vmem:[%s8582_s4 + $0x5] sm:$0x7] }
 0xcea   :  { %2902 = vrot.lane.b32.xlu0 %v2897_v6, %s5750_s8  ;;  %v2529_v46 = vmul.f32 %v2528_v55, %v7241_v54  ;;  %v2401_v6 = vadd.f32 0.18741608, %v2400_v13  ;;  %v2567_v41 = vmul.f32 %v2566_v24, %v7277_v4  ;;  %v2493_v14 = vmul.f32 %v2492_v57, %v7239_v28 }
 0xceb   :  { %v2459_v8 = vadd.f32 %v7279_v45, %v2458_v9  ;;  %v2466_v55 = vand.u32 2147483648, %v7257_v58  ;;  %v2464_v53 = vand.u32 2147483647, %v7257_v58  ;;  %v2609_v33 = vmul.f32 %v2608_v48, %v7270_v17 }
 0xcec   :  { %v2530_v60 = vadd.f32 0.112945676, %v2529_v46  ;;  %v2402_v39 = vmul.f32 %v2401_v6, %v7196_v19  ;;  %v2568_v20 = vadd.f32 0.014752088, %v2567_v41  ;;  %v2443_v21 = vadd.f32 1.1283791, %v2442_v3 }
 0xced   :  { %v2476_v0 = vmul.f32 %v2475_v2, %v7239_v28  ;;  %v2423_v35 = vsel %vm7309_vm6, %v7275_v10, %v2419_v59  ;;  %v2463_v32 = vsel %vm7317_vm8, %v7279_v45, %v2459_v8  ;;  %v7328_v58 = vadd.f32 1.0, %v2493_v14 }
 0xcee   :  { %v2531_v37 = vmul.f32 %v2530_v60, %v7241_v54  ;;  %v2403_v46 = vadd.f32 1.1283791, %v2402_v39  ;;  %v2569_v43 = vmul.f32 %v2568_v20, %v7277_v4  ;;  %v2427_v60 = vor.u32 1.1754944e-38, %v2426_v7  ;;  %v3005_v20 = vpop.permute.xlu1 %3004 }
 0xcef   :  { %v2467_v40 = vor.u32 1.1754944e-38, %v2466_v55  ;;  %v2516_v13 = vmul.f32 %v2515_v29, %v7241_v54  ;;  %vm2425_vm9 = vcmp.eq.f32.partialorder %v2424_v56, 8.507059e+37  ;;  %vm2465_vm10 = vcmp.eq.f32.partialorder %v2464_v53, 8.507059e+37  ;;  %v7353_v29 = vpop.permute.xlu2 %2344 }
 0xcf0   :  { %v2532_v16 = vadd.f32 0.4994258, %v2531_v37  ;;  %v2610_v12 = vadd.f32 0.112945676, %v2609_v33  ;;  %v2428_v10 = vsel %vm2425_vm9, %v2427_v60, %v2423_v35  ;;  %v2404_v47 = vmul.f32 %v2403_v46, %v7171_v62  ;;  %v2365_v37 = vpop.f32.mrf.mxu1  ;;  %v7355_v39 = vpop.permute.xlu0 %3000 }
 0xcf1   :  { %v2468_v27 = vsel %vm2465_vm10, %v2467_v40, %v2463_v32  ;;  %v2444_v45 = vmul.f32 %v2443_v21, %v7174_v51  ;;  %5595 = vrcp.f32 %v7328_v58  ;;  %v2570_v24 = vadd.f32 0.112945676, %v2569_v43 }
 0xcf2   :  { %v2533_v19 = vmul.f32 %v2532_v16, %v7241_v54  ;;  %v2477_v34 = vadd.f32 0.0036580483, %v2476_v0  ;;  %v2517_v25 = vadd.f32 0.0036580483, %v2516_v13  ;;  %v2429_v6 = vmul.f32 %v2428_v10, %v2404_v47 }
 0xcf3   :  { %v2469_v61 = vmul.f32 %v2468_v27, %v2444_v45  ;;  %v2611_v57 = vmul.f32 %v2610_v12, %v7270_v17  ;;  %v2932_v62 = vperm.slane %v7343_v26, 1  ;;  %v2571_v51 = vmul.f32 %v2570_v24, %v7277_v4 }
 0xcf4   :  { %v7334_v38 = vadd.f32 1.0, %v2533_v19  ;;  %v2478_v11 = vmul.f32 %v2477_v34, %v7239_v28  ;;  %v2518_v9 = vmul.f32 %v2517_v25, %v7241_v54  ;;  %v5256_v16 = vclamps-f32 %v2429_v6, 1.0 }
 0xcf5   :  { %3029 = vrot.lane.b32.xlu1 %v2932_v62, %s5750_s8  ;;  %v5257_v2 = vclamps-f32 %v2469_v61, 1.0  ;;  %v2612_v48 = vadd.f32 0.4994258, %v2611_v57  ;;  %v2594_v14 = vmul.f32 2.1237322e-06, %v7270_v17  ;;  %v2380_v7 = vmul.f32 0.5, %v7034_v30 }
 0xcf6   :  { %5597 = vrcp.f32 %v7334_v38  ;;  %v2554_v59 = vmul.f32 2.1237322e-06, %v7277_v4  ;;  %v2572_v8 = vadd.f32 0.4994258, %v2571_v51  ;;  %v2479_v55 = vadd.f32 0.05243302, %v2478_v11 }
 0xcf7   :  { %v7351_v41 = vpop.eup %5595  ;;  %v2519_v19 = vadd.f32 0.05243302, %v2518_v9  ;;  %v3017_v23 = vsel %vm83_vm1, %v3005_v20, %v7331_v5  ;;  %v2632_v56 = vadd.f32 1.0, %v5256_v16  ;;  %v2633_v53 = vadd.f32 1.0, %v5257_v2  ;;  %v7379_v45 = vpop.permute.xlu2 %2994 }
 0xcf8   :  { %v2613_v46 = vmul.f32 %v2612_v48, %v7270_v17  ;;  %3047 = vmatpush.bf16.msrb.mxu3 %v3017_v23  ;;  %v2367_v21 = vpop.f32.mrf.mxu1  ;;  %v2381_v49 = vmul.f32 0.5, %v7037_v63  ;;  %v2496_v0 = vmul.f32 %v7351_v41, %v7328_v58  ;;  %v2595_v30 = vadd.f32 0.00028619796, %v2594_v14  ;;  %v2993_v61 = vpop.permute.xlu0 %2992 }
 0xcf9   :  { %v3015_v35 = vsel %vm83_vm1, %v2999_v44, %v7355_v39  ;;  %v2366_v32 = vadd.f32 %v2365_v37, %v7353_v29  ;;  %v2368_v43 = vadd.f32 %v2367_v21, %v7353_v29  ;;  %v2555_v60 = vadd.f32 0.00028619796, %v2554_v59 }
 0xcfa   :  { %v2573_v40 = vmul.f32 %v2572_v8, %v7277_v4  ;;  %v2480_v13 = vmul.f32 %v2479_v55, %v7239_v28  ;;  %v2520_v12 = vmul.f32 %v2519_v19, %v7241_v54  ;;  %v2638_v10 = vmul.f32 %v2632_v56, %v2380_v7 }
 0xcfb   :  { %v2639_v63 = vmul.f32 %v2633_v53, %v2381_v49  ;;  %v7377_v47 = vadd.f32 1.0, %v2613_v46  ;;  %v2497_v44 = vsub.f32 1.0, %v2496_v0  ;;  %v2596_v24 = vmul.f32 %v2595_v30, %v7270_v17 }
 0xcfc   :  { %v7357_v3 = vpop.eup %5597  ;;  %3048 = vmatpush.bf16.msrb.mxu3 %v3015_v35  ;;  %v7382_v37 = vadd.f32 %v2638_v10, %v2366_v32  ;;  %v2556_v25 = vmul.f32 %v2555_v60, %v7277_v4  ;;  %v7387_v6 = vadd.f32 1.0, %v2573_v40  ;;  %v2481_v57 = vadd.f32 0.18741608, %v2480_v13 }
 0xcfd   :  { %v2536_v33 = vmul.f32 %v7357_v3, %v7334_v38  ;;  %v7384_v34 = vadd.f32 %v2639_v63, %v2368_v43  ;;  %v3013_v62 = vsel %vm83_vm1, %v2993_v61, %v7379_v45  ;;  %v2521_v51 = vadd.f32 0.18741608, %v2520_v12  ;;  %v2987_v12 = vpop.permute.xlu1 %2986 }
 0xcfe   :  { %5599 = vrcp.f32 %v7377_v47  ;;  %v2498_v9 = vmul.f32 %v7351_v41, %v2497_v44  ;;  %v2597_v16 = vadd.f32 0.0036580483, %v2596_v24  ;;  %v2557_v2 = vadd.f32 0.0036580483, %v2556_v25 }
 0xcff   :  { %v2537_v27 = vsub.f32 1.0, %v2536_v33  ;;  %5601 = vrcp.f32 %v7387_v6  ;;  %v2856_v48 = vpack.c.bf16 %v7382_v37, %v7382_v37  ;;  %v2857_v14 = vpack.c.bf16 %v7384_v34, %v7384_v34 }
 0xd00   :  { %3049 = vmatpush.bf16.msrb.mxu3 %v3013_v62  ;;  %v2482_v59 = vmul.f32 %v2481_v57, %v7239_v28  ;;  %vm2501_vm11 = vweird.f32 %v7351_v41  ;;  %v2522_v8 = vmul.f32 %v2521_v51, %v7241_v54  ;;  %vm2541_vm0 = vweird.f32 %v7357_v3  ;;  %v7419_v49 = vpop.f32.mrf.mxu1  ;;  %v7426_v35 = vpop.permute.xlu0 %2988 }
 0xd01   :  { %v2538_v11 = vmul.f32 %v7357_v3, %v2537_v27  ;;  %vm2540_vm12 = vweird.f32 %v7334_v38  ;;  %v2544_v7 = vand.u32 2147483647, %v7334_v38  ;;  %v2546_v55 = vand.u32 2147483648, %v7334_v38 }
 0xd02   :  { %v2598_v19 = vmul.f32 %v2597_v16, %v7270_v17  ;;  %v2499_v28 = vadd.f32 %v7351_v41, %v2498_v9  ;;  %v2558_v56 = vmul.f32 %v2557_v2, %v7277_v4  ;;  %v2874_v53 = vunpack.c.l.b16 %v2856_v48  ;;  %vm7413_vm13 = vmor %vm2540_vm12, %vm2541_vm0 }
 0xd03   :  { %v2539_v20 = vadd.f32 %v7357_v3, %v2538_v11  ;;  %v2875_v54 = vunpack.c.l.b16 %v2857_v14  ;;  %v2506_v33 = vand.u32 2147483648, %v7328_v58  ;;  %vm2500_vm2 = vweird.f32 %v7328_v58 }
 0xd04   :  { %v7408_v23 = vpop.eup %5599  ;;  %v2504_v38 = vand.u32 2147483647, %v7328_v58  ;;  %v2523_v0 = vadd.f32 1.1283791, %v2522_v8  ;;  %v2483_v32 = vadd.f32 1.1283791, %v2482_v59  ;;  %vm7430_vm4 = vmor %vm2500_vm2, %vm2501_vm11  ;;  %v3011_v25 = vsel %vm83_vm1, %v2987_v12, %v7426_v35 }
 0xd05   :  { %v7417_v21 = vpop.eup %5601  ;;  %v2543_v30 = vsel %vm7413_vm13, %v7357_v3, %v2539_v20  ;;  %v2547_v60 = vor.u32 1.1754944e-38, %v2546_v55  ;;  %v2599_v40 = vadd.f32 0.05243302, %v2598_v19  ;;  %v2616_v13 = vmul.f32 %v7408_v23, %v7377_v47  ;;  %3050 = vmatpush.bf16.msrb.mxu3 %v3011_v25 }
 0xd06   :  { %v2503_v58 = vsel %vm7430_vm4, %v7351_v41, %v2499_v28  ;;  %vm2545_vm5 = vcmp.eq.f32.partialorder %v2544_v7, 8.507059e+37  ;;  %v2559_v3 = vadd.f32 0.05243302, %v2558_v56  ;;  %v2880_v10 = vpack.c.b16 %v2875_v54, %v2874_v53 }
 0xd07   :  { %v2507_v27 = vor.u32 1.1754944e-38, %v2506_v33  ;;  %v2548_v44 = vsel %vm2545_vm5, %v2547_v60, %v2543_v30  ;;  %v2576_v24 = vmul.f32 %v7417_v21, %v7387_v6  ;;  %vm2505_vm6 = vcmp.eq.f32.partialorder %v2504_v38, 8.507059e+37 }
 0xd08   :  { %v2524_v61 = vmul.f32 %v2523_v0, %v7227_v31  ;;  %v2931_v41 = vperm.slane %v7343_v26, 0  ;;  %v2600_v51 = vmul.f32 %v2599_v40, %v7270_v17  ;;  %v2617_v11 = vsub.f32 1.0, %v2616_v13  ;;  %v2372_v8 = vpop.f32.mrf.mxu1 }
 0xd09   :  { %v2508_v62 = vsel %vm2505_vm6, %v2507_v27, %v2503_v58  ;;  %v2484_v9 = vmul.f32 %v2483_v32, %v7224_v1  ;;  %v2560_v2 = vmul.f32 %v2559_v3, %v7277_v4  ;;  %v2577_v48 = vsub.f32 1.0, %v2576_v24 }
 0xd0a   :  { %v2549_v16 = vmul.f32 %v2548_v44, %v2524_v61  ;;  %3027 = vrot.lane.b32.xlu2 %v2931_v41, %s5750_s8  ;;  %v2601_v14 = vadd.f32 0.18741608, %v2600_v51  ;;  %v2618_v59 = vmul.f32 %v7408_v23, %v2617_v11  ;;  %vm2621_vm7 = vweird.f32 %v7408_v23 }
 0xd0b   :  { %v2509_v31 = vmul.f32 %v2508_v62, %v2484_v9  ;;  %v2561_v7 = vadd.f32 0.18741608, %v2560_v2  ;;  %v2578_v55 = vmul.f32 %v7417_v21, %v2577_v48  ;;  %v2626_v54 = vand.u32 2147483648, %v7377_v47 }
 0xd0c   :  { %v5259_v20 = vclamps-f32 %v2549_v16, 1.0  ;;  %v2602_v1 = vmul.f32 %v2601_v14, %v7270_v17  ;;  %v2619_v28 = vadd.f32 %v7408_v23, %v2618_v59  ;;  %vm2581_vm8 = vweird.f32 %v7417_v21 }
 0xd0d   :  { %v5258_v19 = vclamps-f32 %v2509_v31, 1.0  ;;  %v2562_v53 = vmul.f32 %v2561_v7, %v7277_v4  ;;  %v2579_v33 = vadd.f32 %v7417_v21, %v2578_v55  ;;  %vm2620_vm9 = vweird.f32 %v7377_v47 }
 0xd0e   :  { %v2635_v56 = vadd.f32 1.0, %v5259_v20  ;;  %v2624_v46 = vand.u32 2147483647, %v7377_v47  ;;  %v2383_v17 = vmul.f32 0.5, %v7058_v18  ;;  %vm2580_vm10 = vweird.f32 %v7387_v6  ;;  %vm7468_vm11 = vmor %vm2620_vm9, %vm2621_vm7 }
 0xd0f   :  { %v2634_v38 = vadd.f32 1.0, %v5258_v19  ;;  %v2586_v0 = vand.u32 2147483648, %v7387_v6  ;;  %v2373_v4 = vadd.f32 %v2372_v8, %v7353_v29  ;;  %v2584_v32 = vand.u32 2147483647, %v7387_v6  ;;  %vm2582_vm0 = vmor %vm2580_vm10, %vm2581_vm8 }
 0xd10   :  { %v2603_v43 = vadd.f32 1.1283791, %v2602_v1  ;;  %v2623_v47 = vsel %vm7468_vm11, %v7408_v23, %v2619_v28  ;;  %v2382_v60 = vmul.f32 0.5, %v7055_v50  ;;  %v2563_v18 = vadd.f32 1.1283791, %v2562_v53  ;;  %v2375_v12 = vpop.f32.mrf.mxu1 }
 0xd11   :  { %v2627_v40 = vor.u32 1.1754944e-38, %v2626_v54  ;;  %v2371_v13 = vadd.f32 %v7419_v49, %v7353_v29  ;;  %v2641_v58 = vmul.f32 %v2635_v56, %v2383_v17  ;;  %v2583_v3 = vsel %vm2582_vm0, %v7417_v21, %v2579_v33 }
 0xd12   :  { %vm2625_vm12 = vcmp.eq.f32.partialorder %v2624_v46, 8.507059e+37  ;;  %vm2585_vm13 = vcmp.eq.f32.partialorder %v2584_v32, 8.507059e+37  ;;  %v2604_v23 = vmul.f32 %v2603_v43, %v7253_v15  ;;  %v2564_v24 = vmul.f32 %v2563_v18, %v7261_v22 }
 0xd13   :  { %v2628_v6 = vsel %vm2625_vm12, %v2627_v40, %v2623_v47  ;;  %v7481_v27 = vadd.f32 %v2641_v58, %v2373_v4  ;;  %v2385_v48 = vmul.f32 0.5, %v7069_v36  ;;  %v2376_v14 = vadd.f32 %v2375_v12, %v7353_v29 }
 0xd14   :  { %v2629_v25 = vmul.f32 %v2628_v6, %v2604_v23  ;;  %v2384_v59 = vmul.f32 0.5, %v7080_v42 }
 0xd15   :  { %v2859_v21 = vpack.c.bf16 %v7481_v27, %v7481_v27 }
 0xd16   :  { %v5261_v61 = vclamps-f32 %v2629_v25, 1.0 }
 0xd17   :  { %v2877_v51 = vunpack.c.l.b16 %v2859_v21  ;;  %v5416_v21 = vld [vmem:[%s8581_s3 + $0x98] sm:$0xf0] }
 0xd18   :  { %v2377_v11 = vpop.f32.mrf.mxu1  ;;  %v2637_v9 = vadd.f32 1.0, %v5261_v61 }
 0xd19   :  { %v2378_v2 = vadd.f32 %v2377_v11, %v7353_v29 }
 0xd1a   :  { %v2643_v8 = vmul.f32 %v2637_v9, %v2385_v48  ;;  %v5279_v48 = vld [vmem:[%s8581_s3 + $0x10] sm:$0xf] }
 0xd1c   :  { %v7500_v55 = vadd.f32 %v2643_v8, %v2378_v2 }
 0xd1e   :  { %v2861_v36 = vpack.c.bf16 %v7500_v55, %v7500_v55 }
 0xd20   :  { %v2879_v1 = vunpack.c.l.b16 %v2861_v36  ;;  %v5410_v36 = vld [vmem:[%s8581_s3 + $0x48] sm:$0xf0] }
 0xd2c   :  { %v2899_v63 = vpop.permute.xlu2 %2898 }
 0xd2d   :  { %v7445_v57 = vsel %vm83_vm1, %v2880_v10, %v2899_v63  ;;  %v2587_v10 = vor.u32 1.1754944e-38, %v2586_v0  ;;  %v2640_v63 = vmul.f32 %v2634_v38, %v2382_v60 }
 0xd2e   :  { %5317 = vmatmul.msk.bf16.vlgmr.msrb.gmra.mxu3 %vm551_vm3, %v7445_v57 }
 0xd2f   :  { %v2588_v50 = vsel %vm2585_vm13, %v2587_v10, %v2583_v3  ;;  %v7484_v44 = vadd.f32 %v2640_v63, %v2371_v13 }
 0xd30   :  { %v2589_v49 = vmul.f32 %v2588_v50, %v2564_v24 }
 0xd31   :  { %v2858_v41 = vpack.c.bf16 %v7484_v44, %v7484_v44 }
 0xd32   :  { %v5260_v62 = vclamps-f32 %v2589_v49, 1.0  ;;  %v5315_v49 = vld [vmem:[%s8581_s3 + $0x88] sm:$0xf] }
 0xd33   :  { %v2876_v16 = vunpack.c.l.b16 %v2858_v41 }
 0xd34   :  { %v2636_v15 = vadd.f32 1.0, %v5260_v62  ;;  %v5316_v62 = vor.u32 %v5416_v21, %v5315_v49 }
 0xd35   :  { %v2881_v22 = vpack.c.b16 %v2877_v51, %v2876_v16  ;;  %v5303_v16 = vld [vmem:[%s8581_s3 + $0x60] sm:$0xf] }
 0xd36   :  { %v2642_v7 = vmul.f32 %v2636_v15, %v2384_v59  ;;  %v5413_v15 = vld [vmem:[%s8581_s3 + $0x70] sm:$0xf0] }
 0xd38   :  { %v7502_v19 = vadd.f32 %v2642_v7, %v2376_v14  ;;  %v5304_v14 = vor.u32 %v5413_v15, %v5303_v16  ;;  %v5291_v7 = vld [vmem:[%s8581_s3 + $0x38] sm:$0xf] }
 0xd3a   :  { %v2860_v29 = vpack.c.bf16 %v7502_v19, %v7502_v19 }
 0xd3c   :  { %v2878_v42 = vunpack.c.l.b16 %v2860_v29  ;;  %v5292_v29 = vor.u32 %v5410_v36, %v5291_v7 }
 0xd3e   :  { %v2882_v28 = vpack.c.b16 %v2879_v1, %v2878_v42  ;;  %v2933_v1 = vperm.slane %v7343_v26, 2 }
 0xd4c   :  { %v2901_v31 = vpop.permute.xlu1 %2900 }
 0xd4d   :  { %v7496_v20 = vsel %vm83_vm1, %v2881_v22, %v2901_v31  ;;  %v5407_v22 = vld [vmem:[%s8581_s3 + $0x20] sm:$0xf0] }
 0xd4e   :  { %5318 = vmatmul.msk.bf16.gmra.mxu3 %vm551_vm3, %v7496_v20  ;;  %v5280_v59 = vor.u32 %v5407_v22, %v5279_v48 }
 0xd5c   :  { %v2903_v56 = vpop.permute.xlu0 %2902 }
 0xd5d   :  { %v7509_v53 = vsel %vm83_vm1, %v2882_v28, %v2903_v56 }
 0xd5e   :  { %5319 = vmatmul.msk.bf16.gmra.mxu3 %vm551_vm3, %v7509_v53 }
 0xd64   :  { %v3028_v33 = vpop.permute.xlu2 %3027 }
 0xd67   :  { %v7513_v54 = vpop.permute.xlu1 %3029 }
 0xd68   :  { %v3033_v46 = vsel %vm83_vm1, %v3028_v33, %v7513_v54 }
 0xdb1   :  { %v3052_v38 = vpop.f32.mrf.mxu3 }
 0xdb2   :  { %v3053_v17 = vadd.f32 %v3052_v38, %v3033_v46 }
 0xdb4   :  { %v3092_v0 = vpack.c.bf16 %v3053_v17, %v3053_v17 }
 0xdb6   :  { %v3099_v30 = vunpack.c.l.b16 %v3092_v0 }
 0xdb8   :  { %v7517_v4 = vpack.c.b16 %v3099_v30, %v3099_v30 }
 0xdb9   :  { %v3054_v32 = vpop.f32.mrf.mxu3 }
 0xdba   :  { %v3055_v43 = vadd.f32 %v3054_v32, %v3033_v46  ;;  %3101 = vrot.lane.b32.xlu0 %v7517_v4, %s5752_s29 }
 0xdbc   :  { %v3093_v47 = vpack.c.bf16 %v3055_v43, %v3055_v43 }
 0xdbe   :  { %v3123_v60 = vunpack.c.l.b16 %v3093_v47 }
 0xdc0   :  { %v7521_v18 = vpack.c.b16 %v3123_v60, %v3123_v60 }
 0xdc2   :  { %3125 = vrot.lane.b32.xlu2 %v7521_v18, %s5752_s29 }
 0xdd1   :  { %v3057_v40 = vpop.f32.mrf.mxu3 }
 0xdd2   :  { %v3058_v13 = vadd.f32 %v3057_v40, %v3033_v46 }
 0xdd4   :  { %v3094_v58 = vpack.c.bf16 %v3058_v13, %v3058_v13 }
 0xdd6   :  { %v3147_v3 = vunpack.c.l.b16 %v3094_v58 }
 0xdd8   :  { %v7525_v12 = vpack.c.b16 %v3147_v3, %v3147_v3 }
 0xdd9   :  { %v3059_v10 = vpop.f32.mrf.mxu3 }
 0xdda   :  { %v3060_v6 = vadd.f32 %v3059_v10, %v3033_v46  ;;  %3149 = vrot.lane.b32.xlu1 %v7525_v12, %s5752_s29 }
 0xddc   :  { %v3095_v63 = vpack.c.bf16 %v3060_v6, %v3060_v6 }
 0xdde   :  { %v3171_v23 = vunpack.c.l.b16 %v3095_v63 }
 0xde0   :  { %v7529_v50 = vpack.c.b16 %v3171_v23, %v3171_v23 }
 0xde1   :  { %v3062_v24 = vpop.f32.mrf.mxu3 }
 0xde2   :  { %v3063_v25 = vadd.f32 %v3062_v24, %v3033_v46  ;;  %3173 = vrot.lane.b32.xlu0 %v7529_v50, %s5752_s29 }
 0xde4   :  { %v3096_v61 = vpack.c.bf16 %v3063_v25, %v3063_v25 }
 0xde6   :  { %v3195_v41 = vunpack.c.l.b16 %v3096_v61 }
 0xde8   :  { %v7539_v51 = vpack.c.b16 %v3195_v41, %v3195_v41 }
 0xde9   :  { %v3064_v11 = vpop.f32.mrf.mxu3 }
 0xdea   :  { %v3065_v9 = vadd.f32 %v3064_v11, %v3033_v46  ;;  %3197 = vrot.lane.b32.xlu2 %v7539_v51, %s5752_s29  ;;  %3008 = vrot.lane.b32.xlu0 %v5316_v62, %s5750_s8 }
 0xdec   :  { %v3097_v2 = vpack.c.bf16 %v3065_v9, %v3065_v9 }
 0xdee   :  { %v3219_v31 = vunpack.c.l.b16 %v3097_v2 }
 0xdf0   :  { %v7556_v8 = vpack.c.b16 %v3219_v31, %v3219_v31 }
 0xdf2   :  { %3221 = vrot.lane.b32.xlu1 %v7556_v8, %s5752_s29  ;;  %3002 = vrot.lane.b32.xlu2 %v5304_v14, %s5750_s8 }
 0xdf3   :  { %2990 = vrot.lane.b32.xlu0 %v5280_v59, %s5750_s8 }
 0xdfa   :  { %2996 = vrot.lane.b32.xlu1 %v5292_v29, %s5750_s8  ;;  %3617 = vrot.lane.b32.xlu2 %v7521_v18, %s5750_s8 }
 0xdfb   :  { %3594 = vrot.lane.b32.xlu0 %v7517_v4, %s5750_s8 }
 0xe02   :  { %3031 = vrot.lane.b32.xlu1 %v2933_v1, %s5750_s8 }
 0xe1c   :  { %v3126_v42 = vpop.permute.xlu2 %3125 }
 0xe1d   :  { %v3131_v28 = vsel %vm83_vm1, %v3126_v42, 0 }
 0xe1e   :  { %3140 = vmatpush.bf16.xpose.msrb.mxu2 %v3131_v28 }
 0xe25   :  { %5324 = vmatmul.msk.bf16.vlgmr.msrb.gmra.mxu2 %vm83_vm1, %v3093_v47 }
 0xe2c   :  { %v3102_v56 = vpop.permute.xlu0 %3101 }
 0xe2d   :  { %v3107_v33 = vsel %vm83_vm1, %v3102_v56, 0 }
 0xe2e   :  { %3116 = vmatpush.bf16.xpose.msrb.mxu1 %v3107_v33 }
 0xe35   :  { %5323 = vmatmul.msk.bf16.vlgmr.msrb.gmra.mxu1 %vm83_vm1, %v3092_v0 }
 0xe44   :  { %v3198_v46 = vpop.permute.xlu2 %3197 }
 0xe45   :  { %v3203_v38 = vsel %vm83_vm1, %v3198_v46, 0 }
 0xe46   :  { %3212 = vmatpush.bf16.xpose.msra.mxu2 %v3203_v38 }
 0xe4c   :  { %v3150_v17 = vpop.permute.xlu1 %3149  ;;  %v3003_v47 = vpop.permute.xlu2 %3002 }
 0xe4d   :  { %v3155_v26 = vsel %vm83_vm1, %v3150_v17, 0  ;;  %5327 = vmatmul.msk.bf16.vlgmr.msra.gmra.mxu2 %vm83_vm1, %v3096_v61  ;;  %v3016_v60 = vsel %vm83_vm1, %v7355_v39, %v3003_v47 }
 0xe4e   :  { %3164 = vmatpush.bf16.xpose.msra.mxu3 %v3155_v26 }
 0xe54   :  { %v3174_v30 = vpop.permute.xlu0 %3173  ;;  %v3618_v56 = vpop.permute.xlu2 %3617 }
 0xe55   :  { %v3179_v32 = vsel %vm83_vm1, %v3174_v30, 0  ;;  %5325 = vmatmul.msk.bf16.vlgmr.msra.gmra.mxu3 %vm83_vm1, %v3094_v58  ;;  %v3623_v38 = vsel %vm83_vm1, %v3618_v56, 0 }
 0xe56   :  { %3188 = vmatpush.bf16.xpose.msra.mxu1 %v3179_v32 }
 0xe5c   :  { %v3009_v43 = vpop.permute.xlu0 %3008 }
 0xe5d   :  { %v3018_v0 = vsel %vm83_vm1, %v7331_v5, %v3009_v43  ;;  %5326 = vmatmul.msk.bf16.vlgmr.msra.gmra.mxu1 %vm83_vm1, %v3095_v63 }
 0xe5e   :  { %3071 = vmatpush.bf16.msra.mxu0 %v3018_v0 }
 0xe62   :  { %3072 = vmatpush.bf16.msra.mxu0 %v3016_v60 }
 0xe64   :  { %v3222_v40 = vpop.permute.xlu1 %3221 }
 0xe65   :  { %v3227_v13 = vsel %vm83_vm1, %v3222_v40, 0  ;;  %v2991_v10 = vpop.permute.xlu0 %2990 }
 0xe66   :  { %3236 = vmatpush.bf16.xpose.msrb.mxu3 %v3227_v13  ;;  %v3012_v5 = vsel %vm83_vm1, %v7426_v35, %v2991_v10 }
 0xe6c   :  { %v2997_v3 = vpop.permute.xlu1 %2996 }
 0xe6d   :  { %5328 = vmatmul.msk.bf16.vlgmr.msrb.gmra.mxu3 %vm83_vm1, %v3097_v2  ;;  %v3014_v58 = vsel %vm83_vm1, %v7379_v45, %v2997_v3 }
 0xe6e   :  { %3073 = vmatpush.bf16.msra.mxu0 %v3014_v58 }
 0xe72   :  { %3074 = vmatpush.bf16.msra.mxu0 %v3012_v5 }
 0xe74   :  { %v3032_v62 = vpop.permute.xlu1 %3031 }
 0xe75   :  { %5320 = vmatmul.msk.bf16.vlgmr.msra.gmra.mxu0 %vm551_vm3, %v7445_v57  ;;  %v3034_v9 = vsel %vm83_vm1, %v7513_v54, %v3032_v62  ;;  %v3595_v54 = vpop.permute.xlu0 %3594 }
 0xe76   :  { %v3600_v1 = vsel %vm83_vm1, %v3595_v54, 0 }
 0xe85   :  { %5321 = vmatmul.msk.bf16.gmra.mxu0 %vm551_vm3, %v7496_v20 }
 0xe95   :  { %5322 = vmatmul.msk.bf16.gmra.mxu0 %vm551_vm3, %v7509_v53 }
 0xea8   :  { %v7601_v39 = vpop.f32.mrf.mxu2 }
 0xea9   :  { %v3245_v45 = vsel %vm777_vm15, %v7601_v39, -inf }
 0xeaa   :  { %3246 = vmax.xlane.f32.xlu1 %v3245_v45 }
 0xeb0   :  { %v3144_v6 = vpop.f32.mrf.mxu2 }
 0xeb2   :  { %v7605_v63 = vpop.f32.mrf.mxu1 }
 0xeb3   :  { %v3242_v35 = vsel %vm777_vm15, %v7605_v63, -inf }
 0xeb4   :  { %3243 = vmax.xlane.f32.xlu2 %v3242_v35 }
 0xeba   :  { %v3120_v57 = vpop.f32.mrf.mxu1 }
 0xed0   :  { %v7609_v23 = vpop.f32.mrf.mxu2 }
 0xed1   :  { %v3254_v20 = vsel %vm777_vm15, %v7609_v23, -inf }
 0xed2   :  { %3255 = vmax.xlane.f32.xlu1 %v3254_v20 }
 0xed8   :  { %v7613_v53 = vpop.f32.mrf.mxu3  ;;  %v3216_v24 = vpop.f32.mrf.mxu2 }
 0xed9   :  { %v3248_v25 = vsel %vm777_vm15, %v7613_v53, -inf }
 0xeda   :  { %3249 = vmax.xlane.f32.xlu0 %v3248_v25  ;;  %v7617_v49 = vpop.f32.mrf.mxu1 }
 0xedb   :  { %v3251_v21 = vsel %vm777_vm15, %v7617_v49, -inf }
 0xedc   :  { %3252 = vmax.xlane.f32.xlu2 %v3251_v21 }
 0xee0   :  { %v3168_v61 = vpop.f32.mrf.mxu3 }
 0xee2   :  { %v3192_v41 = vpop.f32.mrf.mxu1 }
 0xeeb   :  { %3592 = vrot.lane.b32.xlu1 %v7517_v4, %s5749_s30 }
 0xeee   :  { %3615 = vrot.lane.b32.xlu0 %v7521_v18, %s5749_s30 }
 0xef0   :  { %v7625_v11 = vpop.f32.mrf.mxu3 }
 0xef1   :  { %v3257_v43 = vsel %vm777_vm15, %v7625_v11, -inf }
 0xef2   :  { %v3076_v16 = vpop.f32.mrf.mxu0 }
 0xef3   :  { %v3077_v15 = vadd.f32 %v3076_v16, %v3034_v9 }
 0xef5   :  { %v7629_v2 = vpack.c.bf16 %v3077_v15, %v3077_v15 }
 0xef7   :  { %v3324_v48 = vsel %vm859_vm14, %v7629_v2, 0 }
 0xef8   :  { %v3240_v22 = vpop.f32.mrf.mxu3  ;;  %3333 = vmatpush.bf16.msrb.mxu1 %v3324_v48 }
 0xefa   :  { %v3078_v31 = vpop.f32.mrf.mxu0 }
 0xefb   :  { %v3079_v4 = vadd.f32 %v3078_v31, %v3034_v9 }
 0xefd   :  { %v7633_v14 = vpack.c.bf16 %v3079_v4, %v3079_v4 }
 0xeff   :  { %v3343_v18 = vsel %vm859_vm14, %v7633_v14, 0 }
 0xf00   :  { %3352 = vmatpush.bf16.msrb.mxu2 %v3343_v18 }
 0xf02   :  { %v3081_v59 = vpop.f32.mrf.mxu0 }
 0xf03   :  { %v3082_v7 = vadd.f32 %v3081_v59, %v3034_v9 }
 0xf05   :  { %v7637_v36 = vpack.c.bf16 %v3082_v7, %v3082_v7 }
 0xf07   :  { %v3362_v29 = vsel %vm859_vm14, %v7637_v36, 0 }
 0xf08   :  { %3371 = vmatpush.bf16.msra.mxu3 %v3362_v29 }
 0xf0a   :  { %v3083_v42 = vpop.f32.mrf.mxu0 }
 0xf0b   :  { %v3084_v28 = vadd.f32 %v3083_v42, %v3034_v9 }
 0xf0c   :  { %3609 = vmatpush.bf16.xpose.msrb.mxu3 %v3600_v1 }
 0xf0d   :  { %v7642_v33 = vpack.c.bf16 %v3084_v28, %v3084_v28 }
 0xf0f   :  { %v3381_v46 = vsel %vm859_vm14, %v7642_v33, 0 }
 0xf10   :  { %3390 = vmatpush.bf16.msrb.mxu0 %v3381_v46 }
 0xf12   :  { %v3086_v17 = vpop.f32.mrf.mxu0 }
 0xf13   :  { %v3087_v26 = vadd.f32 %v3086_v17, %v3034_v9 }
 0xf14   :  { %3632 = vmatpush.bf16.xpose.msra.mxu0 %v3623_v38 }
 0xf15   :  { %v7647_v30 = vpack.c.bf16 %v3087_v26, %v3087_v26 }
 0xf17   :  { %v3400_v32 = vsel %vm859_vm14, %v7647_v30, 0 }
 0xf18   :  { %3258 = vmax.xlane.f32.xlu0 %v3257_v43  ;;  %3409 = vmatpush.bf16.msra.mxu1 %v3400_v32 }
 0xf1a   :  { %v3088_v0 = vpop.f32.mrf.mxu0 }
 0xf1b   :  { %v3089_v47 = vadd.f32 %v3088_v0, %v3034_v9 }
 0xf1d   :  { %v7653_v60 = vpack.c.bf16 %v3089_v47, %v3089_v47  ;;  %v3247_v13 = vpop.xlane.xlu1 %3246 }
 0xf1e   :  { %v3261_v3 = vsub.f32 %v7601_v39, %v3247_v13 }
 0xf1f   :  { %v3419_v40 = vsel %vm859_vm14, %v7653_v60, 0 }
 0xf20   :  { %3428 = vmatpush.bf16.msra.mxu2 %v3419_v40  ;;  %v3268_v58 = vmul.f32 1.442695, %v3261_v3 }
 0xf22   :  { %5603 = vpow2.f32 %v3268_v58 }
 0xf27   :  { %v3244_v10 = vpop.xlane.xlu2 %3243 }
 0xf28   :  { %v5604_v5 = vpop.eup %5603  ;;  %v3260_v45 = vsub.f32 %v7605_v63, %v3244_v10 }
 0xf29   :  { %v3281_v6 = vsel %vm777_vm15, %v5604_v5, 0.0 }
 0xf2a   :  { %v3266_v35 = vmul.f32 1.442695, %v3260_v45  ;;  %3282 = vadd.xlane.f32.xlu1 %v3281_v6 }
 0xf2c   :  { %5605 = vpow2.f32 %v3266_v35 }
 0xf32   :  { %v5606_v57 = vpop.eup %5605 }
 0xf33   :  { %v3278_v20 = vsel %vm777_vm15, %v5606_v57, 0.0 }
 0xf34   :  { %3279 = vadd.xlane.f32.xlu2 %v3278_v20 }
 0xf43   :  { %3640 = vrot.lane.b32.xlu1 %v7525_v12, %s5750_s8 }
 0xf4b   :  { %3661 = vrot.lane.b32.xlu1 %v7529_v50, %s5749_s30 }
 0xf4d   :  { %v3250_v24 = vpop.xlane.xlu0 %3249 }
 0xf4e   :  { %v3262_v39 = vsub.f32 %v7613_v53, %v3250_v24  ;;  %v3256_v53 = vpop.xlane.xlu1 %3255 }
 0xf4f   :  { %v3253_v25 = vpop.xlane.xlu2 %3252  ;;  %v3264_v15 = vsub.f32 %v7609_v23, %v3256_v53 }
 0xf50   :  { %v3270_v63 = vmul.f32 1.442695, %v3262_v39  ;;  %v3263_v21 = vsub.f32 %v7617_v49, %v3253_v25 }
 0xf51   :  { %v3274_v48 = vmul.f32 1.442695, %v3264_v15 }
 0xf52   :  { %5607 = vpow2.f32 %v3270_v63  ;;  %v3272_v61 = vmul.f32 1.442695, %v3263_v21 }
 0xf53   :  { %3684 = vrot.lane.b32.xlu1 %v7539_v51, %s5749_s30 }
 0xf54   :  { %5609 = vpow2.f32 %v3272_v61 }
 0xf55   :  { %5611 = vpow2.f32 %v3274_v48 }
 0xf58   :  { %v5608_v41 = vpop.eup %5607 }
 0xf59   :  { %v3284_v62 = vsel %vm777_vm15, %v5608_v41, 0.0 }
 0xf5a   :  { %v5610_v9 = vpop.eup %5609  ;;  %3285 = vadd.xlane.f32.xlu0 %v3284_v62 }
 0xf5b   :  { %v3287_v16 = vsel %vm777_vm15, %v5610_v9, 0.0  ;;  %v5612_v18 = vpop.eup %5611 }
 0xf5c   :  { %3288 = vadd.xlane.f32.xlu2 %v3287_v16  ;;  %v3290_v59 = vsel %vm777_vm15, %v5612_v18, 0.0 }
 0xf5d   :  { %v3593_v7 = vpop.permute.xlu1 %3592 }
 0xf60   :  { %v3616_v49 = vpop.permute.xlu0 %3615 }
 0xf6e   :  { %3638 = vrot.lane.b32.xlu0 %v7525_v12, %s5749_s30 }
 0xf74   :  { %3663 = vrot.lane.b32.xlu2 %v7529_v50, %s5750_s8 }
 0xf8b   :  { %v3259_v22 = vpop.xlane.xlu0 %3258 }
 0xf8c   :  { %v3265_v31 = vsub.f32 %v7625_v11, %v3259_v22 }
 0xf8e   :  { %v3276_v4 = vmul.f32 1.442695, %v3265_v31 }
 0xf90   :  { %5613 = vpow2.f32 %v3276_v4 }
 0xf96   :  { %v5614_v12 = vpop.eup %5613 }
 0xf97   :  { %v3293_v54 = vsel %vm777_vm15, %v5614_v12, 0.0 }
 0xf98   :  { %3291 = vadd.xlane.f32.xlu0 %v3290_v59 }
 0xf9d   :  { %3294 = vadd.xlane.f32.xlu2 %v3293_v54  ;;  %v3283_v50 = vpop.xlane.xlu1 %3282  ;;  %v3803_v54 = vunpack.c.l.b16 %v7629_v2 }
 0xf9e   :  { %5615 = vrcp.f32 %v3283_v50 }
 0xf9f   :  { %v3804_v50 = vpack.c.b16 %v3803_v54, %v3803_v54 }
 0xfa4   :  { %v5616_v29 = vpop.eup %5615 }
 0xfa5   :  { %v3303_v23 = vmul.f32 %v5616_v29, %v5604_v5 }
 0xfa7   :  { %v3309_v1 = vpack.c.bf16 %v3303_v23, %v3303_v23  ;;  %v3280_v42 = vpop.xlane.xlu2 %3279 }
 0xfa8   :  { %5617 = vrcp.f32 %v3280_v42 }
 0xfa9   :  { %5330 = vmatmul.msk.bf16.vlgmr.msrb.gmra.mxu2 %vm777_vm15, %v3309_v1 }
 0xfac   :  { %3709 = vrot.lane.b32.xlu0 %v7556_v8, %s5750_s8 }
 0xfae   :  { %v5618_v11 = vpop.eup %5617 }
 0xfaf   :  { %v3302_v28 = vmul.f32 %v5618_v11, %v5606_v57 }
 0xfb1   :  { %v3308_v56 = vpack.c.bf16 %v3302_v28, %v3302_v28 }
 0xfb3   :  { %5329 = vmatmul.msk.bf16.vlgmr.msrb.gmra.mxu1 %vm777_vm15, %v3308_v56 }
 0xfb5   :  { %3686 = vrot.lane.b32.xlu2 %v7539_v51, %s5750_s8  ;;  %v3641_v46 = vpop.permute.xlu1 %3640 }
 0xfb6   :  { %v3646_v38 = vsel %vm83_vm1, %v3641_v46, 0 }
 0xfb7   :  { %3655 = vmatpush.bf16.xpose.msrb.mxu1 %v3646_v38 }
 0xfbd   :  { %3707 = vrot.lane.b32.xlu2 %v7556_v8, %s5749_s30  ;;  %v3662_v35 = vpop.permute.xlu1 %3661 }
 0xfc5   :  { %v3685_v61 = vpop.permute.xlu1 %3684 }
 0xfcd   :  { %v3286_v17 = vpop.xlane.xlu0 %3285 }
 0xfce   :  { %5619 = vrcp.f32 %v3286_v17 }
 0xfcf   :  { %v3289_v26 = vpop.xlane.xlu2 %3288 }
 0xfd0   :  { %5621 = vrcp.f32 %v3289_v26 }
 0xfd4   :  { %v5620_v32 = vpop.eup %5619 }
 0xfd5   :  { %v3304_v43 = vmul.f32 %v5620_v32, %v5608_v41 }
 0xfd6   :  { %v5622_v0 = vpop.eup %5621 }
 0xfd7   :  { %v3310_v47 = vpack.c.bf16 %v3304_v43, %v3304_v43  ;;  %v3305_v40 = vmul.f32 %v5622_v0, %v5610_v9  ;;  %v3664_v13 = vpop.permute.xlu2 %3663 }
 0xfd8   :  { %v3669_v51 = vsel %vm83_vm1, %v3664_v13, 0 }
 0xfd9   :  { %v3311_v3 = vpack.c.bf16 %v3305_v40, %v3305_v40  ;;  %5331 = vmatmul.msk.bf16.vlgmr.msra.gmra.mxu3 %vm777_vm15, %v3310_v47  ;;  %3678 = vmatpush.bf16.xpose.msrb.mxu2 %v3669_v51  ;;  %v3875_v40 = vunpack.c.l.b16 %v7642_v33  ;;  %v3827_v51 = vunpack.c.l.b16 %v7633_v14 }
 0xfdb   :  { %5332 = vmatmul.msk.bf16.vlgmr.msrb.gmra.mxu0 %vm777_vm15, %v3311_v3  ;;  %v3876_v13 = vpack.c.b16 %v3875_v40, %v3875_v40  ;;  %v3828_v3 = vpack.c.b16 %v3827_v51, %v3827_v51 }
 0xfe0   :  { %v3639_v8 = vpop.permute.xlu0 %3638 }
 0xfe9   :  { %5335 = vmatmul.msk.bf16.vlgmr.msrb.gmra.mxu3 %vm83_vm1, %v3593_v7 }
 0xfeb   :  { %5336 = vmatmul.msk.bf16.vlgmr.msra.gmra.mxu0 %vm83_vm1, %v3616_v49 }
0x100b   :  { %v3292_v58 = vpop.xlane.xlu0 %3291 }
0x100c   :  { %5623 = vrcp.f32 %v3292_v58 }
0x1010   :  { %v3295_v10 = vpop.xlane.xlu2 %3294 }
0x1011   :  { %5625 = vrcp.f32 %v3295_v10 }
0x1012   :  { %v5624_v5 = vpop.eup %5623 }
0x1013   :  { %v3306_v45 = vmul.f32 %v5624_v5, %v5612_v18 }
0x1015   :  { %v3312_v6 = vpack.c.bf16 %v3306_v45, %v3306_v45 }
0x1017   :  { %v5626_v57 = vpop.eup %5625  ;;  %5333 = vmatmul.msk.bf16.vlgmr.msra.gmra.mxu1 %vm777_vm15, %v3312_v6 }
0x1018   :  { %v3307_v20 = vmul.f32 %v5626_v57, %v5614_v12  ;;  %v3687_v24 = vpop.permute.xlu2 %3686 }
0x1019   :  { %v3692_v39 = vsel %vm83_vm1, %v3687_v24, 0 }
0x101a   :  { %v3313_v25 = vpack.c.bf16 %v3307_v20, %v3307_v20  ;;  %3701 = vmatpush.bf16.xpose.msra.mxu3 %v3692_v39  ;;  %v3851_v39 = vunpack.c.l.b16 %v7637_v36 }
0x101c   :  { %5334 = vmatmul.msk.bf16.vlgmr.msra.gmra.mxu2 %vm777_vm15, %v3313_v25  ;;  %v3852_v25 = vpack.c.b16 %v3851_v39, %v3851_v39 }
0x101e   :  { %v3710_v63 = vpop.permute.xlu0 %3709 }
0x101f   :  { %v3715_v21 = vsel %vm83_vm1, %v3710_v63, 0 }
0x1020   :  { %3724 = vmatpush.bf16.xpose.msrb.mxu0 %v3715_v21  ;;  %v3708_v41 = vpop.permute.xlu2 %3707 }
0x1021   :  { %5339 = vmatmul.msk.bf16.vlgmr.msra.gmra.mxu3 %vm83_vm1, %v3685_v61 }
0x1027   :  { %5337 = vmatmul.msk.bf16.vlgmr.msrb.gmra.mxu1 %vm83_vm1, %v3639_v8  ;;  %5340 = vmatmul.msk.bf16.vlgmr.msrb.gmra.mxu0 %vm83_vm1, %v3708_v41 }
0x102c   :  { %5338 = vmatmul.msk.bf16.vlgmr.msrb.gmra.mxu2 %vm83_vm1, %v3662_v35  ;;  %v7701_v62 = vpop.f32.mrf.mxu2 }
0x1030   :  { %v7703_v9 = vpop.f32.mrf.mxu1 }
0x1034   :  { %v3356_v16 = vpop.f32.mrf.mxu2 }
0x1038   :  { %v3337_v53 = vpop.f32.mrf.mxu1 }
0x1058   :  { %v7705_v49 = vpop.f32.mrf.mxu0 }
0x105c   :  { %v7707_v15 = vpop.f32.mrf.mxu3 }
0x1060   :  { %v3394_v48 = vpop.f32.mrf.mxu0 }
0x1064   :  { %v3375_v22 = vpop.f32.mrf.mxu3 }
0x1068   :  { %v3634_v31 = vpop.f32.mrf.mxu0 }
0x1069   :  { %v3733_v4 = vsel %vm777_vm15, %v3634_v31, -inf }
0x106a   :  { %3734 = vmax.xlane.f32.xlu0 %v3733_v4 }
0x106c   :  { %v3611_v18 = vpop.f32.mrf.mxu3 }
0x106d   :  { %v3730_v59 = vsel %vm777_vm15, %v3611_v18, -inf }
0x106e   :  { %3731 = vmax.xlane.f32.xlu1 %v3730_v59 }
0x1070   :  { %v3636_v7 = vpop.f32.mrf.mxu0 }
0x1074   :  { %v3613_v12 = vpop.f32.mrf.mxu3 }
0x107e   :  { %3805 = vrot.lane.b32.xlu0 %v3804_v50, %s5749_s30 }
0x1094   :  { %v7713_v29 = vpop.f32.mrf.mxu1 }
0x109c   :  { %v3413_v23 = vpop.f32.mrf.mxu1 }
0x109d   :  { %v3437_v23 = vsel %vm83_vm1, %v7701_v62, 0.0 }
0x109f   :  { %v7715_v1 = vpop.f32.mrf.mxu2 }
0x10a4   :  { %v3657_v42 = vpop.f32.mrf.mxu1  ;;  %v3703_v11 = vpop.f32.mrf.mxu3 }
0x10a5   :  { %v3726_v28 = vpop.f32.mrf.mxu0  ;;  %v3736_v56 = vsel %vm777_vm15, %v3657_v42, -inf  ;;  %v3742_v32 = vsel %vm777_vm15, %v3703_v11, -inf }
0x10a6   :  { %3737 = vmax.xlane.f32.xlu2 %v3736_v56  ;;  %v3745_v46 = vsel %vm777_vm15, %v3726_v28, -inf  ;;  %v3449_v56 = vsel %vm83_vm1, %v7715_v1, 0.0 }
0x10a7   :  { %3746 = vmax.xlane.f32.xlu1 %v3745_v46  ;;  %v3432_v38 = vpop.f32.mrf.mxu2  ;;  %v3923_v46 = vunpack.c.l.b16 %v7653_v60 }
0x10a9   :  { %v3924_v38 = vpack.c.b16 %v3923_v46, %v3923_v46 }
0x10ac   :  { %v3659_v17 = vpop.f32.mrf.mxu1  ;;  %v3705_v2 = vpop.f32.mrf.mxu3 }
0x10ad   :  { %v3728_v26 = vpop.f32.mrf.mxu0  ;;  %v3440_v17 = vsel %vm83_vm1, %v7707_v15, 0.0 }
0x10ae   :  { %3743 = vmax.xlane.f32.xlu2 %v3742_v32 }
0x10af   :  { %v7720_v43 = vpop.f32.mrf.mxu2 }
0x10b0   :  { %v3739_v0 = vsel %vm777_vm15, %v7720_v43, -inf }
0x10b1   :  { %3740 = vmax.xlane.f32.xlu0 %v3739_v0 }
0x10b7   :  { %v3682_v47 = vpop.f32.mrf.mxu2 }
0x10c0   :  { %3877 = vrot.lane.b32.xlu1 %v3876_v13, %s5749_s30 }
0x10c6   :  { %3829 = vrot.lane.b32.xlu2 %v3828_v3, %s5749_s30 }
0x10dd   :  { %v3735_v8 = vpop.xlane.xlu0 %3734 }
0x10de   :  { %v3749_v58 = vsub.f32 %v3634_v31, %v3735_v8 }
0x10e0   :  { %v3756_v10 = vmul.f32 1.442695, %v3749_v58 }
0x10e1   :  { %v3732_v5 = vpop.xlane.xlu1 %3731 }
0x10e2   :  { %5627 = vpow2.f32 %v3756_v10  ;;  %v3748_v45 = vsub.f32 %v3611_v18, %v3732_v5 }
0x10e4   :  { %v3754_v6 = vmul.f32 1.442695, %v3748_v45  ;;  %v3899_v45 = vunpack.c.l.b16 %v7647_v30 }
0x10e6   :  { %5629 = vpow2.f32 %v3754_v6  ;;  %v3900_v6 = vpack.c.b16 %v3899_v45, %v3899_v45 }
0x10e8   :  { %v5628_v35 = vpop.eup %5627 }
0x10e9   :  { %v3769_v57 = vsel %vm777_vm15, %v5628_v35, 0.0 }
0x10ea   :  { %3770 = vadd.xlane.f32.xlu0 %v3769_v57 }
0x10ec   :  { %v5630_v33 = vpop.eup %5629 }
0x10ed   :  { %v3766_v14 = vsel %vm777_vm15, %v5630_v33, 0.0 }
0x10ee   :  { %3767 = vadd.xlane.f32.xlu1 %v3766_v14 }
0x10f0   :  { %v3806_v20 = vpop.permute.xlu0 %3805 }
0x10f1   :  { %v3811_v24 = vsel %vm859_vm14, %v3806_v20, 0 }
0x10f2   :  { %3820 = vmatpush.bf16.msra.mxu1 %v3811_v24  ;;  %v3443_v24 = vsel %vm83_vm1, %v7705_v49, 0.0 }
0x10fe   :  { %3853 = vrot.lane.b32.xlu0 %v3852_v25, %s5749_s30 }
0x1119   :  { %v3738_v63 = vpop.xlane.xlu2 %3737 }
0x111a   :  { %v3750_v21 = vsub.f32 %v3657_v42, %v3738_v63  ;;  %v3747_v61 = vpop.xlane.xlu1 %3746 }
0x111b   :  { %v3753_v41 = vsub.f32 %v3726_v28, %v3747_v61  ;;  %v3434_v28 = vsel %vm83_vm1, %v7703_v9, 0.0 }
0x111c   :  { %v3758_v16 = vmul.f32 1.442695, %v3750_v21 }
0x111d   :  { %v3764_v53 = vmul.f32 1.442695, %v3753_v41 }
0x111e   :  { %5631 = vpow2.f32 %v3758_v16 }
0x111f   :  { %5633 = vpow2.f32 %v3764_v53 }
0x1121   :  { %v3744_v48 = vpop.xlane.xlu2 %3743 }
0x1122   :  { %v3752_v22 = vsub.f32 %v3703_v11, %v3744_v48 }
0x1124   :  { %v5632_v31 = vpop.eup %5631  ;;  %v3762_v4 = vmul.f32 1.442695, %v3752_v22  ;;  %v3741_v2 = vpop.xlane.xlu0 %3740 }
0x1125   :  { %v5634_v18 = vpop.eup %5633  ;;  %v3772_v59 = vsel %vm777_vm15, %v5632_v31, 0.0  ;;  %v3751_v26 = vsub.f32 %v7720_v43, %v3741_v2 }
0x1126   :  { %5635 = vpow2.f32 %v3762_v4  ;;  %3773 = vadd.xlane.f32.xlu1 %v3772_v59  ;;  %v3781_v36 = vsel %vm777_vm15, %v5634_v18, 0.0 }
0x1127   :  { %3782 = vadd.xlane.f32.xlu2 %v3781_v36  ;;  %v3760_v32 = vmul.f32 1.442695, %v3751_v26 }
0x1129   :  { %v3830_v7 = vpop.permute.xlu2 %3829 }
0x112a   :  { %v3835_v12 = vsel %vm859_vm14, %v3830_v7, 0 }
0x112b   :  { %3844 = vmatpush.bf16.msra.mxu2 %v3835_v12  ;;  %v3446_v12 = vsel %vm83_vm1, %v7713_v29, 0.0 }
0x112c   :  { %v7736_v54 = vpop.eup %5635 }
0x112d   :  { %v3778_v50 = vsel %vm777_vm15, %v7736_v54, 0.0 }
0x112e   :  { %3779 = vadd.xlane.f32.xlu0 %v3778_v50 }
0x112f   :  { %3438 = vadd.xlane.f32.xlu2 %v3437_v23 }
0x1132   :  { %v3878_v42 = vpop.permute.xlu1 %3877 }
0x1133   :  { %v3883_v11 = vsel %vm859_vm14, %v3878_v42, 0 }
0x1134   :  { %3892 = vmatpush.bf16.msra.mxu0 %v3883_v11 }
0x1136   :  { %3435 = vadd.xlane.f32.xlu0 %v3434_v28  ;;  %v5441_v28 = vld [vmem:[%s8582_s4 + $0x7] ss:$0 sm:$0xff] }
0x1137   :  { %3450 = vadd.xlane.f32.xlu2 %v3449_v56 }
0x113e   :  { %3441 = vadd.xlane.f32.xlu0 %v3440_v17 }
0x113f   :  { %3925 = vrot.lane.b32.xlu1 %v3924_v38, %s5749_s30 }
0x115d   :  { %v3771_v0 = vpop.xlane.xlu0 %3770 }
0x115e   :  { %5637 = vrcp.f32 %v3771_v0 }
0x115f   :  { %5639 = vpow2.f32 %v3760_v32 }
0x1161   :  { %v3768_v47 = vpop.xlane.xlu1 %3767 }
0x1162   :  { %5641 = vrcp.f32 %v3768_v47 }
0x1164   :  { %v5638_v40 = vpop.eup %5637 }
0x1165   :  { %v5640_v13 = vpop.eup %5639  ;;  %v3791_v51 = vmul.f32 %v5638_v40, %v5628_v35 }
0x1166   :  { %v3775_v8 = vsel %vm777_vm15, %v5640_v13, 0.0 }
0x1167   :  { %v3797_v60 = vpack.c.bf16 %v3791_v51, %v3791_v51 }
0x1168   :  { %v5642_v3 = vpop.eup %5641 }
0x1169   :  { %v3790_v58 = vmul.f32 %v5642_v3, %v5630_v33  ;;  %3776 = vadd.xlane.f32.xlu1 %v3775_v8  ;;  %5342 = vmatmul.msk.bf16.vlgmr.msra.gmra.mxu2 %vm777_vm15, %v3797_v60 }
0x116b   :  { %v3796_v10 = vpack.c.bf16 %v3790_v58, %v3790_v58 }
0x116d   :  { %5341 = vmatmul.msk.bf16.vlgmr.msra.gmra.mxu1 %vm777_vm15, %v3796_v10 }
0x1170   :  { %v3854_v43 = vpop.permute.xlu0 %3853 }
0x1171   :  { %v3859_v5 = vsel %vm859_vm14, %v3854_v43, 0 }
0x1172   :  { %3868 = vmatpush.bf16.msrb.mxu3 %v3859_v5 }
0x1182   :  { %3901 = vrot.lane.b32.xlu1 %v3900_v6, %s5749_s30 }
0x1199   :  { %v3774_v35 = vpop.xlane.xlu1 %3773 }
0x119a   :  { %5643 = vrcp.f32 %v3774_v35  ;;  %v3783_v20 = vpop.xlane.xlu2 %3782 }
0x119b   :  { %5645 = vrcp.f32 %v3783_v20 }
0x11a0   :  { %v5644_v57 = vpop.eup %5643 }
0x11a1   :  { %v3792_v14 = vmul.f32 %v5644_v57, %v5632_v31  ;;  %v5646_v39 = vpop.eup %5645  ;;  %v3780_v48 = vpop.xlane.xlu0 %3779 }
0x11a2   :  { %v3795_v25 = vmul.f32 %v5646_v39, %v5634_v18  ;;  %v3439_v56 = vpop.xlane.xlu2 %3438 }
0x11a3   :  { %v3798_v33 = vpack.c.bf16 %v3792_v14, %v3792_v14 }
0x11a4   :  { %v3801_v21 = vpack.c.bf16 %v3795_v25, %v3795_v25 }
0x11a5   :  { %5343 = vmatmul.msk.bf16.vlgmr.msrb.gmra.mxu3 %vm777_vm15, %v3798_v33 }
0x11a9   :  { %v3436_v58 = vpop.xlane.xlu0 %3435 }
0x11aa   :  { %v3451_v26 = vpop.xlane.xlu2 %3450 }
0x11ab   :  { %v3457_v0 = vmul.f32 %v3451_v26, %v5866_v52 }
0x11ac   :  { %3444 = vadd.xlane.f32.xlu1 %v3443_v24 }
0x11ad   :  { %v7784_v40 = vsub.f32 %v7715_v1, %v3457_v0  ;;  %v3452_v1 = vmul.f32 %v3436_v58, %v5866_v52 }
0x11af   :  { %v7796_v43 = vsub.f32 %v7703_v9, %v3452_v1 }
0x11b1   :  { %v3926_v63 = vpop.permute.xlu1 %3925  ;;  %v3464_v35 = vmul.f32 %v7796_v43, %v7796_v43 }
0x11b2   :  { %v3931_v30 = vsel %vm859_vm14, %v3926_v63, 0 }
0x11b3   :  { %3940 = vmatpush.bf16.msrb.mxu2 %v3931_v30  ;;  %v3470_v33 = vsel %vm83_vm1, %v3464_v35, 0.0 }
0x11b6   :  { %5346 = vmatmul.msk.bf16.vlgmr.msrb.gmra.mxu2 %vm777_vm15, %v3801_v21 }
0x11dc   :  { %v3777_v61 = vpop.xlane.xlu1 %3776 }
0x11dd   :  { %5647 = vrcp.f32 %v3777_v61 }
0x11de   :  { %5649 = vrcp.f32 %v3780_v48 }
0x11e3   :  { %v5648_v41 = vpop.eup %5647 }
0x11e4   :  { %v3793_v16 = vmul.f32 %v5648_v41, %v5640_v13  ;;  %v5650_v59 = vpop.eup %5649 }
0x11e5   :  { %v3794_v7 = vmul.f32 %v5650_v59, %v7736_v54 }
0x11e6   :  { %v3799_v53 = vpack.c.bf16 %v3793_v16, %v3793_v16  ;;  %v3442_v16 = vpop.xlane.xlu0 %3441 }
0x11e7   :  { %v3800_v11 = vpack.c.bf16 %v3794_v7, %v3794_v7  ;;  %v3453_v7 = vmul.f32 %v3439_v56, %v5866_v52 }
0x11e8   :  { %5344 = vmatmul.msk.bf16.vlgmr.msra.gmra.mxu0 %vm777_vm15, %v3799_v53 }
0x11ea   :  { %v3822_v22 = vpop.f32.mrf.mxu1 }
0x11eb   :  { %v3946_v31 = vsel %vm83_vm1, %v3822_v22, 0.0 }
0x11ec   :  { %3947 = vadd.xlane.f32.xlu1 %v3946_v31  ;;  %v3846_v4 = vpop.f32.mrf.mxu2 }
0x11ed   :  { %v3949_v18 = vsel %vm83_vm1, %v3846_v4, 0.0 }
0x11ee   :  { %3950 = vadd.xlane.f32.xlu2 %v3949_v18 }
0x11f2   :  { %v3824_v36 = vpop.f32.mrf.mxu1 }
0x11f4   :  { %3447 = vadd.xlane.f32.xlu1 %v3446_v12  ;;  %v3902_v50 = vpop.permute.xlu1 %3901  ;;  %v3848_v23 = vpop.f32.mrf.mxu2 }
0x11f5   :  { %v3907_v42 = vsel %vm859_vm14, %v3902_v50, 0  ;;  %v7829_v23 = vsub.f32 %v7701_v62, %v3453_v7 }
0x11f6   :  { %3916 = vmatpush.bf16.msrb.mxu1 %v3907_v42 }
0x11f9   :  { %5345 = vmatmul.msk.bf16.vlgmr.msrb.gmra.mxu1 %vm777_vm15, %v3800_v11 }
0x120d   :  { %3577 = vrot.lane.b32.xlu1 %v5441_v28, %s5752_s29 }
0x121f   :  { %v3445_v54 = vpop.xlane.xlu1 %3444 }
0x1220   :  { %v3455_v17 = vmul.f32 %v3445_v54, %v5866_v52 }
0x1222   :  { %v7778_v2 = vsub.f32 %v7705_v49, %v3455_v17  ;;  %v3469_v49 = vmul.f32 %v7784_v40, %v7784_v40 }
0x1224   :  { %v3467_v47 = vmul.f32 %v7778_v2, %v7778_v2  ;;  %v3485_v3 = vsel %vm83_vm1, %v3469_v49, 0.0 }
0x1226   :  { %v3479_v13 = vsel %vm83_vm1, %v3467_v47, 0.0 }
0x1228   :  { %v3870_v46 = vpop.f32.mrf.mxu3 }
0x1229   :  { %v3952_v38 = vsel %vm83_vm1, %v3870_v46, 0.0 }
0x122a   :  { %3953 = vadd.xlane.f32.xlu0 %v3952_v38 }
0x1230   :  { %v3872_v32 = vpop.f32.mrf.mxu3 }
0x1237   :  { %3480 = vadd.xlane.f32.xlu1 %v3479_v13 }
0x1239   :  { %v7787_v51 = vpop.f32.mrf.mxu2 }
0x123a   :  { %v3961_v60 = vsel %vm83_vm1, %v7787_v51, 0.0 }
0x123b   :  { %3962 = vadd.xlane.f32.xlu2 %v3961_v60 }
0x123f   :  { %3486 = vadd.xlane.f32.xlu1 %v3485_v3 }
0x1241   :  { %v3944_v8 = vpop.f32.mrf.mxu2 }
0x1242   :  { %v3454_v8 = vmul.f32 %v3442_v16, %v5866_v52 }
0x125f   :  { %v3948_v20 = vpop.xlane.xlu1 %3947 }
0x1260   :  { %v3964_v24 = vmul.f32 %v3948_v20, %v5866_v52 }
0x1261   :  { %v3951_v45 = vpop.xlane.xlu2 %3950 }
0x1262   :  { %v3965_v6 = vmul.f32 %v3951_v45, %v5866_v52  ;;  %v7809_v63 = vsub.f32 %v3822_v22, %v3964_v24 }
0x1264   :  { %v7802_v14 = vsub.f32 %v3846_v4, %v3965_v6  ;;  %v3976_v21 = vmul.f32 %v7809_v63, %v7809_v63  ;;  %v7859_v6 = vsub.f32 %v7707_v15, %v3454_v8 }
0x1265   :  { %v3894_v10 = vpop.f32.mrf.mxu0 }
0x1266   :  { %v3955_v5 = vsel %vm83_vm1, %v3894_v10, 0.0  ;;  %v3977_v9 = vmul.f32 %v7802_v14, %v7802_v14  ;;  %v3982_v41 = vsel %vm83_vm1, %v3976_v21, 0.0 }
0x1267   :  { %3956 = vadd.xlane.f32.xlu2 %v3955_v5  ;;  %v5353_v5 = vld [vmem:[%s8581_s3 + $0x38] sm:$0xf] }
0x1268   :  { %v3985_v25 = vsel %vm83_vm1, %v3977_v9, 0.0 }
0x126d   :  { %v3896_v57 = vpop.f32.mrf.mxu0 }
0x126f   :  { %3471 = vadd.xlane.f32.xlu2 %v3470_v33 }
0x1276   :  { %v3918_v39 = vpop.f32.mrf.mxu1 }
0x1277   :  { %3986 = vadd.xlane.f32.xlu2 %v3985_v25  ;;  %v3958_v30 = vsel %vm83_vm1, %v3918_v39, 0.0 }
0x1278   :  { %3959 = vadd.xlane.f32.xlu0 %v3958_v30  ;;  %v3448_v30 = vpop.xlane.xlu1 %3447 }
0x127e   :  { %v3920_v61 = vpop.f32.mrf.mxu1 }
0x1280   :  { %3983 = vadd.xlane.f32.xlu0 %v3982_v41 }
0x1294   :  { %3568 = vrot.lane.b32.xlu0 %v5441_v28, %s5749_s30  ;;  %v3465_v28 = vmul.f32 %v7829_v23, %v7829_v23 }
0x1296   :  { %v3473_v54 = vsel %vm83_vm1, %v3465_v28, 0.0 }
0x129d   :  { %v3954_v53 = vpop.xlane.xlu0 %3953 }
0x129e   :  { %v3966_v48 = vmul.f32 %v3954_v53, %v5866_v52 }
0x12a0   :  { %v7817_v31 = vsub.f32 %v3870_v46, %v3966_v48 }
0x12a2   :  { %v3978_v22 = vmul.f32 %v7817_v31, %v7817_v31 }
0x12a4   :  { %v3988_v4 = vsel %vm83_vm1, %v3978_v22, 0.0 }
0x12a5   :  { %3989 = vadd.xlane.f32.xlu2 %v3988_v4 }
0x12ae   :  { %v3963_v18 = vpop.xlane.xlu2 %3962 }
0x12af   :  { %v3969_v62 = vmul.f32 %v3963_v18, %v5866_v52  ;;  %v7870_v18 = vpop.permute.xlu1 %3577 }
0x12b1   :  { %v7845_v47 = vsub.f32 %v7787_v51, %v3969_v62  ;;  %v5418_v51 = vld [vmem:[%s8581_s3 + $0x48] sm:$0xf0]  ;;  %v5420_v62 = vld [vmem:[%s8581_s3 + $0x98] sm:$0xf0] }
0x12b2   :  { %v5354_v33 = vor.u32 %v5418_v51, %v5353_v5 }
0x12da   :  { %v3957_v59 = vpop.xlane.xlu2 %3956 }
0x12db   :  { %v3967_v36 = vmul.f32 %v3957_v59, %v5866_v52 }
0x12dd   :  { %v7824_v12 = vsub.f32 %v3894_v10, %v3967_v36  ;;  %v3981_v10 = vmul.f32 %v7845_v47, %v7845_v47 }
0x12df   :  { %v3979_v50 = vmul.f32 %v7824_v12, %v7824_v12  ;;  %v3997_v57 = vsel %vm83_vm1, %v3981_v10, 0.0 }
0x12e1   :  { %v3991_v42 = vsel %vm83_vm1, %v3979_v50, 0.0 }
0x12e2   :  { %3992 = vadd.xlane.f32.xlu0 %v3991_v42  ;;  %v7832_v11 = vpop.xlane.xlu2 %3471 }
0x12ea   :  { %3474 = vadd.xlane.f32.xlu0 %v3473_v54  ;;  %v3987_v56 = vpop.xlane.xlu2 %3986  ;;  %v5349_v54 = vld [vmem:[%s8581_s3 + $0x10] sm:$0xf] }
0x12eb   :  { %v4001_v46 = vmul.f32 %v3987_v56, %v5866_v52  ;;  %v3960_v38 = vpop.xlane.xlu0 %3959 }
0x12ec   :  { %v3968_v17 = vmul.f32 %v3960_v38, %v5866_v52  ;;  %v5417_v38 = vld [vmem:[%s8581_s3 + $0x20] sm:$0xf0] }
0x12ed   :  { %v4007_v26 = vadd.f32 1e-05, %v4001_v46 }
0x12ee   :  { %v7840_v32 = vsub.f32 %v3918_v39, %v3968_v17  ;;  %v3466_v39 = vmul.f32 %v7859_v6, %v7859_v6  ;;  %v5350_v17 = vor.u32 %v5417_v38, %v5349_v54 }
0x12ef   :  { %5651 = vrsqrt.f32 %v4007_v26  ;;  %vm4028_vm15 = vweird.f32 %v4007_v26 }
0x12f0   :  { %v3980_v0 = vmul.f32 %v7840_v32, %v7840_v32  ;;  %v3476_v61 = vsel %vm83_vm1, %v3466_v39, 0.0  ;;  %4172 = vrot.lane.b32.xlu1 %v5350_v17, %s5749_s30 }
0x12f2   :  { %v3994_v13 = vsel %vm83_vm1, %v3980_v0, 0.0 }
0x12f3   :  { %3995 = vadd.xlane.f32.xlu2 %v3994_v13  ;;  %v3984_v60 = vpop.xlane.xlu0 %3983  ;;  %v5357_v13 = vld [vmem:[%s8581_s3 + $0x60] sm:$0xf] }
0x12f4   :  { %v4000_v49 = vmul.f32 %v3984_v60, %v5866_v52  ;;  %v5419_v60 = vld [vmem:[%s8581_s3 + $0x70] sm:$0xf0] }
0x12f5   :  { %v5652_v3 = vpop.eup %5651 }
0x12f6   :  { %v4023_v58 = vmul.f32 %v5652_v3, %v4007_v26  ;;  %v4006_v1 = vadd.f32 1e-05, %v4000_v49  ;;  %vm4029_vm14 = vweird.f32 %v5652_v3  ;;  %v5361_v26 = vld [vmem:[%s8581_s3 + $0x88] sm:$0xf]  ;;  %v5358_v49 = vor.u32 %v5419_v60, %v5357_v13 }
0x12f7   :  { %vm4030_vm2 = vmor %vm4028_vm15, %vm4029_vm14  ;;  %v5362_v0 = vor.u32 %v5420_v62, %v5361_v26 }
0x12f8   :  { %v4024_v45 = vmul.f32 %v5652_v3, %v4023_v58  ;;  %5653 = vrsqrt.f32 %v4006_v1  ;;  %vm4018_vm5 = vweird.f32 %v4006_v1  ;;  %v3456_v58 = vmul.f32 %v3448_v30, %v5866_v52 }
0x12fa   :  { %v4025_v35 = vmul.f32 0.5, %v4024_v45  ;;  %v7901_v10 = vsub.f32 %v7713_v29, %v3456_v58 }
0x12fb   :  { %3998 = vadd.xlane.f32.xlu2 %v3997_v57 }
0x12fc   :  { %v4026_v20 = vsub.f32 1.5, %v4025_v35  ;;  %v3468_v5 = vmul.f32 %v7901_v10, %v7901_v10 }
0x12fe   :  { %v5654_v9 = vpop.eup %5653  ;;  %v4027_v24 = vmul.f32 %v5652_v3, %v4026_v20  ;;  %4174 = vrot.lane.b32.xlu0 %v5354_v33, %s5749_s30  ;;  %v3482_v45 = vsel %vm83_vm1, %v3468_v5, 0.0  ;;  %v3488_v20 = vmul.f32 %v7832_v11, %v5866_v52 }
0x12ff   :  { %v4013_v25 = vmul.f32 %v5654_v9, %v4006_v1  ;;  %vm4019_vm4 = vweird.f32 %v5654_v9 }
0x1300   :  { %v4031_v21 = vsel %vm4030_vm2, %v5652_v3, %v4027_v24  ;;  %vm4020_vm6 = vmor %vm4018_vm5, %vm4019_vm4 }
0x1301   :  { %v4014_v15 = vmul.f32 %v5654_v9, %v4013_v25  ;;  %v4073_v16 = vmul.f32 %v4031_v21, %v7802_v14  ;;  %v7909_v25 = vadd.f32 1e-05, %v3488_v20 }
0x1303   :  { %v4015_v41 = vmul.f32 0.5, %v4014_v15  ;;  %3477 = vadd.xlane.f32.xlu2 %v3476_v61  ;;  %v3481_v15 = vpop.xlane.xlu1 %3480  ;;  %vm3506_vm4 = vweird.f32 %v7909_v25 }
0x1304   :  { %v3491_v11 = vmul.f32 %v3481_v15, %v5866_v52 }
0x1305   :  { %v4016_v53 = vsub.f32 1.5, %v4015_v41 }
0x1306   :  { %v7867_v48 = vpop.permute.xlu0 %3568 }
0x1307   :  { %v4017_v22 = vmul.f32 %v5654_v9, %v4016_v53  ;;  %v4079_v4 = vmul.f32 %v4073_v16, %v7867_v48 }
0x1309   :  { %v4021_v59 = vsel %vm4020_vm6, %v5654_v9, %v4017_v22  ;;  %v4085_v7 = vadd.f32 %v4079_v4, %v7870_v18 }
0x130a   :  { %v4072_v36 = vmul.f32 %v4021_v59, %v7809_v63 }
0x130b   :  { %v4091_v42 = vpack.c.bf16 %v4085_v7, %v4085_v7  ;;  %v7917_v7 = vadd.f32 1e-05, %v3491_v11 }
0x130c   :  { %v4078_v50 = vmul.f32 %v4072_v36, %v7867_v48 }
0x130d   :  { %v4118_v46 = vunpack.c.l.b16 %v4091_v42 }
0x130e   :  { %v4084_v14 = vadd.f32 %v4078_v50, %v7870_v18 }
0x1310   :  { %v4090_v28 = vpack.c.bf16 %v4084_v14, %v4084_v14 }
0x1312   :  { %v4117_v56 = vunpack.c.l.b16 %v4090_v28 }
0x1314   :  { %v4123_v63 = vpack.c.b16 %v4118_v46, %v4117_v56 }
0x1316   :  { %4126 = vrot.lane.b32.xlu0 %v4123_v63, %s5750_s8 }
0x1318   :  { %v3990_v3 = vpop.xlane.xlu2 %3989 }
0x1319   :  { %v4002_v8 = vmul.f32 %v3990_v3, %v5866_v52 }
0x131b   :  { %4178 = vrot.lane.b32.xlu2 %v5362_v0, %s5749_s30  ;;  %v4008_v1 = vadd.f32 1e-05, %v4002_v8 }
0x131d   :  { %5655 = vrsqrt.f32 %v4008_v1  ;;  %vm4038_vm8 = vweird.f32 %v4008_v1 }
0x1323   :  { %4176 = vrot.lane.b32.xlu2 %v5358_v49, %s5749_s30  ;;  %v5656_v51 = vpop.eup %5655 }
0x1324   :  { %v4033_v35 = vmul.f32 %v5656_v51, %v4008_v1  ;;  %vm4039_vm7 = vweird.f32 %v5656_v51 }
0x1325   :  { %vm4040_vm9 = vmor %vm4038_vm8, %vm4039_vm7 }
0x1326   :  { %v4034_v57 = vmul.f32 %v5656_v51, %v4033_v35 }
0x1328   :  { %v4035_v33 = vmul.f32 0.5, %v4034_v57 }
0x132a   :  { %v4036_v39 = vsub.f32 1.5, %v4035_v33 }
0x132c   :  { %v4037_v30 = vmul.f32 %v5656_v51, %v4036_v39 }
0x132e   :  { %v4041_v16 = vsel %vm4040_vm9, %v5656_v51, %v4037_v30 }
0x132f   :  { %v4074_v59 = vmul.f32 %v4041_v16, %v7817_v31 }
0x1331   :  { %v4080_v28 = vmul.f32 %v4074_v59, %v7867_v48 }
0x1333   :  { %v4086_v0 = vadd.f32 %v4080_v28, %v7870_v18 }
0x1335   :  { %v4092_v5 = vpack.c.bf16 %v4086_v0, %v4086_v0 }
0x1337   :  { %v4119_v39 = vunpack.c.l.b16 %v4092_v5 }
0x134c   :  { %3483 = vadd.xlane.f32.xlu2 %v3482_v45 }
0x1355   :  { %v3993_v9 = vpop.xlane.xlu0 %3992 }
0x1356   :  { %v4003_v24 = vmul.f32 %v3993_v9, %v5866_v52  ;;  %v5442_v9 = vld [vmem:[%s8582_s4 + $0x7] ss:$0 sm:$0xff] }
0x1357   :  { %4184 = vrot.lane.b32.xlu1 %v5442_v9, %s5750_s8 }
0x1358   :  { %v4009_v29 = vadd.f32 1e-05, %v4003_v24 }
0x135a   :  { %5657 = vrsqrt.f32 %v4009_v29  ;;  %vm4048_vm11 = vweird.f32 %v4009_v29 }
0x135b   :  { %5659 = vrsqrt.f32 %v7909_v25 }
0x135d   :  { %v3475_v21 = vpop.xlane.xlu0 %3474 }
0x135e   :  { %v3489_v61 = vmul.f32 %v3475_v21, %v5866_v52 }
0x1360   :  { %v5658_v41 = vpop.eup %5657  ;;  %v3495_v53 = vadd.f32 1e-05, %v3489_v61 }
0x1361   :  { %v4043_v22 = vmul.f32 %v5658_v41, %v4009_v29  ;;  %v7914_v4 = vpop.eup %5659  ;;  %vm4049_vm10 = vweird.f32 %v5658_v41 }
0x1362   :  { %5661 = vrsqrt.f32 %v3495_v53  ;;  %v3501_v14 = vmul.f32 %v7914_v4, %v7909_v25  ;;  %vm4050_vm0 = vmor %vm4048_vm11, %vm4049_vm10  ;;  %vm3516_vm13 = vweird.f32 %v3495_v53  ;;  %vm3507_vm14 = vweird.f32 %v7914_v4 }
0x1363   :  { %v4044_v36 = vmul.f32 %v5658_v41, %v4043_v22  ;;  %5663 = vrsqrt.f32 %v7917_v7  ;;  %vm3508_vm5 = vmor %vm3506_vm4, %vm3507_vm14  ;;  %vm3536_vm11 = vweird.f32 %v7917_v7 }
0x1364   :  { %v3502_v63 = vmul.f32 %v7914_v4, %v3501_v14 }
0x1365   :  { %v4045_v50 = vmul.f32 0.5, %v4044_v36 }
0x1366   :  { %v3996_v42 = vpop.xlane.xlu2 %3995  ;;  %v3503_v58 = vmul.f32 0.5, %v3502_v63 }
0x1367   :  { %v4046_v54 = vsub.f32 1.5, %v4045_v50  ;;  %v4004_v56 = vmul.f32 %v3996_v42, %v5866_v52 }
0x1368   :  { %v5662_v46 = vpop.eup %5661  ;;  %v3504_v24 = vsub.f32 1.5, %v3503_v58 }
0x1369   :  { %v4047_v38 = vmul.f32 %v5658_v41, %v4046_v54  ;;  %v3511_v31 = vmul.f32 %v5662_v46, %v3495_v53  ;;  %v4010_v17 = vadd.f32 1e-05, %v4004_v56  ;;  %v7927_v49 = vpop.eup %5663  ;;  %vm3517_vm12 = vweird.f32 %v5662_v46 }
0x136a   :  { %v3531_v57 = vmul.f32 %v7927_v49, %v7917_v7  ;;  %vm3518_vm15 = vmor %vm3516_vm13, %vm3517_vm12  ;;  %v3505_v22 = vmul.f32 %v7914_v4, %v3504_v24  ;;  %vm3537_vm9 = vweird.f32 %v7927_v49 }
0x136b   :  { %v4051_v26 = vsel %vm4050_vm0, %v5658_v41, %v4047_v38  ;;  %v3512_v62 = vmul.f32 %v5662_v46, %v3511_v31  ;;  %5665 = vrsqrt.f32 %v4010_v17  ;;  %vm4058_vm6 = vweird.f32 %v4010_v17  ;;  %vm3538_vm12 = vmor %vm3536_vm11, %vm3537_vm9 }
0x136c   :  { %v4075_v13 = vmul.f32 %v4051_v26, %v7824_v12  ;;  %v3532_v21 = vmul.f32 %v7927_v49, %v3531_v57  ;;  %v3509_v56 = vsel %vm3508_vm5, %v7914_v4, %v3505_v22 }
0x136d   :  { %v3513_v60 = vmul.f32 0.5, %v3512_v62  ;;  %v3560_v25 = vmul.f32 %v3509_v56, %v7796_v43 }
0x136e   :  { %v4081_v3 = vmul.f32 %v4075_v13, %v7867_v48  ;;  %v3999_v8 = vpop.xlane.xlu2 %3998  ;;  %v3533_v14 = vmul.f32 0.5, %v3532_v21 }
0x136f   :  { %v4005_v1 = vmul.f32 %v3999_v8, %v5866_v52  ;;  %v3514_v51 = vsub.f32 1.5, %v3513_v60  ;;  %v3571_v60 = vmul.f32 %v7867_v48, %v3560_v25  ;;  %v3487_v8 = vpop.xlane.xlu1 %3486 }
0x1370   :  { %v4087_v45 = vadd.f32 %v4081_v3, %v7870_v18  ;;  %v3534_v31 = vsub.f32 1.5, %v3533_v14  ;;  %v4175_v5 = vpop.permute.xlu0 %4174 }
0x1371   :  { %v5666_v35 = vpop.eup %5665  ;;  %v4011_v33 = vadd.f32 1e-05, %v4005_v1  ;;  %v3515_v29 = vmul.f32 %v5662_v46, %v3514_v51 }
0x1372   :  { %v4053_v20 = vmul.f32 %v5666_v35, %v4010_v17  ;;  %v4093_v12 = vpack.c.bf16 %v4087_v45, %v4087_v45  ;;  %vm4059_vm2 = vweird.f32 %v5666_v35 }
0x1373   :  { %5667 = vrsqrt.f32 %v4011_v33  ;;  %v3519_v59 = vsel %vm3518_vm15, %v5662_v46, %v3515_v29  ;;  %vm4060_vm7 = vmor %vm4058_vm6, %vm4059_vm2  ;;  %vm4068_vm10 = vweird.f32 %v4011_v33 }
0x1374   :  { %v4054_v30 = vmul.f32 %v5666_v35, %v4053_v20  ;;  %v4120_v15 = vunpack.c.l.b16 %v4093_v12  ;;  %v3561_v54 = vmul.f32 %v3519_v59, %v7829_v23  ;;  %v3535_v23 = vmul.f32 %v7927_v49, %v3534_v31 }
0x1376   :  { %v4055_v61 = vmul.f32 0.5, %v4054_v30  ;;  %v3478_v41 = vpop.xlane.xlu2 %3477  ;;  %v4124_v11 = vpack.c.b16 %v4120_v15, %v4119_v39  ;;  %v3572_v0 = vmul.f32 %v7867_v48, %v3561_v54  ;;  %v3539_v51 = vsel %vm3538_vm12, %v7927_v49, %v3535_v23 }
0x1377   :  { %v3490_v16 = vmul.f32 %v3478_v41, %v5866_v52  ;;  %v3563_v9 = vmul.f32 %v3539_v51, %v7778_v2  ;;  %v4173_v41 = vpop.permute.xlu1 %4172 }
0x1378   :  { %v4056_v36 = vsub.f32 1.5, %v4055_v61  ;;  %4128 = vrot.lane.b32.xlu0 %v4124_v11, %s5750_s8  ;;  %v3581_v43 = vadd.f32 %v7870_v18, %v3572_v0 }
0x1379   :  { %v5668_v50 = vpop.eup %5667  ;;  %v3496_v53 = vadd.f32 1e-05, %v3490_v16 }
0x137a   :  { %v4057_v42 = vmul.f32 %v5666_v35, %v4056_v36  ;;  %v4063_v28 = vmul.f32 %v5668_v50, %v4011_v33  ;;  %vm4069_vm8 = vweird.f32 %v5668_v50  ;;  %v3587_v12 = vpack.c.bf16 %v3581_v43, %v3581_v43 }
0x137b   :  { %5669 = vrsqrt.f32 %v3496_v53  ;;  %vm4070_vm0 = vmor %vm4068_vm10, %vm4069_vm8  ;;  %vm3526_vm14 = vweird.f32 %v3496_v53 }
0x137c   :  { %v4061_v46 = vsel %vm4060_vm7, %v5666_v35, %v4057_v42  ;;  %v4064_v38 = vmul.f32 %v5668_v50, %v4063_v28  ;;  %v3580_v35 = vadd.f32 %v7870_v18, %v3571_v60  ;;  %v4103_v15 = vunpack.c.l.b16 %v3587_v12 }
0x137d   :  { %v4076_v63 = vmul.f32 %v4061_v46, %v7840_v32 }
0x137e   :  { %v4065_v26 = vmul.f32 0.5, %v4064_v38  ;;  %v4179_v62 = vpop.permute.xlu2 %4178  ;;  %v3586_v39 = vpack.c.bf16 %v3580_v35, %v3580_v35 }
0x137f   :  { %4197 = vmatpush.bf16.msra.mxu3 %v4179_v62  ;;  %v4082_v4 = vmul.f32 %v4076_v63, %v7867_v48 }
0x1380   :  { %v4066_v17 = vsub.f32 1.5, %v4065_v26  ;;  %v4102_v16 = vunpack.c.l.b16 %v3586_v39  ;;  %v3493_v26 = vmul.f32 %v3487_v8, %v5866_v52 }
0x1381   :  { %v5670_v13 = vpop.eup %5669  ;;  %v4088_v57 = vadd.f32 %v4082_v4, %v7870_v18 }
0x1382   :  { %v4067_v3 = vmul.f32 %v5668_v50, %v4066_v17  ;;  %v3521_v32 = vmul.f32 %v5670_v13, %v3496_v53  ;;  %vm3527_vm13 = vweird.f32 %v5670_v13  ;;  %v3499_v25 = vadd.f32 1e-05, %v3493_v26 }
0x1383   :  { %v4094_v49 = vpack.c.bf16 %v4088_v57, %v4088_v57  ;;  %vm3528_vm15 = vmor %vm3526_vm14, %vm3527_vm13 }
0x1384   :  { %v4071_v58 = vsel %vm4070_vm0, %v5668_v50, %v4067_v3  ;;  %v3522_v1 = vmul.f32 %v5670_v13, %v3521_v32  ;;  %v4108_v50 = vpack.c.b16 %v4103_v15, %v4102_v16  ;;  %vm3556_vm7 = vweird.f32 %v3499_v25 }
0x1385   :  { %v4077_v45 = vmul.f32 %v4071_v58, %v7845_v47  ;;  %v3574_v47 = vmul.f32 %v7867_v48, %v3563_v9  ;;  %v4121_v2 = vunpack.c.l.b16 %v4094_v49 }
0x1386   :  { %v3523_v33 = vmul.f32 0.5, %v3522_v1  ;;  %v4177_v20 = vpop.permute.xlu2 %4176 }
0x1387   :  { %v4083_v7 = vmul.f32 %v4077_v45, %v7867_v48  ;;  %4198 = vmatpush.bf16.msra.mxu3 %v4177_v20  ;;  %v3583_v36 = vadd.f32 %v7870_v18, %v3574_v47 }
0x1388   :  { %v3524_v24 = vsub.f32 1.5, %v3523_v33  ;;  %v4127_v59 = vpop.permute.xlu0 %4126 }
0x1389   :  { %v4089_v29 = vadd.f32 %v4083_v7, %v7870_v18  ;;  %v4134_v42 = vsel %vm83_vm1, %v4108_v50, %v4127_v59 }
0x138a   :  { %v3525_v30 = vmul.f32 %v5670_v13, %v3524_v24 }
0x138b   :  { %4199 = vmatpush.bf16.msra.mxu3 %v4175_v5  ;;  %v4095_v21 = vpack.c.bf16 %v4089_v29, %v4089_v29 }
0x138c   :  { %v3529_v61 = vsel %vm3528_vm15, %v5670_v13, %v3525_v30 }
0x138d   :  { %v3562_v11 = vmul.f32 %v3529_v61, %v7859_v6  ;;  %v4122_v22 = vunpack.c.l.b16 %v4095_v21  ;;  %v3589_v6 = vpack.c.bf16 %v3583_v36, %v3583_v36 }
0x138f   :  { %4200 = vmatpush.bf16.msra.mxu3 %v4173_v41  ;;  %v4125_v14 = vpack.c.b16 %v4122_v22, %v4121_v2  ;;  %v3573_v53 = vmul.f32 %v7867_v48, %v3562_v11  ;;  %v4105_v46 = vunpack.c.l.b16 %v3589_v6 }
0x1391   :  { %4130 = vrot.lane.b32.xlu0 %v4125_v14, %s5750_s8  ;;  %v3582_v28 = vadd.f32 %v7870_v18, %v3573_v53 }
0x1392   :  { %5363 = vmatmul.msk.bf16.vlgmr.msra.gmra.mxu3 %vm551_vm3, %v4134_v42 }
0x1393   :  { %v3588_v54 = vpack.c.bf16 %v3582_v28, %v3582_v28 }
0x1395   :  { %v4104_v56 = vunpack.c.l.b16 %v3588_v54 }
0x1397   :  { %v4109_v38 = vpack.c.b16 %v4105_v46, %v4104_v56 }
0x13bf   :  { %v3484_v31 = vpop.xlane.xlu2 %3483 }
0x13c0   :  { %v3492_v63 = vmul.f32 %v3484_v31, %v5866_v52 }
0x13c2   :  { %v3498_v62 = vadd.f32 1e-05, %v3492_v63 }
0x13c4   :  { %5671 = vrsqrt.f32 %v3498_v62  ;;  %vm3546_vm4 = vweird.f32 %v3498_v62 }
0x13c5   :  { %5673 = vrsqrt.f32 %v3499_v25 }
0x13ca   :  { %v5672_v0 = vpop.eup %5671 }
0x13cb   :  { %v3541_v17 = vmul.f32 %v5672_v0, %v3498_v62  ;;  %v5674_v13 = vpop.eup %5673  ;;  %vm3547_vm2 = vweird.f32 %v5672_v0 }
0x13cc   :  { %v3551_v23 = vmul.f32 %v5674_v13, %v3499_v25  ;;  %vm3548_vm5 = vmor %vm3546_vm4, %vm3547_vm2  ;;  %vm3557_vm6 = vweird.f32 %v5674_v13 }
0x13cd   :  { %v3542_v4 = vmul.f32 %v5672_v0, %v3541_v17  ;;  %vm3558_vm8 = vmor %vm3556_vm7, %vm3557_vm6  ;;  %v8009_v17 = vld [vmem:[%s8582_s4 + $0x8] ss:$0 sm:$0xff] }
0x13ce   :  { %v3552_v60 = vmul.f32 %v5674_v13, %v3551_v23 }
0x13cf   :  { %v3543_v3 = vmul.f32 0.5, %v3542_v4 }
0x13d0   :  { %v3553_v32 = vmul.f32 0.5, %v3552_v60  ;;  %v8021_v60 = vmul.f32 0.70710677, %v7384_v34 }
0x13d1   :  { %v3544_v43 = vsub.f32 1.5, %v3543_v3 }
0x13d2   :  { %v3554_v58 = vsub.f32 1.5, %v3553_v32  ;;  %v4420_v32 = vmul.f32 %v8021_v60, %v8021_v60 }
0x13d3   :  { %v3545_v1 = vmul.f32 %v5672_v0, %v3544_v43 }
0x13d4   :  { %v3555_v8 = vmul.f32 %v5674_v13, %v3554_v58  ;;  %v8026_v58 = vmin.f32 %v4420_v32, 16.0 }
0x13d5   :  { %v3549_v51 = vsel %vm3548_vm5, %v5672_v0, %v3545_v1 }
0x13d6   :  { %v3564_v35 = vmul.f32 %v3549_v51, %v7901_v10  ;;  %v3559_v57 = vsel %vm3558_vm8, %v5674_v13, %v3555_v8  ;;  %v4185_v10 = vpop.permute.xlu1 %4184  ;;  %v8014_v13 = vmul.f32 0.70710677, %v7382_v37 }
0x13d7   :  { %v3565_v33 = vmul.f32 %v3559_v57, %v7784_v40 }
0x13d8   :  { %v3575_v20 = vmul.f32 %v7867_v48, %v3564_v35  ;;  %v4380_v23 = vmul.f32 %v8014_v13, %v8014_v13 }
0x13d9   :  { %v3576_v7 = vmul.f32 %v7867_v48, %v3565_v33 }
0x13da   :  { %v3584_v12 = vadd.f32 %v7870_v18, %v3575_v20  ;;  %v8018_v4 = vmin.f32 %v4380_v23, 16.0 }
0x13db   :  { %v3585_v9 = vadd.f32 %v7870_v18, %v3576_v7 }
0x13dc   :  { %v3590_v24 = vpack.c.bf16 %v3584_v12, %v3584_v12  ;;  %v4393_v3 = vmul.f32 3.8918573e-05, %v8018_v4 }
0x13dd   :  { %v3591_v39 = vpack.c.bf16 %v3585_v9, %v3585_v9 }
0x13de   :  { %v4106_v29 = vunpack.c.l.b16 %v3590_v24  ;;  %v4394_v43 = vadd.f32 0.001143296, %v4393_v3 }
0x13df   :  { %v4107_v49 = vunpack.c.l.b16 %v3591_v39 }
0x13e0   :  { %v4395_v1 = vmul.f32 %v4394_v43, %v8018_v4 }
0x13e1   :  { %v4110_v30 = vpack.c.b16 %v4107_v49, %v4106_v29 }
0x13e2   :  { %v4396_v8 = vadd.f32 0.014752088, %v4395_v1 }
0x13e4   :  { %v4397_v57 = vmul.f32 %v4396_v8, %v8018_v4 }
0x13e6   :  { %v4398_v12 = vadd.f32 0.112945676, %v4397_v57 }
0x13e8   :  { %v4399_v49 = vmul.f32 %v4398_v12, %v8018_v4 }
0x13ea   :  { %v4129_v5 = vpop.permute.xlu0 %4128 }
0x13eb   :  { %v4137_v45 = vsel %vm83_vm1, %v4109_v38, %v4129_v5  ;;  %v4433_v5 = vmul.f32 3.8918573e-05, %v8026_v58 }
0x13ec   :  { %5364 = vmatmul.msk.bf16.gmra.mxu3 %vm551_vm3, %v4137_v45 }
0x13ed   :  { %v4434_v51 = vadd.f32 0.001143296, %v4433_v5 }
0x13ef   :  { %v4435_v33 = vmul.f32 %v4434_v51, %v8026_v58 }
0x13f1   :  { %v4436_v9 = vadd.f32 0.014752088, %v4435_v33 }
0x1403   :  { %v4131_v47 = vpop.permute.xlu0 %4130 }
0x1404   :  { %v4140_v15 = vsel %vm83_vm1, %v4110_v30, %v4131_v47  ;;  %v4437_v30 = vmul.f32 %v4436_v9, %v8026_v58 }
0x1405   :  { %5365 = vmatmul.msk.bf16.gmra.mxu3 %vm551_vm3, %v4140_v15 }
0x1415   :  { %v4202_v40 = vpop.f32.mrf.mxu3 }
0x1416   :  { %v4203_v21 = vadd.f32 %v4202_v40, %v4185_v10  ;;  %v4400_v40 = vadd.f32 0.4994258, %v4399_v49 }
0x1418   :  { %v4218_v61 = vsel %vm83_vm1, %v4203_v21, 0.0 }
0x1419   :  { %4219 = vadd.xlane.f32.xlu0 %v4218_v61 }
0x141d   :  { %v4204_v48 = vpop.f32.mrf.mxu3 }
0x141e   :  { %v4205_v41 = vadd.f32 %v4204_v48, %v4185_v10 }
0x1420   :  { %v4221_v18 = vsel %vm83_vm1, %v4205_v41, 0.0 }
0x1421   :  { %4222 = vadd.xlane.f32.xlu2 %v4221_v18 }
0x146f   :  { %v4207_v11 = vpop.f32.mrf.mxu3 }
0x1470   :  { %v4208_v16 = vadd.f32 %v4207_v11, %v4185_v10 }
0x1472   :  { %v4224_v2 = vsel %vm83_vm1, %v4208_v16, 0.0 }
0x1473   :  { %4225 = vadd.xlane.f32.xlu1 %v4224_v2  ;;  %v4422_v2 = vmul.f32 2.1237322e-06, %v8026_v58 }
0x1477   :  { %v4209_v22 = vpop.f32.mrf.mxu3 }
0x1478   :  { %v4210_v59 = vadd.f32 %v4209_v22, %v4185_v10 }
0x147a   :  { %v4227_v36 = vsel %vm83_vm1, %v4210_v59, 0.0 }
0x147b   :  { %4228 = vadd.xlane.f32.xlu2 %v4227_v36 }
0x1488   :  { %v4212_v50 = vpop.f32.mrf.mxu3 }
0x1489   :  { %v7986_v14 = vadd.f32 %v4212_v50, %v4185_v10  ;;  %v4423_v50 = vadd.f32 0.00028619796, %v4422_v2 }
0x148b   :  { %v4230_v53 = vsel %vm83_vm1, %v7986_v14, 0.0 }
0x148c   :  { %4231 = vadd.xlane.f32.xlu2 %v4230_v53  ;;  %v4220_v42 = vpop.xlane.xlu0 %4219 }
0x148d   :  { %v4236_v28 = vmul.f32 %v4220_v42, %v5866_v52 }
0x148f   :  { %v7993_v56 = vsub.f32 %v4203_v21, %v4236_v28  ;;  %v4438_v21 = vadd.f32 0.112945676, %v4437_v30 }
0x1490   :  { %v4214_v6 = vpop.f32.mrf.mxu3 }
0x1491   :  { %v7991_v54 = vadd.f32 %v4214_v6, %v4185_v10  ;;  %v4248_v63 = vmul.f32 %v7993_v56, %v7993_v56  ;;  %v4382_v10 = vmul.f32 2.1237322e-06, %v8018_v4  ;;  %v4439_v18 = vmul.f32 %v4438_v21, %v8026_v58 }
0x1493   :  { %v4233_v46 = vsel %vm83_vm1, %v7991_v54, 0.0  ;;  %v4254_v62 = vsel %vm83_vm1, %v4248_v63, 0.0  ;;  %v4383_v48 = vadd.f32 0.00028619796, %v4382_v10  ;;  %v4440_v22 = vadd.f32 0.4994258, %v4439_v18 }
0x1494   :  { %v4223_v38 = vpop.xlane.xlu2 %4222  ;;  %4234 = vadd.xlane.f32.xlu2 %v4233_v46  ;;  %v4424_v46 = vmul.f32 %v4423_v50, %v8026_v58  ;;  %v8081_v50 = vmul.f32 0.70710677, %v7484_v44 }
0x1495   :  { %v4237_v31 = vmul.f32 %v4223_v38, %v5866_v52  ;;  %v4384_v11 = vmul.f32 %v4383_v48, %v8018_v4  ;;  %v4441_v53 = vmul.f32 %v4440_v22, %v8026_v58 }
0x1496   :  { %v4425_v23 = vadd.f32 0.0036580483, %v4424_v46 }
0x1497   :  { %v8000_v26 = vsub.f32 %v4205_v41, %v4237_v31  ;;  %v4401_v41 = vmul.f32 %v4400_v40, %v8018_v4  ;;  %v4385_v36 = vadd.f32 0.0036580483, %v4384_v11  ;;  %v8058_v38 = vadd.f32 1.0, %v4441_v53 }
0x1498   :  { %v4426_v1 = vmul.f32 %v4425_v23, %v8026_v58 }
0x1499   :  { %v4249_v25 = vmul.f32 %v8000_v26, %v8000_v26  ;;  %v4386_v6 = vmul.f32 %v4385_v36, %v8018_v4  ;;  %vm4448_vm12 = vweird.f32 %v8058_v38  ;;  %v4452_v46 = vand.u32 2147483647, %v8058_v38 }
0x149a   :  { %v4427_v33 = vadd.f32 0.05243302, %v4426_v1 }
0x149b   :  { %v4257_v0 = vsel %vm83_vm1, %v4249_v25, 0.0  ;;  %vm4453_vm15 = vcmp.eq.f32.partialorder %v4452_v46, 8.507059e+37 }
0x149c   :  { %4255 = vadd.xlane.f32.xlu2 %v4254_v62 }
0x14a4   :  { %4258 = vadd.xlane.f32.xlu2 %v4257_v0  ;;  %v4387_v0 = vadd.f32 0.05243302, %v4386_v6 }
0x14a6   :  { %v4388_v43 = vmul.f32 %v4387_v0, %v8018_v4 }
0x14a8   :  { %v4389_v57 = vadd.f32 0.18741608, %v4388_v43 }
0x14bc   :  { %4359 = vrot.lane.b32.xlu2 %v8009_v17, %s5749_s30 }
0x14e6   :  { %v4226_v45 = vpop.xlane.xlu1 %4225 }
0x14e7   :  { %v4238_v35 = vmul.f32 %v4226_v45, %v5866_v52 }
0x14e9   :  { %v8033_v20 = vsub.f32 %v4208_v16, %v4238_v35  ;;  %v4402_v16 = vadd.f32 1.0, %v4401_v41 }
0x14eb   :  { %v4250_v7 = vmul.f32 %v8033_v20, %v8033_v20  ;;  %5675 = vrcp.f32 %v4402_v16  ;;  %v4414_v30 = vand.u32 2147483648, %v4402_v16  ;;  %vm4408_vm9 = vweird.f32 %v4402_v16 }
0x14ec   :  { %5677 = vrcp.f32 %v8058_v38 }
0x14ed   :  { %v4260_v24 = vsel %vm83_vm1, %v4250_v7, 0.0  ;;  %v4415_v18 = vor.u32 1.1754944e-38, %v4414_v30 }
0x14ee   :  { %v4229_v39 = vpop.xlane.xlu2 %4228  ;;  %4261 = vadd.xlane.f32.xlu0 %v4260_v24  ;;  %v4390_v24 = vmul.f32 %v4389_v57, %v8018_v4 }
0x14ef   :  { %v4239_v29 = vmul.f32 %v4229_v39, %v5866_v52  ;;  %v4428_v39 = vmul.f32 %v4427_v33, %v8026_v58 }
0x14f0   :  { %v4391_v40 = vadd.f32 1.1283791, %v4390_v24 }
0x14f1   :  { %v8041_v47 = vsub.f32 %v4210_v59, %v4239_v29  ;;  %v5676_v63 = vpop.eup %5675  ;;  %v4429_v48 = vadd.f32 0.18741608, %v4428_v39 }
0x14f2   :  { %v4404_v3 = vmul.f32 %v5676_v63, %v4402_v16  ;;  %v5678_v51 = vpop.eup %5677  ;;  %vm4409_vm3 = vweird.f32 %v5676_v63  ;;  %v4392_v22 = vmul.f32 %v4391_v40, %v8014_v13 }
0x14f3   :  { %v4251_v15 = vmul.f32 %v8041_v47, %v8041_v47  ;;  %vm4410_vm10 = vmor %vm4408_vm9, %vm4409_vm3  ;;  %v4430_v36 = vmul.f32 %v4429_v48, %v8026_v58  ;;  %vm4449_vm0 = vweird.f32 %v5678_v51  ;;  %v4460_v58 = vmul.f32 %v8081_v50, %v8081_v50 }
0x14f4   :  { %v4405_v8 = vsub.f32 1.0, %v4404_v3  ;;  %vm4450_vm13 = vmor %vm4448_vm12, %vm4449_vm0 }
0x14f5   :  { %v4263_v61 = vsel %vm83_vm1, %v4251_v15, 0.0  ;;  %v4412_v15 = vand.u32 2147483647, %v4402_v16  ;;  %v4431_v13 = vadd.f32 1.1283791, %v4430_v36  ;;  %v8089_v1 = vmin.f32 %v4460_v58, 16.0 }
0x14f6   :  { %4264 = vadd.xlane.f32.xlu1 %v4263_v61  ;;  %v4406_v12 = vmul.f32 %v5676_v63, %v4405_v8 }
0x14f7   :  { %vm4413_vm11 = vcmp.eq.f32.partialorder %v4412_v15, 8.507059e+37  ;;  %v4473_v24 = vmul.f32 3.8918573e-05, %v8089_v1 }
0x14f8   :  { %v4407_v29 = vadd.f32 %v5676_v63, %v4406_v12 }
0x14f9   :  { %v4474_v40 = vadd.f32 0.001143296, %v4473_v24 }
0x14fa   :  { %v4411_v61 = vsel %vm4410_vm10, %v5676_v63, %v4407_v29 }
0x14ff   :  { %v4232_v59 = vpop.xlane.xlu2 %4231 }
0x1500   :  { %v4240_v42 = vmul.f32 %v4232_v59, %v5866_v52  ;;  %v4416_v59 = vsel %vm4413_vm11, %v4415_v18, %v4411_v61 }
0x1501   :  { %v4417_v6 = vmul.f32 %v4416_v59, %v4392_v22 }
0x1502   :  { %v8054_v28 = vsub.f32 %v7986_v14, %v4240_v42  ;;  %v4454_v42 = vand.u32 2147483648, %v8058_v38 }
0x1503   :  { %v5366_v23 = vclamps-f32 %v4417_v6, 1.0 }
0x1504   :  { %v4252_v31 = vmul.f32 %v8054_v28, %v8054_v28 }
0x1506   :  { %v4266_v62 = vsel %vm83_vm1, %v4252_v31, 0.0 }
0x1507   :  { %4267 = vadd.xlane.f32.xlu0 %v4266_v62  ;;  %v4235_v25 = vpop.xlane.xlu2 %4234 }
0x1508   :  { %v4241_v14 = vmul.f32 %v4235_v25, %v5866_v52  ;;  %v4455_v25 = vor.u32 1.1754944e-38, %v4454_v42 }
0x150a   :  { %v8066_v32 = vsub.f32 %v7991_v54, %v4241_v14  ;;  %v4444_v54 = vmul.f32 %v5678_v51, %v8058_v38  ;;  %v4432_v38 = vmul.f32 %v4431_v13, %v8021_v60  ;;  %v8129_v13 = vmul.f32 0.70710677, %v7500_v55 }
0x150c   :  { %v4253_v5 = vmul.f32 %v8066_v32, %v8066_v32  ;;  %v4445_v49 = vsub.f32 1.0, %v4444_v54  ;;  %v4368_v54 = vmul.f32 0.5, %v7382_v37 }
0x150e   :  { %v4269_v45 = vsel %vm83_vm1, %v4253_v5, 0.0  ;;  %v4446_v41 = vmul.f32 %v5678_v51, %v4445_v49  ;;  %v8092_v5 = vmul.f32 0.70710677, %v7481_v27 }
0x150f   :  { %4270 = vadd.xlane.f32.xlu1 %v4269_v45  ;;  %v4256_v35 = vpop.xlane.xlu2 %4255 }
0x1510   :  { %v4272_v7 = vmul.f32 %v4256_v35, %v5866_v52  ;;  %v4447_v16 = vadd.f32 %v5678_v51, %v4446_v41  ;;  %v4620_v35 = vadd.f32 1.0, %v5366_v23  ;;  %v4500_v60 = vmul.f32 %v8092_v5, %v8092_v5 }
0x1512   :  { %v4278_v9 = vadd.f32 1e-05, %v4272_v7  ;;  %v4451_v63 = vsel %vm4450_vm13, %v5678_v51, %v4447_v16  ;;  %v4626_v29 = vmul.f32 %v4620_v35, %v4368_v54  ;;  %v8103_v15 = vmin.f32 %v4500_v60, 16.0 }
0x1513   :  { %v4456_v43 = vsel %vm4453_vm15, %v4455_v25, %v4451_v63  ;;  %v8117_v16 = vmul.f32 0.70710677, %v7502_v19 }
0x1514   :  { %5679 = vrsqrt.f32 %v4278_v9  ;;  %vm4290_vm2 = vweird.f32 %v4278_v9  ;;  %v4457_v57 = vmul.f32 %v4456_v43, %v4432_v38  ;;  %v4502_v54 = vmul.f32 2.1237322e-06, %v8103_v15 }
0x1517   :  { %v4259_v10 = vpop.xlane.xlu2 %4258 }
0x1518   :  { %v4273_v21 = vmul.f32 %v4259_v10, %v5866_v52 }
0x151a   :  { %v5680_v11 = vpop.eup %5679  ;;  %v4279_v4 = vadd.f32 1e-05, %v4273_v21 }
0x151b   :  { %v4285_v2 = vmul.f32 %v5680_v11, %v4278_v9  ;;  %vm4291_vm14 = vweird.f32 %v5680_v11 }
0x151c   :  { %5681 = vrsqrt.f32 %v4279_v4  ;;  %vm4292_vm4 = vmor %vm4290_vm2, %vm4291_vm14  ;;  %vm4300_vm6 = vweird.f32 %v4279_v4 }
0x151d   :  { %v4286_v53 = vmul.f32 %v5680_v11, %v4285_v2  ;;  %v4513_v2 = vmul.f32 3.8918573e-05, %v8103_v15 }
0x151f   :  { %v4287_v31 = vmul.f32 0.5, %v4286_v53  ;;  %v8095_v7 = vpop.permute.xlu2 %4359 }
0x1521   :  { %v4288_v62 = vsub.f32 1.5, %v4287_v31  ;;  %v4540_v31 = vmul.f32 %v8117_v16, %v8117_v16 }
0x1522   :  { %v5682_v0 = vpop.eup %5681 }
0x1523   :  { %v4289_v14 = vmul.f32 %v5680_v11, %v4288_v62  ;;  %v4295_v3 = vmul.f32 %v5682_v0, %v4279_v4  ;;  %vm4301_vm5 = vweird.f32 %v5682_v0  ;;  %v4475_v4 = vmul.f32 %v4474_v40, %v8089_v1 }
0x1524   :  { %vm4302_vm7 = vmor %vm4300_vm6, %vm4301_vm5  ;;  %v8131_v62 = vmin.f32 %v4540_v31, 16.0 }
0x1525   :  { %v4293_v8 = vsel %vm4292_vm4, %v5680_v11, %v4289_v14  ;;  %v4296_v51 = vmul.f32 %v5682_v0, %v4295_v3  ;;  %v4369_v11 = vmul.f32 0.5, %v7384_v34  ;;  %v4476_v36 = vadd.f32 0.014752088, %v4475_v4 }
0x1526   :  { %v4344_v45 = vmul.f32 %v4293_v8, %v7993_v56  ;;  %v5367_v56 = vclamps-f32 %v4457_v57, 1.0  ;;  %v4553_v23 = vmul.f32 3.8918573e-05, %v8131_v62  ;;  %v4462_v14 = vmul.f32 2.1237322e-06, %v8089_v1 }
0x1527   :  { %v4297_v33 = vmul.f32 0.5, %v4296_v51  ;;  %v4477_v6 = vmul.f32 %v4476_v36, %v8089_v1 }
0x1528   :  { %v4353_v12 = vmul.f32 %v8009_v17, %v4344_v45  ;;  %v4621_v48 = vadd.f32 1.0, %v5367_v56  ;;  %v4554_v8 = vadd.f32 0.001143296, %v4553_v23  ;;  %v4463_v51 = vadd.f32 0.00028619796, %v4462_v14 }
0x1529   :  { %v4298_v9 = vsub.f32 1.5, %v4297_v33  ;;  %v4478_v63 = vadd.f32 0.112945676, %v4477_v6  ;;  %v4503_v56 = vadd.f32 0.00028619796, %v4502_v54 }
0x152a   :  { %v4362_v39 = vadd.f32 %v8095_v7, %v4353_v12  ;;  %v4627_v59 = vmul.f32 %v4621_v48, %v4369_v11  ;;  %v4555_v33 = vmul.f32 %v4554_v8, %v8131_v62  ;;  %v4464_v12 = vmul.f32 %v4463_v51, %v8089_v1 }
0x152b   :  { %v4299_v49 = vmul.f32 %v5682_v0, %v4298_v9  ;;  %v4479_v25 = vmul.f32 %v4478_v63, %v8089_v1 }
0x152c   :  { %v4632_v30 = vadd.f32 %v4626_v29, %v4362_v39  ;;  %v4556_v39 = vadd.f32 0.014752088, %v4555_v33  ;;  %v4465_v29 = vadd.f32 0.0036580483, %v4464_v12 }
0x152d   :  { %v4303_v10 = vsel %vm4302_vm7, %v5682_v0, %v4299_v49  ;;  %v4480_v43 = vadd.f32 0.4994258, %v4479_v25 }
0x152e   :  { %v4345_v21 = vmul.f32 %v4303_v10, %v8000_v26  ;;  %v8107_v61 = vadd.f32 %v4632_v30, %v7382_v37  ;;  %v4514_v37 = vadd.f32 0.001143296, %v4513_v2  ;;  %v4557_v10 = vmul.f32 %v4556_v39, %v8131_v62 }
0x152f   :  { %v4481_v45 = vmul.f32 %v4480_v43, %v8089_v1  ;;  %v4466_v40 = vmul.f32 %v4465_v29, %v8089_v1 }
0x1530   :  { %v4644_v41 = vsel %vm83_vm1, %v8107_v61, 0.0  ;;  %v4354_v18 = vmul.f32 %v8009_v17, %v4345_v21  ;;  %v4515_v46 = vmul.f32 %v4514_v37, %v8103_v15  ;;  %v4504_v21 = vmul.f32 %v4503_v56, %v8103_v15 }
0x1531   :  { %4645 = vadd.xlane.f32.xlu0 %v4644_v41  ;;  %v8147_v60 = vadd.f32 1.0, %v4481_v45  ;;  %v4467_v4 = vadd.f32 0.05243302, %v4466_v40 }
0x1532   :  { %v4363_v22 = vadd.f32 %v8095_v7, %v4354_v18  ;;  %v4516_v58 = vadd.f32 0.014752088, %v4515_v46  ;;  %v4558_v18 = vadd.f32 0.112945676, %v4557_v10  ;;  %v4505_v2 = vadd.f32 0.0036580483, %v4504_v21 }
0x1533   :  { %5683 = vrcp.f32 %v8147_v60  ;;  %v4468_v36 = vmul.f32 %v4467_v4, %v8089_v1  ;;  %v4494_v39 = vand.u32 2147483648, %v8147_v60  ;;  %vm4488_vm3 = vweird.f32 %v8147_v60 }
0x1534   :  { %v4633_v26 = vadd.f32 %v4627_v59, %v4363_v22  ;;  %v4517_v0 = vmul.f32 %v4516_v58, %v8103_v15  ;;  %v4506_v37 = vmul.f32 %v4505_v2, %v8103_v15  ;;  %v4492_v56 = vand.u32 2147483647, %v8147_v60 }
0x1535   :  { %v4469_v58 = vadd.f32 0.18741608, %v4468_v36  ;;  %v4495_v4 = vor.u32 1.1754944e-38, %v4494_v39 }
0x1536   :  { %v8120_v53 = vadd.f32 %v4633_v26, %v7384_v34  ;;  %v4580_v34 = vmul.f32 %v8129_v13, %v8129_v13  ;;  %v4518_v38 = vadd.f32 0.112945676, %v4517_v0  ;;  %v4559_v26 = vmul.f32 %v4558_v18, %v8131_v62 }
0x1537   :  { %v4470_v51 = vmul.f32 %v4469_v58, %v8089_v1  ;;  %vm4493_vm10 = vcmp.eq.f32.partialorder %v4492_v56, 8.507059e+37 }
0x1538   :  { %v4647_v42 = vsel %vm83_vm1, %v8120_v53, 0.0  ;;  %v8139_v3 = vmin.f32 %v4580_v34, 16.0  ;;  %v4519_v35 = vmul.f32 %v4518_v38, %v8103_v15  ;;  %v4560_v31 = vadd.f32 0.4994258, %v4559_v26 }
0x1539   :  { %4648 = vadd.xlane.f32.xlu1 %v4647_v42  ;;  %v5684_v11 = vpop.eup %5683  ;;  %v4542_v42 = vmul.f32 2.1237322e-06, %v8131_v62  ;;  %v4507_v34 = vadd.f32 0.05243302, %v4506_v37  ;;  %v4471_v29 = vadd.f32 1.1283791, %v4470_v51 }
0x153a   :  { %v4593_v57 = vmul.f32 3.8918573e-05, %v8139_v3  ;;  %v4520_v9 = vadd.f32 0.4994258, %v4519_v35  ;;  %v4484_v59 = vmul.f32 %v5684_v11, %v8147_v60  ;;  %v4561_v8 = vmul.f32 %v4560_v31, %v8131_v62 }
0x153b   :  { %v4543_v25 = vadd.f32 0.00028619796, %v4542_v42  ;;  %v4508_v45 = vmul.f32 %v4507_v34, %v8103_v15  ;;  %v4582_v33 = vmul.f32 2.1237322e-06, %v8139_v3  ;;  %vm4489_vm8 = vweird.f32 %v5684_v11 }
0x153c   :  { %v4594_v24 = vadd.f32 0.001143296, %v4593_v57  ;;  %v4521_v49 = vmul.f32 %v4520_v9, %v8103_v15  ;;  %v4485_v46 = vsub.f32 1.0, %v4484_v59  ;;  %vm4490_vm9 = vmor %vm4488_vm3, %vm4489_vm8 }
0x153d   :  { %v4544_v57 = vmul.f32 %v4543_v25, %v8131_v62  ;;  %v4509_v1 = vadd.f32 0.18741608, %v4508_v45 }
0x153e   :  { %v4595_v30 = vmul.f32 %v4594_v24, %v8139_v3  ;;  %v8155_v48 = vadd.f32 1.0, %v4521_v49  ;;  %v4486_v43 = vmul.f32 %v5684_v11, %v4485_v46  ;;  %v8178_v24 = vadd.f32 1.0, %v4561_v8 }
0x153f   :  { %v4545_v49 = vadd.f32 0.0036580483, %v4544_v57  ;;  %v4510_v59 = vmul.f32 %v4509_v1, %v8103_v15 }
0x1540   :  { %v4596_v41 = vadd.f32 0.014752088, %v4595_v30  ;;  %5685 = vrcp.f32 %v8155_v48  ;;  %v4487_v54 = vadd.f32 %v5684_v11, %v4486_v43  ;;  %v4583_v30 = vadd.f32 0.00028619796, %v4582_v33 }
0x1541   :  { %v4546_v26 = vmul.f32 %v4545_v49, %v8131_v62  ;;  %v4534_v15 = vand.u32 2147483648, %v8155_v48  ;;  %vm4528_vm0 = vweird.f32 %v8155_v48  ;;  %v4532_v58 = vand.u32 2147483647, %v8155_v48 }
0x1542   :  { %v4597_v22 = vmul.f32 %v4596_v41, %v8139_v3  ;;  %v4491_v41 = vsel %vm4490_vm9, %v5684_v11, %v4487_v54  ;;  %v4584_v11 = vmul.f32 %v4583_v30, %v8139_v3  ;;  %vm4568_vm8 = vweird.f32 %v8178_v24 }
0x1543   :  { %v4496_v37 = vsel %vm4493_vm10, %v4495_v4, %v4491_v41  ;;  %v4535_v8 = vor.u32 1.1754944e-38, %v4534_v15  ;;  %vm4533_vm14 = vcmp.eq.f32.partialorder %v4532_v58, 8.507059e+37 }
0x1544   :  { %v4598_v6 = vadd.f32 0.112945676, %v4597_v22  ;;  %v4472_v22 = vmul.f32 %v4471_v29, %v8081_v50 }
0x1546   :  { %v8164_v63 = vpop.eup %5685  ;;  %v4599_v23 = vmul.f32 %v4598_v6, %v8139_v3  ;;  %v4497_v31 = vmul.f32 %v4496_v37, %v4472_v22 }
0x1547   :  { %v4524_v38 = vmul.f32 %v8164_v63, %v8155_v48  ;;  %vm4529_vm11 = vweird.f32 %v8164_v63 }
0x1548   :  { %v4600_v12 = vadd.f32 0.4994258, %v4599_v23  ;;  %vm8204_vm12 = vmor %vm4528_vm0, %vm4529_vm11  ;;  %v4547_v23 = vadd.f32 0.05243302, %v4546_v26  ;;  %v5368_v45 = vclamps-f32 %v4497_v31, 1.0 }
0x1549   :  { %v4525_v9 = vsub.f32 1.0, %v4524_v38 }
0x154a   :  { %v4601_v40 = vmul.f32 %v4600_v12, %v8139_v3  ;;  %v4622_v30 = vadd.f32 1.0, %v5368_v45 }
0x154b   :  { %v4526_v18 = vmul.f32 %v8164_v63, %v4525_v9  ;;  %v4548_v9 = vmul.f32 %v4547_v23, %v8131_v62  ;;  %v4572_v23 = vand.u32 2147483647, %v8178_v24 }
0x154c   :  { %v8193_v42 = vadd.f32 1.0, %v4601_v40  ;;  %v4370_v40 = vmul.f32 0.5, %v7484_v44 }
0x154d   :  { %v4527_v6 = vadd.f32 %v8164_v63, %v4526_v18  ;;  %vm4573_vm9 = vcmp.eq.f32.partialorder %v4572_v23, 8.507059e+37 }
0x154e   :  { %v4628_v26 = vmul.f32 %v4622_v30, %v4370_v40  ;;  %vm4608_vm11 = vweird.f32 %v8193_v42 }
0x154f   :  { %v4531_v43 = vsel %vm8204_vm12, %v8164_v63, %v4527_v6 }
0x1550   :  { %v4536_v12 = vsel %vm4533_vm14, %v4535_v8, %v4531_v43 }
0x1561   :  { %v4262_v0 = vpop.xlane.xlu0 %4261 }
0x1562   :  { %v4274_v14 = vmul.f32 %v4262_v0, %v5866_v52  ;;  %v4511_v0 = vadd.f32 1.1283791, %v4510_v59 }
0x1564   :  { %v8173_v35 = vadd.f32 1e-05, %v4274_v14  ;;  %v4585_v14 = vadd.f32 0.0036580483, %v4584_v11  ;;  %v4512_v54 = vmul.f32 %v4511_v0, %v8092_v5 }
0x1566   :  { %5687 = vrsqrt.f32 %v8173_v35  ;;  %vm4310_vm15 = vweird.f32 %v8173_v35  ;;  %v4586_v63 = vmul.f32 %v4585_v14, %v8139_v3 }
0x1567   :  { %5689 = vrcp.f32 %v8178_v24 }
0x1568   :  { %v4587_v41 = vadd.f32 0.05243302, %v4586_v63 }
0x1569   :  { %v4265_v10 = vpop.xlane.xlu1 %4264 }
0x156a   :  { %v4275_v21 = vmul.f32 %v4265_v10, %v5866_v52  ;;  %v4537_v10 = vmul.f32 %v4536_v12, %v4512_v54 }
0x156c   :  { %v5688_v2 = vpop.eup %5687  ;;  %v8189_v60 = vadd.f32 1e-05, %v4275_v21  ;;  %v4549_v21 = vadd.f32 0.18741608, %v4548_v9 }
0x156d   :  { %v4305_v36 = vmul.f32 %v5688_v2, %v8173_v35  ;;  %v8200_v46 = vpop.eup %5689  ;;  %vm4311_vm13 = vweird.f32 %v5688_v2 }
0x156e   :  { %5691 = vrsqrt.f32 %v8189_v60  ;;  %v4564_v48 = vmul.f32 %v8200_v46, %v8178_v24  ;;  %vm4312_vm2 = vmor %vm4310_vm15, %vm4311_vm13  ;;  %vm4320_vm5 = vweird.f32 %v8189_v60  ;;  %v4550_v6 = vmul.f32 %v4549_v21, %v8131_v62 }
0x156f   :  { %v4306_v50 = vmul.f32 %v5688_v2, %v4305_v36  ;;  %5693 = vrcp.f32 %v8193_v42  ;;  %v5369_v36 = vclamps-f32 %v4537_v10, 1.0  ;;  %vm4569_vm7 = vweird.f32 %v8200_v46 }
0x1570   :  { %v4565_v56 = vsub.f32 1.0, %v4564_v48  ;;  %v4574_v62 = vand.u32 2147483648, %v8178_v24  ;;  %v4551_v14 = vadd.f32 1.1283791, %v4550_v6  ;;  %v4371_v48 = vmul.f32 0.5, %v7481_v27  ;;  %vm8250_vm3 = vmor %vm4568_vm8, %vm4569_vm7 }
0x1571   :  { %v4307_v34 = vmul.f32 0.5, %v4306_v50  ;;  %v4588_v50 = vmul.f32 %v4587_v41, %v8139_v3  ;;  %v4623_v0 = vadd.f32 1.0, %v5369_v36 }
0x1572   :  { %v4566_v59 = vmul.f32 %v8200_v46, %v4565_v56  ;;  %v4575_v12 = vor.u32 1.1754944e-38, %v4574_v62  ;;  %v4552_v63 = vmul.f32 %v4551_v14, %v8117_v16  ;;  %v4612_v16 = vand.u32 2147483647, %v8193_v42 }
0x1573   :  { %v4308_v38 = vsub.f32 1.5, %v4307_v34 }
0x1574   :  { %v5692_v51 = vpop.eup %5691  ;;  %v4567_v58 = vadd.f32 %v8200_v46, %v4566_v59  ;;  %vm4613_vm13 = vcmp.eq.f32.partialorder %v4612_v16, 8.507059e+37  ;;  %v5421_v16 = vld [vmem:[%s8581_s3 + $0x20] sm:$0xf0] }
0x1575   :  { %v4309_v57 = vmul.f32 %v5688_v2, %v4308_v38  ;;  %v4315_v33 = vmul.f32 %v5692_v51, %v8189_v60  ;;  %v8219_v39 = vpop.eup %5693  ;;  %vm4321_vm4 = vweird.f32 %v5692_v51 }
0x1576   :  { %v4604_v4 = vmul.f32 %v8219_v39, %v8193_v42  ;;  %vm4322_vm6 = vmor %vm4320_vm5, %vm4321_vm4  ;;  %v4571_v24 = vsel %vm8250_vm3, %v8200_v46, %v4567_v58  ;;  %vm4609_vm10 = vweird.f32 %v8219_v39 }
0x1577   :  { %v4313_v29 = vsel %vm4312_vm2, %v5688_v2, %v4309_v57  ;;  %v4316_v1 = vmul.f32 %v5692_v51, %v4315_v33  ;;  %v4629_v33 = vmul.f32 %v4623_v0, %v4371_v48  ;;  %v4576_v56 = vsel %vm4573_vm9, %v4575_v12, %v4571_v24  ;;  %vm4610_vm0 = vmor %vm4608_vm11, %vm4609_vm10 }
0x1578   :  { %v4346_v49 = vmul.f32 %v4313_v29, %v8033_v20  ;;  %v4605_v34 = vsub.f32 1.0, %v4604_v4  ;;  %v4577_v40 = vmul.f32 %v4576_v56, %v4552_v63 }
0x1579   :  { %v4317_v35 = vmul.f32 0.5, %v4316_v1 }
0x157a   :  { %v4268_v5 = vpop.xlane.xlu0 %4267  ;;  %v4355_v18 = vmul.f32 %v8009_v17, %v4346_v49  ;;  %v4606_v45 = vmul.f32 %v8219_v39, %v4605_v34 }
0x157b   :  { %v4318_v22 = vsub.f32 1.5, %v4317_v35  ;;  %v4276_v2 = vmul.f32 %v4268_v5, %v5866_v52  ;;  %v4614_v35 = vand.u32 2147483648, %v8193_v42 }
0x157c   :  { %v4364_v20 = vadd.f32 %v8095_v7, %v4355_v18  ;;  %v4607_v46 = vadd.f32 %v8219_v39, %v4606_v45 }
0x157d   :  { %v4319_v37 = vmul.f32 %v5692_v51, %v4318_v22  ;;  %v8230_v11 = vadd.f32 1e-05, %v4276_v2  ;;  %v5370_v22 = vclamps-f32 %v4577_v40, 1.0 }
0x157e   :  { %v4634_v15 = vadd.f32 %v4628_v26, %v4364_v20  ;;  %v4611_v5 = vsel %vm4610_vm0, %v8219_v39, %v4607_v46 }
0x157f   :  { %v4323_v31 = vsel %vm4322_vm6, %v5692_v51, %v4319_v37  ;;  %5695 = vrsqrt.f32 %v8230_v11  ;;  %vm4330_vm14 = vweird.f32 %v8230_v11  ;;  %v4624_v6 = vadd.f32 1.0, %v5370_v22 }
0x1580   :  { %v4347_v25 = vmul.f32 %v4323_v31, %v8041_v47  ;;  %v8239_v60 = vadd.f32 %v4634_v15, %v7484_v44  ;;  %v4589_v47 = vadd.f32 0.18741608, %v4588_v50  ;;  %v4372_v31 = vmul.f32 0.5, %v7502_v19 }
0x1582   :  { %v4271_v43 = vpop.xlane.xlu1 %4270  ;;  %v4650_v38 = vsel %vm83_vm1, %v8239_v60, 0.0  ;;  %v4356_v8 = vmul.f32 %v8009_v17, %v4347_v25  ;;  %v4590_v49 = vmul.f32 %v4589_v47, %v8139_v3  ;;  %v4630_v34 = vmul.f32 %v4624_v6, %v4372_v31 }
0x1583   :  { %v4277_v51 = vmul.f32 %v4271_v43, %v5866_v52  ;;  %4651 = vadd.xlane.f32.xlu0 %v4650_v38 }
0x1584   :  { %v4365_v57 = vadd.f32 %v8095_v7, %v4356_v8  ;;  %v4591_v41 = vadd.f32 1.1283791, %v4590_v49  ;;  %v4373_v8 = vmul.f32 0.5, %v7500_v55 }
0x1585   :  { %v5696_v54 = vpop.eup %5695  ;;  %v4283_v9 = vadd.f32 1e-05, %v4277_v51 }
0x1586   :  { %v4325_v29 = vmul.f32 %v5696_v54, %v8230_v11  ;;  %v4635_v1 = vadd.f32 %v4629_v33, %v4365_v57  ;;  %vm4331_vm12 = vweird.f32 %v5696_v54  ;;  %v4592_v20 = vmul.f32 %v4591_v41, %v8129_v13 }
0x1587   :  { %5697 = vrsqrt.f32 %v4283_v9  ;;  %vm4332_vm15 = vmor %vm4330_vm14, %vm4331_vm12  ;;  %vm4340_vm4 = vweird.f32 %v4283_v9 }
0x1588   :  { %v4326_v30 = vmul.f32 %v5696_v54, %v4325_v29  ;;  %v8266_v10 = vadd.f32 %v4635_v1, %v7481_v27  ;;  %v4615_v27 = vor.u32 1.1754944e-38, %v4614_v35  ;;  %v5422_v35 = vld [vmem:[%s8581_s3 + $0x48] sm:$0xf0] }
0x158a   :  { %v4327_v21 = vmul.f32 0.5, %v4326_v30  ;;  %v4653_v3 = vsel %vm83_vm1, %v8266_v10, 0.0  ;;  %v4616_v42 = vsel %vm4613_vm13, %v4615_v27, %v4611_v5 }
0x158b   :  { %4654 = vadd.xlane.f32.xlu1 %v4653_v3  ;;  %v4617_v39 = vmul.f32 %v4616_v42, %v4592_v20 }
0x158c   :  { %v4328_v18 = vsub.f32 1.5, %v4327_v21 }
0x158d   :  { %v5698_v4 = vpop.eup %5697  ;;  %v5371_v25 = vclamps-f32 %v4617_v39, 1.0 }
0x158e   :  { %v4329_v2 = vmul.f32 %v5696_v54, %v4328_v18  ;;  %v4335_v59 = vmul.f32 %v5698_v4, %v4283_v9  ;;  %vm4341_vm2 = vweird.f32 %v5698_v4 }
0x158f   :  { %vm4342_vm5 = vmor %vm4340_vm4, %vm4341_vm2  ;;  %v4625_v14 = vadd.f32 1.0, %v5371_v25 }
0x1590   :  { %v4333_v26 = vsel %vm4332_vm15, %v5696_v54, %v4329_v2  ;;  %v4336_v36 = vmul.f32 %v5698_v4, %v4335_v59 }
0x1591   :  { %v4348_v37 = vmul.f32 %v4333_v26, %v8054_v28  ;;  %v4631_v44 = vmul.f32 %v4625_v14, %v4373_v8 }
0x1592   :  { %v4337_v50 = vmul.f32 0.5, %v4336_v36 }
0x1593   :  { %v4357_v15 = vmul.f32 %v8009_v17, %v4348_v37 }
0x1594   :  { %v4338_v58 = vsub.f32 1.5, %v4337_v50 }
0x1595   :  { %v4366_v11 = vadd.f32 %v8095_v7, %v4357_v15 }
0x1596   :  { %v4339_v0 = vmul.f32 %v5698_v4, %v4338_v58 }
0x1597   :  { %v4636_v13 = vadd.f32 %v4630_v34, %v4366_v11 }
0x1598   :  { %v4343_v62 = vsel %vm4342_vm5, %v5698_v4, %v4339_v0 }
0x1599   :  { %v4349_v28 = vmul.f32 %v4343_v62, %v8066_v32  ;;  %v4642_v23 = vadd.f32 %v4636_v13, %v7502_v19 }
0x159b   :  { %v4656_v43 = vsel %vm83_vm1, %v4642_v23, 0.0  ;;  %v4358_v38 = vmul.f32 %v8009_v17, %v4349_v28 }
0x159c   :  { %4657 = vadd.xlane.f32.xlu2 %v4656_v43 }
0x159d   :  { %v4367_v48 = vadd.f32 %v8095_v7, %v4358_v38 }
0x159f   :  { %v4637_v47 = vadd.f32 %v4631_v44, %v4367_v48 }
0x15a1   :  { %v4643_v51 = vadd.f32 %v4637_v47, %v7500_v55 }
0x15a3   :  { %v4659_v24 = vsel %vm83_vm1, %v4643_v51, 0.0 }
0x15a4   :  { %4660 = vadd.xlane.f32.xlu0 %v4659_v24  ;;  %v4646_v32 = vpop.xlane.xlu0 %4645 }
0x15a5   :  { %v4662_v19 = vmul.f32 %v4646_v32, %v5866_v52 }
0x15a7   :  { %v8290_v45 = vsub.f32 %v8107_v61, %v4662_v19 }
0x15a9   :  { %v4674_v57 = vmul.f32 %v8290_v45, %v8290_v45 }
0x15ab   :  { %v4680_v33 = vsel %vm83_vm1, %v4674_v57, 0.0 }
0x15ac   :  { %v4649_v12 = vpop.xlane.xlu1 %4648  ;;  %4681 = vadd.xlane.f32.xlu1 %v4680_v33 }
0x15ad   :  { %v4663_v7 = vmul.f32 %v4649_v12, %v5866_v52 }
0x15af   :  { %v8297_v55 = vsub.f32 %v8120_v53, %v4663_v7 }
0x15b1   :  { %v4675_v54 = vmul.f32 %v8297_v55, %v8297_v55 }
0x15b3   :  { %v4683_v9 = vsel %vm83_vm1, %v4675_v54, 0.0 }
0x15b4   :  { %4684 = vadd.xlane.f32.xlu0 %v4683_v9  ;;  %4785 = vrot.lane.b32.xlu2 %v8009_v17, %s5750_s8 }
0x15c8   :  { %4776 = vrot.lane.b32.xlu0 %v8009_v17, %s5752_s29 }
0x15f6   :  { %v4652_v61 = vpop.xlane.xlu0 %4651 }
0x15f7   :  { %v4664_v63 = vmul.f32 %v4652_v61, %v5866_v52 }
0x15f9   :  { %v8308_v29 = vsub.f32 %v8239_v60, %v4664_v63  ;;  %v5378_v60 = vld [vmem:[%s8581_s3 + $0x38] sm:$0xf] }
0x15fa   :  { %v5379_v40 = vor.u32 %v5422_v35, %v5378_v60 }
0x15fb   :  { %v4676_v53 = vmul.f32 %v8308_v29, %v8308_v29 }
0x15fd   :  { %v4686_v1 = vsel %vm83_vm1, %v4676_v53, 0.0 }
0x15fe   :  { %v4655_v56 = vpop.xlane.xlu1 %4654  ;;  %4687 = vadd.xlane.f32.xlu1 %v4686_v1 }
0x15ff   :  { %v4665_v49 = vmul.f32 %v4655_v56, %v5866_v52 }
0x1601   :  { %v8315_v46 = vsub.f32 %v8266_v10, %v4665_v49  ;;  %v5374_v10 = vld [vmem:[%s8581_s3 + $0x10] sm:$0xf] }
0x1602   :  { %v5375_v21 = vor.u32 %v5421_v16, %v5374_v10 }
0x1603   :  { %v4677_v17 = vmul.f32 %v8315_v46, %v8315_v46 }
0x1605   :  { %v4689_v30 = vsel %vm83_vm1, %v4677_v17, 0.0 }
0x1606   :  { %4690 = vadd.xlane.f32.xlu0 %v4689_v30 }
0x160f   :  { %v4658_v3 = vpop.xlane.xlu2 %4657 }
0x1610   :  { %v4666_v41 = vmul.f32 %v4658_v3, %v5866_v52 }
0x1612   :  { %v8336_v27 = vsub.f32 %v4642_v23, %v4666_v41 }
0x1614   :  { %v4678_v22 = vmul.f32 %v8336_v27, %v8336_v27 }
0x1616   :  { %v4692_v59 = vsel %vm83_vm1, %v4678_v22, 0.0 }
0x1617   :  { %4817 = vrot.lane.b32.xlu1 %v5379_v40, %s5752_s29  ;;  %v4661_v5 = vpop.xlane.xlu0 %4660  ;;  %v8356_v49 = vpop.permute.xlu2 %4785 }
0x1618   :  { %v4667_v18 = vmul.f32 %v4661_v5, %v5866_v52 }
0x161a   :  { %4815 = vrot.lane.b32.xlu0 %v5375_v21, %s5752_s29  ;;  %v8338_v4 = vsub.f32 %v4643_v51, %v4667_v18 }
0x161c   :  { %v4679_v2 = vmul.f32 %v8338_v4, %v8338_v4 }
0x161e   :  { %v4695_v42 = vsel %vm83_vm1, %v4679_v2, 0.0 }
0x161f   :  { %v4682_v36 = vpop.xlane.xlu1 %4681 }
0x1620   :  { %v4698_v37 = vmul.f32 %v4682_v36, %v5866_v52 }
0x1622   :  { %v4704_v39 = vadd.f32 1e-05, %v4698_v37 }
0x1624   :  { %vm4716_vm9 = vweird.f32 %v4704_v39 }
0x1627   :  { %v4685_v20 = vpop.xlane.xlu0 %4684 }
0x1628   :  { %v4699_v26 = vmul.f32 %v4685_v20, %v5866_v52 }
0x162a   :  { %v4705_v6 = vadd.f32 1e-05, %v4699_v26 }
0x162c   :  { %5699 = vrsqrt.f32 %v4705_v6  ;;  %vm4726_vm7 = vweird.f32 %v4705_v6 }
0x162d   :  { %5701 = vrsqrt.f32 %v4704_v39 }
0x1632   :  { %v5700_v50 = vpop.eup %5699 }
0x1633   :  { %v4721_v15 = vmul.f32 %v5700_v50, %v4705_v6  ;;  %v5702_v31 = vpop.eup %5701  ;;  %vm4727_vm6 = vweird.f32 %v5700_v50 }
0x1634   :  { %v4711_v58 = vmul.f32 %v5702_v31, %v4704_v39  ;;  %vm4728_vm8 = vmor %vm4726_vm7, %vm4727_vm6  ;;  %vm4717_vm3 = vweird.f32 %v5702_v31 }
0x1635   :  { %v4722_v11 = vmul.f32 %v5700_v50, %v4721_v15  ;;  %vm4718_vm10 = vmor %vm4716_vm9, %vm4717_vm3 }
0x1636   :  { %v4712_v13 = vmul.f32 %v5702_v31, %v4711_v58 }
0x1637   :  { %v4723_v62 = vmul.f32 0.5, %v4722_v11 }
0x1638   :  { %v4713_v23 = vmul.f32 0.5, %v4712_v13 }
0x1639   :  { %v4724_v14 = vsub.f32 1.5, %v4723_v62 }
0x163a   :  { %v8348_v34 = vpop.permute.xlu0 %4776  ;;  %v4714_v48 = vsub.f32 1.5, %v4713_v23 }
0x163b   :  { %v4725_v44 = vmul.f32 %v5700_v50, %v4724_v14 }
0x163c   :  { %v4715_v24 = vmul.f32 %v5702_v31, %v4714_v48 }
0x163d   :  { %v4729_v32 = vsel %vm4728_vm8, %v5700_v50, %v4725_v44 }
0x163e   :  { %v4771_v57 = vmul.f32 %v4729_v32, %v8297_v55  ;;  %v4719_v12 = vsel %vm4718_vm10, %v5702_v31, %v4715_v24 }
0x163f   :  { %v4770_v9 = vmul.f32 %v4719_v12, %v8290_v45 }
0x1640   :  { %v4780_v61 = vmul.f32 %v8348_v34, %v4771_v57 }
0x1641   :  { %4693 = vadd.xlane.f32.xlu1 %v4692_v59  ;;  %v4779_v53 = vmul.f32 %v8348_v34, %v4770_v9 }
0x1642   :  { %v8359_v30 = vadd.f32 %v8356_v49, %v4780_v61 }
0x1643   :  { %v8362_v35 = vadd.f32 %v8356_v49, %v4779_v53 }
0x1644   :  { %4696 = vadd.xlane.f32.xlu0 %v4695_v42  ;;  %v8387_v26 = vmul.f32 0.70710677, %v8359_v30 }
0x1645   :  { %v4794_v10 = vpack.c.bf16 %v8359_v30, %v8362_v35  ;;  %v8381_v42 = vmul.f32 0.70710677, %v8362_v35 }
0x1646   :  { %v4906_v15 = vmul.f32 %v8387_v26, %v8387_v26 }
0x1648   :  { %v8395_v58 = vmin.f32 %v4906_v15, 16.0 }
0x164a   :  { %v4908_v15 = vmul.f32 2.1237322e-06, %v8395_v58 }
0x1671   :  { %v4688_v25 = vpop.xlane.xlu1 %4687 }
0x1672   :  { %v4700_v0 = vmul.f32 %v4688_v25, %v5866_v52 }
0x1674   :  { %v4706_v28 = vadd.f32 1e-05, %v4700_v0 }
0x1676   :  { %5703 = vrsqrt.f32 %v4706_v28  ;;  %vm4736_vm14 = vweird.f32 %v4706_v28 }
0x1679   :  { %v4691_v43 = vpop.xlane.xlu0 %4690 }
0x167a   :  { %v4701_v38 = vmul.f32 %v4691_v43, %v5866_v52 }
0x167c   :  { %v5704_v8 = vpop.eup %5703  ;;  %v4707_v47 = vadd.f32 1e-05, %v4701_v38 }
0x167d   :  { %v4731_v51 = vmul.f32 %v5704_v8, %v4706_v28  ;;  %vm4737_vm0 = vweird.f32 %v5704_v8 }
0x167e   :  { %5705 = vrsqrt.f32 %v4707_v47  ;;  %vm4746_vm12 = vweird.f32 %v4707_v47  ;;  %vm4738_vm15 = vmor %vm4736_vm14, %vm4737_vm0 }
0x167f   :  { %v4732_v19 = vmul.f32 %v5704_v8, %v4731_v51 }
0x1681   :  { %v4733_v54 = vmul.f32 0.5, %v4732_v19 }
0x1683   :  { %v4734_v17 = vsub.f32 1.5, %v4733_v54 }
0x1684   :  { %v5706_v33 = vpop.eup %5705 }
0x1685   :  { %v4741_v7 = vmul.f32 %v5706_v33, %v4707_v47  ;;  %vm4747_vm11 = vweird.f32 %v5706_v33  ;;  %v4735_v40 = vmul.f32 %v5704_v8, %v4734_v17 }
0x1686   :  { %vm4748_vm13 = vmor %vm4746_vm12, %vm4747_vm11 }
0x1687   :  { %v4742_v63 = vmul.f32 %v5706_v33, %v4741_v7  ;;  %v4739_v21 = vsel %vm4738_vm15, %v5704_v8, %v4735_v40 }
0x1688   :  { %v4772_v41 = vmul.f32 %v4739_v21, %v8308_v29  ;;  %v4866_v29 = vmul.f32 %v8381_v42, %v8381_v42 }
0x1689   :  { %v4743_v1 = vmul.f32 0.5, %v4742_v63  ;;  %v4818_v56 = vpop.permute.xlu1 %4817 }
0x168a   :  { %4836 = vmatpush.bf16.msrb.mxu0 %v4818_v56  ;;  %v4781_v18 = vmul.f32 %v8348_v34, %v4772_v41  ;;  %v8389_v6 = vmin.f32 %v4866_v29, 16.0 }
0x168b   :  { %v4744_v55 = vsub.f32 1.5, %v4743_v1 }
0x168c   :  { %v4816_v60 = vpop.permute.xlu0 %4815  ;;  %v8375_v2 = vadd.f32 %v8356_v49, %v4781_v18  ;;  %v4879_v31 = vmul.f32 3.8918573e-05, %v8389_v6 }
0x168d   :  { %v4745_v45 = vmul.f32 %v5706_v33, %v4744_v55 }
0x168e   :  { %4837 = vmatpush.bf16.msrb.mxu0 %v4816_v60  ;;  %v4880_v25 = vadd.f32 0.001143296, %v4879_v31  ;;  %v8398_v13 = vmul.f32 0.70710677, %v8375_v2 }
0x168f   :  { %v4749_v16 = vsel %vm4748_vm13, %v5706_v33, %v4745_v45 }
0x1690   :  { %v4773_v3 = vmul.f32 %v4749_v16, %v8315_v46  ;;  %v4881_v14 = vmul.f32 %v4880_v25, %v8389_v6  ;;  %v4946_v38 = vmul.f32 %v8398_v13, %v8398_v13 }
0x1691   :  { %5380 = vmatmul.msk.bf16.vlgmr.msrb.gmra.mxu0 %vm83_vm1, %v4794_v10 }
0x1692   :  { %v4782_v5 = vmul.f32 %v8348_v34, %v4773_v3  ;;  %v4882_v51 = vadd.f32 0.014752088, %v4881_v14  ;;  %v8404_v32 = vmin.f32 %v4946_v38, 16.0 }
0x1694   :  { %v8372_v22 = vadd.f32 %v8356_v49, %v4782_v5  ;;  %v4883_v9 = vmul.f32 %v4882_v51, %v8389_v6  ;;  %v4959_v61 = vmul.f32 3.8918573e-05, %v8404_v32  ;;  %v4868_v5 = vmul.f32 2.1237322e-06, %v8389_v6 }
0x1696   :  { %v4795_v59 = vpack.c.bf16 %v8372_v22, %v8375_v2  ;;  %v8407_v19 = vmul.f32 0.70710677, %v8372_v22  ;;  %v4884_v60 = vadd.f32 0.112945676, %v4883_v9 }
0x1698   :  { %v4986_v63 = vmul.f32 %v8407_v19, %v8407_v19 }
0x169a   :  { %v8418_v45 = vmin.f32 %v4986_v63, 16.0 }
0x16a1   :  { %5381 = vmatmul.msk.bf16.gmra.mxu0 %vm83_vm1, %v4795_v59 }
0x16b4   :  { %v4694_v46 = vpop.xlane.xlu1 %4693 }
0x16b5   :  { %v4702_v20 = vmul.f32 %v4694_v46, %v5866_v52  ;;  %v4869_v46 = vadd.f32 0.00028619796, %v4868_v5 }
0x16b7   :  { %v4708_v36 = vadd.f32 1e-05, %v4702_v20  ;;  %v4697_v37 = vpop.xlane.xlu0 %4696 }
0x16b8   :  { %v4703_v39 = vmul.f32 %v4697_v37, %v5866_v52  ;;  %v4919_v52 = vmul.f32 3.8918573e-05, %v8395_v58 }
0x16b9   :  { %5707 = vrsqrt.f32 %v4708_v36  ;;  %vm4756_vm4 = vweird.f32 %v4708_v36 }
0x16ba   :  { %v4709_v50 = vadd.f32 1e-05, %v4703_v39  ;;  %v4920_v44 = vadd.f32 0.001143296, %v4919_v52 }
0x16bc   :  { %5709 = vrsqrt.f32 %v4709_v50  ;;  %v4921_v12 = vmul.f32 %v4920_v44, %v8395_v58  ;;  %vm4766_vm7 = vweird.f32 %v4709_v50 }
0x16be   :  { %v4922_v17 = vadd.f32 0.014752088, %v4921_v12 }
0x16bf   :  { %v5708_v11 = vpop.eup %5707 }
0x16c0   :  { %v4751_v0 = vmul.f32 %v5708_v11, %v4708_v36  ;;  %vm4757_vm2 = vweird.f32 %v5708_v11  ;;  %v4923_v16 = vmul.f32 %v4922_v17, %v8395_v58 }
0x16c1   :  { %vm4758_vm5 = vmor %vm4756_vm4, %vm4757_vm2 }
0x16c2   :  { %v5710_v62 = vpop.eup %5709  ;;  %v4752_v28 = vmul.f32 %v5708_v11, %v4751_v0  ;;  %v4924_v41 = vadd.f32 0.112945676, %v4923_v16 }
0x16c3   :  { %v4761_v23 = vmul.f32 %v5710_v62, %v4709_v50  ;;  %vm4767_vm6 = vweird.f32 %v5710_v62  ;;  %v4870_v50 = vmul.f32 %v4869_v46, %v8389_v6 }
0x16c4   :  { %v4753_v43 = vmul.f32 0.5, %v4752_v28  ;;  %vm4768_vm8 = vmor %vm4766_vm7, %vm4767_vm6  ;;  %v4925_v29 = vmul.f32 %v4924_v41, %v8395_v58  ;;  %v4909_v28 = vadd.f32 0.00028619796, %v4908_v15 }
0x16c5   :  { %v4762_v8 = vmul.f32 %v5710_v62, %v4761_v23 }
0x16c6   :  { %v4754_v48 = vsub.f32 1.5, %v4753_v43  ;;  %v4926_v39 = vadd.f32 0.4994258, %v4925_v29  ;;  %v4910_v38 = vmul.f32 %v4909_v28, %v8395_v58 }
0x16c7   :  { %v4763_v47 = vmul.f32 0.5, %v4762_v8  ;;  %v4948_v8 = vmul.f32 2.1237322e-06, %v8404_v32 }
0x16c8   :  { %v4755_v24 = vmul.f32 %v5708_v11, %v4754_v48  ;;  %v4927_v0 = vmul.f32 %v4926_v39, %v8395_v58 }
0x16c9   :  { %v4764_v57 = vsub.f32 1.5, %v4763_v47 }
0x16ca   :  { %v4759_v33 = vsel %vm4758_vm5, %v5708_v11, %v4755_v24  ;;  %v8446_v14 = vadd.f32 1.0, %v4927_v0  ;;  %v4911_v24 = vadd.f32 0.0036580483, %v4910_v38 }
0x16cb   :  { %v4774_v7 = vmul.f32 %v4759_v33, %v8336_v27  ;;  %v4765_v54 = vmul.f32 %v5710_v62, %v4764_v57  ;;  %v4960_v27 = vadd.f32 0.001143296, %v4959_v61  ;;  %v4949_v57 = vadd.f32 0.00028619796, %v4948_v8 }
0x16cc   :  { %v4912_v9 = vmul.f32 %v4911_v24, %v8395_v58  ;;  %vm4934_vm12 = vweird.f32 %v8446_v14 }
0x16cd   :  { %v4769_v53 = vsel %vm4768_vm8, %v5710_v62, %v4765_v54  ;;  %v4783_v1 = vmul.f32 %v8348_v34, %v4774_v7  ;;  %v4961_v3 = vmul.f32 %v4960_v27, %v8404_v32  ;;  %v4871_v62 = vadd.f32 0.0036580483, %v4870_v50 }
0x16ce   :  { %v4775_v56 = vmul.f32 %v4769_v53, %v8338_v4  ;;  %v4885_v4 = vmul.f32 %v4884_v60, %v8389_v6  ;;  %v4950_v63 = vmul.f32 %v4949_v57, %v8404_v32  ;;  %v4913_v60 = vadd.f32 0.05243302, %v4912_v9 }
0x16cf   :  { %v8421_v40 = vadd.f32 %v8356_v49, %v4783_v1  ;;  %v4962_v59 = vadd.f32 0.014752088, %v4961_v3  ;;  %v4872_v43 = vmul.f32 %v4871_v62, %v8389_v6  ;;  %v4988_v1 = vmul.f32 2.1237322e-06, %v8418_v45 }
0x16d0   :  { %v4784_v55 = vmul.f32 %v8348_v34, %v4775_v56  ;;  %v4999_v34 = vmul.f32 3.8918573e-05, %v8418_v45  ;;  %v4886_v18 = vadd.f32 0.4994258, %v4885_v4  ;;  %v4951_v16 = vadd.f32 0.0036580483, %v4950_v63 }
0x16d1   :  { %v4963_v36 = vmul.f32 %v4962_v59, %v8404_v32  ;;  %v4873_v51 = vadd.f32 0.05243302, %v4872_v43  ;;  %v4914_v5 = vmul.f32 %v4913_v60, %v8395_v58 }
0x16d2   :  { %v8424_v10 = vadd.f32 %v8356_v49, %v4784_v55  ;;  %v5000_v49 = vadd.f32 0.001143296, %v4999_v34  ;;  %v4887_v20 = vmul.f32 %v4886_v18, %v8389_v6  ;;  %v8468_v34 = vmul.f32 0.70710677, %v8421_v40 }
0x16d3   :  { %v4964_v11 = vadd.f32 0.112945676, %v4963_v36  ;;  %v4874_v54 = vmul.f32 %v4873_v51, %v8389_v6  ;;  %v4952_v59 = vmul.f32 %v4951_v16, %v8404_v32  ;;  %v4915_v50 = vadd.f32 0.18741608, %v4914_v5 }
0x16d4   :  { %v4796_v21 = vpack.c.bf16 %v8424_v10, %v8421_v40  ;;  %v5001_v37 = vmul.f32 %v5000_v49, %v8418_v45  ;;  %v8440_v31 = vadd.f32 1.0, %v4887_v20  ;;  %v5026_v20 = vmul.f32 %v8468_v34, %v8468_v34 }
0x16d5   :  { %v4965_v52 = vmul.f32 %v4964_v11, %v8404_v32  ;;  %v4875_v55 = vadd.f32 0.18741608, %v4874_v54  ;;  %v4953_v11 = vadd.f32 0.05243302, %v4952_v59 }
0x16d6   :  { %5382 = vmatmul.msk.bf16.gmra.mxu0 %vm83_vm1, %v4796_v21  ;;  %v5002_v25 = vadd.f32 0.014752088, %v5001_v37  ;;  %5711 = vrcp.f32 %v8440_v31  ;;  %v4989_v21 = vadd.f32 0.00028619796, %v4988_v1  ;;  %v4900_v37 = vand.u32 2147483648, %v8440_v31 }
0x16d7   :  { %v4966_v48 = vadd.f32 0.4994258, %v4965_v52  ;;  %5713 = vrcp.f32 %v8446_v14  ;;  %v4876_v41 = vmul.f32 %v4875_v55, %v8389_v6  ;;  %vm4894_vm9 = vweird.f32 %v8440_v31 }
0x16d8   :  { %v5003_v23 = vmul.f32 %v5002_v25, %v8418_v45  ;;  %v4990_v49 = vmul.f32 %v4989_v21, %v8418_v45  ;;  %v4898_v6 = vand.u32 2147483647, %v8440_v31  ;;  %v8487_v28 = vmin.f32 %v5026_v20, 16.0 }
0x16d9   :  { %v4967_v33 = vmul.f32 %v4966_v48, %v8404_v32  ;;  %v4877_v39 = vadd.f32 1.1283791, %v4876_v41  ;;  %v8490_v52 = vmul.f32 0.70710677, %v8424_v10  ;;  %v4954_v8 = vmul.f32 %v4953_v11, %v8404_v32 }
0x16da   :  { %v5004_v44 = vadd.f32 0.112945676, %v5003_v23  ;;  %v4991_v25 = vadd.f32 0.0036580483, %v4990_v49  ;;  %v4901_v23 = vor.u32 1.1754944e-38, %v4900_v37  ;;  %vm4899_vm11 = vcmp.eq.f32.partialorder %v4898_v6, 8.507059e+37 }
0x16db   :  { %v8460_v53 = vadd.f32 1.0, %v4967_v33  ;;  %v5039_v51 = vmul.f32 3.8918573e-05, %v8487_v28  ;;  %v5066_v24 = vmul.f32 %v8490_v52, %v8490_v52  ;;  %v4854_v49 = vmul.f32 0.5, %v8362_v35 }
0x16dc   :  { %v5712_v47 = vpop.eup %5711  ;;  %v5005_v12 = vmul.f32 %v5004_v44, %v8418_v45  ;;  %v4992_v48 = vmul.f32 %v4991_v25, %v8418_v45  ;;  %v4878_v44 = vmul.f32 %v4877_v39, %v8381_v42  ;;  %v4955_v42 = vadd.f32 0.18741608, %v4954_v8 }
0x16dd   :  { %v4890_v7 = vmul.f32 %v5712_v47, %v8440_v31  ;;  %v8457_v61 = vpop.eup %5713  ;;  %5715 = vrcp.f32 %v8460_v53  ;;  %vm4895_vm3 = vweird.f32 %v5712_v47  ;;  %v4916_v31 = vmul.f32 %v4915_v50, %v8395_v58 }
0x16de   :  { %v5006_v56 = vadd.f32 0.4994258, %v5005_v12  ;;  %v4930_v27 = vmul.f32 %v8457_v61, %v8446_v14  ;;  %vm4896_vm10 = vmor %vm4894_vm9, %vm4895_vm3  ;;  %vm4935_vm0 = vweird.f32 %v8457_v61  ;;  %v4940_v58 = vand.u32 2147483648, %v8446_v14 }
0x16df   :  { %v4891_v17 = vsub.f32 1.0, %v4890_v7  ;;  %v4917_v12 = vadd.f32 1.1283791, %v4916_v31  ;;  %vm4936_vm13 = vmor %vm4934_vm12, %vm4935_vm0  ;;  %v4938_v7 = vand.u32 2147483647, %v8446_v14  ;;  %v4956_v14 = vmul.f32 %v4955_v42, %v8404_v32 }
0x16e0   :  { %v5007_v4 = vmul.f32 %v5006_v56, %v8418_v45  ;;  %v4931_v18 = vsub.f32 1.0, %v4930_v27  ;;  %v4993_v9 = vadd.f32 0.05243302, %v4992_v48  ;;  %v5040_v56 = vadd.f32 0.001143296, %v5039_v51 }
0x16e1   :  { %v4892_v3 = vmul.f32 %v5712_v47, %v4891_v17  ;;  %v8510_v17 = vmin.f32 %v5066_v24, 16.0  ;;  %v4941_v55 = vor.u32 1.1754944e-38, %v4940_v58  ;;  %v4918_v27 = vmul.f32 %v4917_v12, %v8387_v26  ;;  %v8523_v26 = vld [vmem:[%s8582_s4 + $0x9] ss:$0 sm:$0xff]  ;;  %s5753_s4 = smov [#allocation2]  }
0x16e2   :  { %v8474_v29 = vadd.f32 1.0, %v5007_v4  ;;  %v4932_v15 = vmul.f32 %v8457_v61, %v4931_v18  ;;  %vm4939_vm14 = vcmp.eq.f32.partialorder %v4938_v7, 8.507059e+37  ;;  %v4980_v5 = vand.u32 2147483648, %v8460_v53  ;;  %s5134_s15 = sshll.u32 %s5753_s4, 4  ;;  %s5135_s15 = int_to_ptr.vmem [resolvable:$true] %s5134_s15 }
0x16e3   :  { %v4893_v46 = vadd.f32 %v5712_v47, %v4892_v3  ;;  %v8478_v36 = vpop.eup %5715  ;;  %v5041_v3 = vmul.f32 %v5040_v56, %v8487_v28  ;;  %v5079_v41 = vmul.f32 3.8918573e-05, %v8510_v17  ;;  %vm4974_vm2 = vweird.f32 %v8460_v53 }
0x16e4   :  { %5717 = vrcp.f32 %v8474_v29  ;;  %v4970_v62 = vmul.f32 %v8478_v36, %v8460_v53  ;;  %v4933_v38 = vadd.f32 %v8457_v61, %v4932_v15  ;;  %vm4975_vm15 = vweird.f32 %v8478_v36 }
0x16e5   :  { %v4897_v0 = vsel %vm4896_vm10, %v5712_v47, %v4893_v46  ;;  %v4978_v59 = vand.u32 2147483647, %v8460_v53  ;;  %v4957_v46 = vadd.f32 1.1283791, %v4956_v14  ;;  %vm4976_vm4 = vmor %vm4974_vm2, %vm4975_vm15  ;;  %v5042_v6 = vadd.f32 0.014752088, %v5041_v3 }
0x16e6   :  { %v4902_v43 = vsel %vm4899_vm11, %v4901_v23, %v4897_v0  ;;  %v4971_v47 = vsub.f32 1.0, %v4970_v62  ;;  %v4937_v54 = vsel %vm4936_vm13, %v8457_v61, %v4933_v38  ;;  %v4994_v61 = vmul.f32 %v4993_v9, %v8418_v45 }
0x16e7   :  { %v4903_v33 = vmul.f32 %v4902_v43, %v4878_v44  ;;  %v4942_v16 = vsel %vm4939_vm14, %v4941_v55, %v4937_v54  ;;  %v5080_v50 = vadd.f32 0.001143296, %v5079_v41  ;;  %v4981_v11 = vor.u32 1.1754944e-38, %v4980_v5 }
0x16e8   :  { %v4972_v63 = vmul.f32 %v8478_v36, %v4971_v47  ;;  %v4943_v32 = vmul.f32 %v4942_v16, %v4918_v27  ;;  %v4995_v20 = vadd.f32 0.18741608, %v4994_v61  ;;  %vm4979_vm5 = vcmp.eq.f32.partialorder %v4978_v59, 8.507059e+37 }
0x16e9   :  { %v5383_v60 = vclamps-f32 %v4903_v33, 1.0  ;;  %v4958_v53 = vmul.f32 %v4957_v46, %v8398_v13  ;;  %v5043_v43 = vmul.f32 %v5042_v6, %v8487_v28  ;;  %v5081_v38 = vmul.f32 %v5080_v50, %v8510_v17 }
0x16ea   :  { %v8501_v57 = vpop.eup %5717  ;;  %v4973_v21 = vadd.f32 %v8478_v36, %v4972_v63  ;;  %v5384_v62 = vclamps-f32 %v4943_v32, 1.0  ;;  %v4996_v35 = vmul.f32 %v4995_v20, %v8418_v45  ;;  %v5020_v8 = vand.u32 2147483648, %v8474_v29 }
0x16eb   :  { %v5010_v1 = vmul.f32 %v8501_v57, %v8474_v29  ;;  %v5106_v18 = vadd.f32 1.0, %v5383_v60  ;;  %vm5015_vm6 = vweird.f32 %v8501_v57  ;;  %vm5014_vm7 = vweird.f32 %v8474_v29 }
0x16ec   :  { %v4977_v37 = vsel %vm4976_vm4, %v8478_v36, %v4973_v21  ;;  %v5107_v48 = vadd.f32 1.0, %v5384_v62  ;;  %v5018_v13 = vand.u32 2147483647, %v8474_v29  ;;  %v4855_v45 = vmul.f32 0.5, %v8359_v30  ;;  %vm5016_vm8 = vmor %vm5014_vm7, %vm5015_vm6 }
0x16ed   :  { %v5011_v4 = vsub.f32 1.0, %v5010_v1  ;;  %v5112_v0 = vmul.f32 %v5106_v18, %v4854_v49  ;;  %v4982_v23 = vsel %vm4979_vm5, %v4981_v11, %v4977_v37  ;;  %v4997_v47 = vadd.f32 1.1283791, %v4996_v35 }
0x16ee   :  { %v4983_v44 = vmul.f32 %v4982_v23, %v4958_v53  ;;  %v5044_v24 = vadd.f32 0.112945676, %v5043_v43  ;;  %v5082_v58 = vadd.f32 0.014752088, %v5081_v38  ;;  %v5021_v12 = vor.u32 1.1754944e-38, %v5020_v8 }
0x16ef   :  { %v5012_v39 = vmul.f32 %v8501_v57, %v5011_v4  ;;  %v5113_v54 = vmul.f32 %v5107_v48, %v4855_v45  ;;  %vm5019_vm3 = vcmp.eq.f32.partialorder %v5018_v13, 8.507059e+37  ;;  %v4998_v1 = vmul.f32 %v4997_v47, %v8407_v19 }
0x16f0   :  { %v5385_v42 = vclamps-f32 %v4983_v44, 1.0  ;;  %v5045_v29 = vmul.f32 %v5044_v24, %v8487_v28  ;;  %v5083_v30 = vmul.f32 %v5082_v58, %v8510_v17  ;;  %v4856_v55 = vmul.f32 0.5, %v8375_v2 }
0x16f1   :  { %v5013_v36 = vadd.f32 %v8501_v57, %v5012_v39  ;;  %v5028_v14 = vmul.f32 2.1237322e-06, %v8487_v28  ;;  %v4857_v2 = vmul.f32 0.5, %v8372_v22  ;;  %v5068_v59 = vmul.f32 2.1237322e-06, %v8510_v17 }
0x16f2   :  { %v5046_v60 = vadd.f32 0.4994258, %v5045_v29  ;;  %v5084_v27 = vadd.f32 0.112945676, %v5083_v30 }
0x16f3   :  { %v5017_v51 = vsel %vm5016_vm8, %v8501_v57, %v5013_v36  ;;  %v5108_v57 = vadd.f32 1.0, %v5385_v42  ;;  %v5029_v5 = vadd.f32 0.00028619796, %v5028_v14  ;;  %v5069_v50 = vadd.f32 0.00028619796, %v5068_v59 }
0x16f4   :  { %v5022_v9 = vsel %vm5019_vm3, %v5021_v12, %v5017_v51  ;;  %v5047_v3 = vmul.f32 %v5046_v60, %v8487_v28  ;;  %v5085_v41 = vmul.f32 %v5084_v27, %v8510_v17 }
0x16f5   :  { %v5023_v56 = vmul.f32 %v5022_v9, %v4998_v1  ;;  %v5114_v21 = vmul.f32 %v5108_v57, %v4856_v55  ;;  %v5030_v20 = vmul.f32 %v5029_v5, %v8487_v28  ;;  %v5070_v22 = vmul.f32 %v5069_v50, %v8510_v17 }
0x16f6   :  { %v5048_v32 = vadd.f32 1.0, %v5047_v3  ;;  %v5086_v49 = vadd.f32 0.4994258, %v5085_v41 }
0x16f7   :  { %v5386_v4 = vclamps-f32 %v5023_v56, 1.0  ;;  %v5031_v11 = vadd.f32 0.0036580483, %v5030_v20  ;;  %v5071_v53 = vadd.f32 0.0036580483, %v5070_v22 }
0x16f8   :  { %5719 = vrcp.f32 %v5048_v32  ;;  %v5060_v58 = vand.u32 2147483648, %v5048_v32  ;;  %vm5054_vm10 = vweird.f32 %v5048_v32 }
0x16f9   :  { %v5109_v18 = vadd.f32 1.0, %v5386_v4 }
0x16fa   :  { %v5061_v9 = vor.u32 1.1754944e-38, %v5060_v58 }
0x16fb   :  { %v5115_v39 = vmul.f32 %v5109_v18, %v4857_v2  ;;  %v4859_v2 = vmul.f32 0.5, %v8424_v10 }
0x16fe   :  { %v5720_v62 = vpop.eup %5719 }
0x16ff   :  { %v5050_v35 = vmul.f32 %v5720_v62, %v5048_v32  ;;  %vm5055_vm9 = vweird.f32 %v5720_v62 }
0x1700   :  { %vm5056_vm11 = vmor %vm5054_vm10, %vm5055_vm9 }
0x1701   :  { %v5051_v43 = vsub.f32 1.0, %v5050_v35 }
0x1703   :  { %v5052_v44 = vmul.f32 %v5720_v62, %v5051_v43 }
0x1705   :  { %v5053_v51 = vadd.f32 %v5720_v62, %v5052_v44 }
0x170e   :  { %v4839_v15 = vpop.f32.mrf.mxu0 }
0x170f   :  { %v4840_v25 = vadd.f32 %v8523_v26, %v4839_v15  ;;  %v5087_v15 = vmul.f32 %v5086_v49, %v8510_v17 }
0x1711   :  { %v5118_v31 = vadd.f32 %v5112_v0, %v4840_v25  ;;  %v5088_v25 = vadd.f32 1.0, %v5087_v15  ;;  %v5032_v0 = vmul.f32 %v5031_v11, %v8487_v28 }
0x1713   :  { %5124 = vst.msk [vmem:[#allocation2] sm:$0xff] %vm83_vm1, %v5118_v31  ;;  %5721 = vrcp.f32 %v5088_v25  ;;  %v5033_v23 = vadd.f32 0.05243302, %v5032_v0  ;;  %v5072_v31 = vmul.f32 %v5071_v53, %v8510_v17  ;;  %vm5094_vm13 = vweird.f32 %v5088_v25 }
0x1714   :  { %v5098_v56 = vand.u32 2147483647, %v5088_v25 }
0x1715   :  { %v5034_v36 = vmul.f32 %v5033_v23, %v8487_v28  ;;  %v5073_v8 = vadd.f32 0.05243302, %v5072_v31 }
0x1716   :  { %v4841_v33 = vpop.f32.mrf.mxu0  ;;  %vm5099_vm15 = vcmp.eq.f32.partialorder %v5098_v56, 8.507059e+37 }
0x1717   :  { %v4842_v7 = vadd.f32 %v8523_v26, %v4841_v33  ;;  %v5035_v48 = vadd.f32 0.18741608, %v5034_v36  ;;  %v5074_v45 = vmul.f32 %v5073_v8, %v8510_v17  ;;  %v5058_v33 = vand.u32 2147483647, %v5048_v32 }
0x1719   :  { %v5119_v63 = vadd.f32 %v5113_v54, %v4842_v7  ;;  %v5722_v38 = vpop.eup %5721  ;;  %v5036_v47 = vmul.f32 %v5035_v48, %v8487_v28  ;;  %v5057_v7 = vsel %vm5056_vm11, %v5720_v62, %v5053_v51  ;;  %v5075_v54 = vadd.f32 0.18741608, %v5074_v45 }
0x171a   :  { %v5090_v13 = vmul.f32 %v5722_v38, %v5088_v25  ;;  %vm5059_vm0 = vcmp.eq.f32.partialorder %v5058_v33, 8.507059e+37  ;;  %vm5095_vm12 = vweird.f32 %v5722_v38  ;;  %v5100_v28 = vand.u32 2147483648, %v5088_v25 }
0x171b   :  { %5125 = vst.msk [vmem:[#allocation2 + $0x8] sm:$0xff] %vm83_vm1, %v5119_v63  ;;  %v5037_v12 = vadd.f32 1.1283791, %v5036_v47  ;;  %v5062_v63 = vsel %vm5059_vm0, %v5061_v9, %v5057_v7  ;;  %v5076_v29 = vmul.f32 %v5075_v54, %v8510_v17  ;;  %vm5096_vm14 = vmor %vm5094_vm13, %vm5095_vm12 }
0x171c   :  { %v5091_v24 = vsub.f32 1.0, %v5090_v13  ;;  %v5101_v27 = vor.u32 1.1754944e-38, %v5100_v28 }
0x171d   :  { %v5038_v1 = vmul.f32 %v5037_v12, %v8468_v34  ;;  %v5077_v55 = vadd.f32 1.1283791, %v5076_v29  ;;  %v4858_v34 = vmul.f32 0.5, %v8421_v40 }
0x171e   :  { %v4844_v16 = vpop.f32.mrf.mxu0  ;;  %v5092_v42 = vmul.f32 %v5722_v38, %v5091_v24 }
0x171f   :  { %v4845_v61 = vadd.f32 %v8523_v26, %v4844_v16  ;;  %v5063_v57 = vmul.f32 %v5062_v63, %v5038_v1 }
0x1720   :  { %v5093_v30 = vadd.f32 %v5722_v38, %v5092_v42 }
0x1721   :  { %v5120_v19 = vadd.f32 %v5114_v21, %v4845_v61  ;;  %v5387_v16 = vclamps-f32 %v5063_v57, 1.0  ;;  %v5078_v61 = vmul.f32 %v5077_v55, %v8490_v52 }
0x1722   :  { %v5097_v60 = vsel %vm5096_vm14, %v5722_v38, %v5093_v30 }
0x1723   :  { %5126 = vst.msk [vmem:[#allocation2 + $0x10] sm:$0xff] %vm83_vm1, %v5120_v19  ;;  %v5102_v14 = vsel %vm5099_vm15, %v5101_v27, %v5097_v60  ;;  %v5110_v21 = vadd.f32 1.0, %v5387_v16 }
0x1724   :  { %v5103_v4 = vmul.f32 %v5102_v14, %v5078_v61 }
0x1725   :  { %v5116_v3 = vmul.f32 %v5110_v21, %v4858_v34 }
0x1726   :  { %v4846_v46 = vpop.f32.mrf.mxu0  ;;  %v5388_v41 = vclamps-f32 %v5103_v4, 1.0 }
0x1727   :  { %v4847_v37 = vadd.f32 %v8523_v26, %v4846_v46 }
0x1728   :  { %v5111_v18 = vadd.f32 1.0, %v5388_v41 }
0x1729   :  { %v5121_v6 = vadd.f32 %v5115_v39, %v4847_v37 }
0x172a   :  { %v5117_v32 = vmul.f32 %v5111_v18, %v4859_v2 }
0x172b   :  { %5127 = vst.msk [vmem:[#allocation2 + $0x18] sm:$0xff] %vm83_vm1, %v5121_v6 }
0x1753   :  { %v4849_v17 = vpop.f32.mrf.mxu0 }
0x1754   :  { %v4850_v19 = vadd.f32 %v8523_v26, %v4849_v17 }
0x1756   :  { %v5122_v5 = vadd.f32 %v5116_v3, %v4850_v19 }
0x1758   :  { %5128 = vst.msk [vmem:[#allocation2 + $0x20] sm:$0xff] %vm83_vm1, %v5122_v5 }
0x175b   :  { %v4851_v52 = vpop.f32.mrf.mxu0 }
0x175c   :  { %v4852_v40 = vadd.f32 %v8523_v26, %v4851_v52 }
0x175e   :  { %v5123_v59 = vadd.f32 %v5117_v32, %v4852_v40 }
0x1760   :  { %5129 = vst.msk [vmem:[#allocation2 + $0x28] sm:$0xff] %vm83_vm1, %v5123_v59 }
0x1761   :  { %5142 = dma.vmem_to_hbm [thread:$0]  %s5135_s15, 768, %s5137_s18, [#allocation3], %s5754_s0, %s5754_s0, %s5755_s19  }
0x1762   :  { %5747 = dma.done.wait [#allocation3], 768  }
0x1763   :  { %5748 = vsyncadd [#allocation3], 4294966528 }
0x1764   :  { %5147 = vsyncpa [#allocation3], 1 }

</bundles_post_ra>
